<compile_context>
chip_gen: v7x
topology: tpu7x:2x2x1
jax: 0.10.0
libtpu: 0.0.40
codegen_flags: <defaults>
</compile_context>

<pallas_src>
import functools

import jax
import jax.numpy as jnp
from jax.experimental import pallas as pl
from jax.experimental.pallas import tpu as pltpu  # noqa: F401  (TPU backend)

# ----------------------------- model dimensions ------------------------------
B = 2                     # batch
N_BBOX = 8                # num_bboxs
IMG_DIM = 12              # image feature dim
BBOX_DIM = 4              # bbox feature dim
OBJ_FEAT = IMG_DIM + BBOX_DIM   # obj_feat_size = 16
WRD_EMB = 16              # wrd_embed_size
NUM_GLIMPSES = 2
LSTM_HIDDEN = 32
NUM_WRDS = 64
WRD_PAD_ID = 0
NUM_TURNS = 3
SEQ_LEN = 6               # padded len of qs_tf_in
Q_LEN = 6                 # padded len of qs (text fed to the state handler)
LSTM_IN = WRD_EMB + NUM_GLIMPSES * WRD_EMB   # = 48 (osda glimpse path)

# GuesserModel (state handler): use_category=False, ans_fuse_method='add'
BI_HIDDEN = 32
ANS_EMB = 8
V_HIDDEN = 16
STATE_ALPHA = 0.5
# dropout_prob exists in the module but Dropout is identity in eval mode.

BATCH_PAD = 8             # batch rows padded to one full sublane tile
VOCAB_PAD = 128           # vocab padded to one full lane tile (lane-dense store)


# ----------------------------- the fused kernel --------------------------------
def _qgen_fused_kernel(
        # inputs (full arrays resident in VMEM, DMA'd once)
        q_ref,        # (T*L*BP, E)   word embeddings, row = (t*L + s)*BP + b
        txt_ref,      # (T, BP, BI)   pooled text feature (ViLBERT stand-in)
        ansemb_ref,   # (T, BP, A)    answer embedding
        msk_ref,      # (T, BP, L+2)  [:L] step mask, [L] not_finished, [L+1] end_turn==t
        obj0_ref,     # (BP, N, E)    img_mlp(obj_feats)
        visf_ref,     # (BP, N, BI)   v_pooler(seq_out_vis) stand-in
        pi0_ref,      # (BP, N)       initial belief state
        w3_ref,       # (G, N, E)     [g,j,e] = Linear(N*E,G).weight.T[j*E+e, g]
        wsum_ref,     # (G, E)        sum_j of the above
        gb_ref,       # (G, 1)        glimpse bias
        wihq_ref,     # (E,   4H)     input->gates, word part of W_ih^T
        wihv_ref,     # (G*E, 4H)     input->gates, visual part of W_ih^T
        lstmb_ref,    # (1, 4H)       b_ih + b_hh folded
        whh_ref,      # (H, 4H)
        projw_ref,    # (H, VP)       vocab projection, zero-padded to 128 lanes
        projb_ref,    # (1, VP)
        fw_ref, fb_ref,      # fused_proj   (BI, BI), (1, BI)
        aw_ref, ab_ref,      # ans_proj     (A, BI),  (1, BI)
        s1w_ref, s1b_ref,    # state_proj[0] (BI, BI//2), (1, BI//2)
        s2w_ref, s2b_ref,    # state_proj[2] (1, BI//2) weight row, (1, 1)
        # outputs
        logits_ref,   # (T*L*BP, VP)
        pi_out_ref,   # (T-1, BP, N)
        final_ref,    # (BP, N)
        *, alpha):
    num_turns, bp, bi = txt_ref.shape
    n = obj0_ref.shape[1]
    num_glimpses = w3_ref.shape[0]
    hidden = whh_ref.shape[0]
    gdim = whh_ref.shape[1]                    # 4H (= 128)
    seq_len = msk_ref.shape[2] - 2

    # ---- loop-invariant VMEM->vreg loads, done exactly once ----------------
    obj0 = obj0_ref[...]
    visf = visf_ref[...]
    w3_all = w3_ref[...]
    wsum_all = wsum_ref[...]
    gb_all = gb_ref[...]
    wihv = wihv_ref[...]
    lstm_b = lstmb_ref[...]
    whh = whh_ref[...]
    projw = projw_ref[...]
    projb = projb_ref[...]
    fw = fw_ref[...]
    fb = fb_ref[...]
    aw = aw_ref[...]
    ab = ab_ref[...]
    s1w = s1w_ref[...]
    s1b = s1b_ref[...]
    s2w = s2w_ref[...]
    s2b = s2b_ref[...]

    # word part of the LSTM input projection for ALL turns & steps: one MXU pass
    xq_all = jnp.dot(q_ref[...], wihq_ref[...],
                     preferred_element_type=jnp.float32)       # (T*L*BP, 4H)

    # carried state (plain values; no grid, no scratch)
    pi = pi0_ref[...]                                          # (BP, N)
    h = jnp.zeros((bp, hidden), jnp.float32)
    c = jnp.zeros((bp, hidden), jnp.float32)
    fin = jnp.zeros((bp, n), jnp.float32)

    for t in range(num_turns):                                 # static unroll
        msk = msk_ref[t]                                       # (BP, L+2)
        step_mask = msk[:, :seq_len]
        not_fin = msk[:, seq_len:seq_len + 1]
        end_m = msk[:, seq_len + 1:seq_len + 2]

        # ---------------- OSDA self-diff glimpse attention -------------------
        # scores[b,i,g] = sum_e obj^2[b,i,e]*WS[e,g] - sum_e obj[b,i,e]*M[b,e,g]
        #   WS[e,g] = sum_j Wg[j,e,g], M[b,e,g] = sum_j obj[b,j,e]*Wg[j,e,g]
        # (algebraically identical to diff.view(-1,N,N*E) @ W_glimpse; pure VPU
        #  + reductions, no tiny K=16 MXU pushes or in-kernel lane reshapes)
        obj = obj0 * pi[:, :, None]                            # (BP, N, E)
        obj_sq = obj * obj
        vis_parts = []
        for g in range(num_glimpses):                          # static, G small
            w3g = w3_all[g]                                    # (N, E)
            wsg = wsum_all[g:g + 1, :]                         # (1, E)
            m_g = jnp.sum(obj * w3g[None, :, :], axis=1)       # (BP, E)
            score = (jnp.sum(obj_sq * wsg[None, :, :], axis=-1)
                     - jnp.sum(obj * m_g[:, None, :], axis=-1)
                     + gb_all[g:g + 1, :])                     # (BP, N)
            score = score - jnp.max(score, axis=-1, keepdims=True)
            ex = jnp.exp(score)                                # Softmax over bboxes
            w_att = ex / jnp.sum(ex, axis=-1, keepdims=True)
            vis_parts.append(jnp.sum(w_att[:, :, None] * obj, axis=1))  # (BP, E)
        vis = jnp.concatenate(vis_parts, axis=-1)              # (BP, G*E), g-major

        # per-turn-constant gate contribution (visual + bias): added once, off
        # the recurrence critical path
        xv = jnp.dot(vis, wihv, preferred_element_type=jnp.float32) + lstm_b
        base = t * seq_len * bp
        x_t = (xq_all[base:base + seq_len * bp, :]
               .reshape(seq_len, bp, gdim) + xv[None])         # (L, BP, 4H)

        # ---- masked LSTM recurrence (pack/pad_packed semantics) --------------
        h0, c0 = h, c
        hid_rows = []
        for s in range(seq_len):                               # static unroll
            gates = x_t[s] + jnp.dot(h, whh, preferred_element_type=jnp.float32)
            sg = jax.nn.sigmoid(gates)                         # one EUP pass (8,128)
            th = jnp.tanh(gates)                               # one EUP pass (8,128)
            i_g = sg[:, 0 * hidden:1 * hidden]
            f_g = sg[:, 1 * hidden:2 * hidden]
            g_g = th[:, 2 * hidden:3 * hidden]
            o_g = sg[:, 3 * hidden:4 * hidden]
            c_new = f_g * c + i_g * g_g
            h_new = o_g * jnp.tanh(c_new)
            valid = step_mask[:, s:s + 1]                      # pack_padded semantics
            inv = 1.0 - valid
            h = valid * h_new + inv * h
            c = valid * c_new + inv * c
            hid_rows.append(valid * h_new)                     # pad_packed zero-fill
        hid = jnp.concatenate(hid_rows, axis=0)                # (L*BP, H), aligned

        # fused vocab projection -> lane-dense, sublane-aligned store
        logits_ref[base:base + seq_len * bp, :] = (
            jnp.dot(hid, projw, preferred_element_type=jnp.float32) + projb)

        # last_state update: only batch entries that had a question advance
        nf_inv = 1.0 - not_fin
        h = not_fin * h + nf_inv * h0
        c = not_fin * c + nf_inv * c0

        # ------ GuesserModel.compute_next_state (belief update), t < T-1 ------
        if t < num_turns - 1:                                  # matches PyTorch `if`
            sent = txt_ref[t]                                  # (BP, BI)
            fused = sent[:, None, :] * visf                    # dropout = identity
            fused = (jnp.dot(fused.reshape(bp * n, bi), fw,
                             preferred_element_type=jnp.float32)
                     + fb).reshape(bp, n, bi)
            aproj = jnp.dot(ansemb_ref[t], aw,
                            preferred_element_type=jnp.float32) + ab     # (BP, BI)
            fused = fused * pi[:, :, None] + aproj[:, None, :]           # fuse='add'
            hdd = jnp.maximum(
                jnp.dot(fused.reshape(bp * n, bi), s1w,
                        preferred_element_type=jnp.float32) + s1b, 0.0)
            hdd = hdd.reshape(bp, n, hdd.shape[-1])            # (BP, N, BI//2)
            lg = jnp.sum(hdd * s2w, axis=-1) + s2b             # (BP, N) guess logits
            mx = jnp.max(lg, axis=-1, keepdims=True)
            ex2 = jnp.exp(lg - mx)
            soft = ex2 / jnp.sum(ex2, axis=-1, keepdims=True)  # softmax over bboxes
            pi = (1.0 - alpha) * pi + alpha * soft
            fin = end_m * lg + (1.0 - end_m) * fin             # final_guess[end_turn==t]
            pi_out_ref[t] = pi                                 # post-update, as in ref

    final_ref[...] = fin                                       # written once


# ------------------------------- QGenModel.forward ----------------------------
def qgen_forward(params, qs, qs_tf_in, question_len, answers, img_feats, bboxs,
                 txt_attn_mask, end_turn, pi=None):
    b, t_max, seq_len = qs_tf_in.shape
    n = img_feats.shape[1]
    e = params['img_mlp_w'].shape[1]           # WRD_EMB
    g = params['glimpse_b'].shape[0]           # NUM_GLIMPSES
    h = params['lstm_whh_t'].shape[0]          # LSTM_HIDDEN
    v = params['proj_w'].shape[1]              # NUM_WRDS
    bi = params['fused_proj_w'].shape[0]       # BI_HIDDEN
    bp = BATCH_PAD
    vp = VOCAB_PAD

    def pad_batch(x):                           # zero-pad leading (batch) axis to bp
        return jnp.pad(x, ((0, bp - b),) + ((0, 0),) * (x.ndim - 1))

    # ---------------- plain-JAX prologue (embedding gathers, tiny matmuls) -----
    obj_feats = jnp.concatenate([img_feats, bboxs], axis=-1)               # (B,N,F)
    init_obj_repr = jax.nn.relu(obj_feats @ params['img_mlp_w']
                                + params['img_mlp_b'])                     # img_mlp

    q_emb = params['wrd_embed'][qs_tf_in]                                  # (B,T,L,E)
    # row layout (t*L + s)*BP + b, batch padded to one full sublane tile
    q_flat = jnp.pad(q_emb.transpose(1, 2, 0, 3),
                     ((0, 0), (0, 0), (0, bp - b), (0, 0)))
    q_flat = q_flat.reshape(t_max * seq_len * bp, e)

    # TODO(synk): the ViLBERT BertModel / v_pooler used inside GuesserModel is an
    # external class not included in the source; replaced here by a deterministic
    # plain-JAX stand-in encoder.  compute_next_state itself runs in the kernel.
    seq_out_vis = jnp.tanh(obj_feats @ params['vis_enc_w'] + params['vis_enc_b'])
    vis_feats = jax.nn.relu(seq_out_vis @ params['vpool_w'] + params['vpool_b'])  # (B,N,BI)
    tok = params['bert_txt_embed'][qs]                                     # (B,T,Lq,BI)
    m = txt_attn_mask.astype(jnp.float32)[..., None]
    pooled_txt = jnp.tanh(((tok * m).sum(2) / jnp.maximum(m.sum(2), 1.0))
                          @ params['txt_pool_w'] + params['txt_pool_b'])   # (B,T,BI)
    ans_emb_all = params['ans_embed'][answers]                             # (B,T,A)

    # per-turn masks packed lane-dense:
    #   [:L] step validity (fake_len = max(len,1)), [L] len != 0, [L+1] end_turn==t
    fake_len = jnp.maximum(question_len, 1)
    step_mask = (jnp.arange(seq_len)[None, None, :]
                 < fake_len[:, :, None]).astype(jnp.float32)               # (B,T,L)
    not_fin = (question_len != 0).astype(jnp.float32)[:, :, None]          # (B,T,1)
    end_mask = (end_turn[:, None]
                == jnp.arange(t_max)[None, :]).astype(jnp.float32)[:, :, None]
    masks = jnp.concatenate([step_mask, not_fin, end_mask], axis=-1)       # (B,T,L+2)

    if pi is None:
        pi = jnp.full((b, n), 1.0 / n, jnp.float32)                        # init_state

    # batch-padded, turn-major packing for the kernel (padded rows stay finite
    # inside the kernel and are sliced away below)
    txt_t = pad_batch(pooled_txt).transpose(1, 0, 2)          # (T, BP, BI)
    ans_t = pad_batch(ans_emb_all).transpose(1, 0, 2)         # (T, BP, A)
    msk_t = pad_batch(masks).transpose(1, 0, 2)               # (T, BP, L+2)
    obj0_p = pad_batch(init_obj_repr)                         # (BP, N, E)
    visf_p = pad_batch(vis_feats)                             # (BP, N, BI)
    pi_p = pad_batch(pi)                                      # (BP, N)

    # -------------------- weight pre-arrangement (layout only) -----------------
    w3 = params['glimpse_w'].reshape(n, e, g)      # rows of Linear(N*E,G).weight.T
    w3_gne = jnp.transpose(w3, (2, 0, 1))          # (G,N,E)
    wsum_ge = jnp.transpose(w3.sum(0), (1, 0))     # (G,E)
    gb = params['glimpse_b'].reshape(g, 1)
    wih_q = params['lstm_wih_t'][:e]               # word part of W_ih^T
    wih_v = params['lstm_wih_t'][e:]               # visual part of W_ih^T
    lstm_b = params['lstm_b'].reshape(1, 4 * h)    # b_ih + b_hh folded
    whh = params['lstm_whh_t']
    projw_p = jnp.pad(params['proj_w'], ((0, 0), (0, vp - v)))          # lane-dense
    projb_p = jnp.pad(params['proj_b'].reshape(1, v), ((0, 0), (0, vp - v)))
    fused_b = params['fused_proj_b'].reshape(1, bi)
    ans_b = params['ans_proj_b'].reshape(1, bi)
    s1b = params['state_proj1_b'].reshape(1, -1)
    s2w_row = params['state_proj2_w'].reshape(1, -1)   # (1, BI//2)
    s2b = params['state_proj2_b'].reshape(1, 1)

    inputs = [q_flat, txt_t, ans_t, msk_t, obj0_p, visf_p, pi_p,
              w3_gne, wsum_ge, gb,
              wih_q, wih_v, lstm_b, whh, projw_p, projb_p,
              params['fused_proj_w'], fused_b, params['ans_proj_w'], ans_b,
              params['state_proj1_w'], s1b, s2w_row, s2b]

    out_shape = (jax.ShapeDtypeStruct((t_max * seq_len * bp, vp), jnp.float32),
                 jax.ShapeDtypeStruct((t_max - 1, bp, n), jnp.float32),
                 jax.ShapeDtypeStruct((bp, n), jnp.float32))

    # Single invocation, no grid: everything (< 1 MiB total) sits in VMEM once;
    # the 3-turn state carry is a plain value chain inside the kernel.
    out_logits, out_pi, out_final = pl.pallas_call(
        functools.partial(_qgen_fused_kernel, alpha=float(STATE_ALPHA)),
        out_shape=out_shape,
    )(*inputs)

    result_logits = (out_logits.reshape(t_max, seq_len, bp, vp)[:, :, :b, :v]
                     .transpose(2, 0, 1, 3))                  # (B, T, L, V)
    result_pi = out_pi[:, :b, :].transpose(1, 0, 2)           # (B, T-1, N)
    final_guess = out_final[:b]                               # (B, N)
    return result_logits, result_pi, final_guess


# --------------------------- parameter initialization ------------------------
def init_params(key):
    def w(k, shape, scale=0.1):
        return (scale * jax.random.normal(k, shape)).astype(jnp.float32)

    keys = jax.random.split(key, 24)
    p = {}
    # QGenModel
    p['img_mlp_w'] = w(keys[0], (OBJ_FEAT, WRD_EMB))
    p['img_mlp_b'] = w(keys[1], (WRD_EMB,))
    wrd = w(keys[2], (NUM_WRDS, WRD_EMB))
    p['wrd_embed'] = wrd.at[WRD_PAD_ID].set(0.0)                     # padding_idx
    # attn_glimpse: Linear(N*E, G).weight.T, row index = j*E + e (see OSDA math)
    p['glimpse_w'] = w(keys[3], (N_BBOX * WRD_EMB, NUM_GLIMPSES))
    p['glimpse_b'] = w(keys[4], (NUM_GLIMPSES,))
    p['lstm_wih_t'] = w(keys[5], (LSTM_IN, 4 * LSTM_HIDDEN))
    p['lstm_whh_t'] = w(keys[6], (LSTM_HIDDEN, 4 * LSTM_HIDDEN))
    p['lstm_b'] = w(keys[7], (4 * LSTM_HIDDEN,))                     # b_ih + b_hh folded
    p['proj_w'] = w(keys[8], (LSTM_HIDDEN, NUM_WRDS))
    p['proj_b'] = w(keys[9], (NUM_WRDS,))
    # GuesserModel (state handler, use_category=False, fuse='add')
    p['ans_embed'] = w(keys[10], (3, ANS_EMB))
    p['ans_proj_w'] = w(keys[11], (ANS_EMB, BI_HIDDEN))
    p['ans_proj_b'] = w(keys[12], (BI_HIDDEN,))
    p['fused_proj_w'] = w(keys[13], (BI_HIDDEN, BI_HIDDEN))
    p['fused_proj_b'] = w(keys[14], (BI_HIDDEN,))
    p['state_proj1_w'] = w(keys[15], (BI_HIDDEN, BI_HIDDEN // 2))
    p['state_proj1_b'] = w(keys[16], (BI_HIDDEN // 2,))
    p['state_proj2_w'] = w(keys[17], (BI_HIDDEN // 2, 1))
    p['state_proj2_b'] = w(keys[18], (1,))
    # TODO(synk): ViLBERT BertModel is not provided with the module; these are a
    # deterministic stand-in encoder (seq_out_vis / pooled_out_txt / v_pooler).
    p['bert_txt_embed'] = w(keys[19], (NUM_WRDS, BI_HIDDEN))
    p['txt_pool_w'] = w(keys[20], (BI_HIDDEN, BI_HIDDEN))
    p['txt_pool_b'] = w(keys[21], (BI_HIDDEN,))
    p['vis_enc_w'] = w(keys[22], (OBJ_FEAT, V_HIDDEN))
    p['vis_enc_b'] = jnp.zeros((V_HIDDEN,), jnp.float32)
    p['vpool_w'] = w(keys[23], (V_HIDDEN, BI_HIDDEN))
    p['vpool_b'] = jnp.zeros((BI_HIDDEN,), jnp.float32)
    return p


# ------------------------------------ main -----------------------------------
if __name__ == "__main__":
    key = jax.random.PRNGKey(0)
    kp, k1, k2, k3, k4, k5 = jax.random.split(key, 6)
    params = init_params(kp)

    img_feats = jax.random.normal(k1, (B, N_BBOX, IMG_DIM), jnp.float32)
    bboxs = jax.random.uniform(k2, (B, N_BBOX, BBOX_DIM), jnp.float32)
    qs = jax.random.randint(k3, (B, NUM_TURNS, Q_LEN), 1, NUM_WRDS)
    qs_tf_in = jax.random.randint(k4, (B, NUM_TURNS, SEQ_LEN), 1, NUM_WRDS)
    answers = jax.random.randint(k5, (B, NUM_TURNS), 0, 3)
    question_len = jnp.array([[4, 3, 0], [6, 2, 1]], dtype=jnp.int32)
    txt_attn_mask = (jnp.arange(Q_LEN)[None, None, :]
                     < jnp.array([[5, 4, 1], [6, 3, 2]])[:, :, None]).astype(jnp.float32)
    end_turn = jnp.array([1, 0], dtype=jnp.int32)

    fwd = jax.jit(qgen_forward)
    result_logits, result_pi, final_guess_logits = fwd(
        params, qs, qs_tf_in, question_len, answers, img_feats, bboxs,
        txt_attn_mask, end_turn)
    jax.block_until_ready((result_logits, result_pi, final_guess_logits))

    assert result_logits.shape == (B, NUM_TURNS, SEQ_LEN, NUM_WRDS)
    assert result_pi.shape == (B, NUM_TURNS - 1, N_BBOX)
    assert final_guess_logits.shape == (B, N_BBOX)
    assert bool(jnp.all(jnp.isfinite(result_logits)))
    assert bool(jnp.all(jnp.isfinite(result_pi)))
    assert bool(jnp.all(jnp.isfinite(final_guess_logits)))
    print("KERNEL_OK")
</pallas_src>

<mosaic_0001>
module attributes {stable_mosaic.version = 11 : i64} {
  func.func @_qgen_fused_kernel(%arg0: memref<144x16xf32, #tpu.memory_space<vmem>>, %arg1: memref<3x8x32xf32, #tpu.memory_space<vmem>>, %arg2: memref<3x8x8xf32, #tpu.memory_space<vmem>>, %arg3: memref<3x8x8xf32, #tpu.memory_space<vmem>>, %arg4: memref<8x8x16xf32, #tpu.memory_space<vmem>>, %arg5: memref<8x8x32xf32, #tpu.memory_space<vmem>>, %arg6: memref<8x8xf32, #tpu.memory_space<vmem>>, %arg7: memref<2x8x16xf32, #tpu.memory_space<vmem>>, %arg8: memref<2x16xf32, #tpu.memory_space<vmem>>, %arg9: memref<2x1xf32, #tpu.memory_space<vmem>>, %arg10: memref<16x128xf32, #tpu.memory_space<vmem>>, %arg11: memref<32x128xf32, #tpu.memory_space<vmem>>, %arg12: memref<1x128xf32, #tpu.memory_space<vmem>>, %arg13: memref<32x128xf32, #tpu.memory_space<vmem>>, %arg14: memref<32x128xf32, #tpu.memory_space<vmem>>, %arg15: memref<1x128xf32, #tpu.memory_space<vmem>>, %arg16: memref<32x32xf32, #tpu.memory_space<vmem>>, %arg17: memref<1x32xf32, #tpu.memory_space<vmem>>, %arg18: memref<8x32xf32, #tpu.memory_space<vmem>>, %arg19: memref<1x32xf32, #tpu.memory_space<vmem>>, %arg20: memref<32x16xf32, #tpu.memory_space<vmem>>, %arg21: memref<1x16xf32, #tpu.memory_space<vmem>>, %arg22: memref<1x16xf32, #tpu.memory_space<vmem>>, %arg23: memref<1x1xf32, #tpu.memory_space<vmem>>, %arg24: memref<144x128xf32, #tpu.memory_space<vmem>>, %arg25: memref<2x8x8xf32, #tpu.memory_space<vmem>>, %arg26: memref<8x8xf32, #tpu.memory_space<vmem>>) attributes {dimension_semantics = [], scalar_prefetch = 0 : i64, scratch_operands = 0 : i64, tpu.core_type = #tpu.core_type<tc>} {
    %c0 = arith.constant 0 : index
    %c0_0 = arith.constant 0 : index
    %c0_1 = arith.constant 0 : index
    %0 = vector.load %arg4[%c0, %c0_0, %c0_1] : memref<8x8x16xf32, #tpu.memory_space<vmem>>, vector<8x8x16xf32>
    %c0_2 = arith.constant 0 : index
    %c0_3 = arith.constant 0 : index
    %c0_4 = arith.constant 0 : index
    %1 = vector.load %arg5[%c0_2, %c0_3, %c0_4] : memref<8x8x32xf32, #tpu.memory_space<vmem>>, vector<8x8x32xf32>
    %c0_5 = arith.constant 0 : index
    %c0_6 = arith.constant 0 : index
    %c0_7 = arith.constant 0 : index
    %2 = vector.load %arg7[%c0_5, %c0_6, %c0_7] : memref<2x8x16xf32, #tpu.memory_space<vmem>>, vector<2x8x16xf32>
    %c0_8 = arith.constant 0 : index
    %c0_9 = arith.constant 0 : index
    %3 = vector.load %arg8[%c0_8, %c0_9] : memref<2x16xf32, #tpu.memory_space<vmem>>, vector<2x16xf32>
    %c0_10 = arith.constant 0 : index
    %c0_11 = arith.constant 0 : index
    %4 = vector.load %arg9[%c0_10, %c0_11] : memref<2x1xf32, #tpu.memory_space<vmem>>, vector<2x1xf32>
    %c0_12 = arith.constant 0 : index
    %c0_13 = arith.constant 0 : index
    %5 = vector.load %arg11[%c0_12, %c0_13] : memref<32x128xf32, #tpu.memory_space<vmem>>, vector<32x128xf32>
    %c0_14 = arith.constant 0 : index
    %c0_15 = arith.constant 0 : index
    %6 = vector.load %arg12[%c0_14, %c0_15] : memref<1x128xf32, #tpu.memory_space<vmem>>, vector<1x128xf32>
    %c0_16 = arith.constant 0 : index
    %c0_17 = arith.constant 0 : index
    %7 = vector.load %arg13[%c0_16, %c0_17] : memref<32x128xf32, #tpu.memory_space<vmem>>, vector<32x128xf32>
    %c0_18 = arith.constant 0 : index
    %c0_19 = arith.constant 0 : index
    %8 = vector.load %arg14[%c0_18, %c0_19] : memref<32x128xf32, #tpu.memory_space<vmem>>, vector<32x128xf32>
    %c0_20 = arith.constant 0 : index
    %c0_21 = arith.constant 0 : index
    %9 = vector.load %arg15[%c0_20, %c0_21] : memref<1x128xf32, #tpu.memory_space<vmem>>, vector<1x128xf32>
    %c0_22 = arith.constant 0 : index
    %c0_23 = arith.constant 0 : index
    %10 = vector.load %arg16[%c0_22, %c0_23] : memref<32x32xf32, #tpu.memory_space<vmem>>, vector<32x32xf32>
    %c0_24 = arith.constant 0 : index
    %c0_25 = arith.constant 0 : index
    %11 = vector.load %arg17[%c0_24, %c0_25] : memref<1x32xf32, #tpu.memory_space<vmem>>, vector<1x32xf32>
    %c0_26 = arith.constant 0 : index
    %c0_27 = arith.constant 0 : index
    %12 = vector.load %arg18[%c0_26, %c0_27] : memref<8x32xf32, #tpu.memory_space<vmem>>, vector<8x32xf32>
    %c0_28 = arith.constant 0 : index
    %c0_29 = arith.constant 0 : index
    %13 = vector.load %arg19[%c0_28, %c0_29] : memref<1x32xf32, #tpu.memory_space<vmem>>, vector<1x32xf32>
    %c0_30 = arith.constant 0 : index
    %c0_31 = arith.constant 0 : index
    %14 = vector.load %arg20[%c0_30, %c0_31] : memref<32x16xf32, #tpu.memory_space<vmem>>, vector<32x16xf32>
    %c0_32 = arith.constant 0 : index
    %c0_33 = arith.constant 0 : index
    %15 = vector.load %arg21[%c0_32, %c0_33] : memref<1x16xf32, #tpu.memory_space<vmem>>, vector<1x16xf32>
    %c0_34 = arith.constant 0 : index
    %c0_35 = arith.constant 0 : index
    %16 = vector.load %arg22[%c0_34, %c0_35] : memref<1x16xf32, #tpu.memory_space<vmem>>, vector<1x16xf32>
    %c0_36 = arith.constant 0 : index
    %c0_37 = arith.constant 0 : index
    %17 = vector.load %arg23[%c0_36, %c0_37] : memref<1x1xf32, #tpu.memory_space<vmem>>, vector<1x1xf32>
    %c0_38 = arith.constant 0 : index
    %c0_39 = arith.constant 0 : index
    %18 = vector.load %arg0[%c0_38, %c0_39] : memref<144x16xf32, #tpu.memory_space<vmem>>, vector<144x16xf32>
    %c0_40 = arith.constant 0 : index
    %c0_41 = arith.constant 0 : index
    %19 = vector.load %arg10[%c0_40, %c0_41] : memref<16x128xf32, #tpu.memory_space<vmem>>, vector<16x128xf32>
    %cst = arith.constant dense<0.000000e+00> : vector<144x128xf32>
    %20 = tpu.matmul %18, %19, %cst {dimension_numbers = #tpu.dot_dimension_numbers<[1], [0], [0], [1], [0, 0, 1, 1], [], []>} : vector<144x16xf32>, vector<16x128xf32>, vector<144x128xf32> -> vector<144x128xf32>
    %c0_42 = arith.constant 0 : index
    %c0_43 = arith.constant 0 : index
    %21 = vector.load %arg6[%c0_42, %c0_43] : memref<8x8xf32, #tpu.memory_space<vmem>>, vector<8x8xf32>
    %cst_44 = arith.constant 0.000000e+00 : f32
    %22 = vector.broadcast %cst_44 : f32 to vector<8x32xf32>
    %cst_45 = arith.constant 0.000000e+00 : f32
    %23 = vector.broadcast %cst_45 : f32 to vector<8x32xf32>
    %cst_46 = arith.constant 0.000000e+00 : f32
    %24 = vector.broadcast %cst_46 : f32 to vector<8x8xf32>
    %c0_47 = arith.constant 0 : index
    %c0_48 = arith.constant 0 : index
    %c0_49 = arith.constant 0 : index
    %25 = vector.load %arg3[%c0_47, %c0_48, %c0_49] : memref<3x8x8xf32, #tpu.memory_space<vmem>>, vector<1x8x8xf32>
    %26 = vector.shape_cast %25 : vector<1x8x8xf32> to vector<8x8xf32>
    %27 = vector.extract_strided_slice %26 {offsets = [0, 0], sizes = [8, 6], strides = [1, 1]} : vector<8x8xf32> to vector<8x6xf32>
    %28 = vector.extract_strided_slice %26 {offsets = [0, 6], sizes = [8, 1], strides = [1, 1]} : vector<8x8xf32> to vector<8x1xf32>
    %29 = vector.extract_strided_slice %26 {offsets = [0, 7], sizes = [8, 1], strides = [1, 1]} : vector<8x8xf32> to vector<8x1xf32>
    %30 = vector.shape_cast %21 : vector<8x8xf32> to vector<8x8x1xf32>
    %31 = vector.broadcast %30 : vector<8x8x1xf32> to vector<8x8x16xf32>
    %32 = arith.mulf %0, %31 : vector<8x8x16xf32>
    %33 = arith.mulf %32, %32 : vector<8x8x16xf32>
    %34 = vector.extract_strided_slice %2 {offsets = [0, 0, 0], sizes = [1, 8, 16], strides = [1, 1, 1]} : vector<2x8x16xf32> to vector<1x8x16xf32>
    %35 = vector.shape_cast %34 : vector<1x8x16xf32> to vector<8x16xf32>
    %36 = vector.extract_strided_slice %3 {offsets = [0, 0], sizes = [1, 16], strides = [1, 1]} : vector<2x16xf32> to vector<1x16xf32>
    %37 = vector.shape_cast %35 : vector<8x16xf32> to vector<1x8x16xf32>
    %38 = vector.broadcast %37 : vector<1x8x16xf32> to vector<8x8x16xf32>
    %39 = arith.mulf %32, %38 : vector<8x8x16xf32>
    %cst_50 = arith.constant dense<0.000000e+00> : vector<8x16xf32>
    %40 = vector.multi_reduction <add>, %39, %cst_50 [1] : vector<8x8x16xf32> to vector<8x16xf32>
    %41 = vector.shape_cast %36 : vector<1x16xf32> to vector<1x1x16xf32>
    %42 = vector.broadcast %41 : vector<1x1x16xf32> to vector<8x8x16xf32>
    %43 = arith.mulf %33, %42 : vector<8x8x16xf32>
    %cst_51 = arith.constant dense<0.000000e+00> : vector<8x8xf32>
    %44 = vector.multi_reduction <add>, %43, %cst_51 [2] : vector<8x8x16xf32> to vector<8x8xf32>
    %45 = vector.shape_cast %40 : vector<8x16xf32> to vector<8x1x16xf32>
    %46 = vector.broadcast %45 : vector<8x1x16xf32> to vector<8x8x16xf32>
    %47 = arith.mulf %32, %46 : vector<8x8x16xf32>
    %cst_52 = arith.constant dense<0.000000e+00> : vector<8x8xf32>
    %48 = vector.multi_reduction <add>, %47, %cst_52 [2] : vector<8x8x16xf32> to vector<8x8xf32>
    %49 = arith.subf %44, %48 : vector<8x8xf32>
    %50 = vector.extract_strided_slice %4 {offsets = [0, 0], sizes = [1, 1], strides = [1, 1]} : vector<2x1xf32> to vector<1x1xf32>
    %51 = vector.broadcast %50 : vector<1x1xf32> to vector<8x8xf32>
    %52 = arith.addf %49, %51 : vector<8x8xf32>
    %cst_53 = arith.constant dense<0xFF800000> : vector<8xf32>
    %53 = vector.multi_reduction <maximumf>, %52, %cst_53 [1] : vector<8x8xf32> to vector<8xf32>
    %54 = vector.shape_cast %53 : vector<8xf32> to vector<8x1xf32>
    %55 = vector.broadcast %54 : vector<8x1xf32> to vector<8x8xf32>
    %56 = arith.subf %52, %55 : vector<8x8xf32>
    %57 = math.exp %56 : vector<8x8xf32>
    %cst_54 = arith.constant dense<0.000000e+00> : vector<8xf32>
    %58 = vector.multi_reduction <add>, %57, %cst_54 [1] : vector<8x8xf32> to vector<8xf32>
    %59 = vector.shape_cast %58 : vector<8xf32> to vector<8x1xf32>
    %60 = vector.broadcast %59 : vector<8x1xf32> to vector<8x8xf32>
    %61 = arith.divf %57, %60 : vector<8x8xf32>
    %62 = vector.shape_cast %61 : vector<8x8xf32> to vector<8x8x1xf32>
    %63 = vector.broadcast %62 : vector<8x8x1xf32> to vector<8x8x16xf32>
    %64 = arith.mulf %63, %32 : vector<8x8x16xf32>
    %cst_55 = arith.constant dense<0.000000e+00> : vector<8x16xf32>
    %65 = vector.multi_reduction <add>, %64, %cst_55 [1] : vector<8x8x16xf32> to vector<8x16xf32>
    %66 = vector.extract_strided_slice %2 {offsets = [1, 0, 0], sizes = [1, 8, 16], strides = [1, 1, 1]} : vector<2x8x16xf32> to vector<1x8x16xf32>
    %67 = vector.shape_cast %66 : vector<1x8x16xf32> to vector<8x16xf32>
    %68 = vector.extract_strided_slice %3 {offsets = [1, 0], sizes = [1, 16], strides = [1, 1]} : vector<2x16xf32> to vector<1x16xf32>
    %69 = vector.shape_cast %67 : vector<8x16xf32> to vector<1x8x16xf32>
    %70 = vector.broadcast %69 : vector<1x8x16xf32> to vector<8x8x16xf32>
    %71 = arith.mulf %32, %70 : vector<8x8x16xf32>
    %cst_56 = arith.constant dense<0.000000e+00> : vector<8x16xf32>
    %72 = vector.multi_reduction <add>, %71, %cst_56 [1] : vector<8x8x16xf32> to vector<8x16xf32>
    %73 = vector.shape_cast %68 : vector<1x16xf32> to vector<1x1x16xf32>
    %74 = vector.broadcast %73 : vector<1x1x16xf32> to vector<8x8x16xf32>
    %75 = arith.mulf %33, %74 : vector<8x8x16xf32>
    %cst_57 = arith.constant dense<0.000000e+00> : vector<8x8xf32>
    %76 = vector.multi_reduction <add>, %75, %cst_57 [2] : vector<8x8x16xf32> to vector<8x8xf32>
    %77 = vector.shape_cast %72 : vector<8x16xf32> to vector<8x1x16xf32>
    %78 = vector.broadcast %77 : vector<8x1x16xf32> to vector<8x8x16xf32>
    %79 = arith.mulf %32, %78 : vector<8x8x16xf32>
    %cst_58 = arith.constant dense<0.000000e+00> : vector<8x8xf32>
    %80 = vector.multi_reduction <add>, %79, %cst_58 [2] : vector<8x8x16xf32> to vector<8x8xf32>
    %81 = arith.subf %76, %80 : vector<8x8xf32>
    %82 = vector.extract_strided_slice %4 {offsets = [1, 0], sizes = [1, 1], strides = [1, 1]} : vector<2x1xf32> to vector<1x1xf32>
    %83 = vector.broadcast %82 : vector<1x1xf32> to vector<8x8xf32>
    %84 = arith.addf %81, %83 : vector<8x8xf32>
    %cst_59 = arith.constant dense<0xFF800000> : vector<8xf32>
    %85 = vector.multi_reduction <maximumf>, %84, %cst_59 [1] : vector<8x8xf32> to vector<8xf32>
    %86 = vector.shape_cast %85 : vector<8xf32> to vector<8x1xf32>
    %87 = vector.broadcast %86 : vector<8x1xf32> to vector<8x8xf32>
    %88 = arith.subf %84, %87 : vector<8x8xf32>
    %89 = math.exp %88 : vector<8x8xf32>
    %cst_60 = arith.constant dense<0.000000e+00> : vector<8xf32>
    %90 = vector.multi_reduction <add>, %89, %cst_60 [1] : vector<8x8xf32> to vector<8xf32>
    %91 = vector.shape_cast %90 : vector<8xf32> to vector<8x1xf32>
    %92 = vector.broadcast %91 : vector<8x1xf32> to vector<8x8xf32>
    %93 = arith.divf %89, %92 : vector<8x8xf32>
    %94 = vector.shape_cast %93 : vector<8x8xf32> to vector<8x8x1xf32>
    %95 = vector.broadcast %94 : vector<8x8x1xf32> to vector<8x8x16xf32>
    %96 = arith.mulf %95, %32 : vector<8x8x16xf32>
    %cst_61 = arith.constant dense<0.000000e+00> : vector<8x16xf32>
    %97 = vector.multi_reduction <add>, %96, %cst_61 [1] : vector<8x8x16xf32> to vector<8x16xf32>
    %98 = tpu.concatenate %65, %97 in 1 : vector<8x16xf32>, vector<8x16xf32> -> vector<8x32xf32>
    %cst_62 = arith.constant dense<0.000000e+00> : vector<8x128xf32>
    %99 = tpu.matmul %98, %5, %cst_62 {dimension_numbers = #tpu.dot_dimension_numbers<[1], [0], [0], [1], [0, 0, 1, 1], [], []>} : vector<8x32xf32>, vector<32x128xf32>, vector<8x128xf32> -> vector<8x128xf32>
    %100 = vector.broadcast %6 : vector<1x128xf32> to vector<8x128xf32>
    %101 = arith.addf %99, %100 : vector<8x128xf32>
    %102 = vector.extract_strided_slice %20 {offsets = [0, 0], sizes = [48, 128], strides = [1, 1]} : vector<144x128xf32> to vector<48x128xf32>
    %103 = vector.shape_cast %102 : vector<48x128xf32> to vector<6x8x128xf32>
    %104 = vector.shape_cast %101 : vector<8x128xf32> to vector<1x8x128xf32>
    %105 = vector.broadcast %104 : vector<1x8x128xf32> to vector<6x8x128xf32>
    %106 = arith.addf %103, %105 : vector<6x8x128xf32>
    %107 = vector.extract_strided_slice %106 {offsets = [0, 0, 0], sizes = [1, 8, 128], strides = [1, 1, 1]} : vector<6x8x128xf32> to vector<1x8x128xf32>
    %108 = vector.shape_cast %107 : vector<1x8x128xf32> to vector<8x128xf32>
    %cst_63 = arith.constant dense<0.000000e+00> : vector<8x128xf32>
    %109 = tpu.matmul %22, %7, %cst_63 {dimension_numbers = #tpu.dot_dimension_numbers<[1], [0], [0], [1], [0, 0, 1, 1], [], []>} : vector<8x32xf32>, vector<32x128xf32>, vector<8x128xf32> -> vector<8x128xf32>
    %110 = arith.addf %108, %109 : vector<8x128xf32>
    %111 = arith.negf %110 : vector<8x128xf32>
    %112 = math.exp %111 : vector<8x128xf32>
    %cst_64 = arith.constant 1.000000e+00 : f32
    %113 = vector.broadcast %cst_64 : f32 to vector<8x128xf32>
    %114 = arith.addf %113, %112 : vector<8x128xf32>
    %115 = arith.divf %113, %114 : vector<8x128xf32>
    %116 = math.tanh %110 : vector<8x128xf32>
    %117 = vector.extract_strided_slice %115 {offsets = [0, 0], sizes = [8, 32], strides = [1, 1]} : vector<8x128xf32> to vector<8x32xf32>
    %118 = vector.extract_strided_slice %115 {offsets = [0, 32], sizes = [8, 32], strides = [1, 1]} : vector<8x128xf32> to vector<8x32xf32>
    %119 = vector.extract_strided_slice %116 {offsets = [0, 64], sizes = [8, 32], strides = [1, 1]} : vector<8x128xf32> to vector<8x32xf32>
    %120 = vector.extract_strided_slice %115 {offsets = [0, 96], sizes = [8, 32], strides = [1, 1]} : vector<8x128xf32> to vector<8x32xf32>
    %121 = arith.mulf %118, %23 : vector<8x32xf32>
    %122 = arith.mulf %117, %119 : vector<8x32xf32>
    %123 = arith.addf %121, %122 : vector<8x32xf32>
    %124 = math.tanh %123 : vector<8x32xf32>
    %125 = arith.mulf %120, %124 : vector<8x32xf32>
    %126 = vector.extract_strided_slice %27 {offsets = [0, 0], sizes = [8, 1], strides = [1, 1]} : vector<8x6xf32> to vector<8x1xf32>
    %cst_65 = arith.constant 1.000000e+00 : f32
    %127 = vector.broadcast %cst_65 : f32 to vector<8x1xf32>
    %128 = arith.subf %127, %126 : vector<8x1xf32>
    %129 = vector.broadcast %126 : vector<8x1xf32> to vector<8x32xf32>
    %130 = arith.mulf %129, %125 : vector<8x32xf32>
    %131 = vector.broadcast %128 : vector<8x1xf32> to vector<8x32xf32>
    %132 = arith.mulf %131, %22 : vector<8x32xf32>
    %133 = arith.addf %130, %132 : vector<8x32xf32>
    %134 = vector.broadcast %126 : vector<8x1xf32> to vector<8x32xf32>
    %135 = arith.mulf %134, %123 : vector<8x32xf32>
    %136 = vector.broadcast %128 : vector<8x1xf32> to vector<8x32xf32>
    %137 = arith.mulf %136, %23 : vector<8x32xf32>
    %138 = arith.addf %135, %137 : vector<8x32xf32>
    %139 = vector.broadcast %126 : vector<8x1xf32> to vector<8x32xf32>
    %140 = arith.mulf %139, %125 : vector<8x32xf32>
    %141 = vector.extract_strided_slice %106 {offsets = [1, 0, 0], sizes = [1, 8, 128], strides = [1, 1, 1]} : vector<6x8x128xf32> to vector<1x8x128xf32>
    %142 = vector.shape_cast %141 : vector<1x8x128xf32> to vector<8x128xf32>
    %cst_66 = arith.constant dense<0.000000e+00> : vector<8x128xf32>
    %143 = tpu.matmul %133, %7, %cst_66 {dimension_numbers = #tpu.dot_dimension_numbers<[1], [0], [0], [1], [0, 0, 1, 1], [], []>} : vector<8x32xf32>, vector<32x128xf32>, vector<8x128xf32> -> vector<8x128xf32>
    %144 = arith.addf %142, %143 : vector<8x128xf32>
    %145 = arith.negf %144 : vector<8x128xf32>
    %146 = math.exp %145 : vector<8x128xf32>
    %cst_67 = arith.constant 1.000000e+00 : f32
    %147 = vector.broadcast %cst_67 : f32 to vector<8x128xf32>
    %148 = arith.addf %147, %146 : vector<8x128xf32>
    %149 = arith.divf %147, %148 : vector<8x128xf32>
    %150 = math.tanh %144 : vector<8x128xf32>
    %151 = vector.extract_strided_slice %149 {offsets = [0, 0], sizes = [8, 32], strides = [1, 1]} : vector<8x128xf32> to vector<8x32xf32>
    %152 = vector.extract_strided_slice %149 {offsets = [0, 32], sizes = [8, 32], strides = [1, 1]} : vector<8x128xf32> to vector<8x32xf32>
    %153 = vector.extract_strided_slice %150 {offsets = [0, 64], sizes = [8, 32], strides = [1, 1]} : vector<8x128xf32> to vector<8x32xf32>
    %154 = vector.extract_strided_slice %149 {offsets = [0, 96], sizes = [8, 32], strides = [1, 1]} : vector<8x128xf32> to vector<8x32xf32>
    %155 = arith.mulf %152, %138 : vector<8x32xf32>
    %156 = arith.mulf %151, %153 : vector<8x32xf32>
    %157 = arith.addf %155, %156 : vector<8x32xf32>
    %158 = math.tanh %157 : vector<8x32xf32>
    %159 = arith.mulf %154, %158 : vector<8x32xf32>
    %160 = vector.extract_strided_slice %27 {offsets = [0, 1], sizes = [8, 1], strides = [1, 1]} : vector<8x6xf32> to vector<8x1xf32>
    %cst_68 = arith.constant 1.000000e+00 : f32
    %161 = vector.broadcast %cst_68 : f32 to vector<8x1xf32>
    %162 = arith.subf %161, %160 : vector<8x1xf32>
    %163 = vector.broadcast %160 : vector<8x1xf32> to vector<8x32xf32>
    %164 = arith.mulf %163, %159 : vector<8x32xf32>
    %165 = vector.broadcast %162 : vector<8x1xf32> to vector<8x32xf32>
    %166 = arith.mulf %165, %133 : vector<8x32xf32>
    %167 = arith.addf %164, %166 : vector<8x32xf32>
    %168 = vector.broadcast %160 : vector<8x1xf32> to vector<8x32xf32>
    %169 = arith.mulf %168, %157 : vector<8x32xf32>
    %170 = vector.broadcast %162 : vector<8x1xf32> to vector<8x32xf32>
    %171 = arith.mulf %170, %138 : vector<8x32xf32>
    %172 = arith.addf %169, %171 : vector<8x32xf32>
    %173 = vector.broadcast %160 : vector<8x1xf32> to vector<8x32xf32>
    %174 = arith.mulf %173, %159 : vector<8x32xf32>
    %175 = vector.extract_strided_slice %106 {offsets = [2, 0, 0], sizes = [1, 8, 128], strides = [1, 1, 1]} : vector<6x8x128xf32> to vector<1x8x128xf32>
    %176 = vector.shape_cast %175 : vector<1x8x128xf32> to vector<8x128xf32>
    %cst_69 = arith.constant dense<0.000000e+00> : vector<8x128xf32>
    %177 = tpu.matmul %167, %7, %cst_69 {dimension_numbers = #tpu.dot_dimension_numbers<[1], [0], [0], [1], [0, 0, 1, 1], [], []>} : vector<8x32xf32>, vector<32x128xf32>, vector<8x128xf32> -> vector<8x128xf32>
    %178 = arith.addf %176, %177 : vector<8x128xf32>
    %179 = arith.negf %178 : vector<8x128xf32>
    %180 = math.exp %179 : vector<8x128xf32>
    %cst_70 = arith.constant 1.000000e+00 : f32
    %181 = vector.broadcast %cst_70 : f32 to vector<8x128xf32>
    %182 = arith.addf %181, %180 : vector<8x128xf32>
    %183 = arith.divf %181, %182 : vector<8x128xf32>
    %184 = math.tanh %178 : vector<8x128xf32>
    %185 = vector.extract_strided_slice %183 {offsets = [0, 0], sizes = [8, 32], strides = [1, 1]} : vector<8x128xf32> to vector<8x32xf32>
    %186 = vector.extract_strided_slice %183 {offsets = [0, 32], sizes = [8, 32], strides = [1, 1]} : vector<8x128xf32> to vector<8x32xf32>
    %187 = vector.extract_strided_slice %184 {offsets = [0, 64], sizes = [8, 32], strides = [1, 1]} : vector<8x128xf32> to vector<8x32xf32>
    %188 = vector.extract_strided_slice %183 {offsets = [0, 96], sizes = [8, 32], strides = [1, 1]} : vector<8x128xf32> to vector<8x32xf32>
    %189 = arith.mulf %186, %172 : vector<8x32xf32>
    %190 = arith.mulf %185, %187 : vector<8x32xf32>
    %191 = arith.addf %189, %190 : vector<8x32xf32>
    %192 = math.tanh %191 : vector<8x32xf32>
    %193 = arith.mulf %188, %192 : vector<8x32xf32>
    %194 = vector.extract_strided_slice %27 {offsets = [0, 2], sizes = [8, 1], strides = [1, 1]} : vector<8x6xf32> to vector<8x1xf32>
    %cst_71 = arith.constant 1.000000e+00 : f32
    %195 = vector.broadcast %cst_71 : f32 to vector<8x1xf32>
    %196 = arith.subf %195, %194 : vector<8x1xf32>
    %197 = vector.broadcast %194 : vector<8x1xf32> to vector<8x32xf32>
    %198 = arith.mulf %197, %193 : vector<8x32xf32>
    %199 = vector.broadcast %196 : vector<8x1xf32> to vector<8x32xf32>
    %200 = arith.mulf %199, %167 : vector<8x32xf32>
    %201 = arith.addf %198, %200 : vector<8x32xf32>
    %202 = vector.broadcast %194 : vector<8x1xf32> to vector<8x32xf32>
    %203 = arith.mulf %202, %191 : vector<8x32xf32>
    %204 = vector.broadcast %196 : vector<8x1xf32> to vector<8x32xf32>
    %205 = arith.mulf %204, %172 : vector<8x32xf32>
    %206 = arith.addf %203, %205 : vector<8x32xf32>
    %207 = vector.broadcast %194 : vector<8x1xf32> to vector<8x32xf32>
    %208 = arith.mulf %207, %193 : vector<8x32xf32>
    %209 = vector.extract_strided_slice %106 {offsets = [3, 0, 0], sizes = [1, 8, 128], strides = [1, 1, 1]} : vector<6x8x128xf32> to vector<1x8x128xf32>
    %210 = vector.shape_cast %209 : vector<1x8x128xf32> to vector<8x128xf32>
    %cst_72 = arith.constant dense<0.000000e+00> : vector<8x128xf32>
    %211 = tpu.matmul %201, %7, %cst_72 {dimension_numbers = #tpu.dot_dimension_numbers<[1], [0], [0], [1], [0, 0, 1, 1], [], []>} : vector<8x32xf32>, vector<32x128xf32>, vector<8x128xf32> -> vector<8x128xf32>
    %212 = arith.addf %210, %211 : vector<8x128xf32>
    %213 = arith.negf %212 : vector<8x128xf32>
    %214 = math.exp %213 : vector<8x128xf32>
    %cst_73 = arith.constant 1.000000e+00 : f32
    %215 = vector.broadcast %cst_73 : f32 to vector<8x128xf32>
    %216 = arith.addf %215, %214 : vector<8x128xf32>
    %217 = arith.divf %215, %216 : vector<8x128xf32>
    %218 = math.tanh %212 : vector<8x128xf32>
    %219 = vector.extract_strided_slice %217 {offsets = [0, 0], sizes = [8, 32], strides = [1, 1]} : vector<8x128xf32> to vector<8x32xf32>
    %220 = vector.extract_strided_slice %217 {offsets = [0, 32], sizes = [8, 32], strides = [1, 1]} : vector<8x128xf32> to vector<8x32xf32>
    %221 = vector.extract_strided_slice %218 {offsets = [0, 64], sizes = [8, 32], strides = [1, 1]} : vector<8x128xf32> to vector<8x32xf32>
    %222 = vector.extract_strided_slice %217 {offsets = [0, 96], sizes = [8, 32], strides = [1, 1]} : vector<8x128xf32> to vector<8x32xf32>
    %223 = arith.mulf %220, %206 : vector<8x32xf32>
    %224 = arith.mulf %219, %221 : vector<8x32xf32>
    %225 = arith.addf %223, %224 : vector<8x32xf32>
    %226 = math.tanh %225 : vector<8x32xf32>
    %227 = arith.mulf %222, %226 : vector<8x32xf32>
    %228 = vector.extract_strided_slice %27 {offsets = [0, 3], sizes = [8, 1], strides = [1, 1]} : vector<8x6xf32> to vector<8x1xf32>
    %cst_74 = arith.constant 1.000000e+00 : f32
    %229 = vector.broadcast %cst_74 : f32 to vector<8x1xf32>
    %230 = arith.subf %229, %228 : vector<8x1xf32>
    %231 = vector.broadcast %228 : vector<8x1xf32> to vector<8x32xf32>
    %232 = arith.mulf %231, %227 : vector<8x32xf32>
    %233 = vector.broadcast %230 : vector<8x1xf32> to vector<8x32xf32>
    %234 = arith.mulf %233, %201 : vector<8x32xf32>
    %235 = arith.addf %232, %234 : vector<8x32xf32>
    %236 = vector.broadcast %228 : vector<8x1xf32> to vector<8x32xf32>
    %237 = arith.mulf %236, %225 : vector<8x32xf32>
    %238 = vector.broadcast %230 : vector<8x1xf32> to vector<8x32xf32>
    %239 = arith.mulf %238, %206 : vector<8x32xf32>
    %240 = arith.addf %237, %239 : vector<8x32xf32>
    %241 = vector.broadcast %228 : vector<8x1xf32> to vector<8x32xf32>
    %242 = arith.mulf %241, %227 : vector<8x32xf32>
    %243 = vector.extract_strided_slice %106 {offsets = [4, 0, 0], sizes = [1, 8, 128], strides = [1, 1, 1]} : vector<6x8x128xf32> to vector<1x8x128xf32>
    %244 = vector.shape_cast %243 : vector<1x8x128xf32> to vector<8x128xf32>
    %cst_75 = arith.constant dense<0.000000e+00> : vector<8x128xf32>
    %245 = tpu.matmul %235, %7, %cst_75 {dimension_numbers = #tpu.dot_dimension_numbers<[1], [0], [0], [1], [0, 0, 1, 1], [], []>} : vector<8x32xf32>, vector<32x128xf32>, vector<8x128xf32> -> vector<8x128xf32>
    %246 = arith.addf %244, %245 : vector<8x128xf32>
    %247 = arith.negf %246 : vector<8x128xf32>
    %248 = math.exp %247 : vector<8x128xf32>
    %cst_76 = arith.constant 1.000000e+00 : f32
    %249 = vector.broadcast %cst_76 : f32 to vector<8x128xf32>
    %250 = arith.addf %249, %248 : vector<8x128xf32>
    %251 = arith.divf %249, %250 : vector<8x128xf32>
    %252 = math.tanh %246 : vector<8x128xf32>
    %253 = vector.extract_strided_slice %251 {offsets = [0, 0], sizes = [8, 32], strides = [1, 1]} : vector<8x128xf32> to vector<8x32xf32>
    %254 = vector.extract_strided_slice %251 {offsets = [0, 32], sizes = [8, 32], strides = [1, 1]} : vector<8x128xf32> to vector<8x32xf32>
    %255 = vector.extract_strided_slice %252 {offsets = [0, 64], sizes = [8, 32], strides = [1, 1]} : vector<8x128xf32> to vector<8x32xf32>
    %256 = vector.extract_strided_slice %251 {offsets = [0, 96], sizes = [8, 32], strides = [1, 1]} : vector<8x128xf32> to vector<8x32xf32>
    %257 = arith.mulf %254, %240 : vector<8x32xf32>
    %258 = arith.mulf %253, %255 : vector<8x32xf32>
    %259 = arith.addf %257, %258 : vector<8x32xf32>
    %260 = math.tanh %259 : vector<8x32xf32>
    %261 = arith.mulf %256, %260 : vector<8x32xf32>
    %262 = vector.extract_strided_slice %27 {offsets = [0, 4], sizes = [8, 1], strides = [1, 1]} : vector<8x6xf32> to vector<8x1xf32>
    %cst_77 = arith.constant 1.000000e+00 : f32
    %263 = vector.broadcast %cst_77 : f32 to vector<8x1xf32>
    %264 = arith.subf %263, %262 : vector<8x1xf32>
    %265 = vector.broadcast %262 : vector<8x1xf32> to vector<8x32xf32>
    %266 = arith.mulf %265, %261 : vector<8x32xf32>
    %267 = vector.broadcast %264 : vector<8x1xf32> to vector<8x32xf32>
    %268 = arith.mulf %267, %235 : vector<8x32xf32>
    %269 = arith.addf %266, %268 : vector<8x32xf32>
    %270 = vector.broadcast %262 : vector<8x1xf32> to vector<8x32xf32>
    %271 = arith.mulf %270, %259 : vector<8x32xf32>
    %272 = vector.broadcast %264 : vector<8x1xf32> to vector<8x32xf32>
    %273 = arith.mulf %272, %240 : vector<8x32xf32>
    %274 = arith.addf %271, %273 : vector<8x32xf32>
    %275 = vector.broadcast %262 : vector<8x1xf32> to vector<8x32xf32>
    %276 = arith.mulf %275, %261 : vector<8x32xf32>
    %277 = vector.extract_strided_slice %106 {offsets = [5, 0, 0], sizes = [1, 8, 128], strides = [1, 1, 1]} : vector<6x8x128xf32> to vector<1x8x128xf32>
    %278 = vector.shape_cast %277 : vector<1x8x128xf32> to vector<8x128xf32>
    %cst_78 = arith.constant dense<0.000000e+00> : vector<8x128xf32>
    %279 = tpu.matmul %269, %7, %cst_78 {dimension_numbers = #tpu.dot_dimension_numbers<[1], [0], [0], [1], [0, 0, 1, 1], [], []>} : vector<8x32xf32>, vector<32x128xf32>, vector<8x128xf32> -> vector<8x128xf32>
    %280 = arith.addf %278, %279 : vector<8x128xf32>
    %281 = arith.negf %280 : vector<8x128xf32>
    %282 = math.exp %281 : vector<8x128xf32>
    %cst_79 = arith.constant 1.000000e+00 : f32
    %283 = vector.broadcast %cst_79 : f32 to vector<8x128xf32>
    %284 = arith.addf %283, %282 : vector<8x128xf32>
    %285 = arith.divf %283, %284 : vector<8x128xf32>
    %286 = math.tanh %280 : vector<8x128xf32>
    %287 = vector.extract_strided_slice %285 {offsets = [0, 0], sizes = [8, 32], strides = [1, 1]} : vector<8x128xf32> to vector<8x32xf32>
    %288 = vector.extract_strided_slice %285 {offsets = [0, 32], sizes = [8, 32], strides = [1, 1]} : vector<8x128xf32> to vector<8x32xf32>
    %289 = vector.extract_strided_slice %286 {offsets = [0, 64], sizes = [8, 32], strides = [1, 1]} : vector<8x128xf32> to vector<8x32xf32>
    %290 = vector.extract_strided_slice %285 {offsets = [0, 96], sizes = [8, 32], strides = [1, 1]} : vector<8x128xf32> to vector<8x32xf32>
    %291 = arith.mulf %288, %274 : vector<8x32xf32>
    %292 = arith.mulf %287, %289 : vector<8x32xf32>
    %293 = arith.addf %291, %292 : vector<8x32xf32>
    %294 = math.tanh %293 : vector<8x32xf32>
    %295 = arith.mulf %290, %294 : vector<8x32xf32>
    %296 = vector.extract_strided_slice %27 {offsets = [0, 5], sizes = [8, 1], strides = [1, 1]} : vector<8x6xf32> to vector<8x1xf32>
    %cst_80 = arith.constant 1.000000e+00 : f32
    %297 = vector.broadcast %cst_80 : f32 to vector<8x1xf32>
    %298 = arith.subf %297, %296 : vector<8x1xf32>
    %299 = vector.broadcast %296 : vector<8x1xf32> to vector<8x32xf32>
    %300 = arith.mulf %299, %295 : vector<8x32xf32>
    %301 = vector.broadcast %298 : vector<8x1xf32> to vector<8x32xf32>
    %302 = arith.mulf %301, %269 : vector<8x32xf32>
    %303 = arith.addf %300, %302 : vector<8x32xf32>
    %304 = vector.broadcast %296 : vector<8x1xf32> to vector<8x32xf32>
    %305 = arith.mulf %304, %293 : vector<8x32xf32>
    %306 = vector.broadcast %298 : vector<8x1xf32> to vector<8x32xf32>
    %307 = arith.mulf %306, %274 : vector<8x32xf32>
    %308 = arith.addf %305, %307 : vector<8x32xf32>
    %309 = vector.broadcast %296 : vector<8x1xf32> to vector<8x32xf32>
    %310 = arith.mulf %309, %295 : vector<8x32xf32>
    %311 = tpu.concatenate %140, %174, %208, %242, %276, %310 in 0 : vector<8x32xf32>, vector<8x32xf32>, vector<8x32xf32>, vector<8x32xf32>, vector<8x32xf32>, vector<8x32xf32> -> vector<48x32xf32>
    %cst_81 = arith.constant dense<0.000000e+00> : vector<48x128xf32>
    %312 = tpu.matmul %311, %8, %cst_81 {dimension_numbers = #tpu.dot_dimension_numbers<[1], [0], [0], [1], [0, 0, 1, 1], [], []>} : vector<48x32xf32>, vector<32x128xf32>, vector<48x128xf32> -> vector<48x128xf32>
    %313 = vector.broadcast %9 : vector<1x128xf32> to vector<48x128xf32>
    %314 = arith.addf %312, %313 : vector<48x128xf32>
    %c0_82 = arith.constant 0 : index
    %c0_83 = arith.constant 0 : index
    %315 = vector.load %arg24[%c0_82, %c0_83] : memref<144x128xf32, #tpu.memory_space<vmem>>, vector<48x128xf32>
    tpu.vector_store %arg24[%c0_82, %c0_83], %314 {strides = array<i32>} : memref<144x128xf32, #tpu.memory_space<vmem>>, vector<48x128xf32>,
    %cst_84 = arith.constant 1.000000e+00 : f32
    %316 = vector.broadcast %cst_84 : f32 to vector<8x1xf32>
    %317 = arith.subf %316, %28 : vector<8x1xf32>
    %318 = vector.broadcast %28 : vector<8x1xf32> to vector<8x32xf32>
    %319 = arith.mulf %318, %303 : vector<8x32xf32>
    %320 = vector.broadcast %317 : vector<8x1xf32> to vector<8x32xf32>
    %321 = arith.mulf %320, %22 : vector<8x32xf32>
    %322 = arith.addf %319, %321 : vector<8x32xf32>
    %323 = vector.broadcast %28 : vector<8x1xf32> to vector<8x32xf32>
    %324 = arith.mulf %323, %308 : vector<8x32xf32>
    %325 = vector.broadcast %317 : vector<8x1xf32> to vector<8x32xf32>
    %326 = arith.mulf %325, %23 : vector<8x32xf32>
    %327 = arith.addf %324, %326 : vector<8x32xf32>
    %c0_85 = arith.constant 0 : index
    %c0_86 = arith.constant 0 : index
    %c0_87 = arith.constant 0 : index
    %328 = vector.load %arg1[%c0_85, %c0_86, %c0_87] : memref<3x8x32xf32, #tpu.memory_space<vmem>>, vector<1x8x32xf32>
    %329 = vector.shape_cast %328 : vector<1x8x32xf32> to vector<8x32xf32>
    %330 = vector.shape_cast %329 : vector<8x32xf32> to vector<8x1x32xf32>
    %331 = vector.broadcast %330 : vector<8x1x32xf32> to vector<8x8x32xf32>
    %332 = arith.mulf %331, %1 : vector<8x8x32xf32>
    %333 = vector.shape_cast %332 : vector<8x8x32xf32> to vector<64x32xf32>
    %cst_88 = arith.constant dense<0.000000e+00> : vector<64x32xf32>
    %334 = tpu.matmul %333, %10, %cst_88 {dimension_numbers = #tpu.dot_dimension_numbers<[1], [0], [0], [1], [0, 0, 1, 1], [], []>} : vector<64x32xf32>, vector<32x32xf32>, vector<64x32xf32> -> vector<64x32xf32>
    %335 = vector.broadcast %11 : vector<1x32xf32> to vector<64x32xf32>
    %336 = arith.addf %334, %335 : vector<64x32xf32>
    %337 = vector.shape_cast %336 : vector<64x32xf32> to vector<8x8x32xf32>
    %c0_89 = arith.constant 0 : index
    %c0_90 = arith.constant 0 : index
    %c0_91 = arith.constant 0 : index
    %338 = vector.load %arg2[%c0_89, %c0_90, %c0_91] : memref<3x8x8xf32, #tpu.memory_space<vmem>>, vector<1x8x8xf32>
    %339 = vector.shape_cast %338 : vector<1x8x8xf32> to vector<8x8xf32>
    %cst_92 = arith.constant dense<0.000000e+00> : vector<8x32xf32>
    %340 = tpu.matmul %339, %12, %cst_92 {dimension_numbers = #tpu.dot_dimension_numbers<[1], [0], [0], [1], [0, 0, 1, 1], [], []>} : vector<8x8xf32>, vector<8x32xf32>, vector<8x32xf32> -> vector<8x32xf32>
    %341 = vector.broadcast %13 : vector<1x32xf32> to vector<8x32xf32>
    %342 = arith.addf %340, %341 : vector<8x32xf32>
    %343 = vector.shape_cast %21 : vector<8x8xf32> to vector<8x8x1xf32>
    %344 = vector.broadcast %343 : vector<8x8x1xf32> to vector<8x8x32xf32>
    %345 = arith.mulf %337, %344 : vector<8x8x32xf32>
    %346 = vector.shape_cast %342 : vector<8x32xf32> to vector<8x1x32xf32>
    %347 = vector.broadcast %346 : vector<8x1x32xf32> to vector<8x8x32xf32>
    %348 = arith.addf %345, %347 : vector<8x8x32xf32>
    %349 = vector.shape_cast %348 : vector<8x8x32xf32> to vector<64x32xf32>
    %cst_93 = arith.constant dense<0.000000e+00> : vector<64x16xf32>
    %350 = tpu.matmul %349, %14, %cst_93 {dimension_numbers = #tpu.dot_dimension_numbers<[1], [0], [0], [1], [0, 0, 1, 1], [], []>} : vector<64x32xf32>, vector<32x16xf32>, vector<64x16xf32> -> vector<64x16xf32>
    %351 = vector.broadcast %15 : vector<1x16xf32> to vector<64x16xf32>
    %352 = arith.addf %350, %351 : vector<64x16xf32>
    %cst_94 = arith.constant 0.000000e+00 : f32
    %353 = vector.broadcast %cst_94 : f32 to vector<64x16xf32>
    %354 = arith.maximumf %352, %353 : vector<64x16xf32>
    %355 = vector.shape_cast %354 : vector<64x16xf32> to vector<8x8x16xf32>
    %356 = vector.shape_cast %16 : vector<1x16xf32> to vector<1x1x16xf32>
    %357 = vector.broadcast %356 : vector<1x1x16xf32> to vector<8x8x16xf32>
    %358 = arith.mulf %355, %357 : vector<8x8x16xf32>
    %cst_95 = arith.constant dense<0.000000e+00> : vector<8x8xf32>
    %359 = vector.multi_reduction <add>, %358, %cst_95 [2] : vector<8x8x16xf32> to vector<8x8xf32>
    %360 = vector.broadcast %17 : vector<1x1xf32> to vector<8x8xf32>
    %361 = arith.addf %359, %360 : vector<8x8xf32>
    %cst_96 = arith.constant dense<0xFF800000> : vector<8xf32>
    %362 = vector.multi_reduction <maximumf>, %361, %cst_96 [1] : vector<8x8xf32> to vector<8xf32>
    %363 = vector.shape_cast %362 : vector<8xf32> to vector<8x1xf32>
    %364 = vector.broadcast %363 : vector<8x1xf32> to vector<8x8xf32>
    %365 = arith.subf %361, %364 : vector<8x8xf32>
    %366 = math.exp %365 : vector<8x8xf32>
    %cst_97 = arith.constant dense<0.000000e+00> : vector<8xf32>
    %367 = vector.multi_reduction <add>, %366, %cst_97 [1] : vector<8x8xf32> to vector<8xf32>
    %368 = vector.shape_cast %367 : vector<8xf32> to vector<8x1xf32>
    %369 = vector.broadcast %368 : vector<8x1xf32> to vector<8x8xf32>
    %370 = arith.divf %366, %369 : vector<8x8xf32>
    %cst_98 = arith.constant 5.000000e-01 : f32
    %371 = vector.broadcast %cst_98 : f32 to vector<8x8xf32>
    %372 = arith.mulf %371, %21 : vector<8x8xf32>
    %cst_99 = arith.constant 5.000000e-01 : f32
    %373 = vector.broadcast %cst_99 : f32 to vector<8x8xf32>
    %374 = arith.mulf %373, %370 : vector<8x8xf32>
    %375 = arith.addf %372, %374 : vector<8x8xf32>
    %376 = vector.broadcast %29 : vector<8x1xf32> to vector<8x8xf32>
    %377 = arith.mulf %376, %361 : vector<8x8xf32>
    %cst_100 = arith.constant 1.000000e+00 : f32
    %378 = vector.broadcast %cst_100 : f32 to vector<8x1xf32>
    %379 = arith.subf %378, %29 : vector<8x1xf32>
    %380 = vector.broadcast %379 : vector<8x1xf32> to vector<8x8xf32>
    %381 = arith.mulf %380, %24 : vector<8x8xf32>
    %382 = arith.addf %377, %381 : vector<8x8xf32>
    %c0_101 = arith.constant 0 : index
    %c0_102 = arith.constant 0 : index
    %c0_103 = arith.constant 0 : index
    %383 = vector.load %arg25[%c0_101, %c0_102, %c0_103] : memref<2x8x8xf32, #tpu.memory_space<vmem>>, vector<1x8x8xf32>
    %384 = vector.shape_cast %383 : vector<1x8x8xf32> to vector<8x8xf32>
    %385 = vector.shape_cast %375 : vector<8x8xf32> to vector<1x8x8xf32>
    tpu.vector_store %arg25[%c0_101, %c0_102, %c0_103], %385 {strides = array<i32>} : memref<2x8x8xf32, #tpu.memory_space<vmem>>, vector<1x8x8xf32>,
    %c1 = arith.constant 1 : index
    %c0_104 = arith.constant 0 : index
    %c0_105 = arith.constant 0 : index
    %386 = vector.load %arg3[%c1, %c0_104, %c0_105] : memref<3x8x8xf32, #tpu.memory_space<vmem>>, vector<1x8x8xf32>
    %387 = vector.shape_cast %386 : vector<1x8x8xf32> to vector<8x8xf32>
    %388 = vector.extract_strided_slice %387 {offsets = [0, 0], sizes = [8, 6], strides = [1, 1]} : vector<8x8xf32> to vector<8x6xf32>
    %389 = vector.extract_strided_slice %387 {offsets = [0, 6], sizes = [8, 1], strides = [1, 1]} : vector<8x8xf32> to vector<8x1xf32>
    %390 = vector.extract_strided_slice %387 {offsets = [0, 7], sizes = [8, 1], strides = [1, 1]} : vector<8x8xf32> to vector<8x1xf32>
    %391 = vector.shape_cast %375 : vector<8x8xf32> to vector<8x8x1xf32>
    %392 = vector.broadcast %391 : vector<8x8x1xf32> to vector<8x8x16xf32>
    %393 = arith.mulf %0, %392 : vector<8x8x16xf32>
    %394 = arith.mulf %393, %393 : vector<8x8x16xf32>
    %395 = vector.extract_strided_slice %2 {offsets = [0, 0, 0], sizes = [1, 8, 16], strides = [1, 1, 1]} : vector<2x8x16xf32> to vector<1x8x16xf32>
    %396 = vector.shape_cast %395 : vector<1x8x16xf32> to vector<8x16xf32>
    %397 = vector.extract_strided_slice %3 {offsets = [0, 0], sizes = [1, 16], strides = [1, 1]} : vector<2x16xf32> to vector<1x16xf32>
    %398 = vector.shape_cast %396 : vector<8x16xf32> to vector<1x8x16xf32>
    %399 = vector.broadcast %398 : vector<1x8x16xf32> to vector<8x8x16xf32>
    %400 = arith.mulf %393, %399 : vector<8x8x16xf32>
    %cst_106 = arith.constant dense<0.000000e+00> : vector<8x16xf32>
    %401 = vector.multi_reduction <add>, %400, %cst_106 [1] : vector<8x8x16xf32> to vector<8x16xf32>
    %402 = vector.shape_cast %397 : vector<1x16xf32> to vector<1x1x16xf32>
    %403 = vector.broadcast %402 : vector<1x1x16xf32> to vector<8x8x16xf32>
    %404 = arith.mulf %394, %403 : vector<8x8x16xf32>
    %cst_107 = arith.constant dense<0.000000e+00> : vector<8x8xf32>
    %405 = vector.multi_reduction <add>, %404, %cst_107 [2] : vector<8x8x16xf32> to vector<8x8xf32>
    %406 = vector.shape_cast %401 : vector<8x16xf32> to vector<8x1x16xf32>
    %407 = vector.broadcast %406 : vector<8x1x16xf32> to vector<8x8x16xf32>
    %408 = arith.mulf %393, %407 : vector<8x8x16xf32>
    %cst_108 = arith.constant dense<0.000000e+00> : vector<8x8xf32>
    %409 = vector.multi_reduction <add>, %408, %cst_108 [2] : vector<8x8x16xf32> to vector<8x8xf32>
    %410 = arith.subf %405, %409 : vector<8x8xf32>
    %411 = vector.extract_strided_slice %4 {offsets = [0, 0], sizes = [1, 1], strides = [1, 1]} : vector<2x1xf32> to vector<1x1xf32>
    %412 = vector.broadcast %411 : vector<1x1xf32> to vector<8x8xf32>
    %413 = arith.addf %410, %412 : vector<8x8xf32>
    %cst_109 = arith.constant dense<0xFF800000> : vector<8xf32>
    %414 = vector.multi_reduction <maximumf>, %413, %cst_109 [1] : vector<8x8xf32> to vector<8xf32>
    %415 = vector.shape_cast %414 : vector<8xf32> to vector<8x1xf32>
    %416 = vector.broadcast %415 : vector<8x1xf32> to vector<8x8xf32>
    %417 = arith.subf %413, %416 : vector<8x8xf32>
    %418 = math.exp %417 : vector<8x8xf32>
    %cst_110 = arith.constant dense<0.000000e+00> : vector<8xf32>
    %419 = vector.multi_reduction <add>, %418, %cst_110 [1] : vector<8x8xf32> to vector<8xf32>
    %420 = vector.shape_cast %419 : vector<8xf32> to vector<8x1xf32>
    %421 = vector.broadcast %420 : vector<8x1xf32> to vector<8x8xf32>
    %422 = arith.divf %418, %421 : vector<8x8xf32>
    %423 = vector.shape_cast %422 : vector<8x8xf32> to vector<8x8x1xf32>
    %424 = vector.broadcast %423 : vector<8x8x1xf32> to vector<8x8x16xf32>
    %425 = arith.mulf %424, %393 : vector<8x8x16xf32>
    %cst_111 = arith.constant dense<0.000000e+00> : vector<8x16xf32>
    %426 = vector.multi_reduction <add>, %425, %cst_111 [1] : vector<8x8x16xf32> to vector<8x16xf32>
    %427 = vector.extract_strided_slice %2 {offsets = [1, 0, 0], sizes = [1, 8, 16], strides = [1, 1, 1]} : vector<2x8x16xf32> to vector<1x8x16xf32>
    %428 = vector.shape_cast %427 : vector<1x8x16xf32> to vector<8x16xf32>
    %429 = vector.extract_strided_slice %3 {offsets = [1, 0], sizes = [1, 16], strides = [1, 1]} : vector<2x16xf32> to vector<1x16xf32>
    %430 = vector.shape_cast %428 : vector<8x16xf32> to vector<1x8x16xf32>
    %431 = vector.broadcast %430 : vector<1x8x16xf32> to vector<8x8x16xf32>
    %432 = arith.mulf %393, %431 : vector<8x8x16xf32>
    %cst_112 = arith.constant dense<0.000000e+00> : vector<8x16xf32>
    %433 = vector.multi_reduction <add>, %432, %cst_112 [1] : vector<8x8x16xf32> to vector<8x16xf32>
    %434 = vector.shape_cast %429 : vector<1x16xf32> to vector<1x1x16xf32>
    %435 = vector.broadcast %434 : vector<1x1x16xf32> to vector<8x8x16xf32>
    %436 = arith.mulf %394, %435 : vector<8x8x16xf32>
    %cst_113 = arith.constant dense<0.000000e+00> : vector<8x8xf32>
    %437 = vector.multi_reduction <add>, %436, %cst_113 [2] : vector<8x8x16xf32> to vector<8x8xf32>
    %438 = vector.shape_cast %433 : vector<8x16xf32> to vector<8x1x16xf32>
    %439 = vector.broadcast %438 : vector<8x1x16xf32> to vector<8x8x16xf32>
    %440 = arith.mulf %393, %439 : vector<8x8x16xf32>
    %cst_114 = arith.constant dense<0.000000e+00> : vector<8x8xf32>
    %441 = vector.multi_reduction <add>, %440, %cst_114 [2] : vector<8x8x16xf32> to vector<8x8xf32>
    %442 = arith.subf %437, %441 : vector<8x8xf32>
    %443 = vector.extract_strided_slice %4 {offsets = [1, 0], sizes = [1, 1], strides = [1, 1]} : vector<2x1xf32> to vector<1x1xf32>
    %444 = vector.broadcast %443 : vector<1x1xf32> to vector<8x8xf32>
    %445 = arith.addf %442, %444 : vector<8x8xf32>
    %cst_115 = arith.constant dense<0xFF800000> : vector<8xf32>
    %446 = vector.multi_reduction <maximumf>, %445, %cst_115 [1] : vector<8x8xf32> to vector<8xf32>
    %447 = vector.shape_cast %446 : vector<8xf32> to vector<8x1xf32>
    %448 = vector.broadcast %447 : vector<8x1xf32> to vector<8x8xf32>
    %449 = arith.subf %445, %448 : vector<8x8xf32>
    %450 = math.exp %449 : vector<8x8xf32>
    %cst_116 = arith.constant dense<0.000000e+00> : vector<8xf32>
    %451 = vector.multi_reduction <add>, %450, %cst_116 [1] : vector<8x8xf32> to vector<8xf32>
    %452 = vector.shape_cast %451 : vector<8xf32> to vector<8x1xf32>
    %453 = vector.broadcast %452 : vector<8x1xf32> to vector<8x8xf32>
    %454 = arith.divf %450, %453 : vector<8x8xf32>
    %455 = vector.shape_cast %454 : vector<8x8xf32> to vector<8x8x1xf32>
    %456 = vector.broadcast %455 : vector<8x8x1xf32> to vector<8x8x16xf32>
    %457 = arith.mulf %456, %393 : vector<8x8x16xf32>
    %cst_117 = arith.constant dense<0.000000e+00> : vector<8x16xf32>
    %458 = vector.multi_reduction <add>, %457, %cst_117 [1] : vector<8x8x16xf32> to vector<8x16xf32>
    %459 = tpu.concatenate %426, %458 in 1 : vector<8x16xf32>, vector<8x16xf32> -> vector<8x32xf32>
    %cst_118 = arith.constant dense<0.000000e+00> : vector<8x128xf32>
    %460 = tpu.matmul %459, %5, %cst_118 {dimension_numbers = #tpu.dot_dimension_numbers<[1], [0], [0], [1], [0, 0, 1, 1], [], []>} : vector<8x32xf32>, vector<32x128xf32>, vector<8x128xf32> -> vector<8x128xf32>
    %461 = vector.broadcast %6 : vector<1x128xf32> to vector<8x128xf32>
    %462 = arith.addf %460, %461 : vector<8x128xf32>
    %463 = vector.extract_strided_slice %20 {offsets = [48, 0], sizes = [48, 128], strides = [1, 1]} : vector<144x128xf32> to vector<48x128xf32>
    %464 = vector.shape_cast %463 : vector<48x128xf32> to vector<6x8x128xf32>
    %465 = vector.shape_cast %462 : vector<8x128xf32> to vector<1x8x128xf32>
    %466 = vector.broadcast %465 : vector<1x8x128xf32> to vector<6x8x128xf32>
    %467 = arith.addf %464, %466 : vector<6x8x128xf32>
    %468 = vector.extract_strided_slice %467 {offsets = [0, 0, 0], sizes = [1, 8, 128], strides = [1, 1, 1]} : vector<6x8x128xf32> to vector<1x8x128xf32>
    %469 = vector.shape_cast %468 : vector<1x8x128xf32> to vector<8x128xf32>
    %cst_119 = arith.constant dense<0.000000e+00> : vector<8x128xf32>
    %470 = tpu.matmul %322, %7, %cst_119 {dimension_numbers = #tpu.dot_dimension_numbers<[1], [0], [0], [1], [0, 0, 1, 1], [], []>} : vector<8x32xf32>, vector<32x128xf32>, vector<8x128xf32> -> vector<8x128xf32>
    %471 = arith.addf %469, %470 : vector<8x128xf32>
    %472 = arith.negf %471 : vector<8x128xf32>
    %473 = math.exp %472 : vector<8x128xf32>
    %cst_120 = arith.constant 1.000000e+00 : f32
    %474 = vector.broadcast %cst_120 : f32 to vector<8x128xf32>
    %475 = arith.addf %474, %473 : vector<8x128xf32>
    %476 = arith.divf %474, %475 : vector<8x128xf32>
    %477 = math.tanh %471 : vector<8x128xf32>
    %478 = vector.extract_strided_slice %476 {offsets = [0, 0], sizes = [8, 32], strides = [1, 1]} : vector<8x128xf32> to vector<8x32xf32>
    %479 = vector.extract_strided_slice %476 {offsets = [0, 32], sizes = [8, 32], strides = [1, 1]} : vector<8x128xf32> to vector<8x32xf32>
    %480 = vector.extract_strided_slice %477 {offsets = [0, 64], sizes = [8, 32], strides = [1, 1]} : vector<8x128xf32> to vector<8x32xf32>
    %481 = vector.extract_strided_slice %476 {offsets = [0, 96], sizes = [8, 32], strides = [1, 1]} : vector<8x128xf32> to vector<8x32xf32>
    %482 = arith.mulf %479, %327 : vector<8x32xf32>
    %483 = arith.mulf %478, %480 : vector<8x32xf32>
    %484 = arith.addf %482, %483 : vector<8x32xf32>
    %485 = math.tanh %484 : vector<8x32xf32>
    %486 = arith.mulf %481, %485 : vector<8x32xf32>
    %487 = vector.extract_strided_slice %388 {offsets = [0, 0], sizes = [8, 1], strides = [1, 1]} : vector<8x6xf32> to vector<8x1xf32>
    %cst_121 = arith.constant 1.000000e+00 : f32
    %488 = vector.broadcast %cst_121 : f32 to vector<8x1xf32>
    %489 = arith.subf %488, %487 : vector<8x1xf32>
    %490 = vector.broadcast %487 : vector<8x1xf32> to vector<8x32xf32>
    %491 = arith.mulf %490, %486 : vector<8x32xf32>
    %492 = vector.broadcast %489 : vector<8x1xf32> to vector<8x32xf32>
    %493 = arith.mulf %492, %322 : vector<8x32xf32>
    %494 = arith.addf %491, %493 : vector<8x32xf32>
    %495 = vector.broadcast %487 : vector<8x1xf32> to vector<8x32xf32>
    %496 = arith.mulf %495, %484 : vector<8x32xf32>
    %497 = vector.broadcast %489 : vector<8x1xf32> to vector<8x32xf32>
    %498 = arith.mulf %497, %327 : vector<8x32xf32>
    %499 = arith.addf %496, %498 : vector<8x32xf32>
    %500 = vector.broadcast %487 : vector<8x1xf32> to vector<8x32xf32>
    %501 = arith.mulf %500, %486 : vector<8x32xf32>
    %502 = vector.extract_strided_slice %467 {offsets = [1, 0, 0], sizes = [1, 8, 128], strides = [1, 1, 1]} : vector<6x8x128xf32> to vector<1x8x128xf32>
    %503 = vector.shape_cast %502 : vector<1x8x128xf32> to vector<8x128xf32>
    %cst_122 = arith.constant dense<0.000000e+00> : vector<8x128xf32>
    %504 = tpu.matmul %494, %7, %cst_122 {dimension_numbers = #tpu.dot_dimension_numbers<[1], [0], [0], [1], [0, 0, 1, 1], [], []>} : vector<8x32xf32>, vector<32x128xf32>, vector<8x128xf32> -> vector<8x128xf32>
    %505 = arith.addf %503, %504 : vector<8x128xf32>
    %506 = arith.negf %505 : vector<8x128xf32>
    %507 = math.exp %506 : vector<8x128xf32>
    %cst_123 = arith.constant 1.000000e+00 : f32
    %508 = vector.broadcast %cst_123 : f32 to vector<8x128xf32>
    %509 = arith.addf %508, %507 : vector<8x128xf32>
    %510 = arith.divf %508, %509 : vector<8x128xf32>
    %511 = math.tanh %505 : vector<8x128xf32>
    %512 = vector.extract_strided_slice %510 {offsets = [0, 0], sizes = [8, 32], strides = [1, 1]} : vector<8x128xf32> to vector<8x32xf32>
    %513 = vector.extract_strided_slice %510 {offsets = [0, 32], sizes = [8, 32], strides = [1, 1]} : vector<8x128xf32> to vector<8x32xf32>
    %514 = vector.extract_strided_slice %511 {offsets = [0, 64], sizes = [8, 32], strides = [1, 1]} : vector<8x128xf32> to vector<8x32xf32>
    %515 = vector.extract_strided_slice %510 {offsets = [0, 96], sizes = [8, 32], strides = [1, 1]} : vector<8x128xf32> to vector<8x32xf32>
    %516 = arith.mulf %513, %499 : vector<8x32xf32>
    %517 = arith.mulf %512, %514 : vector<8x32xf32>
    %518 = arith.addf %516, %517 : vector<8x32xf32>
    %519 = math.tanh %518 : vector<8x32xf32>
    %520 = arith.mulf %515, %519 : vector<8x32xf32>
    %521 = vector.extract_strided_slice %388 {offsets = [0, 1], sizes = [8, 1], strides = [1, 1]} : vector<8x6xf32> to vector<8x1xf32>
    %cst_124 = arith.constant 1.000000e+00 : f32
    %522 = vector.broadcast %cst_124 : f32 to vector<8x1xf32>
    %523 = arith.subf %522, %521 : vector<8x1xf32>
    %524 = vector.broadcast %521 : vector<8x1xf32> to vector<8x32xf32>
    %525 = arith.mulf %524, %520 : vector<8x32xf32>
    %526 = vector.broadcast %523 : vector<8x1xf32> to vector<8x32xf32>
    %527 = arith.mulf %526, %494 : vector<8x32xf32>
    %528 = arith.addf %525, %527 : vector<8x32xf32>
    %529 = vector.broadcast %521 : vector<8x1xf32> to vector<8x32xf32>
    %530 = arith.mulf %529, %518 : vector<8x32xf32>
    %531 = vector.broadcast %523 : vector<8x1xf32> to vector<8x32xf32>
    %532 = arith.mulf %531, %499 : vector<8x32xf32>
    %533 = arith.addf %530, %532 : vector<8x32xf32>
    %534 = vector.broadcast %521 : vector<8x1xf32> to vector<8x32xf32>
    %535 = arith.mulf %534, %520 : vector<8x32xf32>
    %536 = vector.extract_strided_slice %467 {offsets = [2, 0, 0], sizes = [1, 8, 128], strides = [1, 1, 1]} : vector<6x8x128xf32> to vector<1x8x128xf32>
    %537 = vector.shape_cast %536 : vector<1x8x128xf32> to vector<8x128xf32>
    %cst_125 = arith.constant dense<0.000000e+00> : vector<8x128xf32>
    %538 = tpu.matmul %528, %7, %cst_125 {dimension_numbers = #tpu.dot_dimension_numbers<[1], [0], [0], [1], [0, 0, 1, 1], [], []>} : vector<8x32xf32>, vector<32x128xf32>, vector<8x128xf32> -> vector<8x128xf32>
    %539 = arith.addf %537, %538 : vector<8x128xf32>
    %540 = arith.negf %539 : vector<8x128xf32>
    %541 = math.exp %540 : vector<8x128xf32>
    %cst_126 = arith.constant 1.000000e+00 : f32
    %542 = vector.broadcast %cst_126 : f32 to vector<8x128xf32>
    %543 = arith.addf %542, %541 : vector<8x128xf32>
    %544 = arith.divf %542, %543 : vector<8x128xf32>
    %545 = math.tanh %539 : vector<8x128xf32>
    %546 = vector.extract_strided_slice %544 {offsets = [0, 0], sizes = [8, 32], strides = [1, 1]} : vector<8x128xf32> to vector<8x32xf32>
    %547 = vector.extract_strided_slice %544 {offsets = [0, 32], sizes = [8, 32], strides = [1, 1]} : vector<8x128xf32> to vector<8x32xf32>
    %548 = vector.extract_strided_slice %545 {offsets = [0, 64], sizes = [8, 32], strides = [1, 1]} : vector<8x128xf32> to vector<8x32xf32>
    %549 = vector.extract_strided_slice %544 {offsets = [0, 96], sizes = [8, 32], strides = [1, 1]} : vector<8x128xf32> to vector<8x32xf32>
    %550 = arith.mulf %547, %533 : vector<8x32xf32>
    %551 = arith.mulf %546, %548 : vector<8x32xf32>
    %552 = arith.addf %550, %551 : vector<8x32xf32>
    %553 = math.tanh %552 : vector<8x32xf32>
    %554 = arith.mulf %549, %553 : vector<8x32xf32>
    %555 = vector.extract_strided_slice %388 {offsets = [0, 2], sizes = [8, 1], strides = [1, 1]} : vector<8x6xf32> to vector<8x1xf32>
    %cst_127 = arith.constant 1.000000e+00 : f32
    %556 = vector.broadcast %cst_127 : f32 to vector<8x1xf32>
    %557 = arith.subf %556, %555 : vector<8x1xf32>
    %558 = vector.broadcast %555 : vector<8x1xf32> to vector<8x32xf32>
    %559 = arith.mulf %558, %554 : vector<8x32xf32>
    %560 = vector.broadcast %557 : vector<8x1xf32> to vector<8x32xf32>
    %561 = arith.mulf %560, %528 : vector<8x32xf32>
    %562 = arith.addf %559, %561 : vector<8x32xf32>
    %563 = vector.broadcast %555 : vector<8x1xf32> to vector<8x32xf32>
    %564 = arith.mulf %563, %552 : vector<8x32xf32>
    %565 = vector.broadcast %557 : vector<8x1xf32> to vector<8x32xf32>
    %566 = arith.mulf %565, %533 : vector<8x32xf32>
    %567 = arith.addf %564, %566 : vector<8x32xf32>
    %568 = vector.broadcast %555 : vector<8x1xf32> to vector<8x32xf32>
    %569 = arith.mulf %568, %554 : vector<8x32xf32>
    %570 = vector.extract_strided_slice %467 {offsets = [3, 0, 0], sizes = [1, 8, 128], strides = [1, 1, 1]} : vector<6x8x128xf32> to vector<1x8x128xf32>
    %571 = vector.shape_cast %570 : vector<1x8x128xf32> to vector<8x128xf32>
    %cst_128 = arith.constant dense<0.000000e+00> : vector<8x128xf32>
    %572 = tpu.matmul %562, %7, %cst_128 {dimension_numbers = #tpu.dot_dimension_numbers<[1], [0], [0], [1], [0, 0, 1, 1], [], []>} : vector<8x32xf32>, vector<32x128xf32>, vector<8x128xf32> -> vector<8x128xf32>
    %573 = arith.addf %571, %572 : vector<8x128xf32>
    %574 = arith.negf %573 : vector<8x128xf32>
    %575 = math.exp %574 : vector<8x128xf32>
    %cst_129 = arith.constant 1.000000e+00 : f32
    %576 = vector.broadcast %cst_129 : f32 to vector<8x128xf32>
    %577 = arith.addf %576, %575 : vector<8x128xf32>
    %578 = arith.divf %576, %577 : vector<8x128xf32>
    %579 = math.tanh %573 : vector<8x128xf32>
    %580 = vector.extract_strided_slice %578 {offsets = [0, 0], sizes = [8, 32], strides = [1, 1]} : vector<8x128xf32> to vector<8x32xf32>
    %581 = vector.extract_strided_slice %578 {offsets = [0, 32], sizes = [8, 32], strides = [1, 1]} : vector<8x128xf32> to vector<8x32xf32>
    %582 = vector.extract_strided_slice %579 {offsets = [0, 64], sizes = [8, 32], strides = [1, 1]} : vector<8x128xf32> to vector<8x32xf32>
    %583 = vector.extract_strided_slice %578 {offsets = [0, 96], sizes = [8, 32], strides = [1, 1]} : vector<8x128xf32> to vector<8x32xf32>
    %584 = arith.mulf %581, %567 : vector<8x32xf32>
    %585 = arith.mulf %580, %582 : vector<8x32xf32>
    %586 = arith.addf %584, %585 : vector<8x32xf32>
    %587 = math.tanh %586 : vector<8x32xf32>
    %588 = arith.mulf %583, %587 : vector<8x32xf32>
    %589 = vector.extract_strided_slice %388 {offsets = [0, 3], sizes = [8, 1], strides = [1, 1]} : vector<8x6xf32> to vector<8x1xf32>
    %cst_130 = arith.constant 1.000000e+00 : f32
    %590 = vector.broadcast %cst_130 : f32 to vector<8x1xf32>
    %591 = arith.subf %590, %589 : vector<8x1xf32>
    %592 = vector.broadcast %589 : vector<8x1xf32> to vector<8x32xf32>
    %593 = arith.mulf %592, %588 : vector<8x32xf32>
    %594 = vector.broadcast %591 : vector<8x1xf32> to vector<8x32xf32>
    %595 = arith.mulf %594, %562 : vector<8x32xf32>
    %596 = arith.addf %593, %595 : vector<8x32xf32>
    %597 = vector.broadcast %589 : vector<8x1xf32> to vector<8x32xf32>
    %598 = arith.mulf %597, %586 : vector<8x32xf32>
    %599 = vector.broadcast %591 : vector<8x1xf32> to vector<8x32xf32>
    %600 = arith.mulf %599, %567 : vector<8x32xf32>
    %601 = arith.addf %598, %600 : vector<8x32xf32>
    %602 = vector.broadcast %589 : vector<8x1xf32> to vector<8x32xf32>
    %603 = arith.mulf %602, %588 : vector<8x32xf32>
    %604 = vector.extract_strided_slice %467 {offsets = [4, 0, 0], sizes = [1, 8, 128], strides = [1, 1, 1]} : vector<6x8x128xf32> to vector<1x8x128xf32>
    %605 = vector.shape_cast %604 : vector<1x8x128xf32> to vector<8x128xf32>
    %cst_131 = arith.constant dense<0.000000e+00> : vector<8x128xf32>
    %606 = tpu.matmul %596, %7, %cst_131 {dimension_numbers = #tpu.dot_dimension_numbers<[1], [0], [0], [1], [0, 0, 1, 1], [], []>} : vector<8x32xf32>, vector<32x128xf32>, vector<8x128xf32> -> vector<8x128xf32>
    %607 = arith.addf %605, %606 : vector<8x128xf32>
    %608 = arith.negf %607 : vector<8x128xf32>
    %609 = math.exp %608 : vector<8x128xf32>
    %cst_132 = arith.constant 1.000000e+00 : f32
    %610 = vector.broadcast %cst_132 : f32 to vector<8x128xf32>
    %611 = arith.addf %610, %609 : vector<8x128xf32>
    %612 = arith.divf %610, %611 : vector<8x128xf32>
    %613 = math.tanh %607 : vector<8x128xf32>
    %614 = vector.extract_strided_slice %612 {offsets = [0, 0], sizes = [8, 32], strides = [1, 1]} : vector<8x128xf32> to vector<8x32xf32>
    %615 = vector.extract_strided_slice %612 {offsets = [0, 32], sizes = [8, 32], strides = [1, 1]} : vector<8x128xf32> to vector<8x32xf32>
    %616 = vector.extract_strided_slice %613 {offsets = [0, 64], sizes = [8, 32], strides = [1, 1]} : vector<8x128xf32> to vector<8x32xf32>
    %617 = vector.extract_strided_slice %612 {offsets = [0, 96], sizes = [8, 32], strides = [1, 1]} : vector<8x128xf32> to vector<8x32xf32>
    %618 = arith.mulf %615, %601 : vector<8x32xf32>
    %619 = arith.mulf %614, %616 : vector<8x32xf32>
    %620 = arith.addf %618, %619 : vector<8x32xf32>
    %621 = math.tanh %620 : vector<8x32xf32>
    %622 = arith.mulf %617, %621 : vector<8x32xf32>
    %623 = vector.extract_strided_slice %388 {offsets = [0, 4], sizes = [8, 1], strides = [1, 1]} : vector<8x6xf32> to vector<8x1xf32>
    %cst_133 = arith.constant 1.000000e+00 : f32
    %624 = vector.broadcast %cst_133 : f32 to vector<8x1xf32>
    %625 = arith.subf %624, %623 : vector<8x1xf32>
    %626 = vector.broadcast %623 : vector<8x1xf32> to vector<8x32xf32>
    %627 = arith.mulf %626, %622 : vector<8x32xf32>
    %628 = vector.broadcast %625 : vector<8x1xf32> to vector<8x32xf32>
    %629 = arith.mulf %628, %596 : vector<8x32xf32>
    %630 = arith.addf %627, %629 : vector<8x32xf32>
    %631 = vector.broadcast %623 : vector<8x1xf32> to vector<8x32xf32>
    %632 = arith.mulf %631, %620 : vector<8x32xf32>
    %633 = vector.broadcast %625 : vector<8x1xf32> to vector<8x32xf32>
    %634 = arith.mulf %633, %601 : vector<8x32xf32>
    %635 = arith.addf %632, %634 : vector<8x32xf32>
    %636 = vector.broadcast %623 : vector<8x1xf32> to vector<8x32xf32>
    %637 = arith.mulf %636, %622 : vector<8x32xf32>
    %638 = vector.extract_strided_slice %467 {offsets = [5, 0, 0], sizes = [1, 8, 128], strides = [1, 1, 1]} : vector<6x8x128xf32> to vector<1x8x128xf32>
    %639 = vector.shape_cast %638 : vector<1x8x128xf32> to vector<8x128xf32>
    %cst_134 = arith.constant dense<0.000000e+00> : vector<8x128xf32>
    %640 = tpu.matmul %630, %7, %cst_134 {dimension_numbers = #tpu.dot_dimension_numbers<[1], [0], [0], [1], [0, 0, 1, 1], [], []>} : vector<8x32xf32>, vector<32x128xf32>, vector<8x128xf32> -> vector<8x128xf32>
    %641 = arith.addf %639, %640 : vector<8x128xf32>
    %642 = arith.negf %641 : vector<8x128xf32>
    %643 = math.exp %642 : vector<8x128xf32>
    %cst_135 = arith.constant 1.000000e+00 : f32
    %644 = vector.broadcast %cst_135 : f32 to vector<8x128xf32>
    %645 = arith.addf %644, %643 : vector<8x128xf32>
    %646 = arith.divf %644, %645 : vector<8x128xf32>
    %647 = math.tanh %641 : vector<8x128xf32>
    %648 = vector.extract_strided_slice %646 {offsets = [0, 0], sizes = [8, 32], strides = [1, 1]} : vector<8x128xf32> to vector<8x32xf32>
    %649 = vector.extract_strided_slice %646 {offsets = [0, 32], sizes = [8, 32], strides = [1, 1]} : vector<8x128xf32> to vector<8x32xf32>
    %650 = vector.extract_strided_slice %647 {offsets = [0, 64], sizes = [8, 32], strides = [1, 1]} : vector<8x128xf32> to vector<8x32xf32>
    %651 = vector.extract_strided_slice %646 {offsets = [0, 96], sizes = [8, 32], strides = [1, 1]} : vector<8x128xf32> to vector<8x32xf32>
    %652 = arith.mulf %649, %635 : vector<8x32xf32>
    %653 = arith.mulf %648, %650 : vector<8x32xf32>
    %654 = arith.addf %652, %653 : vector<8x32xf32>
    %655 = math.tanh %654 : vector<8x32xf32>
    %656 = arith.mulf %651, %655 : vector<8x32xf32>
    %657 = vector.extract_strided_slice %388 {offsets = [0, 5], sizes = [8, 1], strides = [1, 1]} : vector<8x6xf32> to vector<8x1xf32>
    %cst_136 = arith.constant 1.000000e+00 : f32
    %658 = vector.broadcast %cst_136 : f32 to vector<8x1xf32>
    %659 = arith.subf %658, %657 : vector<8x1xf32>
    %660 = vector.broadcast %657 : vector<8x1xf32> to vector<8x32xf32>
    %661 = arith.mulf %660, %656 : vector<8x32xf32>
    %662 = vector.broadcast %659 : vector<8x1xf32> to vector<8x32xf32>
    %663 = arith.mulf %662, %630 : vector<8x32xf32>
    %664 = arith.addf %661, %663 : vector<8x32xf32>
    %665 = vector.broadcast %657 : vector<8x1xf32> to vector<8x32xf32>
    %666 = arith.mulf %665, %654 : vector<8x32xf32>
    %667 = vector.broadcast %659 : vector<8x1xf32> to vector<8x32xf32>
    %668 = arith.mulf %667, %635 : vector<8x32xf32>
    %669 = arith.addf %666, %668 : vector<8x32xf32>
    %670 = vector.broadcast %657 : vector<8x1xf32> to vector<8x32xf32>
    %671 = arith.mulf %670, %656 : vector<8x32xf32>
    %672 = tpu.concatenate %501, %535, %569, %603, %637, %671 in 0 : vector<8x32xf32>, vector<8x32xf32>, vector<8x32xf32>, vector<8x32xf32>, vector<8x32xf32>, vector<8x32xf32> -> vector<48x32xf32>
    %cst_137 = arith.constant dense<0.000000e+00> : vector<48x128xf32>
    %673 = tpu.matmul %672, %8, %cst_137 {dimension_numbers = #tpu.dot_dimension_numbers<[1], [0], [0], [1], [0, 0, 1, 1], [], []>} : vector<48x32xf32>, vector<32x128xf32>, vector<48x128xf32> -> vector<48x128xf32>
    %674 = vector.broadcast %9 : vector<1x128xf32> to vector<48x128xf32>
    %675 = arith.addf %673, %674 : vector<48x128xf32>
    %c48 = arith.constant 48 : index
    %c0_138 = arith.constant 0 : index
    %676 = vector.load %arg24[%c48, %c0_138] : memref<144x128xf32, #tpu.memory_space<vmem>>, vector<48x128xf32>
    tpu.vector_store %arg24[%c48, %c0_138], %675 {strides = array<i32>} : memref<144x128xf32, #tpu.memory_space<vmem>>, vector<48x128xf32>,
    %cst_139 = arith.constant 1.000000e+00 : f32
    %677 = vector.broadcast %cst_139 : f32 to vector<8x1xf32>
    %678 = arith.subf %677, %389 : vector<8x1xf32>
    %679 = vector.broadcast %389 : vector<8x1xf32> to vector<8x32xf32>
    %680 = arith.mulf %679, %664 : vector<8x32xf32>
    %681 = vector.broadcast %678 : vector<8x1xf32> to vector<8x32xf32>
    %682 = arith.mulf %681, %322 : vector<8x32xf32>
    %683 = arith.addf %680, %682 : vector<8x32xf32>
    %684 = vector.broadcast %389 : vector<8x1xf32> to vector<8x32xf32>
    %685 = arith.mulf %684, %669 : vector<8x32xf32>
    %686 = vector.broadcast %678 : vector<8x1xf32> to vector<8x32xf32>
    %687 = arith.mulf %686, %327 : vector<8x32xf32>
    %688 = arith.addf %685, %687 : vector<8x32xf32>
    %c1_140 = arith.constant 1 : index
    %c0_141 = arith.constant 0 : index
    %c0_142 = arith.constant 0 : index
    %689 = vector.load %arg1[%c1_140, %c0_141, %c0_142] : memref<3x8x32xf32, #tpu.memory_space<vmem>>, vector<1x8x32xf32>
    %690 = vector.shape_cast %689 : vector<1x8x32xf32> to vector<8x32xf32>
    %691 = vector.shape_cast %690 : vector<8x32xf32> to vector<8x1x32xf32>
    %692 = vector.broadcast %691 : vector<8x1x32xf32> to vector<8x8x32xf32>
    %693 = arith.mulf %692, %1 : vector<8x8x32xf32>
    %694 = vector.shape_cast %693 : vector<8x8x32xf32> to vector<64x32xf32>
    %cst_143 = arith.constant dense<0.000000e+00> : vector<64x32xf32>
    %695 = tpu.matmul %694, %10, %cst_143 {dimension_numbers = #tpu.dot_dimension_numbers<[1], [0], [0], [1], [0, 0, 1, 1], [], []>} : vector<64x32xf32>, vector<32x32xf32>, vector<64x32xf32> -> vector<64x32xf32>
    %696 = vector.broadcast %11 : vector<1x32xf32> to vector<64x32xf32>
    %697 = arith.addf %695, %696 : vector<64x32xf32>
    %698 = vector.shape_cast %697 : vector<64x32xf32> to vector<8x8x32xf32>
    %c1_144 = arith.constant 1 : index
    %c0_145 = arith.constant 0 : index
    %c0_146 = arith.constant 0 : index
    %699 = vector.load %arg2[%c1_144, %c0_145, %c0_146] : memref<3x8x8xf32, #tpu.memory_space<vmem>>, vector<1x8x8xf32>
    %700 = vector.shape_cast %699 : vector<1x8x8xf32> to vector<8x8xf32>
    %cst_147 = arith.constant dense<0.000000e+00> : vector<8x32xf32>
    %701 = tpu.matmul %700, %12, %cst_147 {dimension_numbers = #tpu.dot_dimension_numbers<[1], [0], [0], [1], [0, 0, 1, 1], [], []>} : vector<8x8xf32>, vector<8x32xf32>, vector<8x32xf32> -> vector<8x32xf32>
    %702 = vector.broadcast %13 : vector<1x32xf32> to vector<8x32xf32>
    %703 = arith.addf %701, %702 : vector<8x32xf32>
    %704 = vector.shape_cast %375 : vector<8x8xf32> to vector<8x8x1xf32>
    %705 = vector.broadcast %704 : vector<8x8x1xf32> to vector<8x8x32xf32>
    %706 = arith.mulf %698, %705 : vector<8x8x32xf32>
    %707 = vector.shape_cast %703 : vector<8x32xf32> to vector<8x1x32xf32>
    %708 = vector.broadcast %707 : vector<8x1x32xf32> to vector<8x8x32xf32>
    %709 = arith.addf %706, %708 : vector<8x8x32xf32>
    %710 = vector.shape_cast %709 : vector<8x8x32xf32> to vector<64x32xf32>
    %cst_148 = arith.constant dense<0.000000e+00> : vector<64x16xf32>
    %711 = tpu.matmul %710, %14, %cst_148 {dimension_numbers = #tpu.dot_dimension_numbers<[1], [0], [0], [1], [0, 0, 1, 1], [], []>} : vector<64x32xf32>, vector<32x16xf32>, vector<64x16xf32> -> vector<64x16xf32>
    %712 = vector.broadcast %15 : vector<1x16xf32> to vector<64x16xf32>
    %713 = arith.addf %711, %712 : vector<64x16xf32>
    %cst_149 = arith.constant 0.000000e+00 : f32
    %714 = vector.broadcast %cst_149 : f32 to vector<64x16xf32>
    %715 = arith.maximumf %713, %714 : vector<64x16xf32>
    %716 = vector.shape_cast %715 : vector<64x16xf32> to vector<8x8x16xf32>
    %717 = vector.shape_cast %16 : vector<1x16xf32> to vector<1x1x16xf32>
    %718 = vector.broadcast %717 : vector<1x1x16xf32> to vector<8x8x16xf32>
    %719 = arith.mulf %716, %718 : vector<8x8x16xf32>
    %cst_150 = arith.constant dense<0.000000e+00> : vector<8x8xf32>
    %720 = vector.multi_reduction <add>, %719, %cst_150 [2] : vector<8x8x16xf32> to vector<8x8xf32>
    %721 = vector.broadcast %17 : vector<1x1xf32> to vector<8x8xf32>
    %722 = arith.addf %720, %721 : vector<8x8xf32>
    %cst_151 = arith.constant dense<0xFF800000> : vector<8xf32>
    %723 = vector.multi_reduction <maximumf>, %722, %cst_151 [1] : vector<8x8xf32> to vector<8xf32>
    %724 = vector.shape_cast %723 : vector<8xf32> to vector<8x1xf32>
    %725 = vector.broadcast %724 : vector<8x1xf32> to vector<8x8xf32>
    %726 = arith.subf %722, %725 : vector<8x8xf32>
    %727 = math.exp %726 : vector<8x8xf32>
    %cst_152 = arith.constant dense<0.000000e+00> : vector<8xf32>
    %728 = vector.multi_reduction <add>, %727, %cst_152 [1] : vector<8x8xf32> to vector<8xf32>
    %729 = vector.shape_cast %728 : vector<8xf32> to vector<8x1xf32>
    %730 = vector.broadcast %729 : vector<8x1xf32> to vector<8x8xf32>
    %731 = arith.divf %727, %730 : vector<8x8xf32>
    %cst_153 = arith.constant 5.000000e-01 : f32
    %732 = vector.broadcast %cst_153 : f32 to vector<8x8xf32>
    %733 = arith.mulf %732, %375 : vector<8x8xf32>
    %cst_154 = arith.constant 5.000000e-01 : f32
    %734 = vector.broadcast %cst_154 : f32 to vector<8x8xf32>
    %735 = arith.mulf %734, %731 : vector<8x8xf32>
    %736 = arith.addf %733, %735 : vector<8x8xf32>
    %737 = vector.broadcast %390 : vector<8x1xf32> to vector<8x8xf32>
    %738 = arith.mulf %737, %722 : vector<8x8xf32>
    %cst_155 = arith.constant 1.000000e+00 : f32
    %739 = vector.broadcast %cst_155 : f32 to vector<8x1xf32>
    %740 = arith.subf %739, %390 : vector<8x1xf32>
    %741 = vector.broadcast %740 : vector<8x1xf32> to vector<8x8xf32>
    %742 = arith.mulf %741, %382 : vector<8x8xf32>
    %743 = arith.addf %738, %742 : vector<8x8xf32>
    %c1_156 = arith.constant 1 : index
    %c0_157 = arith.constant 0 : index
    %c0_158 = arith.constant 0 : index
    %744 = vector.load %arg25[%c1_156, %c0_157, %c0_158] : memref<2x8x8xf32, #tpu.memory_space<vmem>>, vector<1x8x8xf32>
    %745 = vector.shape_cast %744 : vector<1x8x8xf32> to vector<8x8xf32>
    %746 = vector.shape_cast %736 : vector<8x8xf32> to vector<1x8x8xf32>
    tpu.vector_store %arg25[%c1_156, %c0_157, %c0_158], %746 {strides = array<i32>} : memref<2x8x8xf32, #tpu.memory_space<vmem>>, vector<1x8x8xf32>,
    %c2 = arith.constant 2 : index
    %c0_159 = arith.constant 0 : index
    %c0_160 = arith.constant 0 : index
    %747 = vector.load %arg3[%c2, %c0_159, %c0_160] : memref<3x8x8xf32, #tpu.memory_space<vmem>>, vector<1x8x8xf32>
    %748 = vector.shape_cast %747 : vector<1x8x8xf32> to vector<8x8xf32>
    %749 = vector.extract_strided_slice %748 {offsets = [0, 0], sizes = [8, 6], strides = [1, 1]} : vector<8x8xf32> to vector<8x6xf32>
    %750 = vector.shape_cast %736 : vector<8x8xf32> to vector<8x8x1xf32>
    %751 = vector.broadcast %750 : vector<8x8x1xf32> to vector<8x8x16xf32>
    %752 = arith.mulf %0, %751 : vector<8x8x16xf32>
    %753 = arith.mulf %752, %752 : vector<8x8x16xf32>
    %754 = vector.extract_strided_slice %2 {offsets = [0, 0, 0], sizes = [1, 8, 16], strides = [1, 1, 1]} : vector<2x8x16xf32> to vector<1x8x16xf32>
    %755 = vector.shape_cast %754 : vector<1x8x16xf32> to vector<8x16xf32>
    %756 = vector.extract_strided_slice %3 {offsets = [0, 0], sizes = [1, 16], strides = [1, 1]} : vector<2x16xf32> to vector<1x16xf32>
    %757 = vector.shape_cast %755 : vector<8x16xf32> to vector<1x8x16xf32>
    %758 = vector.broadcast %757 : vector<1x8x16xf32> to vector<8x8x16xf32>
    %759 = arith.mulf %752, %758 : vector<8x8x16xf32>
    %cst_161 = arith.constant dense<0.000000e+00> : vector<8x16xf32>
    %760 = vector.multi_reduction <add>, %759, %cst_161 [1] : vector<8x8x16xf32> to vector<8x16xf32>
    %761 = vector.shape_cast %756 : vector<1x16xf32> to vector<1x1x16xf32>
    %762 = vector.broadcast %761 : vector<1x1x16xf32> to vector<8x8x16xf32>
    %763 = arith.mulf %753, %762 : vector<8x8x16xf32>
    %cst_162 = arith.constant dense<0.000000e+00> : vector<8x8xf32>
    %764 = vector.multi_reduction <add>, %763, %cst_162 [2] : vector<8x8x16xf32> to vector<8x8xf32>
    %765 = vector.shape_cast %760 : vector<8x16xf32> to vector<8x1x16xf32>
    %766 = vector.broadcast %765 : vector<8x1x16xf32> to vector<8x8x16xf32>
    %767 = arith.mulf %752, %766 : vector<8x8x16xf32>
    %cst_163 = arith.constant dense<0.000000e+00> : vector<8x8xf32>
    %768 = vector.multi_reduction <add>, %767, %cst_163 [2] : vector<8x8x16xf32> to vector<8x8xf32>
    %769 = arith.subf %764, %768 : vector<8x8xf32>
    %770 = vector.extract_strided_slice %4 {offsets = [0, 0], sizes = [1, 1], strides = [1, 1]} : vector<2x1xf32> to vector<1x1xf32>
    %771 = vector.broadcast %770 : vector<1x1xf32> to vector<8x8xf32>
    %772 = arith.addf %769, %771 : vector<8x8xf32>
    %cst_164 = arith.constant dense<0xFF800000> : vector<8xf32>
    %773 = vector.multi_reduction <maximumf>, %772, %cst_164 [1] : vector<8x8xf32> to vector<8xf32>
    %774 = vector.shape_cast %773 : vector<8xf32> to vector<8x1xf32>
    %775 = vector.broadcast %774 : vector<8x1xf32> to vector<8x8xf32>
    %776 = arith.subf %772, %775 : vector<8x8xf32>
    %777 = math.exp %776 : vector<8x8xf32>
    %cst_165 = arith.constant dense<0.000000e+00> : vector<8xf32>
    %778 = vector.multi_reduction <add>, %777, %cst_165 [1] : vector<8x8xf32> to vector<8xf32>
    %779 = vector.shape_cast %778 : vector<8xf32> to vector<8x1xf32>
    %780 = vector.broadcast %779 : vector<8x1xf32> to vector<8x8xf32>
    %781 = arith.divf %777, %780 : vector<8x8xf32>
    %782 = vector.shape_cast %781 : vector<8x8xf32> to vector<8x8x1xf32>
    %783 = vector.broadcast %782 : vector<8x8x1xf32> to vector<8x8x16xf32>
    %784 = arith.mulf %783, %752 : vector<8x8x16xf32>
    %cst_166 = arith.constant dense<0.000000e+00> : vector<8x16xf32>
    %785 = vector.multi_reduction <add>, %784, %cst_166 [1] : vector<8x8x16xf32> to vector<8x16xf32>
    %786 = vector.extract_strided_slice %2 {offsets = [1, 0, 0], sizes = [1, 8, 16], strides = [1, 1, 1]} : vector<2x8x16xf32> to vector<1x8x16xf32>
    %787 = vector.shape_cast %786 : vector<1x8x16xf32> to vector<8x16xf32>
    %788 = vector.extract_strided_slice %3 {offsets = [1, 0], sizes = [1, 16], strides = [1, 1]} : vector<2x16xf32> to vector<1x16xf32>
    %789 = vector.shape_cast %787 : vector<8x16xf32> to vector<1x8x16xf32>
    %790 = vector.broadcast %789 : vector<1x8x16xf32> to vector<8x8x16xf32>
    %791 = arith.mulf %752, %790 : vector<8x8x16xf32>
    %cst_167 = arith.constant dense<0.000000e+00> : vector<8x16xf32>
    %792 = vector.multi_reduction <add>, %791, %cst_167 [1] : vector<8x8x16xf32> to vector<8x16xf32>
    %793 = vector.shape_cast %788 : vector<1x16xf32> to vector<1x1x16xf32>
    %794 = vector.broadcast %793 : vector<1x1x16xf32> to vector<8x8x16xf32>
    %795 = arith.mulf %753, %794 : vector<8x8x16xf32>
    %cst_168 = arith.constant dense<0.000000e+00> : vector<8x8xf32>
    %796 = vector.multi_reduction <add>, %795, %cst_168 [2] : vector<8x8x16xf32> to vector<8x8xf32>
    %797 = vector.shape_cast %792 : vector<8x16xf32> to vector<8x1x16xf32>
    %798 = vector.broadcast %797 : vector<8x1x16xf32> to vector<8x8x16xf32>
    %799 = arith.mulf %752, %798 : vector<8x8x16xf32>
    %cst_169 = arith.constant dense<0.000000e+00> : vector<8x8xf32>
    %800 = vector.multi_reduction <add>, %799, %cst_169 [2] : vector<8x8x16xf32> to vector<8x8xf32>
    %801 = arith.subf %796, %800 : vector<8x8xf32>
    %802 = vector.extract_strided_slice %4 {offsets = [1, 0], sizes = [1, 1], strides = [1, 1]} : vector<2x1xf32> to vector<1x1xf32>
    %803 = vector.broadcast %802 : vector<1x1xf32> to vector<8x8xf32>
    %804 = arith.addf %801, %803 : vector<8x8xf32>
    %cst_170 = arith.constant dense<0xFF800000> : vector<8xf32>
    %805 = vector.multi_reduction <maximumf>, %804, %cst_170 [1] : vector<8x8xf32> to vector<8xf32>
    %806 = vector.shape_cast %805 : vector<8xf32> to vector<8x1xf32>
    %807 = vector.broadcast %806 : vector<8x1xf32> to vector<8x8xf32>
    %808 = arith.subf %804, %807 : vector<8x8xf32>
    %809 = math.exp %808 : vector<8x8xf32>
    %cst_171 = arith.constant dense<0.000000e+00> : vector<8xf32>
    %810 = vector.multi_reduction <add>, %809, %cst_171 [1] : vector<8x8xf32> to vector<8xf32>
    %811 = vector.shape_cast %810 : vector<8xf32> to vector<8x1xf32>
    %812 = vector.broadcast %811 : vector<8x1xf32> to vector<8x8xf32>
    %813 = arith.divf %809, %812 : vector<8x8xf32>
    %814 = vector.shape_cast %813 : vector<8x8xf32> to vector<8x8x1xf32>
    %815 = vector.broadcast %814 : vector<8x8x1xf32> to vector<8x8x16xf32>
    %816 = arith.mulf %815, %752 : vector<8x8x16xf32>
    %cst_172 = arith.constant dense<0.000000e+00> : vector<8x16xf32>
    %817 = vector.multi_reduction <add>, %816, %cst_172 [1] : vector<8x8x16xf32> to vector<8x16xf32>
    %818 = tpu.concatenate %785, %817 in 1 : vector<8x16xf32>, vector<8x16xf32> -> vector<8x32xf32>
    %cst_173 = arith.constant dense<0.000000e+00> : vector<8x128xf32>
    %819 = tpu.matmul %818, %5, %cst_173 {dimension_numbers = #tpu.dot_dimension_numbers<[1], [0], [0], [1], [0, 0, 1, 1], [], []>} : vector<8x32xf32>, vector<32x128xf32>, vector<8x128xf32> -> vector<8x128xf32>
    %820 = vector.broadcast %6 : vector<1x128xf32> to vector<8x128xf32>
    %821 = arith.addf %819, %820 : vector<8x128xf32>
    %822 = vector.extract_strided_slice %20 {offsets = [96, 0], sizes = [48, 128], strides = [1, 1]} : vector<144x128xf32> to vector<48x128xf32>
    %823 = vector.shape_cast %822 : vector<48x128xf32> to vector<6x8x128xf32>
    %824 = vector.shape_cast %821 : vector<8x128xf32> to vector<1x8x128xf32>
    %825 = vector.broadcast %824 : vector<1x8x128xf32> to vector<6x8x128xf32>
    %826 = arith.addf %823, %825 : vector<6x8x128xf32>
    %827 = vector.extract_strided_slice %826 {offsets = [0, 0, 0], sizes = [1, 8, 128], strides = [1, 1, 1]} : vector<6x8x128xf32> to vector<1x8x128xf32>
    %828 = vector.shape_cast %827 : vector<1x8x128xf32> to vector<8x128xf32>
    %cst_174 = arith.constant dense<0.000000e+00> : vector<8x128xf32>
    %829 = tpu.matmul %683, %7, %cst_174 {dimension_numbers = #tpu.dot_dimension_numbers<[1], [0], [0], [1], [0, 0, 1, 1], [], []>} : vector<8x32xf32>, vector<32x128xf32>, vector<8x128xf32> -> vector<8x128xf32>
    %830 = arith.addf %828, %829 : vector<8x128xf32>
    %831 = arith.negf %830 : vector<8x128xf32>
    %832 = math.exp %831 : vector<8x128xf32>
    %cst_175 = arith.constant 1.000000e+00 : f32
    %833 = vector.broadcast %cst_175 : f32 to vector<8x128xf32>
    %834 = arith.addf %833, %832 : vector<8x128xf32>
    %835 = arith.divf %833, %834 : vector<8x128xf32>
    %836 = math.tanh %830 : vector<8x128xf32>
    %837 = vector.extract_strided_slice %835 {offsets = [0, 0], sizes = [8, 32], strides = [1, 1]} : vector<8x128xf32> to vector<8x32xf32>
    %838 = vector.extract_strided_slice %835 {offsets = [0, 32], sizes = [8, 32], strides = [1, 1]} : vector<8x128xf32> to vector<8x32xf32>
    %839 = vector.extract_strided_slice %836 {offsets = [0, 64], sizes = [8, 32], strides = [1, 1]} : vector<8x128xf32> to vector<8x32xf32>
    %840 = vector.extract_strided_slice %835 {offsets = [0, 96], sizes = [8, 32], strides = [1, 1]} : vector<8x128xf32> to vector<8x32xf32>
    %841 = arith.mulf %838, %688 : vector<8x32xf32>
    %842 = arith.mulf %837, %839 : vector<8x32xf32>
    %843 = arith.addf %841, %842 : vector<8x32xf32>
    %844 = math.tanh %843 : vector<8x32xf32>
    %845 = arith.mulf %840, %844 : vector<8x32xf32>
    %846 = vector.extract_strided_slice %749 {offsets = [0, 0], sizes = [8, 1], strides = [1, 1]} : vector<8x6xf32> to vector<8x1xf32>
    %cst_176 = arith.constant 1.000000e+00 : f32
    %847 = vector.broadcast %cst_176 : f32 to vector<8x1xf32>
    %848 = arith.subf %847, %846 : vector<8x1xf32>
    %849 = vector.broadcast %846 : vector<8x1xf32> to vector<8x32xf32>
    %850 = arith.mulf %849, %845 : vector<8x32xf32>
    %851 = vector.broadcast %848 : vector<8x1xf32> to vector<8x32xf32>
    %852 = arith.mulf %851, %683 : vector<8x32xf32>
    %853 = arith.addf %850, %852 : vector<8x32xf32>
    %854 = vector.broadcast %846 : vector<8x1xf32> to vector<8x32xf32>
    %855 = arith.mulf %854, %843 : vector<8x32xf32>
    %856 = vector.broadcast %848 : vector<8x1xf32> to vector<8x32xf32>
    %857 = arith.mulf %856, %688 : vector<8x32xf32>
    %858 = arith.addf %855, %857 : vector<8x32xf32>
    %859 = vector.broadcast %846 : vector<8x1xf32> to vector<8x32xf32>
    %860 = arith.mulf %859, %845 : vector<8x32xf32>
    %861 = vector.extract_strided_slice %826 {offsets = [1, 0, 0], sizes = [1, 8, 128], strides = [1, 1, 1]} : vector<6x8x128xf32> to vector<1x8x128xf32>
    %862 = vector.shape_cast %861 : vector<1x8x128xf32> to vector<8x128xf32>
    %cst_177 = arith.constant dense<0.000000e+00> : vector<8x128xf32>
    %863 = tpu.matmul %853, %7, %cst_177 {dimension_numbers = #tpu.dot_dimension_numbers<[1], [0], [0], [1], [0, 0, 1, 1], [], []>} : vector<8x32xf32>, vector<32x128xf32>, vector<8x128xf32> -> vector<8x128xf32>
    %864 = arith.addf %862, %863 : vector<8x128xf32>
    %865 = arith.negf %864 : vector<8x128xf32>
    %866 = math.exp %865 : vector<8x128xf32>
    %cst_178 = arith.constant 1.000000e+00 : f32
    %867 = vector.broadcast %cst_178 : f32 to vector<8x128xf32>
    %868 = arith.addf %867, %866 : vector<8x128xf32>
    %869 = arith.divf %867, %868 : vector<8x128xf32>
    %870 = math.tanh %864 : vector<8x128xf32>
    %871 = vector.extract_strided_slice %869 {offsets = [0, 0], sizes = [8, 32], strides = [1, 1]} : vector<8x128xf32> to vector<8x32xf32>
    %872 = vector.extract_strided_slice %869 {offsets = [0, 32], sizes = [8, 32], strides = [1, 1]} : vector<8x128xf32> to vector<8x32xf32>
    %873 = vector.extract_strided_slice %870 {offsets = [0, 64], sizes = [8, 32], strides = [1, 1]} : vector<8x128xf32> to vector<8x32xf32>
    %874 = vector.extract_strided_slice %869 {offsets = [0, 96], sizes = [8, 32], strides = [1, 1]} : vector<8x128xf32> to vector<8x32xf32>
    %875 = arith.mulf %872, %858 : vector<8x32xf32>
    %876 = arith.mulf %871, %873 : vector<8x32xf32>
    %877 = arith.addf %875, %876 : vector<8x32xf32>
    %878 = math.tanh %877 : vector<8x32xf32>
    %879 = arith.mulf %874, %878 : vector<8x32xf32>
    %880 = vector.extract_strided_slice %749 {offsets = [0, 1], sizes = [8, 1], strides = [1, 1]} : vector<8x6xf32> to vector<8x1xf32>
    %cst_179 = arith.constant 1.000000e+00 : f32
    %881 = vector.broadcast %cst_179 : f32 to vector<8x1xf32>
    %882 = arith.subf %881, %880 : vector<8x1xf32>
    %883 = vector.broadcast %880 : vector<8x1xf32> to vector<8x32xf32>
    %884 = arith.mulf %883, %879 : vector<8x32xf32>
    %885 = vector.broadcast %882 : vector<8x1xf32> to vector<8x32xf32>
    %886 = arith.mulf %885, %853 : vector<8x32xf32>
    %887 = arith.addf %884, %886 : vector<8x32xf32>
    %888 = vector.broadcast %880 : vector<8x1xf32> to vector<8x32xf32>
    %889 = arith.mulf %888, %877 : vector<8x32xf32>
    %890 = vector.broadcast %882 : vector<8x1xf32> to vector<8x32xf32>
    %891 = arith.mulf %890, %858 : vector<8x32xf32>
    %892 = arith.addf %889, %891 : vector<8x32xf32>
    %893 = vector.broadcast %880 : vector<8x1xf32> to vector<8x32xf32>
    %894 = arith.mulf %893, %879 : vector<8x32xf32>
    %895 = vector.extract_strided_slice %826 {offsets = [2, 0, 0], sizes = [1, 8, 128], strides = [1, 1, 1]} : vector<6x8x128xf32> to vector<1x8x128xf32>
    %896 = vector.shape_cast %895 : vector<1x8x128xf32> to vector<8x128xf32>
    %cst_180 = arith.constant dense<0.000000e+00> : vector<8x128xf32>
    %897 = tpu.matmul %887, %7, %cst_180 {dimension_numbers = #tpu.dot_dimension_numbers<[1], [0], [0], [1], [0, 0, 1, 1], [], []>} : vector<8x32xf32>, vector<32x128xf32>, vector<8x128xf32> -> vector<8x128xf32>
    %898 = arith.addf %896, %897 : vector<8x128xf32>
    %899 = arith.negf %898 : vector<8x128xf32>
    %900 = math.exp %899 : vector<8x128xf32>
    %cst_181 = arith.constant 1.000000e+00 : f32
    %901 = vector.broadcast %cst_181 : f32 to vector<8x128xf32>
    %902 = arith.addf %901, %900 : vector<8x128xf32>
    %903 = arith.divf %901, %902 : vector<8x128xf32>
    %904 = math.tanh %898 : vector<8x128xf32>
    %905 = vector.extract_strided_slice %903 {offsets = [0, 0], sizes = [8, 32], strides = [1, 1]} : vector<8x128xf32> to vector<8x32xf32>
    %906 = vector.extract_strided_slice %903 {offsets = [0, 32], sizes = [8, 32], strides = [1, 1]} : vector<8x128xf32> to vector<8x32xf32>
    %907 = vector.extract_strided_slice %904 {offsets = [0, 64], sizes = [8, 32], strides = [1, 1]} : vector<8x128xf32> to vector<8x32xf32>
    %908 = vector.extract_strided_slice %903 {offsets = [0, 96], sizes = [8, 32], strides = [1, 1]} : vector<8x128xf32> to vector<8x32xf32>
    %909 = arith.mulf %906, %892 : vector<8x32xf32>
    %910 = arith.mulf %905, %907 : vector<8x32xf32>
    %911 = arith.addf %909, %910 : vector<8x32xf32>
    %912 = math.tanh %911 : vector<8x32xf32>
    %913 = arith.mulf %908, %912 : vector<8x32xf32>
    %914 = vector.extract_strided_slice %749 {offsets = [0, 2], sizes = [8, 1], strides = [1, 1]} : vector<8x6xf32> to vector<8x1xf32>
    %cst_182 = arith.constant 1.000000e+00 : f32
    %915 = vector.broadcast %cst_182 : f32 to vector<8x1xf32>
    %916 = arith.subf %915, %914 : vector<8x1xf32>
    %917 = vector.broadcast %914 : vector<8x1xf32> to vector<8x32xf32>
    %918 = arith.mulf %917, %913 : vector<8x32xf32>
    %919 = vector.broadcast %916 : vector<8x1xf32> to vector<8x32xf32>
    %920 = arith.mulf %919, %887 : vector<8x32xf32>
    %921 = arith.addf %918, %920 : vector<8x32xf32>
    %922 = vector.broadcast %914 : vector<8x1xf32> to vector<8x32xf32>
    %923 = arith.mulf %922, %911 : vector<8x32xf32>
    %924 = vector.broadcast %916 : vector<8x1xf32> to vector<8x32xf32>
    %925 = arith.mulf %924, %892 : vector<8x32xf32>
    %926 = arith.addf %923, %925 : vector<8x32xf32>
    %927 = vector.broadcast %914 : vector<8x1xf32> to vector<8x32xf32>
    %928 = arith.mulf %927, %913 : vector<8x32xf32>
    %929 = vector.extract_strided_slice %826 {offsets = [3, 0, 0], sizes = [1, 8, 128], strides = [1, 1, 1]} : vector<6x8x128xf32> to vector<1x8x128xf32>
    %930 = vector.shape_cast %929 : vector<1x8x128xf32> to vector<8x128xf32>
    %cst_183 = arith.constant dense<0.000000e+00> : vector<8x128xf32>
    %931 = tpu.matmul %921, %7, %cst_183 {dimension_numbers = #tpu.dot_dimension_numbers<[1], [0], [0], [1], [0, 0, 1, 1], [], []>} : vector<8x32xf32>, vector<32x128xf32>, vector<8x128xf32> -> vector<8x128xf32>
    %932 = arith.addf %930, %931 : vector<8x128xf32>
    %933 = arith.negf %932 : vector<8x128xf32>
    %934 = math.exp %933 : vector<8x128xf32>
    %cst_184 = arith.constant 1.000000e+00 : f32
    %935 = vector.broadcast %cst_184 : f32 to vector<8x128xf32>
    %936 = arith.addf %935, %934 : vector<8x128xf32>
    %937 = arith.divf %935, %936 : vector<8x128xf32>
    %938 = math.tanh %932 : vector<8x128xf32>
    %939 = vector.extract_strided_slice %937 {offsets = [0, 0], sizes = [8, 32], strides = [1, 1]} : vector<8x128xf32> to vector<8x32xf32>
    %940 = vector.extract_strided_slice %937 {offsets = [0, 32], sizes = [8, 32], strides = [1, 1]} : vector<8x128xf32> to vector<8x32xf32>
    %941 = vector.extract_strided_slice %938 {offsets = [0, 64], sizes = [8, 32], strides = [1, 1]} : vector<8x128xf32> to vector<8x32xf32>
    %942 = vector.extract_strided_slice %937 {offsets = [0, 96], sizes = [8, 32], strides = [1, 1]} : vector<8x128xf32> to vector<8x32xf32>
    %943 = arith.mulf %940, %926 : vector<8x32xf32>
    %944 = arith.mulf %939, %941 : vector<8x32xf32>
    %945 = arith.addf %943, %944 : vector<8x32xf32>
    %946 = math.tanh %945 : vector<8x32xf32>
    %947 = arith.mulf %942, %946 : vector<8x32xf32>
    %948 = vector.extract_strided_slice %749 {offsets = [0, 3], sizes = [8, 1], strides = [1, 1]} : vector<8x6xf32> to vector<8x1xf32>
    %cst_185 = arith.constant 1.000000e+00 : f32
    %949 = vector.broadcast %cst_185 : f32 to vector<8x1xf32>
    %950 = arith.subf %949, %948 : vector<8x1xf32>
    %951 = vector.broadcast %948 : vector<8x1xf32> to vector<8x32xf32>
    %952 = arith.mulf %951, %947 : vector<8x32xf32>
    %953 = vector.broadcast %950 : vector<8x1xf32> to vector<8x32xf32>
    %954 = arith.mulf %953, %921 : vector<8x32xf32>
    %955 = arith.addf %952, %954 : vector<8x32xf32>
    %956 = vector.broadcast %948 : vector<8x1xf32> to vector<8x32xf32>
    %957 = arith.mulf %956, %945 : vector<8x32xf32>
    %958 = vector.broadcast %950 : vector<8x1xf32> to vector<8x32xf32>
    %959 = arith.mulf %958, %926 : vector<8x32xf32>
    %960 = arith.addf %957, %959 : vector<8x32xf32>
    %961 = vector.broadcast %948 : vector<8x1xf32> to vector<8x32xf32>
    %962 = arith.mulf %961, %947 : vector<8x32xf32>
    %963 = vector.extract_strided_slice %826 {offsets = [4, 0, 0], sizes = [1, 8, 128], strides = [1, 1, 1]} : vector<6x8x128xf32> to vector<1x8x128xf32>
    %964 = vector.shape_cast %963 : vector<1x8x128xf32> to vector<8x128xf32>
    %cst_186 = arith.constant dense<0.000000e+00> : vector<8x128xf32>
    %965 = tpu.matmul %955, %7, %cst_186 {dimension_numbers = #tpu.dot_dimension_numbers<[1], [0], [0], [1], [0, 0, 1, 1], [], []>} : vector<8x32xf32>, vector<32x128xf32>, vector<8x128xf32> -> vector<8x128xf32>
    %966 = arith.addf %964, %965 : vector<8x128xf32>
    %967 = arith.negf %966 : vector<8x128xf32>
    %968 = math.exp %967 : vector<8x128xf32>
    %cst_187 = arith.constant 1.000000e+00 : f32
    %969 = vector.broadcast %cst_187 : f32 to vector<8x128xf32>
    %970 = arith.addf %969, %968 : vector<8x128xf32>
    %971 = arith.divf %969, %970 : vector<8x128xf32>
    %972 = math.tanh %966 : vector<8x128xf32>
    %973 = vector.extract_strided_slice %971 {offsets = [0, 0], sizes = [8, 32], strides = [1, 1]} : vector<8x128xf32> to vector<8x32xf32>
    %974 = vector.extract_strided_slice %971 {offsets = [0, 32], sizes = [8, 32], strides = [1, 1]} : vector<8x128xf32> to vector<8x32xf32>
    %975 = vector.extract_strided_slice %972 {offsets = [0, 64], sizes = [8, 32], strides = [1, 1]} : vector<8x128xf32> to vector<8x32xf32>
    %976 = vector.extract_strided_slice %971 {offsets = [0, 96], sizes = [8, 32], strides = [1, 1]} : vector<8x128xf32> to vector<8x32xf32>
    %977 = arith.mulf %974, %960 : vector<8x32xf32>
    %978 = arith.mulf %973, %975 : vector<8x32xf32>
    %979 = arith.addf %977, %978 : vector<8x32xf32>
    %980 = math.tanh %979 : vector<8x32xf32>
    %981 = arith.mulf %976, %980 : vector<8x32xf32>
    %982 = vector.extract_strided_slice %749 {offsets = [0, 4], sizes = [8, 1], strides = [1, 1]} : vector<8x6xf32> to vector<8x1xf32>
    %cst_188 = arith.constant 1.000000e+00 : f32
    %983 = vector.broadcast %cst_188 : f32 to vector<8x1xf32>
    %984 = arith.subf %983, %982 : vector<8x1xf32>
    %985 = vector.broadcast %982 : vector<8x1xf32> to vector<8x32xf32>
    %986 = arith.mulf %985, %981 : vector<8x32xf32>
    %987 = vector.broadcast %984 : vector<8x1xf32> to vector<8x32xf32>
    %988 = arith.mulf %987, %955 : vector<8x32xf32>
    %989 = arith.addf %986, %988 : vector<8x32xf32>
    %990 = vector.broadcast %982 : vector<8x1xf32> to vector<8x32xf32>
    %991 = arith.mulf %990, %979 : vector<8x32xf32>
    %992 = vector.broadcast %984 : vector<8x1xf32> to vector<8x32xf32>
    %993 = arith.mulf %992, %960 : vector<8x32xf32>
    %994 = arith.addf %991, %993 : vector<8x32xf32>
    %995 = vector.broadcast %982 : vector<8x1xf32> to vector<8x32xf32>
    %996 = arith.mulf %995, %981 : vector<8x32xf32>
    %997 = vector.extract_strided_slice %826 {offsets = [5, 0, 0], sizes = [1, 8, 128], strides = [1, 1, 1]} : vector<6x8x128xf32> to vector<1x8x128xf32>
    %998 = vector.shape_cast %997 : vector<1x8x128xf32> to vector<8x128xf32>
    %cst_189 = arith.constant dense<0.000000e+00> : vector<8x128xf32>
    %999 = tpu.matmul %989, %7, %cst_189 {dimension_numbers = #tpu.dot_dimension_numbers<[1], [0], [0], [1], [0, 0, 1, 1], [], []>} : vector<8x32xf32>, vector<32x128xf32>, vector<8x128xf32> -> vector<8x128xf32>
    %1000 = arith.addf %998, %999 : vector<8x128xf32>
    %1001 = arith.negf %1000 : vector<8x128xf32>
    %1002 = math.exp %1001 : vector<8x128xf32>
    %cst_190 = arith.constant 1.000000e+00 : f32
    %1003 = vector.broadcast %cst_190 : f32 to vector<8x128xf32>
    %1004 = arith.addf %1003, %1002 : vector<8x128xf32>
    %1005 = arith.divf %1003, %1004 : vector<8x128xf32>
    %1006 = math.tanh %1000 : vector<8x128xf32>
    %1007 = vector.extract_strided_slice %1005 {offsets = [0, 0], sizes = [8, 32], strides = [1, 1]} : vector<8x128xf32> to vector<8x32xf32>
    %1008 = vector.extract_strided_slice %1005 {offsets = [0, 32], sizes = [8, 32], strides = [1, 1]} : vector<8x128xf32> to vector<8x32xf32>
    %1009 = vector.extract_strided_slice %1006 {offsets = [0, 64], sizes = [8, 32], strides = [1, 1]} : vector<8x128xf32> to vector<8x32xf32>
    %1010 = vector.extract_strided_slice %1005 {offsets = [0, 96], sizes = [8, 32], strides = [1, 1]} : vector<8x128xf32> to vector<8x32xf32>
    %1011 = arith.mulf %1008, %994 : vector<8x32xf32>
    %1012 = arith.mulf %1007, %1009 : vector<8x32xf32>
    %1013 = arith.addf %1011, %1012 : vector<8x32xf32>
    %1014 = math.tanh %1013 : vector<8x32xf32>
    %1015 = arith.mulf %1010, %1014 : vector<8x32xf32>
    %1016 = vector.extract_strided_slice %749 {offsets = [0, 5], sizes = [8, 1], strides = [1, 1]} : vector<8x6xf32> to vector<8x1xf32>
    %1017 = vector.broadcast %1016 : vector<8x1xf32> to vector<8x32xf32>
    %1018 = arith.mulf %1017, %1015 : vector<8x32xf32>
    %1019 = tpu.concatenate %860, %894, %928, %962, %996, %1018 in 0 : vector<8x32xf32>, vector<8x32xf32>, vector<8x32xf32>, vector<8x32xf32>, vector<8x32xf32>, vector<8x32xf32> -> vector<48x32xf32>
    %cst_191 = arith.constant dense<0.000000e+00> : vector<48x128xf32>
    %1020 = tpu.matmul %1019, %8, %cst_191 {dimension_numbers = #tpu.dot_dimension_numbers<[1], [0], [0], [1], [0, 0, 1, 1], [], []>} : vector<48x32xf32>, vector<32x128xf32>, vector<48x128xf32> -> vector<48x128xf32>
    %1021 = vector.broadcast %9 : vector<1x128xf32> to vector<48x128xf32>
    %1022 = arith.addf %1020, %1021 : vector<48x128xf32>
    %c96 = arith.constant 96 : index
    %c0_192 = arith.constant 0 : index
    %1023 = vector.load %arg24[%c96, %c0_192] : memref<144x128xf32, #tpu.memory_space<vmem>>, vector<48x128xf32>
    tpu.vector_store %arg24[%c96, %c0_192], %1022 {strides = array<i32>} : memref<144x128xf32, #tpu.memory_space<vmem>>, vector<48x128xf32>,
    %c0_193 = arith.constant 0 : index
    %c0_194 = arith.constant 0 : index
    %1024 = vector.load %arg26[%c0_193, %c0_194] : memref<8x8xf32, #tpu.memory_space<vmem>>, vector<8x8xf32>
    tpu.vector_store %arg26[%c0_193, %c0_194], %743 {strides = array<i32>} : memref<8x8xf32, #tpu.memory_space<vmem>>, vector<8x8xf32>,
    return
  }
}

</mosaic_0001>

<bundles_post_ra>
// kernel: qgen_forward.1
= control target key start
LH: loop header
LB: loop body
LE: loop exit
PB: predicated region body
PF: predicated region fallthrough
CT: control target
= control target key end

     0   :  { %v362_v0 = vlaneseq  ;;  %vm150_vm0 = vcmask 130048   ;;  %vm628_vm1 = vcmask 1041409   ;;  %vm630_vm2 = vcmask 1042434   ;;  %s12884_s6 = inlined_call_operand.vmem [shape: f32[8,8], index: 6, kind: input, shape index: {}]   ;;  %s12885_s9 = inlined_call_operand.vmem [shape: f32[2,1], index: 9, kind: input, shape index: {}]   ;;  %s12886_s4 = inlined_call_operand.vmem [shape: f32[8,8,16], index: 4, kind: input, shape index: {}]   ;;  %s12887_s8 = inlined_call_operand.vmem [shape: f32[2,16], index: 8, kind: input, shape index: {}]   ;;  %s12888_s7 = inlined_call_operand.vmem [shape: f32[2,8,16], index: 7, kind: input, shape index: {}]   ;;  %s12889_s10 = inlined_call_operand.vmem [shape: f32[16,128], index: 10, kind: input, shape index: {}]   ;;  %s12890_s0 = inlined_call_operand.vmem [shape: f32[144,16], index: 0, kind: input, shape index: {}]   ;;  %s12891_s11 = inlined_call_operand.vmem [shape: f32[32,128], index: 11, kind: input, shape index: {}]   ;;  %s12892_s13 = inlined_call_operand.vmem [shape: f32[32,128], index: 13, kind: input, shape index: {}]   ;;  %s12893_s12 = inlined_call_operand.vmem [shape: f32[1,128], index: 12, kind: input, shape index: {}]   ;;  %s12894_s3 = inlined_call_operand.vmem [shape: f32[3,8,8], index: 3, kind: input, shape index: {}]   ;;  %s12895_s16 = inlined_call_operand.vmem [shape: f32[32,32], index: 16, kind: input, shape index: {}]   ;;  %s12896_s1 = inlined_call_operand.vmem [shape: f32[3,8,32], index: 1, kind: input, shape index: {}]   ;;  %s12897_s5 = inlined_call_operand.vmem [shape: f32[8,8,32], index: 5, kind: input, shape index: {}]   ;;  %s12898_s14 = inlined_call_operand.vmem [shape: f32[32,128], index: 14, kind: input, shape index: {}]   ;;  %s12899_s18 = inlined_call_operand.vmem [shape: f32[8,32], index: 18, kind: input, shape index: {}]   ;;  %s12900_s2 = inlined_call_operand.vmem [shape: f32[3,8,8], index: 2, kind: input, shape index: {}]   ;;  %s12901_s15 = inlined_call_operand.vmem [shape: f32[1,128], index: 15, kind: input, shape index: {}]   ;;  %s12902_s24 = inlined_call_operand.vmem [shape: f32[144,128], index: 24, kind: output, shape index: {0}]   ;;  %s12903_s20 = inlined_call_operand.vmem [shape: f32[32,16], index: 20, kind: input, shape index: {}]   ;;  %s12904_s17 = inlined_call_operand.vmem [shape: f32[1,32], index: 17, kind: input, shape index: {}]   ;;  %s12905_s19 = inlined_call_operand.vmem [shape: f32[1,32], index: 19, kind: input, shape index: {}]   ;;  %s12906_s23 = inlined_call_operand.<no memory space> [shape: f32[1,1], index: 23, kind: input, shape index: {}]   ;;  %s12907_s21 = inlined_call_operand.vmem [shape: f32[1,16], index: 21, kind: input, shape index: {}]   ;;  %s12908_s22 = inlined_call_operand.vmem [shape: f32[1,16], index: 22, kind: input, shape index: {}]   ;;  %s12909_s25 = inlined_call_operand.vmem [shape: f32[2,8,8], index: 25, kind: output, shape index: {1}]   ;;  %s12910_s26 = inlined_call_operand.vmem [shape: f32[8,8], index: 26, kind: output, shape index: {2}]  }
   0x1   :  { %12986 = sst [smem:[#allocation40_spill]] %s12884_s6  ;;  %vm632_vm3 = vcmask 1043459   ;;  %vm634_vm4 = vcmask 1044484   ;;  %vm636_vm5 = vcmask 1045509   ;;  %vm638_vm6 = vcmask 1046534  }
   0x2   :  { %12987 = sst [smem:[#allocation41_spill]] %s12885_s9  ;;  %v9889_v1 = vshrl.u32 %v362_v0, 7  ;;  %v595_v2 = vand.u32 127, %v362_v0  ;;  %vm640_vm7 = vcmask 1047559   ;;  %vm643_vm8 = vcmask 64512  }
   0x3   :  { %12988 = sst [smem:[#allocation42_spill]] %s12886_s4  ;;  %vm9741_vm9 = vmmov 0   ;;  %vm1493_vm10 = vcmask 261120   ;;  %s13012_s4 = smov 32  }
   0x4   :  { %12989 = sst [smem:[#allocation43_spill]] %s12887_s8  ;;  %v9895_v4 = vsub.s32 0, %v9889_v1  ;;  %v9898_v5 = vsub.s32 2, %v9889_v1  ;;  %v9901_v6 = vsub.s32 %v595_v2, %v9889_v1  ;;  %v9904_v7 = vsub.s32 3, %v9889_v1  ;;  %s9744_s8 = smov 64  }
   0x5   :  { %12990 = sst [smem:[#allocation44_spill]] %s12888_s7  ;;  %v9907_v8 = vsub.s32 1, %v9889_v1  ;;  %v9914_v13 = vsub.s32 5, %v9889_v1  ;;  %v9917_v14 = vsub.s32 4, %v9889_v1  ;;  %v9922_v17 = vsub.s32 6, %v9889_v1  ;;  %s12998_s7 = sld [smem:[#allocation41_spill]] }
   0x6   :  { %12991 = sst [smem:[#allocation45_spill]] %s12889_s10  ;;  %v9925_v18 = vsub.s32 7, %v9889_v1  ;;  %s13001_s9 = sld [smem:[#allocation44_spill]] }
   0x7   :  { %12992 = sst [smem:[#allocation46_spill]] %s12890_s0  ;;  %s13000_s0 = sld [smem:[#allocation43_spill]] }
   0x8   :  { %12993 = sst [smem:[#allocation47_spill]] %s12891_s11  ;;  %s12997_s11 = sld [smem:[#allocation40_spill]] }
   0x9   :  { %12994 = sst [smem:[#allocation48_spill]] %s12892_s13  ;;  %s13003_s27 = sld [smem:[#allocation46_spill]] }
   0xa   :  { %12995 = sst [smem:[#allocation49_spill]] %s12893_s12  ;;  %s12999_s12 = sld [smem:[#allocation42_spill]] }
   0xb   :  { %12996 = sst [smem:[#allocation50_spill]] %s12894_s3  ;;  %v101_v21 = vld [vmem:[%s12998_s7] sm:$0x3]  ;;  %s13002_s3 = sld [smem:[#allocation45_spill]] }
   0xc   :  { %9231 = vpush %v101_v21  ;;  %v1088_v22 = vrot.slane %v101_v21, 1  ;;  %v9950_v28 = vld [vmem:[%s13001_s9 + $0x8] sm:$0xff]  ;;  %s13007_s6 = sld [smem:[#allocation48_spill]] }
   0xd   :  { %v9941_v25 = vld [vmem:[%s13000_s0] sm:$0x3]  ;;  %s13009_s0 = sld [smem:[#allocation49_spill]] }
   0xe   :  { %v360_v3 = vld [vmem:[%s12997_s11] sm:$0xff]  ;;  %9233 = vpush %v1088_v22  ;;  %v9960_v31 = vrot.slane %v9941_v25, %v9907_v8 }
   0xf   :  { %v379_v9 = vrot.slane %v360_v3, %v9898_v5  ;;  %v365_v10 = vrot.slane %v360_v3, %v9895_v4  ;;  %v386_v11 = vrot.slane %v360_v3, %v9904_v7  ;;  %v372_v12 = vrot.slane %v360_v3, %v9907_v8 }
  0x10   :  { %v400_v15 = vrot.slane %v360_v3, %v9914_v13  ;;  %v393_v16 = vrot.slane %v360_v3, %v9917_v14  ;;  %v407_v19 = vrot.slane %v360_v3, %v9922_v17  ;;  %v414_v20 = vrot.slane %v360_v3, %v9925_v18  ;;  %v84_v23 = vld [vmem:[%s12999_s12 + $0x10] sm:$0xff]  ;;  %v82_v24 = vld [vmem:[%s12999_s12] sm:$0xff]  ;;  %v85_v32 = vld [vmem:[%s12999_s12 + $0x18] sm:$0xff] }
  0x11   :  { %381 = vbcast.lane.b32.xlu1 %v379_v9, 256  ;;  %367 = vbcast.lane.b32.xlu0 %v365_v10, 256  ;;  %v83_v33 = vld [vmem:[%s12999_s12 + $0x8] sm:$0xff]  ;;  %v86_v43 = vld [vmem:[%s12999_s12 + $0x20] sm:$0xff] }
  0x12   :  { %v87_v58 = vld [vmem:[%s12999_s12 + $0x28] sm:$0xff] }
  0x15   :  { %388 = vbcast.lane.b32.xlu1 %v386_v11, 256  ;;  %374 = vbcast.lane.b32.xlu0 %v372_v12, 256 }
  0x19   :  { %402 = vbcast.lane.b32.xlu1 %v400_v15, 256  ;;  %395 = vbcast.lane.b32.xlu0 %v393_v16, 256 }
  0x1d   :  { %409 = vbcast.lane.b32.xlu0 %v407_v19, 256  ;;  %416 = vbcast.lane.b32.xlu1 %v414_v20, 256  ;;  %v88_v20 = vld [vmem:[%s12999_s12 + $0x30] sm:$0xff] }
  0x3d   :  { %s10179_s7 = spop %9231 }
  0x3f   :  { %s9234_s29 = spop %9233 }
  0x83   :  { %v9943_v26 = vpop.permute.xlu1 %381  ;;  %v9945_v27 = vpop.permute.xlu0 %367 }
  0x84   :  { %v9953_v29 = vmul.f32 %v9943_v26, %v84_v23  ;;  %v9956_v30 = vmul.f32 %v9945_v27, %v82_v24 }
  0x86   :  { %v9970_v34 = vmul.f32 %v9956_v30, %v9956_v30  ;;  %v948_v35 = vmul.f32 %v9956_v30, %v9950_v28  ;;  %v950_v36 = vmul.f32 %v9953_v29, %v9950_v28  ;;  %v9990_v42 = vmul.f32 %v9953_v29, %v9953_v29 }
  0x87   :  { %v9976_v37 = vpop.permute.xlu1 %388  ;;  %v9978_v38 = vpop.permute.xlu0 %374 }
  0x88   :  { %v9981_v39 = vmul.f32 %v9976_v37, %v85_v32  ;;  %v9984_v40 = vmul.f32 %v9978_v38, %v83_v33  ;;  %v1016_v41 = vmul.f32 %v9960_v31, %v9970_v34  ;;  %v956_v44 = vsel %vm150_vm0, %v948_v35, 0.0  ;;  %v89_v32 = vld [vmem:[%s12999_s12 + $0x38] sm:$0xff] }
  0x89   :  { %v970_v45 = vsel %vm150_vm0, %v950_v36, 0.0  ;;  %v957_v49 = vrot.slane %v956_v44, 4  ;;  %v1018_v56 = vmul.f32 %v9960_v31, %v9990_v42 }
  0x8a   :  { %v1024_v46 = vsel %vm150_vm0, %v1016_v41, 0.0  ;;  %v10000_v47 = vmul.f32 %v9984_v40, %v9984_v40  ;;  %v949_v50 = vmul.f32 %v9984_v40, %v9950_v28  ;;  %v971_v51 = vrot.slane %v970_v45, 4 }
  0x8b   :  { %v10002_v48 = vpop.permute.xlu0 %395  ;;  %1025 = vadd.xlane.f32.xlu0 %v1024_v46  ;;  %v951_v52 = vmul.f32 %v9981_v39, %v9950_v28  ;;  %v10008_v53 = vpop.permute.xlu1 %402  ;;  %v10019_v57 = vmul.f32 %v9981_v39, %v9981_v39  ;;  %v958_v59 = vadd.f32 %v957_v49, %v956_v44  ;;  %v1030_v12 = vsel %vm150_vm0, %v1018_v56, 0.0 }
  0x8c   :  { %v10011_v54 = vmul.f32 %v10002_v48, %v86_v43  ;;  %v1017_v55 = vmul.f32 %v9960_v31, %v10000_v47  ;;  %v963_v60 = vsel %vm150_vm0, %v949_v50, 0.0  ;;  %v972_v61 = vadd.f32 %v971_v51, %v970_v45 }
  0x8d   :  { %v977_v62 = vsel %vm150_vm0, %v951_v52, 0.0  ;;  %v964_v0 = vrot.slane %v963_v60, 4  ;;  %v959_v2 = vrot.slane %v958_v59, 2  ;;  %v10032_v11 = vmul.f32 %v10008_v53, %v87_v58 }
  0x8e   :  { %v1027_v63 = vsel %vm150_vm0, %v1017_v55, 0.0  ;;  %v10029_v3 = vmul.f32 %v10011_v54, %v10011_v54  ;;  %v973_v9 = vrot.slane %v972_v61, 2  ;;  %v978_v10 = vrot.slane %v977_v62, 4 }
  0x8f   :  { %1028 = vadd.xlane.f32.xlu1 %v1027_v63  ;;  %v1019_v15 = vmul.f32 %v9960_v31, %v10019_v57  ;;  %v965_v16 = vadd.f32 %v964_v0, %v963_v60  ;;  %v10037_v19 = vpop.permute.xlu0 %409  ;;  %v960_v21 = vadd.f32 %v959_v2, %v958_v59  ;;  %v10042_v24 = vpop.permute.xlu1 %416  ;;  %v10049_v35 = vmul.f32 %v10032_v11, %v10032_v11 }
  0x90   :  { %v974_v22 = vadd.f32 %v973_v9, %v972_v61  ;;  %v979_v23 = vadd.f32 %v978_v10, %v977_v62  ;;  %v1020_v41 = vmul.f32 %v9960_v31, %v10029_v3  ;;  %v10054_v45 = vmul.f32 %v10037_v19, %v88_v20  ;;  %v10072_v61 = vld [vmem:[%s13001_s9] sm:$0xff] }
  0x91   :  { %v966_v33 = vrot.slane %v965_v16, 2  ;;  %v961_v36 = vrot.slane %v960_v21, 1  ;;  %v1033_v46 = vsel %vm150_vm0, %v1019_v15, 0.0  ;;  %v952_v50 = vmul.f32 %v10011_v54, %v9950_v28 }
  0x92   :  { %v975_v43 = vrot.slane %v974_v22, 1  ;;  %v980_v44 = vrot.slane %v979_v23, 2  ;;  %v10060_v51 = vmul.f32 %v10042_v24, %v89_v32  ;;  %v1021_v58 = vmul.f32 %v9960_v31, %v10049_v35 }
  0x93   :  { %1031 = vadd.xlane.f32.xlu1 %v1030_v12  ;;  %v967_v49 = vadd.f32 %v966_v33, %v965_v16  ;;  %v962_v52 = vadd.f32 %v961_v36, %v960_v21  ;;  %v10066_v59 = vmul.f32 %v10054_v45, %v10054_v45  ;;  %v984_v60 = vsel %vm150_vm0, %v952_v50, 0.0 }
  0x94   :  { %v981_v55 = vadd.f32 %v980_v44, %v979_v23  ;;  %v1036_v63 = vsel %vm150_vm0, %v1020_v41, 0.0  ;;  %v976_v0 = vadd.f32 %v975_v43, %v974_v22  ;;  %v985_v2 = vrot.slane %v984_v60, 4 }
  0x95   :  { %v968_v56 = vrot.slane %v967_v49, 1  ;;  %v1048_v62 = vmul.f32 %v962_v52, %v9956_v30  ;;  %v953_v12 = vmul.f32 %v10032_v11, %v9950_v28  ;;  %v954_v15 = vmul.f32 %v10054_v45, %v9950_v28 }
  0x96   :  { %v982_v10 = vrot.slane %v981_v55, 1  ;;  %v10083_v20 = vmul.f32 %v10060_v51, %v10060_v51  ;;  %v986_v21 = vadd.f32 %v985_v2, %v984_v60  ;;  %v434_v23 = vmul.f32 %v9956_v30, %v10072_v61 }
  0x97   :  { %1034 = vadd.xlane.f32.xlu1 %v1033_v46  ;;  %v969_v9 = vadd.f32 %v968_v56, %v967_v49  ;;  %v1056_v16 = vsel %vm150_vm0, %v1048_v62, 0.0  ;;  %v1022_v32 = vmul.f32 %v9960_v31, %v10066_v59  ;;  %v991_v33 = vsel %vm150_vm0, %v953_v12, 0.0 }
  0x98   :  { %1057 = vadd.xlane.f32.xlu0 %v1056_v16  ;;  %v998_v36 = vsel %vm150_vm0, %v954_v15, 0.0  ;;  %v1039_v41 = vsel %vm150_vm0, %v1021_v58, 0.0  ;;  %v987_v43 = vrot.slane %v986_v21, 2  ;;  %v992_v44 = vrot.slane %v991_v33, 4 }
  0x99   :  { %v1049_v22 = vmul.f32 %v969_v9, %v9984_v40  ;;  %v999_v46 = vrot.slane %v998_v36, 4  ;;  %v1050_v50 = vmul.f32 %v976_v0, %v9953_v29  ;;  %v983_v52 = vadd.f32 %v982_v10, %v981_v55 }
  0x9a   :  { %v955_v56 = vmul.f32 %v10060_v51, %v9950_v28  ;;  %v988_v60 = vadd.f32 %v987_v43, %v986_v21  ;;  %v993_v62 = vadd.f32 %v992_v44, %v991_v33  ;;  %v1042_v9 = vsel %vm150_vm0, %v1022_v32, 0.0 }
  0x9b   :  { %1037 = vadd.xlane.f32.xlu1 %v1036_v63  ;;  %v1059_v49 = vsel %vm150_vm0, %v1049_v22, 0.0  ;;  %v1000_v2 = vadd.f32 %v999_v46, %v998_v36  ;;  %v1023_v58 = vmul.f32 %v9960_v31, %v10083_v20  ;;  %v436_v12 = vmul.f32 %v9953_v29, %v10072_v61 }
  0x9c   :  { %1060 = vadd.xlane.f32.xlu0 %v1059_v49  ;;  %v1005_v63 = vsel %vm150_vm0, %v955_v56, 0.0  ;;  %v989_v0 = vrot.slane %v988_v60, 1  ;;  %v994_v55 = vrot.slane %v993_v62, 2  ;;  %v1062_v28 = vsel %vm150_vm0, %v1050_v50, 0.0 }
  0x9d   :  { %v1001_v10 = vrot.slane %v1000_v2, 2  ;;  %v1006_v15 = vrot.slane %v1005_v63, 4  ;;  %v1051_v16 = vmul.f32 %v983_v52, %v9981_v39  ;;  %v435_v21 = vmul.f32 %v9984_v40, %v10072_v61 }
  0x9e   :  { %v442_v22 = vsel %vm150_vm0, %v434_v23, 0.0  ;;  %v990_v32 = vadd.f32 %v989_v0, %v988_v60  ;;  %v995_v33 = vadd.f32 %v994_v55, %v993_v62  ;;  %v456_v49 = vsel %vm150_vm0, %v436_v12, 0.0 }
  0x9f   :  { %1040 = vadd.xlane.f32.xlu1 %v1039_v41  ;;  %v1002_v36 = vadd.f32 %v1001_v10, %v1000_v2  ;;  %v1007_v43 = vadd.f32 %v1006_v15, %v1005_v63  ;;  %v10110_v41 = vrot.slane %v9941_v25, %v9895_v4  ;;  %v449_v44 = vsel %vm150_vm0, %v435_v21, 0.0 }
  0xa0   :  { %1063 = vadd.xlane.f32.xlu0 %v1062_v28  ;;  %v443_v46 = vrot.slane %v442_v22, 4  ;;  %v996_v50 = vrot.slane %v995_v33, 1  ;;  %v1045_v56 = vsel %vm150_vm0, %v1023_v58, 0.0  ;;  %v1052_v23 = vmul.f32 %v990_v32, %v10011_v54 }
  0xa1   :  { %v1008_v52 = vrot.slane %v1007_v43, 2  ;;  %v450_v60 = vrot.slane %v449_v44, 4  ;;  %v457_v62 = vrot.slane %v456_v49, 4  ;;  %v1065_v2 = vsel %vm150_vm0, %v1051_v16, 0.0 }
  0xa2   :  { %v997_v63 = vadd.f32 %v996_v50, %v995_v33  ;;  %v1003_v0 = vrot.slane %v1002_v36, 1  ;;  %v502_v55 = vmul.f32 %v10110_v41, %v9970_v34  ;;  %v444_v12 = vadd.f32 %v443_v46, %v442_v22 }
  0xa3   :  { %1043 = vadd.xlane.f32.xlu1 %v1042_v9  ;;  %v1009_v25 = vadd.f32 %v1008_v52, %v1007_v43  ;;  %v451_v10 = vadd.f32 %v450_v60, %v449_v44  ;;  %v437_v9 = vmul.f32 %v9981_v39, %v10072_v61  ;;  %v504_v58 = vmul.f32 %v10110_v41, %v9990_v42 }
  0xa4   :  { %1066 = vadd.xlane.f32.xlu0 %v1065_v2  ;;  %v1068_v15 = vsel %vm150_vm0, %v1052_v23, 0.0  ;;  %v458_v16 = vadd.f32 %v457_v62, %v456_v49  ;;  %v1053_v32 = vmul.f32 %v997_v63, %v10032_v11  ;;  %v1004_v33 = vadd.f32 %v1003_v0, %v1002_v36 }
  0xa5   :  { %v452_v28 = vrot.slane %v451_v10, 2  ;;  %v463_v21 = vsel %vm150_vm0, %v437_v9, 0.0  ;;  %v1010_v43 = vrot.slane %v1009_v25, 1  ;;  %v510_v22 = vsel %vm150_vm0, %v502_v55, 0.0 }
  0xa6   :  { %v464_v34 = vrot.slane %v463_v21, 4  ;;  %v445_v44 = vrot.slane %v444_v12, 2  ;;  %v516_v46 = vsel %vm150_vm0, %v504_v58, 0.0  ;;  %v438_v42 = vmul.f32 %v10011_v54, %v10072_v61 }
  0xa7   :  { %1046 = vadd.xlane.f32.xlu1 %v1045_v56  ;;  %v439_v49 = vmul.f32 %v10032_v11, %v10072_v61  ;;  %v505_v50 = vmul.f32 %v10110_v41, %v10019_v57  ;;  %v453_v52 = vadd.f32 %v452_v28, %v451_v10  ;;  %v459_v36 = vrot.slane %v458_v16, 2 }
  0xa8   :  { %1069 = vadd.xlane.f32.xlu0 %v1068_v15  ;;  %v465_v56 = vadd.f32 %v464_v34, %v463_v21  ;;  %v1071_v23 = vsel %vm150_vm0, %v1053_v32, 0.0  ;;  %v1054_v60 = vmul.f32 %v1004_v33, %v10054_v45  ;;  %v1011_v62 = vadd.f32 %v1010_v43, %v1009_v25 }
  0xa9   :  { %v470_v2 = vsel %vm150_vm0, %v438_v42, 0.0  ;;  %v446_v63 = vadd.f32 %v445_v44, %v444_v12  ;;  %v477_v55 = vsel %vm150_vm0, %v439_v49, 0.0  ;;  %v440_v9 = vmul.f32 %v10054_v45, %v10072_v61 }
  0xaa   :  { %v471_v0 = vrot.slane %v470_v2, 4  ;;  %v519_v57 = vsel %vm150_vm0, %v505_v50, 0.0  ;;  %v454_v10 = vrot.slane %v453_v52, 1  ;;  %v460_v58 = vadd.f32 %v459_v36, %v458_v16 }
  0xab   :  { %511 = vadd.xlane.f32.xlu1 %v510_v22  ;;  %v466_v15 = vrot.slane %v465_v56, 2  ;;  %v1074_v28 = vsel %vm150_vm0, %v1054_v60, 0.0  ;;  %v1055_v25 = vmul.f32 %v1011_v62, %v10060_v51  ;;  %v478_v32 = vrot.slane %v477_v55, 4 }
  0xac   :  { %1072 = vadd.xlane.f32.xlu0 %v1071_v23  ;;  %v472_v21 = vadd.f32 %v471_v0, %v470_v2  ;;  %v506_v12 = vmul.f32 %v10110_v41, %v10029_v3  ;;  %v447_v33 = vrot.slane %v446_v63, 1  ;;  %v484_v43 = vsel %vm150_vm0, %v440_v9, 0.0 }
  0xad   :  { %v441_v34 = vmul.f32 %v10060_v51, %v10072_v61  ;;  %v503_v16 = vmul.f32 %v10110_v41, %v10000_v47  ;;  %v455_v22 = vadd.f32 %v454_v10, %v453_v52  ;;  %v461_v44 = vrot.slane %v460_v58, 1 }
  0xae   :  { %v1077_v42 = vsel %vm150_vm0, %v1055_v25, 0.0  ;;  %v473_v49 = vrot.slane %v472_v21, 2  ;;  %v479_v50 = vadd.f32 %v478_v32, %v477_v55  ;;  %v485_v36 = vrot.slane %v484_v43, 4 }
  0xaf   :  { %517 = vadd.xlane.f32.xlu1 %v516_v46  ;;  %v467_v46 = vadd.f32 %v466_v15, %v465_v56  ;;  %v522_v3 = vsel %vm150_vm0, %v506_v12, 0.0  ;;  %v507_v23 = vmul.f32 %v10110_v41, %v10049_v35  ;;  %v448_v60 = vadd.f32 %v447_v33, %v446_v63 }
  0xb0   :  { %1075 = vadd.xlane.f32.xlu0 %v1074_v28  ;;  %v491_v61 = vsel %vm150_vm0, %v441_v34, 0.0  ;;  %v513_v47 = vsel %vm150_vm0, %v503_v16, 0.0  ;;  %v535_v52 = vmul.f32 %v455_v22, %v9984_v40  ;;  %v462_v56 = vadd.f32 %v461_v44, %v460_v58 }
  0xb1   :  { %v468_v62 = vrot.slane %v467_v46, 1  ;;  %v474_v2 = vadd.f32 %v473_v49, %v472_v21  ;;  %v480_v0 = vrot.slane %v479_v50, 2  ;;  %v486_v55 = vadd.f32 %v485_v36, %v484_v43 }
  0xb2   :  { %v492_v9 = vrot.slane %v491_v61, 4  ;;  %v534_v10 = vmul.f32 %v448_v60, %v9956_v30  ;;  %v545_v35 = vsel %vm150_vm0, %v535_v52, 0.0  ;;  %v536_v63 = vmul.f32 %v462_v56, %v9953_v29 }
  0xb3   :  { %520 = vadd.xlane.f32.xlu1 %v519_v57  ;;  %v525_v57 = vsel %vm150_vm0, %v507_v23, 0.0  ;;  %v469_v15 = vadd.f32 %v468_v62, %v467_v46  ;;  %v475_v28 = vrot.slane %v474_v2, 1  ;;  %v481_v25 = vadd.f32 %v480_v0, %v479_v50 }
  0xb4   :  { %1078 = vadd.xlane.f32.xlu0 %v1077_v42  ;;  %v487_v32 = vrot.slane %v486_v55, 2  ;;  %v493_v58 = vadd.f32 %v492_v9, %v491_v61  ;;  %v542_v21 = vsel %vm150_vm0, %v534_v10, 0.0  ;;  %v508_v12 = vmul.f32 %v10110_v41, %v10066_v59 }
  0xb5   :  { %v548_v33 = vsel %vm150_vm0, %v536_v63, 0.0  ;;  %v537_v43 = vmul.f32 %v469_v15, %v9981_v39  ;;  %v476_v34 = vadd.f32 %v475_v28, %v474_v2  ;;  %v482_v16 = vrot.slane %v481_v25, 1 }
  0xb6   :  { %v488_v22 = vadd.f32 %v487_v32, %v486_v55  ;;  %v494_v44 = vrot.slane %v493_v58, 2  ;;  %v528_v46 = vsel %vm150_vm0, %v508_v12, 0.0  ;;  %v509_v42 = vmul.f32 %v10110_v41, %v10083_v20 }
  0xb7   :  { %523 = vadd.xlane.f32.xlu1 %v522_v3  ;;  %v551_v49 = vsel %vm150_vm0, %v537_v43, 0.0  ;;  %v538_v59 = vmul.f32 %v476_v34, %v10011_v54  ;;  %v483_v50 = vadd.f32 %v482_v16, %v481_v25 }
  0xb8   :  { %514 = vadd.xlane.f32.xlu0 %v513_v47  ;;  %v489_v36 = vrot.slane %v488_v22, 1  ;;  %v495_v3 = vadd.f32 %v494_v44, %v493_v58  ;;  %v531_v23 = vsel %vm150_vm0, %v509_v42, 0.0 }
  0xb9   :  { %v554_v60 = vsel %vm150_vm0, %v538_v59, 0.0  ;;  %v539_v61 = vmul.f32 %v483_v50, %v10032_v11 }
  0xba   :  { %v490_v47 = vadd.f32 %v489_v36, %v488_v22  ;;  %v496_v52 = vrot.slane %v495_v3, 1 }
  0xbb   :  { %526 = vadd.xlane.f32.xlu1 %v525_v57  ;;  %v557_v20 = vsel %vm150_vm0, %v539_v61, 0.0 }
  0xbc   :  { %546 = vadd.xlane.f32.xlu0 %v545_v35  ;;  %v540_v56 = vmul.f32 %v490_v47, %v10054_v45  ;;  %v497_v62 = vadd.f32 %v496_v52, %v495_v3 }
  0xbe   :  { %v560_v2 = vsel %vm150_vm0, %v540_v56, 0.0  ;;  %v541_v0 = vmul.f32 %v497_v62, %v10060_v51 }
  0xbf   :  { %543 = vadd.xlane.f32.xlu1 %v542_v21 }
  0xc0   :  { %549 = vadd.xlane.f32.xlu0 %v548_v33  ;;  %v563_v55 = vsel %vm150_vm0, %v541_v0, 0.0 }
  0xc3   :  { %529 = vadd.xlane.f32.xlu1 %v528_v46  ;;  %v10181_v46 = vstv %s9234_s29  ;;  %s12924_s29 = smov 32  }
  0xc4   :  { %552 = vadd.xlane.f32.xlu0 %v551_v49 }
  0xc7   :  { %532 = vadd.xlane.f32.xlu1 %v531_v23 }
  0xc8   :  { %555 = vadd.xlane.f32.xlu0 %v554_v60 }
  0xcc   :  { %558 = vadd.xlane.f32.xlu0 %v557_v20 }
  0xd0   :  { %561 = vadd.xlane.f32.xlu0 %v560_v2 }
  0xd4   :  { %564 = vadd.xlane.f32.xlu0 %v563_v55 }
 0x118   :  { %v1026_v10 = vpop.xlane.xlu0 %1025 }
 0x11c   :  { %v1029_v9 = vpop.xlane.xlu1 %1028 }
 0x120   :  { %v1032_v57 = vpop.xlane.xlu1 %1031 }
 0x124   :  { %v1035_v35 = vpop.xlane.xlu1 %1034 }
 0x125   :  { %v1058_v63 = vpop.xlane.xlu0 %1057 }
 0x126   :  { %v1080_v22 = vsub.f32 %v1026_v10, %v1058_v63 }
 0x128   :  { %v1038_v15 = vpop.xlane.xlu1 %1037  ;;  %v10190_v23 = vadd.f32 %v10181_v46, %v1080_v22 }
 0x129   :  { %v1061_v28 = vpop.xlane.xlu0 %1060 }
 0x12a   :  { %v1081_v43 = vsub.f32 %v1029_v9, %v1061_v28  ;;  %v1111_v0 = vrot.slane %v10190_v23, %v9901_v6 }
 0x12c   :  { %v1041_v25 = vpop.xlane.xlu1 %1040  ;;  %v10184_v59 = vadd.f32 %v10181_v46, %v1081_v43 }
 0x12d   :  { %v1064_v32 = vpop.xlane.xlu0 %1063 }
 0x12e   :  { %v1082_v16 = vsub.f32 %v1032_v57, %v1064_v32  ;;  %v1115_v52 = vrot.slane %v10184_v59, %v9901_v6 }
 0x130   :  { %v1044_v58 = vpop.xlane.xlu1 %1043  ;;  %v10187_v3 = vadd.f32 %v10181_v46, %v1082_v16 }
 0x131   :  { %v1067_v21 = vpop.xlane.xlu0 %1066 }
 0x132   :  { %v1083_v44 = vsub.f32 %v1035_v35, %v1067_v21  ;;  %v1119_v62 = vrot.slane %v10187_v3, %v9901_v6  ;;  %v1140_v35 = vsel %vm628_vm1, %v1115_v52, %v1111_v0 }
 0x134   :  { %v1047_v12 = vpop.xlane.xlu1 %1046  ;;  %v10193_v60 = vadd.f32 %v10181_v46, %v1083_v44  ;;  %v1141_v28 = vsel %vm630_vm2, %v1119_v62, %v1140_v35 }
 0x135   :  { %v1070_v33 = vpop.xlane.xlu0 %1069 }
 0x136   :  { %v1084_v42 = vsub.f32 %v1038_v15, %v1070_v33  ;;  %v1123_v55 = vrot.slane %v10193_v60, %v9901_v6 }
 0x138   :  { %v512_v34 = vpop.xlane.xlu1 %511  ;;  %v10196_v61 = vadd.f32 %v10181_v46, %v1084_v42  ;;  %v1142_v32 = vsel %vm632_vm3, %v1123_v55, %v1141_v28 }
 0x139   :  { %v1073_v49 = vpop.xlane.xlu0 %1072 }
 0x13a   :  { %v1085_v50 = vsub.f32 %v1041_v25, %v1073_v49  ;;  %v1127_v57 = vrot.slane %v10196_v61, %v9901_v6 }
 0x13c   :  { %v518_v36 = vpop.xlane.xlu1 %517  ;;  %v10201_v20 = vadd.f32 %v10181_v46, %v1085_v50  ;;  %v1143_v43 = vsel %vm634_vm4, %v1127_v57, %v1142_v32  ;;  %v10232_v57 = vstv %s10179_s7  ;;  %s13004_s7 = sld [smem:[#allocation47_spill]] }
 0x13d   :  { %v1076_v47 = vpop.xlane.xlu0 %1075 }
 0x13e   :  { %v1086_v56 = vsub.f32 %v1044_v58, %v1076_v47  ;;  %v1131_v63 = vrot.slane %v10201_v20, %v9901_v6 }
 0x140   :  { %v521_v2 = vpop.xlane.xlu1 %520  ;;  %v10210_v9 = vadd.f32 %v10181_v46, %v1086_v56  ;;  %v1144_v16 = vsel %vm636_vm5, %v1131_v63, %v1143_v43  ;;  %v12920_v43 = vmov 0  }
 0x141   :  { %v1079_v10 = vpop.xlane.xlu0 %1078  ;;  %9251 = vset.pattern.permute.xlu0 %v12920_v43  ;;  %9250 = vset.pattern.permute.xlu1 %v12920_v43 }
 0x142   :  { %v1087_v15 = vsub.f32 %v1047_v12, %v1079_v10  ;;  %v1135_v25 = vrot.slane %v10210_v9, %v9901_v6 }
 0x144   :  { %v10222_v58 = vadd.f32 %v10181_v46, %v1087_v15  ;;  %v524_v21 = vpop.xlane.xlu1 %523  ;;  %v1145_v22 = vsel %vm638_vm6, %v1135_v25, %v1144_v16 }
 0x145   :  { %v515_v33 = vpop.xlane.xlu0 %514 }
 0x146   :  { %v1139_v12 = vrot.slane %v10222_v58, %v9901_v6 }
 0x148   :  { %v1146_v44 = vsel %vm640_vm7, %v1139_v12, %v1145_v22  ;;  %v527_v50 = vpop.xlane.xlu1 %526 }
 0x149   :  { %v547_v42 = vpop.xlane.xlu0 %546  ;;  %v1148_v49 = vsel %vm643_vm8, %v1146_v44, -inf }
 0x14a   :  { %1149 = vmax.xlane.f32.xlu1 %v1148_v49  ;;  %v567_v55 = vsub.f32 %v515_v33, %v547_v42 }
 0x14c   :  { %v544_v52 = vpop.xlane.xlu1 %543  ;;  %v10238_v25 = vadd.f32 %v10232_v57, %v567_v55 }
 0x14d   :  { %v550_v47 = vpop.xlane.xlu0 %549  ;;  %v566_v62 = vsub.f32 %v512_v34, %v544_v52 }
 0x14e   :  { %v568_v10 = vsub.f32 %v518_v36, %v550_v47  ;;  %v603_v16 = vrot.slane %v10238_v25, %v9901_v6 }
 0x14f   :  { %v10235_v35 = vadd.f32 %v10232_v57, %v566_v62 }
 0x150   :  { %v10243_v34 = vadd.f32 %v10232_v57, %v568_v10  ;;  %v530_v33 = vpop.xlane.xlu1 %529 }
 0x151   :  { %v553_v56 = vpop.xlane.xlu0 %552  ;;  %v599_v36 = vrot.slane %v10235_v35, %v9901_v6 }
 0x152   :  { %v569_v63 = vsub.f32 %v521_v2, %v553_v56  ;;  %v607_v42 = vrot.slane %v10243_v34, %v9901_v6 }
 0x153   :  { %v629_v49 = vsel %vm628_vm1, %v603_v16, %v599_v36 }
 0x154   :  { %v10248_v2 = vadd.f32 %v10232_v57, %v569_v63  ;;  %v533_v52 = vpop.xlane.xlu1 %532  ;;  %v631_v10 = vsel %vm630_vm2, %v607_v42, %v629_v49 }
 0x155   :  { %v556_v0 = vpop.xlane.xlu0 %555 }
 0x156   :  { %v570_v15 = vsub.f32 %v524_v21, %v556_v0 }
 0x158   :  { %v10251_v21 = vadd.f32 %v10232_v57, %v570_v15 }
 0x159   :  { %v559_v28 = vpop.xlane.xlu0 %558 }
 0x15a   :  { %v571_v32 = vsub.f32 %v527_v50, %v559_v28  ;;  %v611_v50 = vrot.slane %v10248_v2, %v9901_v6  ;;  %v615_v56 = vrot.slane %v10251_v21, %v9901_v6 }
 0x15c   :  { %v10256_v22 = vadd.f32 %v10232_v57, %v571_v32  ;;  %v633_v15 = vsel %vm632_vm3, %v611_v50, %v631_v10 }
 0x15d   :  { %v562_v12 = vpop.xlane.xlu0 %561  ;;  %v635_v32 = vsel %vm634_vm4, %v615_v56, %v633_v15 }
 0x15e   :  { %v572_v44 = vsub.f32 %v530_v33, %v562_v12  ;;  %v619_v0 = vrot.slane %v10256_v22, %v9901_v6 }
 0x160   :  { %v10264_v47 = vadd.f32 %v10232_v57, %v572_v44  ;;  %v637_v36 = vsel %vm636_vm5, %v619_v0, %v635_v32 }
 0x161   :  { %v565_v62 = vpop.xlane.xlu0 %564 }
 0x162   :  { %v573_v55 = vsub.f32 %v533_v52, %v565_v62  ;;  %v623_v63 = vrot.slane %v10264_v47, %v9901_v6 }
 0x164   :  { %v10275_v28 = vadd.f32 %v10232_v57, %v573_v55  ;;  %v639_v12 = vsel %vm638_vm6, %v623_v63, %v637_v36 }
 0x166   :  { %v627_v33 = vrot.slane %v10275_v28, %v9901_v6 }
 0x168   :  { %v641_v16 = vsel %vm640_vm7, %v627_v33, %v639_v12 }
 0x169   :  { %v644_v44 = vsel %vm643_vm8, %v641_v16, -inf }
 0x16a   :  { %645 = vmax.xlane.f32.xlu0 %v644_v44 }
 0x1d7   :  { %v1150_v42 = vpop.xlane.xlu1 %1149 }
 0x1d8   :  { %v1155_v49 = vrot.slane %v1150_v42, %v9895_v4  ;;  %v1159_v50 = vrot.slane %v1150_v42, %v9907_v8  ;;  %v1163_v52 = vrot.slane %v1150_v42, %v9898_v5  ;;  %v1167_v0 = vrot.slane %v1150_v42, %v9904_v7 }
 0x1d9   :  { %v1171_v15 = vrot.slane %v1150_v42, %v9917_v14  ;;  %v1175_v36 = vrot.slane %v1150_v42, %v9914_v13 }
 0x1da   :  { %v1193_v56 = vsub.f32 %v10184_v59, %v1159_v50  ;;  %v1192_v62 = vsub.f32 %v10190_v23, %v1155_v49  ;;  %v1194_v55 = vsub.f32 %v10187_v3, %v1163_v52  ;;  %v1195_v33 = vsub.f32 %v10193_v60, %v1167_v0 }
 0x1db   :  { %v1196_v59 = vsub.f32 %v10196_v61, %v1171_v15  ;;  %v1179_v23 = vrot.slane %v1150_v42, %v9922_v17  ;;  %v1197_v3 = vsub.f32 %v10201_v20, %v1175_v36  ;;  %v1183_v60 = vrot.slane %v1150_v42, %v9925_v18 }
 0x1dc   :  { %v1202_v10 = vmul.f32 1.442695, %v1193_v56  ;;  %v1200_v63 = vmul.f32 1.442695, %v1192_v62  ;;  %v1204_v32 = vmul.f32 1.442695, %v1194_v55 }
 0x1dd   :  { %v1206_v12 = vmul.f32 1.442695, %v1195_v33  ;;  %v1208_v16 = vmul.f32 1.442695, %v1196_v59  ;;  %v1210_v50 = vmul.f32 1.442695, %v1197_v3  ;;  %v1198_v61 = vsub.f32 %v10210_v9, %v1179_v23 }
 0x1de   :  { %9298 = vpow2.f32 %v1202_v10  ;;  %v1199_v56 = vsub.f32 %v10222_v58, %v1183_v60 }
 0x1df   :  { %9300 = vpow2.f32 %v1200_v63  ;;  %v1212_v20 = vmul.f32 1.442695, %v1198_v61 }
 0x1e0   :  { %9302 = vpow2.f32 %v1204_v32  ;;  %v1214_v0 = vmul.f32 1.442695, %v1199_v56 }
 0x1e1   :  { %9304 = vpow2.f32 %v1206_v12 }
 0x1e2   :  { %9306 = vpow2.f32 %v1208_v16 }
 0x1e3   :  { %9308 = vpow2.f32 %v1210_v50 }
 0x1e4   :  { %9310 = vpow2.f32 %v1212_v20 }
 0x1e5   :  { %9312 = vpow2.f32 %v1214_v0 }
 0x1e8   :  { %v10297_v44 = vpop.eup %9298 }
 0x1e9   :  { %v10299_v49 = vpop.eup %9300  ;;  %1228 = vperm.xlu0 %9251, %v10297_v44  }
 0x1ea   :  { %1225 = vperm.xlu1 %9250, %v10299_v49   ;;  %v10305_v52 = vpop.eup %9302 }
 0x1eb   :  { %v10309_v62 = vpop.eup %9304 }
 0x1ec   :  { %v10312_v55 = vpop.eup %9306 }
 0x1ed   :  { %v10318_v15 = vpop.eup %9308 }
 0x1ee   :  { %1231 = vperm.xlu1 %9250, %v10305_v52   ;;  %v10328_v60 = vpop.eup %9310 }
 0x1ef   :  { %v10334_v56 = vpop.eup %9312 }
 0x1f2   :  { %1234 = vperm.xlu1 %9250, %v10309_v62  }
 0x1f6   :  { %1237 = vperm.xlu1 %9250, %v10312_v55  }
 0x1f7   :  { %v646_v42 = vpop.xlane.xlu0 %645 }
 0x1f8   :  { %v651_v9 = vrot.slane %v646_v42, %v9895_v4  ;;  %v655_v10 = vrot.slane %v646_v42, %v9907_v8  ;;  %v659_v63 = vrot.slane %v646_v42, %v9898_v5  ;;  %v667_v58 = vrot.slane %v646_v42, %v9917_v14 }
 0x1f9   :  { %v675_v32 = vrot.slane %v646_v42, %v9922_v17  ;;  %v663_v12 = vrot.slane %v646_v42, %v9904_v7 }
 0x1fa   :  { %1240 = vperm.xlu1 %9250, %v10318_v15   ;;  %v690_v33 = vsub.f32 %v10243_v34, %v659_v63  ;;  %v688_v36 = vsub.f32 %v10235_v35, %v651_v9  ;;  %v692_v59 = vsub.f32 %v10251_v21, %v667_v58  ;;  %v689_v23 = vsub.f32 %v10238_v25, %v655_v10 }
 0x1fb   :  { %v694_v61 = vsub.f32 %v10264_v47, %v675_v32  ;;  %v671_v34 = vrot.slane %v646_v42, %v9914_v13  ;;  %v691_v20 = vsub.f32 %v10248_v2, %v663_v12  ;;  %v679_v21 = vrot.slane %v646_v42, %v9925_v18 }
 0x1fc   :  { %v700_v16 = vmul.f32 1.442695, %v690_v33  ;;  %v696_v3 = vmul.f32 1.442695, %v688_v36  ;;  %v704_v50 = vmul.f32 1.442695, %v692_v59 }
 0x1fd   :  { %v698_v35 = vmul.f32 1.442695, %v689_v23  ;;  %v708_v25 = vmul.f32 1.442695, %v694_v61  ;;  %v702_v0 = vmul.f32 1.442695, %v691_v20  ;;  %v693_v9 = vsub.f32 %v10256_v22, %v671_v34 }
 0x1fe   :  { %1243 = vperm.xlu1 %9250, %v10328_v60   ;;  %9314 = vpow2.f32 %v700_v16  ;;  %v695_v10 = vsub.f32 %v10275_v28, %v679_v21 }
 0x1ff   :  { %9316 = vpow2.f32 %v696_v3  ;;  %v706_v47 = vmul.f32 1.442695, %v693_v9 }
 0x200   :  { %9318 = vpow2.f32 %v704_v50  ;;  %v710_v58 = vmul.f32 1.442695, %v695_v10 }
 0x201   :  { %9320 = vpow2.f32 %v698_v35 }
 0x202   :  { %1246 = vperm.xlu1 %9250, %v10334_v56   ;;  %9322 = vpow2.f32 %v708_v25 }
 0x203   :  { %9324 = vpow2.f32 %v702_v0 }
 0x204   :  { %9326 = vpow2.f32 %v706_v47 }
 0x205   :  { %9328 = vpow2.f32 %v710_v58 }
 0x208   :  { %v10340_v63 = vpop.eup %9314 }
 0x209   :  { %v10342_v2 = vpop.eup %9316  ;;  %727 = vperm.xlu0 %9251, %v10340_v63  }
 0x20a   :  { %721 = vperm.xlu1 %9250, %v10342_v2   ;;  %v10346_v42 = vpop.eup %9318 }
 0x20b   :  { %v10348_v32 = vpop.eup %9320 }
 0x20c   :  { %v10352_v22 = vpop.eup %9322 }
 0x20d   :  { %733 = vperm.xlu0 %9251, %v10346_v42   ;;  %v10354_v28 = vpop.eup %9324 }
 0x20e   :  { %724 = vperm.xlu1 %9250, %v10348_v32   ;;  %v10358_v33 = vpop.eup %9326 }
 0x20f   :  { %v10361_v36 = vpop.eup %9328 }
 0x211   :  { %739 = vperm.xlu0 %9251, %v10352_v22  }
 0x212   :  { %730 = vperm.xlu1 %9250, %v10354_v28  }
 0x216   :  { %736 = vperm.xlu1 %9250, %v10358_v33  }
 0x21a   :  { %742 = vperm.xlu1 %9250, %v10361_v36  }
 0x268   :  { %v1229_v3 = vpop.permute.xlu0 %1228 }
 0x269   :  { %v1226_v12 = vpop.permute.xlu1 %1225  ;;  %v1255_v61 = vrot.slane %v1229_v3, %v9901_v6 }
 0x26a   :  { %v1251_v34 = vrot.slane %v1226_v12, %v9901_v6 }
 0x26c   :  { %v1280_v0 = vsel %vm628_vm1, %v1255_v61, %v1251_v34 }
 0x26d   :  { %v1232_v59 = vpop.permute.xlu1 %1231 }
 0x26e   :  { %v1259_v35 = vrot.slane %v1232_v59, %v9901_v6 }
 0x270   :  { %v1281_v47 = vsel %vm630_vm2, %v1259_v35, %v1280_v0 }
 0x271   :  { %v1235_v23 = vpop.permute.xlu1 %1234 }
 0x272   :  { %v1263_v20 = vrot.slane %v1235_v23, %v9901_v6 }
 0x274   :  { %v1282_v58 = vsel %vm632_vm3, %v1263_v20, %v1281_v47 }
 0x275   :  { %v1238_v16 = vpop.permute.xlu1 %1237 }
 0x276   :  { %v1267_v25 = vrot.slane %v1238_v16, %v9901_v6 }
 0x278   :  { %v1283_v3 = vsel %vm634_vm4, %v1267_v25, %v1282_v58 }
 0x279   :  { %v1241_v50 = vpop.permute.xlu1 %1240 }
 0x27a   :  { %v1271_v9 = vrot.slane %v1241_v50, %v9901_v6 }
 0x27c   :  { %v1284_v23 = vsel %vm636_vm5, %v1271_v9, %v1283_v3 }
 0x27d   :  { %v1244_v21 = vpop.permute.xlu1 %1243 }
 0x27e   :  { %v1275_v10 = vrot.slane %v1244_v21, %v9901_v6 }
 0x280   :  { %v1285_v16 = vsel %vm638_vm6, %v1275_v10, %v1284_v23 }
 0x281   :  { %v1247_v12 = vpop.permute.xlu1 %1246 }
 0x282   :  { %v1279_v59 = vrot.slane %v1247_v12, %v9901_v6 }
 0x284   :  { %v1286_v43 = vsel %vm640_vm7, %v1279_v59, %v1285_v16 }
 0x285   :  { %v1288_v61 = vsel %vm643_vm8, %v1286_v43, 0.0 }
 0x286   :  { %1289 = vadd.xlane.f32.xlu0 %v1288_v61 }
 0x288   :  { %v728_v34 = vpop.permute.xlu0 %727 }
 0x289   :  { %v722_v50 = vpop.permute.xlu1 %721  ;;  %v755_v47 = vrot.slane %v728_v34, %v9901_v6 }
 0x28a   :  { %v747_v21 = vrot.slane %v722_v50, %v9901_v6 }
 0x28c   :  { %v734_v25 = vpop.permute.xlu0 %733 }
 0x28d   :  { %v725_v35 = vpop.permute.xlu1 %724  ;;  %v763_v3 = vrot.slane %v734_v25, %v9901_v6 }
 0x28e   :  { %v751_v20 = vrot.slane %v725_v35, %v9901_v6 }
 0x290   :  { %v776_v0 = vsel %vm628_vm1, %v751_v20, %v747_v21  ;;  %v740_v59 = vpop.permute.xlu0 %739 }
 0x291   :  { %v731_v9 = vpop.permute.xlu1 %730  ;;  %v777_v58 = vsel %vm630_vm2, %v755_v47, %v776_v0  ;;  %v771_v50 = vrot.slane %v740_v59, %v9901_v6 }
 0x292   :  { %v759_v10 = vrot.slane %v731_v9, %v9901_v6 }
 0x294   :  { %v778_v43 = vsel %vm632_vm3, %v759_v10, %v777_v58 }
 0x295   :  { %v737_v12 = vpop.permute.xlu1 %736  ;;  %v779_v16 = vsel %vm634_vm4, %v763_v3, %v778_v43 }
 0x296   :  { %v767_v23 = vrot.slane %v737_v12, %v9901_v6 }
 0x298   :  { %v780_v61 = vsel %vm636_vm5, %v767_v23, %v779_v16 }
 0x299   :  { %v743_v34 = vpop.permute.xlu1 %742  ;;  %v781_v21 = vsel %vm638_vm6, %v771_v50, %v780_v61 }
 0x29a   :  { %v775_v35 = vrot.slane %v743_v34, %v9901_v6 }
 0x29c   :  { %v782_v20 = vsel %vm640_vm7, %v775_v35, %v781_v21 }
 0x29d   :  { %v784_v0 = vsel %vm643_vm8, %v782_v20, 0.0 }
 0x29e   :  { %785 = vadd.xlane.f32.xlu1 %v784_v0 }
 0x313   :  { %v1290_v25 = vpop.xlane.xlu0 %1289 }
 0x314   :  { %v1295_v47 = vrot.slane %v1290_v25, %v9895_v4  ;;  %v1299_v9 = vrot.slane %v1290_v25, %v9907_v8  ;;  %v1303_v10 = vrot.slane %v1290_v25, %v9898_v5  ;;  %v1307_v58 = vrot.slane %v1290_v25, %v9904_v7 }
 0x315   :  { %v1311_v43 = vrot.slane %v1290_v25, %v9917_v14  ;;  %v1315_v3 = vrot.slane %v1290_v25, %v9914_v13  ;;  %v1319_v12 = vrot.slane %v1290_v25, %v9922_v17  ;;  %v1323_v59 = vrot.slane %v1290_v25, %v9925_v18 }
 0x316   :  { %9330 = vrcp.f32 %v1295_v47 }
 0x317   :  { %9332 = vrcp.f32 %v1299_v9 }
 0x318   :  { %9334 = vrcp.f32 %v1303_v10 }
 0x319   :  { %9336 = vrcp.f32 %v1307_v58 }
 0x31a   :  { %9338 = vrcp.f32 %v1311_v43 }
 0x31b   :  { %9340 = vrcp.f32 %v1315_v3 }
 0x31c   :  { %9342 = vrcp.f32 %v1319_v12 }
 0x31d   :  { %9344 = vrcp.f32 %v1323_v59 }
 0x320   :  { %v9331_v23 = vpop.eup %9330 }
 0x321   :  { %v9333_v16 = vpop.eup %9332  ;;  %v1333_v61 = vmul.f32 %v9331_v23, %v10299_v49 }
 0x322   :  { %v9335_v50 = vpop.eup %9334  ;;  %v1335_v34 = vmul.f32 %v9333_v16, %v10297_v44 }
 0x323   :  { %v9337_v35 = vpop.eup %9336  ;;  %1350 = vperm.xlu0 %9251, %v1333_v61   ;;  %v1337_v21 = vmul.f32 %v9335_v50, %v10305_v52 }
 0x324   :  { %1355 = vperm.xlu1 %9250, %v1335_v34   ;;  %v9339_v20 = vpop.eup %9338  ;;  %v1339_v0 = vmul.f32 %v9337_v35, %v10309_v62 }
 0x325   :  { %v9341_v47 = vpop.eup %9340  ;;  %v1341_v25 = vmul.f32 %v9339_v20, %v10312_v55 }
 0x326   :  { %v9343_v9 = vpop.eup %9342  ;;  %v1343_v49 = vmul.f32 %v9341_v47, %v10318_v15 }
 0x327   :  { %1360 = vperm.xlu0 %9251, %v1337_v21   ;;  %v9345_v10 = vpop.eup %9344  ;;  %v1345_v62 = vmul.f32 %v9343_v9, %v10328_v60 }
 0x328   :  { %1365 = vperm.xlu1 %9250, %v1339_v0   ;;  %v1347_v12 = vmul.f32 %v9345_v10, %v10334_v56  ;;  %v103_v10 = vld [vmem:[%s13004_s7 + $0x8] sm:$0xff] }
 0x32b   :  { %1370 = vperm.xlu0 %9251, %v1341_v25   ;;  %v786_v58 = vpop.xlane.xlu1 %785 }
 0x32c   :  { %1375 = vperm.xlu1 %9250, %v1343_v49   ;;  %v795_v44 = vrot.slane %v786_v58, %v9907_v8  ;;  %v791_v43 = vrot.slane %v786_v58, %v9895_v4  ;;  %v803_v52 = vrot.slane %v786_v58, %v9904_v7  ;;  %v799_v3 = vrot.slane %v786_v58, %v9898_v5 }
 0x32d   :  { %v811_v55 = vrot.slane %v786_v58, %v9914_v13  ;;  %v807_v15 = vrot.slane %v786_v58, %v9917_v14  ;;  %v819_v59 = vrot.slane %v786_v58, %v9925_v18  ;;  %v815_v60 = vrot.slane %v786_v58, %v9922_v17 }
 0x32e   :  { %9346 = vrcp.f32 %v795_v44  ;;  %v104_v44 = vld [vmem:[%s13004_s7 + $0x10] sm:$0xff] }
 0x32f   :  { %1380 = vperm.xlu0 %9251, %v1345_v62   ;;  %9348 = vrcp.f32 %v791_v43  ;;  %v105_v43 = vld [vmem:[%s13004_s7 + $0x18] sm:$0xff] }
 0x330   :  { %1385 = vperm.xlu1 %9250, %v1347_v12   ;;  %9350 = vrcp.f32 %v803_v52  ;;  %v131_v52 = vld [vmem:[%s13003_s27 + $0x8] sm:$0xff]  ;;  %v10457_v62 = vpack.c.bf16 %v105_v43, %v104_v44  ;;  %v133_v12 = vld [vmem:[%s13003_s27 + $0x18] sm:$0xff] }
 0x331   :  { %9352 = vrcp.f32 %v799_v3  ;;  %v132_v3 = vld [vmem:[%s13003_s27 + $0x10] sm:$0xff] }
 0x332   :  { %9354 = vrcp.f32 %v811_v55  ;;  %13006 = vst [vmem:[#allocation4_spill] sm:$0xff] %v10457_v62 }
 0x333   :  { %9356 = vrcp.f32 %v807_v15 }
 0x334   :  { %9358 = vrcp.f32 %v819_v59 }
 0x335   :  { %9360 = vrcp.f32 %v815_v60 }
 0x338   :  { %v9347_v23 = vpop.eup %9346 }
 0x339   :  { %v9349_v16 = vpop.eup %9348  ;;  %v831_v56 = vmul.f32 %v9347_v23, %v10348_v32 }
 0x33a   :  { %v9351_v61 = vpop.eup %9350  ;;  %v829_v50 = vmul.f32 %v9349_v16, %v10342_v2 }
 0x33b   :  { %v9353_v34 = vpop.eup %9352  ;;  %851 = vperm.xlu1 %9250, %v831_v56   ;;  %v835_v35 = vmul.f32 %v9351_v61, %v10354_v28  ;;  %v149_v28 = vld [vmem:[%s13002_s3 + $0x8] sm:$0xff] }
 0x33c   :  { %846 = vperm.xlu0 %9251, %v829_v50   ;;  %v9355_v21 = vpop.eup %9354  ;;  %v833_v20 = vmul.f32 %v9353_v34, %v10340_v63  ;;  %v148_v63 = vld [vmem:[%s13002_s3] sm:$0xff]  ;;  %s12922_s3 = smov 16  }
 0x33d   :  { %v9357_v0 = vpop.eup %9356  ;;  %v839_v47 = vmul.f32 %v9355_v21, %v10358_v33  ;;  %v12934_v33 = vmov 0.0|0.0  }
 0x33e   :  { %v9359_v25 = vpop.eup %9358  ;;  %v837_v32 = vmul.f32 %v9357_v0, %v10346_v42  ;;  %9045 = vmatprep.subr.bf16.mxu1 %v12934_v33  ;;  %v130_v42 = vld [vmem:[%s13003_s27] sm:$0xff] }
 0x33f   :  { %861 = vperm.xlu1 %9250, %v835_v35   ;;  %v9361_v9 = vpop.eup %9360  ;;  %v843_v2 = vmul.f32 %v9359_v25, %v10361_v36  ;;  %v9041_v36 = vpack.c.bf16 %v149_v28, %v148_v63  ;;  %8642 = vmatprep.mubr.msk.f32.mxu0 %vm150_vm0, %v130_v42 }
 0x340   :  { %856 = vperm.xlu0 %9251, %v833_v20   ;;  %v841_v49 = vmul.f32 %v9361_v9, %v10352_v22  ;;  %v102_v22 = vld [vmem:[%s13004_s7] sm:$0xff]  ;;  %s13010_s7 = sld [smem:[#allocation50_spill]] }
 0x341   :  { %v10445_v58 = vpack.c.bf16 %v103_v10, %v102_v22  ;;  %9042 = vmatprep.subr.bf16.mxu0 %v9041_v36 }
 0x342   :  { %9044 = vmatpush3.bf16.msra.mxu0 %v9041_v36 }
 0x343   :  { %871 = vperm.xlu1 %9250, %v839_v47   ;;  %13005 = vst [vmem:[#allocation3_spill] sm:$0xff] %v10445_v58  ;;  %9047 = vmatpush3.bf16.msra.mxu1 %v10445_v58 }
 0x344   :  { %866 = vperm.xlu0 %9251, %v837_v32   ;;  %9048 = vmatprep.subr.bf16.mxu1 %v12934_v33 }
 0x345   :  { %9069 = vmatprep.subr.bf16.mxu0 %v12934_v33  ;;  %8643 = vmatmul.mubr.msk.f32.vlgmr.msra.gmra.mrb[0].mxu0 %vm150_vm0, %v131_v52 }
 0x346   :  { %8645 = vmatprep.mubr.msk.f32.mxu0 %vm150_vm0, %v132_v3 }
 0x347   :  { %881 = vperm.xlu1 %9250, %v843_v2   ;;  %9050 = vmatpush3.bf16.msra.mxu1 %v10457_v62 }
 0x348   :  { %876 = vperm.xlu0 %9251, %v841_v49   ;;  %9051 = vmatprep.subr.bf16.mxu1 %v12934_v33 }
 0x349   :  { %8646 = vmatmul.mubr.msk.f32.gmra.mrb[2].mxu0 %vm150_vm0, %v133_v12 }
 0x3a2   :  { %v1351_v55 = vpop.permute.xlu0 %1350 }
 0x3a3   :  { %v1388_v15 = vmul.f32 %v1351_v55, %v9956_v30  ;;  %v1356_v59 = vpop.permute.xlu1 %1355 }
 0x3a4   :  { %v1389_v60 = vmul.f32 %v1356_v59, %v9984_v40 }
 0x3a5   :  { %v1396_v23 = vsel %vm150_vm0, %v1388_v15, 0.0 }
 0x3a6   :  { %v1397_v16 = vrot.slane %v1396_v23, 4  ;;  %v1403_v56 = vsel %vm150_vm0, %v1389_v60, 0.0  ;;  %v1361_v61 = vpop.permute.xlu0 %1360 }
 0x3a7   :  { %v1404_v50 = vrot.slane %v1403_v56, 4  ;;  %v1390_v34 = vmul.f32 %v1361_v61, %v9953_v29  ;;  %v1366_v35 = vpop.permute.xlu1 %1365 }
 0x3a8   :  { %v1398_v21 = vadd.f32 %v1397_v16, %v1396_v23  ;;  %v1391_v20 = vmul.f32 %v1366_v35, %v9981_v39 }
 0x3a9   :  { %v1405_v0 = vadd.f32 %v1404_v50, %v1403_v56  ;;  %v1410_v47 = vsel %vm150_vm0, %v1390_v34, 0.0 }
 0x3aa   :  { %v1399_v25 = vrot.slane %v1398_v21, 2  ;;  %v1411_v32 = vrot.slane %v1410_v47, 4  ;;  %v1417_v9 = vsel %vm150_vm0, %v1391_v20, 0.0  ;;  %v1371_v2 = vpop.permute.xlu0 %1370 }
 0x3ab   :  { %v1406_v49 = vrot.slane %v1405_v0, 2  ;;  %v1418_v63 = vrot.slane %v1417_v9, 4  ;;  %v1392_v28 = vmul.f32 %v1371_v2, %v10011_v54  ;;  %v1376_v42 = vpop.permute.xlu1 %1375 }
 0x3ac   :  { %v1400_v36 = vadd.f32 %v1399_v25, %v1398_v21  ;;  %v1412_v22 = vadd.f32 %v1411_v32, %v1410_v47  ;;  %v1393_v10 = vmul.f32 %v1376_v42, %v10032_v11 }
 0x3ad   :  { %v1407_v44 = vadd.f32 %v1406_v49, %v1405_v0  ;;  %v1419_v43 = vadd.f32 %v1418_v63, %v1417_v9  ;;  %v1424_v52 = vsel %vm150_vm0, %v1392_v28, 0.0 }
 0x3ae   :  { %v1401_v3 = vrot.slane %v1400_v36, 1  ;;  %v1413_v12 = vrot.slane %v1412_v22, 2  ;;  %v1425_v55 = vrot.slane %v1424_v52, 4  ;;  %v1431_v15 = vsel %vm150_vm0, %v1393_v10, 0.0  ;;  %v1381_v59 = vpop.permute.xlu0 %1380 }
 0x3af   :  { %v1408_v60 = vrot.slane %v1407_v44, 1  ;;  %v1420_v23 = vrot.slane %v1419_v43, 2  ;;  %v1432_v16 = vrot.slane %v1431_v15, 4  ;;  %v1394_v56 = vmul.f32 %v1381_v59, %v10054_v45  ;;  %v1386_v61 = vpop.permute.xlu1 %1385  ;;  %v135_v59 = vld [vmem:[%s13003_s27 + $0x28] sm:$0xff] }
 0x3b0   :  { %v1402_v50 = vadd.f32 %v1401_v3, %v1400_v36  ;;  %v1414_v34 = vadd.f32 %v1413_v12, %v1412_v22  ;;  %v1426_v35 = vadd.f32 %v1425_v55, %v1424_v52  ;;  %v1395_v21 = vmul.f32 %v1386_v61, %v10060_v51  ;;  %v134_v36 = vld [vmem:[%s13003_s27 + $0x20] sm:$0xff] }
 0x3b1   :  { %v1409_v20 = vadd.f32 %v1408_v60, %v1407_v44  ;;  %v1421_v0 = vadd.f32 %v1420_v23, %v1419_v43  ;;  %v1433_v47 = vadd.f32 %v1432_v16, %v1431_v15  ;;  %v1438_v25 = vsel %vm150_vm0, %v1394_v56, 0.0  ;;  %8648 = vmatprep.mubr.msk.f32.mxu0 %vm150_vm0, %v134_v36  ;;  %v107_v55 = vld [vmem:[%s13007_s6] sm:$0xff]  ;;  %v108_v15 = vld [vmem:[%s13007_s6 + $0x8] sm:$0xff] }
 0x3b2   :  { %v1415_v32 = vrot.slane %v1414_v34, 1  ;;  %v1427_v9 = vrot.slane %v1426_v35, 2  ;;  %v1439_v2 = vrot.slane %v1438_v25, 4  ;;  %v1445_v49 = vsel %vm150_vm0, %v1395_v21, 0.0  ;;  %8649 = vmatmul.mubr.msk.f32.gmra.mrb[4].mxu0 %vm150_vm0, %v135_v59 }
 0x3b3   :  { %v1476_v63 = vsel %vm628_vm1, %v1409_v20, %v1402_v50  ;;  %v1422_v28 = vrot.slane %v1421_v0, 1  ;;  %v1434_v42 = vrot.slane %v1433_v47, 2  ;;  %v1446_v10 = vrot.slane %v1445_v49, 4  ;;  %v109_v20 = vld [vmem:[%s13007_s6 + $0x10] sm:$0xff] }
 0x3b4   :  { %v1416_v22 = vadd.f32 %v1415_v32, %v1414_v34  ;;  %v1428_v44 = vadd.f32 %v1427_v9, %v1426_v35  ;;  %v1440_v43 = vadd.f32 %v1439_v2, %v1438_v25  ;;  %v12932_v56 = vmov 0.0  }
 0x3b5   :  { %v1423_v52 = vadd.f32 %v1422_v28, %v1421_v0  ;;  %v1435_v3 = vadd.f32 %v1434_v42, %v1433_v47  ;;  %v1447_v12 = vadd.f32 %v1446_v10, %v1445_v49  ;;  %8677 = vmatprep.mubr.msk.f32.mxu1 %vm9741_vm9, %v12932_v56  ;;  %v10506_v34 = vpack.c.bf16 %v108_v15, %v107_v55  ;;  %v110_v0 = vld [vmem:[%s13007_s6 + $0x18] sm:$0xff] }
 0x3b6   :  { %v1429_v60 = vrot.slane %v1428_v44, 1  ;;  %v1441_v23 = vrot.slane %v1440_v43, 2  ;;  %v1477_v16 = vsel %vm630_vm2, %v1416_v22, %v1476_v63  ;;  %v10518_v63 = vpack.c.bf16 %v110_v0, %v109_v20 }
 0x3b7   :  { %v1436_v61 = vrot.slane %v1435_v3, 1  ;;  %v1448_v50 = vrot.slane %v1447_v12, 2  ;;  %v1478_v32 = vsel %vm632_vm3, %v1423_v52, %v1477_v16  ;;  %9071 = vmatpush3.bf16.msra.mxu0 %v10506_v34 }
 0x3b8   :  { %v1430_v35 = vadd.f32 %v1429_v60, %v1428_v44  ;;  %v1442_v21 = vadd.f32 %v1441_v23, %v1440_v43  ;;  %9072 = vmatprep.subr.bf16.mxu0 %v12934_v33  ;;  %13008 = vst [vmem:[#allocation5_spill] sm:$0xff] %v10518_v63 }
 0x3b9   :  { %v1437_v47 = vadd.f32 %v1436_v61, %v1435_v3  ;;  %v1449_v25 = vadd.f32 %v1448_v50, %v1447_v12 }
 0x3ba   :  { %v1443_v9 = vrot.slane %v1442_v21, 1  ;;  %v1479_v2 = vsel %vm634_vm4, %v1430_v35, %v1478_v32  ;;  %v852_v43 = vpop.permute.xlu1 %851 }
 0x3bb   :  { %v1450_v49 = vrot.slane %v1449_v25, 1  ;;  %v1480_v10 = vsel %vm636_vm5, %v1437_v47, %v1479_v2  ;;  %9074 = vmatpush3.bf16.msra.mxu0 %v10518_v63  ;;  %v847_v44 = vpop.permute.xlu0 %846  ;;  %v885_v12 = vmul.f32 %v852_v43, %v9984_v40 }
 0x3bc   :  { %v1444_v28 = vadd.f32 %v1443_v9, %v1442_v21  ;;  %9081 = vmatprep.subr.bf16.mxu0 %v12934_v33  ;;  %v884_v55 = vmul.f32 %v847_v44, %v9956_v30 }
 0x3bd   :  { %v1451_v42 = vadd.f32 %v1450_v49, %v1449_v25  ;;  %v899_v60 = vsel %vm150_vm0, %v885_v12, 0.0 }
 0x3be   :  { %v1481_v36 = vsel %vm638_vm6, %v1444_v28, %v1480_v10  ;;  %v862_v3 = vpop.permute.xlu1 %861  ;;  %v892_v16 = vsel %vm150_vm0, %v884_v55, 0.0  ;;  %v900_v21 = vrot.slane %v899_v60, 4 }
 0x3bf   :  { %v1482_v22 = vsel %vm640_vm7, %v1451_v42, %v1481_v36  ;;  %v857_v52 = vpop.permute.xlu0 %856  ;;  %v887_v61 = vmul.f32 %v862_v3, %v9981_v39  ;;  %v893_v0 = vrot.slane %v892_v16, 4 }
 0x3c0   :  { %1483 = vrot.lane.b32.xlu0 %v1482_v22, %s12922_s3  ;;  %v886_v59 = vmul.f32 %v857_v52, %v9953_v29  ;;  %v901_v9 = vadd.f32 %v900_v21, %v899_v60 }
 0x3c1   :  { %v913_v30 = vsel %vm150_vm0, %v887_v61, 0.0  ;;  %v894_v2 = vadd.f32 %v893_v0, %v892_v16 }
 0x3c2   :  { %v872_v23 = vpop.permute.xlu1 %871  ;;  %v906_v50 = vsel %vm150_vm0, %v886_v59, 0.0  ;;  %v914_v39 = vrot.slane %v913_v30, 4  ;;  %v902_v36 = vrot.slane %v901_v9, 2 }
 0x3c3   :  { %v867_v15 = vpop.permute.xlu0 %866  ;;  %v907_v40 = vrot.slane %v906_v50, 4  ;;  %v889_v47 = vmul.f32 %v872_v23, %v10032_v11  ;;  %v895_v22 = vrot.slane %v894_v2, 2 }
 0x3c4   :  { %v888_v35 = vmul.f32 %v867_v15, %v10011_v54  ;;  %v915_v44 = vadd.f32 %v914_v39, %v913_v30  ;;  %v903_v12 = vadd.f32 %v902_v36, %v901_v9 }
 0x3c5   :  { %v908_v49 = vadd.f32 %v907_v40, %v906_v50  ;;  %v927_v54 = vsel %vm150_vm0, %v889_v47, 0.0  ;;  %v896_v55 = vadd.f32 %v895_v22, %v894_v2 }
 0x3c6   :  { %v920_v29 = vsel %vm150_vm0, %v888_v35, 0.0  ;;  %v882_v32 = vpop.permute.xlu1 %881  ;;  %v928_v11 = vrot.slane %v927_v54, 4  ;;  %v916_v15 = vrot.slane %v915_v44, 2 }
 0x3c7   :  { %v877_v20 = vpop.permute.xlu0 %876  ;;  %v921_v28 = vrot.slane %v920_v29, 4  ;;  %v891_v42 = vmul.f32 %v882_v32, %v10060_v51  ;;  %v909_v43 = vrot.slane %v908_v49, 2  ;;  %v904_v51 = vrot.slane %v903_v12, 1 }
 0x3c8   :  { %v890_v25 = vmul.f32 %v877_v20, %v10054_v45  ;;  %v929_v59 = vadd.f32 %v928_v11, %v927_v54  ;;  %v897_v50 = vrot.slane %v896_v55, 1  ;;  %v917_v35 = vadd.f32 %v916_v15, %v915_v44 }
 0x3c9   :  { %v922_v52 = vadd.f32 %v921_v28, %v920_v29  ;;  %v941_v45 = vsel %vm150_vm0, %v891_v42, 0.0  ;;  %v910_v23 = vadd.f32 %v909_v43, %v908_v49  ;;  %v905_v47 = vadd.f32 %v904_v51, %v903_v12 }
 0x3ca   :  { %v934_v10 = vsel %vm150_vm0, %v890_v25, 0.0  ;;  %v942_v60 = vrot.slane %v941_v45, 4  ;;  %v930_v21 = vrot.slane %v929_v59, 2  ;;  %v898_v29 = vadd.f32 %v897_v50, %v896_v55 }
 0x3cb   :  { %v935_v3 = vrot.slane %v934_v10, 4  ;;  %v923_v16 = vrot.slane %v922_v52, 2  ;;  %v911_v0 = vrot.slane %v910_v23, 1  ;;  %v918_v25 = vrot.slane %v917_v35, 1 }
 0x3cc   :  { %v943_v20 = vadd.f32 %v942_v60, %v941_v45  ;;  %v931_v32 = vadd.f32 %v930_v21, %v929_v59  ;;  %v1460_v49 = vsel %vm628_vm1, %v905_v47, %v898_v29 }
 0x3cd   :  { %v936_v61 = vadd.f32 %v935_v3, %v934_v10  ;;  %v924_v40 = vadd.f32 %v923_v16, %v922_v52  ;;  %v912_v2 = vadd.f32 %v911_v0, %v910_v23  ;;  %v919_v54 = vadd.f32 %v918_v25, %v917_v35 }
 0x3ce   :  { %v944_v9 = vrot.slane %v943_v20, 2  ;;  %v932_v42 = vrot.slane %v931_v32, 1 }
 0x3cf   :  { %v937_v30 = vrot.slane %v936_v61, 2  ;;  %v925_v39 = vrot.slane %v924_v40, 1  ;;  %v1461_v36 = vsel %vm630_vm2, %v912_v2, %v1460_v49 }
 0x3d0   :  { %v945_v10 = vadd.f32 %v944_v9, %v943_v20  ;;  %v933_v11 = vadd.f32 %v932_v42, %v931_v32  ;;  %v1462_v52 = vsel %vm632_vm3, %v919_v54, %v1461_v36  ;;  %v8329_v20 = vld [vmem:[%s13009_s0] ss:$0 sm:$0xff] }
 0x3d1   :  { %v938_v28 = vadd.f32 %v937_v30, %v936_v61  ;;  %v926_v22 = vadd.f32 %v925_v39, %v924_v40  ;;  %v10579_v42 = vld [vmem:[%s13010_s7] sm:$0xff] }
 0x3d2   :  { %v946_v43 = vrot.slane %v945_v10, 1 }
 0x3d3   :  { %v939_v44 = vrot.slane %v938_v28, 1  ;;  %v1463_v45 = vsel %vm634_vm4, %v926_v22, %v1462_v52  ;;  %v10584_v52 = vsub.f32 1.0, %v10579_v42 }
 0x3d4   :  { %v947_v12 = vadd.f32 %v946_v43, %v945_v10  ;;  %v1464_v55 = vsel %vm636_vm5, %v933_v11, %v1463_v45 }
 0x3d5   :  { %v940_v3 = vadd.f32 %v939_v44, %v938_v28  ;;  %13011 = vst [vmem:[#allocation6_spill] sm:$0xff] %v10584_v52 }
 0x3d7   :  { %v1465_v15 = vsel %vm638_vm6, %v940_v3, %v1464_v55 }
 0x3d8   :  { %v1466_v16 = vsel %vm640_vm7, %v947_v12, %v1465_v15 }
 0x418   :  { %v8644_v59 = vpop.f32.mrb[0].mxu0 }
 0x419   :  { %v271_v60 = vpop.f32.mrb[1].mxu0 }
 0x41c   :  { %v8647_v51 = vpop.f32.mrb[2].mxu0 }
 0x41d   :  { %v281_v50 = vpop.f32.mrb[3].mxu0 }
 0x432   :  { %v1484_v23 = vpop.permute.xlu0 %1483 }
 0x433   :  { %v1486_v61 = vsel %vm150_vm0, %v1466_v16, %v1484_v23 }
 0x434   :  { %8678 = vmatmul.mubr.msk.f32.vlgmr.msra.gmra.mrb[0].mxu1 %vm1493_vm10, %v1486_v61 }
 0x435   :  { %9053 = vmatpush3.bf16.msra.mxu1 %v10506_v34  ;;  %8688 = vmatprep.mubr.msk.f32.mxu1 %vm9741_vm9, %v12932_v56 }
 0x436   :  { %9054 = vmatprep.subr.bf16.mxu1 %v12934_v33 }
 0x439   :  { %9056 = vmatpush3.bf16.msra.mxu1 %v10518_v63 }
 0x43a   :  { %9057 = vmatprep.subr.bf16.mxu1 %v12934_v33 }
 0x43c   :  { %8689 = vmatmul.mubr.f32.vlgmr.msra.gmra.mrb[2].mxu1 %v12932_v56 }
 0x43d   :  { %9059 = vmatpush3.bf16.msra.mxu1 %v10506_v34  ;;  %8699 = vmatprep.mubr.msk.f32.mxu1 %vm9741_vm9, %v12932_v56 }
 0x43e   :  { %9060 = vmatprep.subr.bf16.mxu1 %v12934_v33 }
 0x441   :  { %9062 = vmatpush3.bf16.msra.mxu1 %v10518_v63 }
 0x442   :  { %9063 = vmatprep.subr.bf16.mxu1 %v12934_v33 }
 0x485   :  { %v8650_v35 = vpop.f32.mrb[4].mxu0 }
 0x486   :  { %v291_v21 = vpop.f32.mrb[5].mxu0 }
 0x507   :  { %v1563_v0 = vpop.f32.mrb[0].mxu1 }
 0x508   :  { %v1564_v40 = vadd.f32 %v8329_v20, %v1563_v0  ;;  %v8679_v30 = vpop.f32.mrb[1].mxu1 }
 0x50a   :  { %v10567_v47 = vadd.f32 %v8650_v35, %v1564_v40  ;;  %v10569_v29 = vadd.f32 %v1564_v40, %v291_v21  ;;  %v1567_v25 = vadd.f32 %v1564_v40, %v271_v60  ;;  %v1568_v32 = vadd.f32 %v8644_v59, %v1564_v40 }
 0x50b   :  { %v10571_v9 = vadd.f32 %v1564_v40, %v281_v50  ;;  %v10573_v2 = vadd.f32 %v8647_v51, %v1564_v40  ;;  %v12928_v35 = vmov 1  }
 0x50f   :  { %v1642_v39 = vpop.f32.mrb[2].mxu1 }
 0x510   :  { %v1646_v28 = vadd.f32 %v1642_v39, %v1567_v25  ;;  %v8690_v49 = vpop.f32.mrb[3].mxu1 }
 0x512   :  { %9362 = vtanh.f32 %v1646_v28  ;;  %v8331_v10 = vmul.f32 -1.442695, %v1646_v28 }
 0x514   :  { %9364 = vpow2.f32 %v8331_v10 }
 0x51c   :  { %v9363_v54 = vpop.eup %9362 }
 0x51d   :  { %1656 = vrot.lane.b32.xlu1 %v9363_v54, %s9744_s8 }
 0x51e   :  { %v9365_v36 = vpop.eup %9364 }
 0x51f   :  { %v1650_v22 = vadd.f32 1.0, %v9365_v36 }
 0x521   :  { %1674 = vperm.xlu1 %9250, %v10579_v42   ;;  %9366 = vrcp.f32 %v1650_v22 }
 0x525   :  { %9252 = vset.pattern.permute.xlu1 %v12928_v35 }
 0x52b   :  { %v9367_v44 = vpop.eup %9366 }
 0x52c   :  { %v1654_v3 = vmul.f32 0.0, %v9367_v44 }
 0x58f   :  { %v1657_v11 = vpop.permute.xlu1 %1656 }
 0x590   :  { %v1659_v43 = vmul.f32 %v9367_v44, %v1657_v11 }
 0x592   :  { %1661 = vrot.lane.b32.xlu0 %v1659_v43, %s12924_s29 }
 0x596   :  { %1680 = vperm.xlu0 %9251, %v10584_v52  }
 0x59a   :  { %9253 = vset.pattern.permute.xlu0 %v12928_v35 }
 0x5a0   :  { %v1675_v15 = vpop.permute.xlu1 %1674 }
 0x604   :  { %v1662_v45 = vpop.permute.xlu0 %1661 }
 0x605   :  { %v1664_v12 = vadd.f32 %v1662_v45, %v1654_v3 }
 0x607   :  { %9368 = vtanh.f32 %v1664_v12 }
 0x611   :  { %v9369_v55 = vpop.eup %9368 }
 0x612   :  { %1667 = vrot.lane.b32.xlu1 %v9369_v55, %s9744_s8 }
 0x615   :  { %v1681_v59 = vpop.permute.xlu0 %1680 }
 0x616   :  { %v1683_v16 = vmul.f32 0.0, %v1681_v59 }
 0x684   :  { %v1668_v60 = vpop.permute.xlu1 %1667 }
 0x685   :  { %v1670_v23 = vmul.f32 %v9367_v44, %v1668_v60 }
 0x687   :  { %v10588_v61 = vmul.f32 %v1675_v15, %v1670_v23 }
 0x689   :  { %v1684_v51 = vadd.f32 %v1683_v16, %v10588_v61 }
 0x68b   :  { %1688 = vrot.lane.b32.xlu0 %v1684_v51, %s12924_s29 }
 0x6fd   :  { %v1689_v50 = vpop.permute.xlu0 %1688 }
 0x6fe   :  { %8700 = vmatmul.mubr.msk.f32.vlgmr.msra.gmra.mrb[4].mxu1 %vm1493_vm10, %v1689_v50 }
 0x6ff   :  { %9065 = vmatpush3.bf16.msra.mxu1 %v10506_v34  ;;  %8710 = vmatprep.mubr.msk.f32.mxu1 %vm9741_vm9, %v12932_v56 }
 0x700   :  { %9066 = vmatprep.subr.bf16.mxu1 %v12934_v33 }
 0x703   :  { %9068 = vmatpush3.bf16.msra.mxu1 %v10518_v63 }
 0x704   :  { %9075 = vmatprep.subr.bf16.mxu1 %v12934_v33 }
 0x7d1   :  { %v1758_v21 = vpop.f32.mrb[4].mxu1 }
 0x7d2   :  { %v1762_v20 = vadd.f32 %v1758_v21, %v1568_v32  ;;  %v8701_v0 = vpop.f32.mrb[5].mxu1  ;;  %v1685_v32 = vmul.f32 %v1675_v15, %v1664_v12  ;;  %v12926_v15 = vmov 2  }
 0x7d4   :  { %9370 = vtanh.f32 %v1762_v20  ;;  %v8333_v30 = vmul.f32 -1.442695, %v1762_v20  ;;  %v1686_v10 = vadd.f32 %v1685_v32, %v1683_v16 }
 0x7d6   :  { %9372 = vpow2.f32 %v8333_v30 }
 0x7de   :  { %v9371_v40 = vpop.eup %9370 }
 0x7df   :  { %1772 = vrot.lane.b32.xlu1 %v9371_v40, %s9744_s8 }
 0x7e0   :  { %v9373_v25 = vpop.eup %9372 }
 0x7e1   :  { %v1766_v39 = vadd.f32 1.0, %v9373_v25 }
 0x7e3   :  { %1788 = vperm.xlu1 %9252, %v10579_v42   ;;  %9374 = vrcp.f32 %v1766_v39 }
 0x7e7   :  { %9255 = vset.pattern.permute.xlu1 %v12926_v15 }
 0x7ed   :  { %v9375_v28 = vpop.eup %9374 }
 0x7ee   :  { %v1770_v36 = vmul.f32 %v9375_v28, %v1686_v10 }
 0x851   :  { %v1773_v49 = vpop.permute.xlu1 %1772 }
 0x852   :  { %v1775_v54 = vmul.f32 %v9375_v28, %v1773_v49 }
 0x854   :  { %1777 = vrot.lane.b32.xlu0 %v1775_v54, %s12924_s29 }
 0x858   :  { %1793 = vperm.xlu0 %9253, %v10584_v52  }
 0x85c   :  { %9254 = vset.pattern.permute.xlu0 %v12926_v15 }
 0x862   :  { %v1789_v43 = vpop.permute.xlu1 %1788 }
 0x8c6   :  { %v1778_v22 = vpop.permute.xlu0 %1777 }
 0x8c7   :  { %v1780_v44 = vadd.f32 %v1778_v22, %v1770_v36  ;;  %v136_v22 = vld [vmem:[%s13003_s27 + $0x30] sm:$0xff] }
 0x8c8   :  { %8651 = vmatprep.mubr.msk.f32.mxu0 %vm150_vm0, %v136_v22 }
 0x8c9   :  { %9376 = vtanh.f32 %v1780_v44 }
 0x8d3   :  { %v9377_v11 = vpop.eup %9376 }
 0x8d4   :  { %1783 = vrot.lane.b32.xlu1 %v9377_v11, %s9744_s8  ;;  %v137_v11 = vld [vmem:[%s13003_s27 + $0x38] sm:$0xff] }
 0x8d5   :  { %8652 = vmatmul.mubr.msk.f32.gmra.mrb[6].mxu0 %vm150_vm0, %v137_v11 }
 0x8d7   :  { %v1794_v3 = vpop.permute.xlu0 %1793 }
 0x8d8   :  { %v1796_v59 = vmul.f32 %v1794_v3, %v1684_v51 }
 0x946   :  { %v1784_v45 = vpop.permute.xlu1 %1783 }
 0x947   :  { %v1786_v55 = vmul.f32 %v9375_v28, %v1784_v45  ;;  %v1798_v28 = vmul.f32 %v1789_v43, %v1780_v44  ;;  %v139_v44 = vld [vmem:[%s13003_s27 + $0x48] sm:$0xff]  ;;  %v141_v45 = vld [vmem:[%s13003_s27 + $0x58] sm:$0xff] }
 0x949   :  { %v10606_v60 = vmul.f32 %v1789_v43, %v1786_v55  ;;  %v140_v43 = vld [vmem:[%s13003_s27 + $0x50] sm:$0xff]  ;;  %v142_v55 = vld [vmem:[%s13003_s27 + $0x60] sm:$0xff] }
 0x94b   :  { %v10609_v23 = vadd.f32 %v1796_v59, %v10606_v60  ;;  %v143_v59 = vld [vmem:[%s13003_s27 + $0x68] sm:$0xff] }
 0x94d   :  { %1802 = vrot.lane.b32.xlu1 %v10609_v23, %s12924_s29 }
 0x9bf   :  { %v1803_v12 = vpop.permute.xlu1 %1802 }
 0x9c0   :  { %8711 = vmatmul.mubr.msk.f32.vlgmr.msra.gmra.mrb[6].mxu1 %vm1493_vm10, %v1803_v12  ;;  %v144_v12 = vld [vmem:[%s13003_s27 + $0x70] sm:$0xff] }
 0x9c1   :  { %9077 = vmatpush3.bf16.msra.mxu1 %v10506_v34  ;;  %8732 = vmatprep.mubr.msk.f32.mxu1 %vm9741_vm9, %v12932_v56 }
 0x9c2   :  { %9078 = vmatprep.subr.bf16.mxu1 %v12934_v33 }
 0x9c5   :  { %9080 = vmatpush3.bf16.msra.mxu1 %v10518_v63 }
 0xa93   :  { %v1872_v16 = vpop.f32.mrb[6].mxu1 }
 0xa94   :  { %v1876_v51 = vadd.f32 %v1872_v16, %v10571_v9  ;;  %v8712_v50 = vpop.f32.mrb[7].mxu1  ;;  %v1799_v9 = vmul.f32 %v1794_v3, %v1686_v10  ;;  %v138_v10 = vld [vmem:[%s13003_s27 + $0x40] sm:$0xff]  ;;  %v145_v16 = vld [vmem:[%s13003_s27 + $0x78] sm:$0xff] }
 0xa95   :  { %8654 = vmatprep.mubr.msk.f32.mxu0 %vm150_vm0, %v138_v10  ;;  %v147_v50 = vld [vmem:[%s13003_s27 + $0x88] sm:$0xff] }
 0xa96   :  { %9378 = vtanh.f32 %v1876_v51  ;;  %v8335_v20 = vmul.f32 -1.442695, %v1876_v51  ;;  %v10626_v49 = vadd.f32 %v1799_v9, %v1798_v28  ;;  %8655 = vmatmul.mubr.msk.f32.gmra.mrb[8].mxu0 %vm150_vm0, %v139_v44  ;;  %v146_v51 = vld [vmem:[%s13003_s27 + $0x80] sm:$0xff]  ;;  %v10688_v28 = vpop.f32.mrb[6].mxu0 }
 0xa97   :  { %8657 = vmatprep.mubr.msk.f32.mxu0 %vm150_vm0, %v140_v43  ;;  %13013 = vst [vmem:[#allocation7_spill] sm:$0xff] %v10688_v28 }
 0xa98   :  { %9380 = vpow2.f32 %v8335_v20 }
 0xa9a   :  { %8658 = vmatmul.mubr.msk.f32.gmra.mrb[10].mxu0 %vm150_vm0, %v141_v45 }
 0xa9b   :  { %8660 = vmatprep.mubr.msk.f32.mxu0 %vm150_vm0, %v142_v55 }
 0xa9e   :  { %8661 = vmatmul.mubr.msk.f32.gmra.mrb[12].mxu0 %vm150_vm0, %v143_v59  ;;  %v12930_v59 = vmov 3  }
 0xa9f   :  { %8663 = vmatprep.mubr.msk.f32.mxu0 %vm150_vm0, %v144_v12 }
 0xaa0   :  { %v9379_v21 = vpop.eup %9378 }
 0xaa1   :  { %1886 = vrot.lane.b32.xlu0 %v9379_v21, %s9744_s8 }
 0xaa2   :  { %v9381_v0 = vpop.eup %9380  ;;  %8664 = vmatmul.mubr.msk.f32.gmra.mrb[14].mxu0 %vm150_vm0, %v145_v16 }
 0xaa3   :  { %v1880_v40 = vadd.f32 1.0, %v9381_v0  ;;  %8666 = vmatprep.mubr.msk.f32.mxu0 %vm150_vm0, %v146_v51 }
 0xaa5   :  { %1902 = vperm.xlu0 %9254, %v10579_v42   ;;  %9382 = vrcp.f32 %v1880_v40 }
 0xaa6   :  { %8667 = vmatmul.mubr.msk.f32.gmra.mrb[16].mxu0 %vm150_vm0, %v147_v50 }
 0xaa7   :  { %8721 = vmatprep.mubr.msk.f32.mxu0 %vm9741_vm9, %v12932_v56 }
 0xaa9   :  { %9257 = vset.pattern.permute.xlu0 %v12930_v59 }
 0xaaf   :  { %v9383_v30 = vpop.eup %9382 }
 0xab0   :  { %v1884_v54 = vmul.f32 %v9383_v30, %v10626_v49 }
 0xb13   :  { %v1887_v25 = vpop.permute.xlu0 %1886 }
 0xb14   :  { %v1889_v39 = vmul.f32 %v9383_v30, %v1887_v25 }
 0xb16   :  { %1891 = vrot.lane.b32.xlu1 %v1889_v39, %s12924_s29 }
 0xb1a   :  { %1907 = vperm.xlu1 %9255, %v10584_v52  }
 0xb1e   :  { %9256 = vset.pattern.permute.xlu1 %v12930_v59 }
 0xb24   :  { %v1903_v40 = vpop.permute.xlu0 %1902 }
 0xb88   :  { %v1892_v32 = vpop.permute.xlu1 %1891 }
 0xb89   :  { %v10629_v36 = vadd.f32 %v1892_v32, %v1884_v54  ;;  %v10690_v54 = vpop.f32.mrb[7].mxu0 }
 0xb8a   :  { %13014 = vst [vmem:[#allocation8_spill] sm:$0xff] %v10690_v54  ;;  %v10692_v32 = vpop.f32.mrb[8].mxu0 }
 0xb8b   :  { %9384 = vtanh.f32 %v10629_v36  ;;  %13015 = vst [vmem:[#allocation9_spill] sm:$0xff] %v10692_v32  ;;  %v10694_v22 = vpop.f32.mrb[9].mxu0 }
 0xb8c   :  { %13016 = vst [vmem:[#allocation10_spill] sm:$0xff] %v10694_v22  ;;  %v10696_v11 = vpop.f32.mrb[10].mxu0 }
 0xb8d   :  { %13017 = vst [vmem:[#allocation11_spill] sm:$0xff] %v10696_v11 }
 0xb95   :  { %v9385_v3 = vpop.eup %9384 }
 0xb96   :  { %1897 = vrot.lane.b32.xlu1 %v9385_v3, %s9744_s8 }
 0xb99   :  { %v1908_v21 = vpop.permute.xlu1 %1907 }
 0xb9a   :  { %v1910_v25 = vmul.f32 %v1908_v21, %v10609_v23 }
 0xc08   :  { %v1898_v20 = vpop.permute.xlu1 %1897 }
 0xc09   :  { %v1900_v0 = vmul.f32 %v9383_v30, %v1898_v20  ;;  %v10698_v30 = vpop.f32.mrb[11].mxu0 }
 0xc0a   :  { %13018 = vst [vmem:[#allocation12_spill] sm:$0xff] %v10698_v30  ;;  %v10700_v10 = vpop.f32.mrb[12].mxu0 }
 0xc0b   :  { %v10684_v39 = vmul.f32 %v1903_v40, %v1900_v0  ;;  %13019 = vst [vmem:[#allocation13_spill] sm:$0xff] %v10700_v10  ;;  %v10702_v23 = vpop.f32.mrb[13].mxu0 }
 0xc0c   :  { %13020 = vst [vmem:[#allocation14_spill] sm:$0xff] %v10702_v23  ;;  %v10704_v44 = vpop.f32.mrb[14].mxu0 }
 0xc0d   :  { %v1911_v9 = vadd.f32 %v1910_v25, %v10684_v39  ;;  %13021 = vst [vmem:[#allocation15_spill] sm:$0xff] %v10704_v44  ;;  %v10706_v43 = vpop.f32.mrb[15].mxu0  ;;  %v119_v44 = vld [vmem:[%s12895_s16 + $0x18] sm:$0xff] }
 0xc0e   :  { %13022 = vst [vmem:[#allocation16_spill] sm:$0xff] %v10706_v43  ;;  %v10708_v3 = vpop.f32.mrb[16].mxu0 }
 0xc0f   :  { %1916 = vrot.lane.b32.xlu0 %v1911_v9, %s13012_s4  ;;  %13023 = vst [vmem:[#allocation17_spill] sm:$0xff] %v10708_v3  ;;  %v10710_v45 = vpop.f32.mrb[17].mxu0 }
 0xc10   :  { %13024 = vst [vmem:[#allocation18_spill] sm:$0xff] %v10710_v45 }
 0xc81   :  { %v1917_v55 = vpop.permute.xlu0 %1916 }
 0xc82   :  { %8722 = vmatmul.mubr.msk.f32.vlgmr.msra.gmra.mrb[18].mxu0 %vm1493_vm10, %v1917_v55 }
 0xc83   :  { %9083 = vmatpush3.bf16.msra.mxu0 %v10506_v34  ;;  %8743 = vmatprep.mubr.msk.f32.mxu0 %vm9741_vm9, %v12932_v56 }
 0xc84   :  { %9084 = vmatprep.subr.bf16.mxu0 %v12934_v33 }
 0xc87   :  { %9086 = vmatpush3.bf16.msra.mxu0 %v10518_v63 }
 0xd55   :  { %v1986_v12 = vpop.f32.mrb[18].mxu0 }
 0xd56   :  { %v1990_v16 = vadd.f32 %v1986_v12, %v10573_v2  ;;  %v8723_v51 = vpop.f32.mrb[19].mxu0  ;;  %v1913_v2 = vmul.f32 %v1908_v21, %v10626_v49  ;;  %v1912_v12 = vmul.f32 %v1903_v40, %v10629_v36  ;;  %v12936_v36 = vmov 4  }
 0xd58   :  { %9386 = vtanh.f32 %v1990_v16  ;;  %v8337_v20 = vmul.f32 -1.442695, %v1990_v16  ;;  %v1914_v51 = vadd.f32 %v1913_v2, %v1912_v12 }
 0xd5a   :  { %9388 = vpow2.f32 %v8337_v20 }
 0xd62   :  { %v9387_v50 = vpop.eup %9386 }
 0xd63   :  { %2000 = vrot.lane.b32.xlu1 %v9387_v50, %s9744_s8 }
 0xd64   :  { %v9389_v0 = vpop.eup %9388 }
 0xd65   :  { %v1994_v25 = vadd.f32 1.0, %v9389_v0 }
 0xd67   :  { %2016 = vperm.xlu1 %9256, %v10579_v42   ;;  %9390 = vrcp.f32 %v1994_v25 }
 0xd6b   :  { %9259 = vset.pattern.permute.xlu1 %v12936_v36 }
 0xd71   :  { %v9391_v55 = vpop.eup %9390 }
 0xd72   :  { %v1998_v50 = vmul.f32 %v9391_v55, %v1914_v51 }
 0xdd5   :  { %v2001_v15 = vpop.permute.xlu1 %2000 }
 0xdd6   :  { %v2003_v35 = vmul.f32 %v9391_v55, %v2001_v15 }
 0xdd8   :  { %2005 = vrot.lane.b32.xlu0 %v2003_v35, %s13012_s4 }
 0xddc   :  { %2021 = vperm.xlu0 %9257, %v10584_v52  }
 0xde0   :  { %9258 = vset.pattern.permute.xlu0 %v12936_v36 }
 0xde6   :  { %v2017_v20 = vpop.permute.xlu1 %2016 }
 0xe4a   :  { %v2006_v59 = vpop.permute.xlu0 %2005 }
 0xe4b   :  { %v2008_v56 = vadd.f32 %v2006_v59, %v1998_v50 }
 0xe4d   :  { %9392 = vtanh.f32 %v2008_v56 }
 0xe57   :  { %v9393_v16 = vpop.eup %9392 }
 0xe58   :  { %2011 = vrot.lane.b32.xlu1 %v9393_v16, %s9744_s8 }
 0xe5b   :  { %v2022_v0 = vpop.permute.xlu0 %2021 }
 0xe5c   :  { %v2024_v33 = vmul.f32 %v2022_v0, %v1911_v9 }
 0xeca   :  { %v2012_v25 = vpop.permute.xlu1 %2011 }
 0xecb   :  { %v2014_v15 = vmul.f32 %v9391_v55, %v2012_v25 }
 0xecd   :  { %v10728_v35 = vmul.f32 %v2017_v20, %v2014_v15  ;;  %v2026_v15 = vmul.f32 %v2017_v20, %v2008_v56 }
 0xecf   :  { %v2025_v3 = vadd.f32 %v2024_v33, %v10728_v35  ;;  %v13025_v33 = vmov 0  }
 0xed1   :  { %2030 = vrot.lane.b32.xlu1 %v2025_v3, %s13012_s4 }
 0xf43   :  { %v2031_v49 = vpop.permute.xlu1 %2030 }
 0xf44   :  { %8733 = vmatmul.mubr.msk.f32.vlgmr.msra.gmra.mrb[8].mxu1 %vm1493_vm10, %v2031_v49 }
0x1017   :  { %v2100_v21 = vpop.f32.mrb[8].mxu1 }
0x1018   :  { %v2104_v40 = vadd.f32 %v2100_v21, %v10569_v29  ;;  %v8734_v59 = vpop.f32.mrb[9].mxu1  ;;  %v2027_v29 = vmul.f32 %v2022_v0, %v1914_v51  ;;  %v9750_v51 = vmov 1966171168  }
0x1019   :  { %v2411_v20 = vunpack.c.l.s4 %v9750_v51 }
0x101a   :  { %9394 = vtanh.f32 %v2104_v40  ;;  %v8339_v55 = vmul.f32 -1.442695, %v2104_v40  ;;  %v10741_v49 = vadd.f32 %v2027_v29, %v2026_v15  ;;  %v116_v40 = vld [vmem:[%s12895_s16] sm:$0xff]  ;;  %v10765_v29 = vld.sshfl [vmem:[%s12896_s1 + $0x8] sm:$0xff pattern:$0x75316420] }
0x101b   :  { %v2412_v0 = vunpack.c.0.s8 %v2411_v20  ;;  %13028 = vst [vmem:[#allocation21_spill] sm:$0xff] %v10765_v29 }
0x101c   :  { %9396 = vpow2.f32 %v8339_v55  ;;  %v117_v55 = vld [vmem:[%s12895_s16 + $0x8] sm:$0xff] }
0x1024   :  { %v9395_v9 = vpop.eup %9394 }
0x1025   :  { %2114 = vrot.lane.b32.xlu0 %v9395_v9, %s9744_s8 }
0x1026   :  { %v9397_v2 = vpop.eup %9396 }
0x1027   :  { %v2108_v12 = vadd.f32 1.0, %v9397_v2  ;;  %v10753_v2 = vpack.c.bf16 %v117_v55, %v116_v40  ;;  %v5397_v55 = vcombine.high %v10765_v29, %v10765_v29 }
0x1029   :  { %2130 = vperm.xlu0 %9258, %v10579_v42   ;;  %9398 = vrcp.f32 %v2108_v12  ;;  %13026 = vst [vmem:[#allocation19_spill] sm:$0xff] %v10753_v2  ;;  %9096 = vmatprep.subr.bf16.mxu0 %v10753_v2 }
0x102d   :  { %9261 = vset.pattern.permute.xlu0 %v13025_v33 }
0x1033   :  { %v9399_v50 = vpop.eup %9398 }
0x1034   :  { %v2112_v21 = vmul.f32 %v9399_v50, %v10741_v49 }
0x1097   :  { %v2115_v16 = vpop.permute.xlu0 %2114 }
0x1098   :  { %v2117_v25 = vmul.f32 %v9399_v50, %v2115_v16  ;;  %v10760_v16 = vsub.s32 %v2412_v0, %v9889_v1 }
0x109a   :  { %2119 = vrot.lane.b32.xlu1 %v2117_v25, %s13012_s4  ;;  %13027 = vst [vmem:[#allocation20_spill] sm:$0xff] %v10760_v16 }
0x109e   :  { %2135 = vperm.xlu1 %9259, %v10584_v52  }
0x110c   :  { %v2120_v59 = vpop.permute.xlu1 %2119 }
0x110d   :  { %v10744_v9 = vadd.f32 %v2120_v59, %v2112_v21  ;;  %v10767_v21 = vpop.permute.xlu0 %2130 }
0x110f   :  { %9400 = vtanh.f32 %v10744_v9 }
0x1119   :  { %v9401_v56 = vpop.eup %9400 }
0x111a   :  { %2125 = vrot.lane.b32.xlu1 %v9401_v56, %s9744_s8  ;;  %v5419_v56 = vrot.slane %v5397_v55, %v10760_v16 }
0x111c   :  { %v5429_v51 = vcombine.high %v5419_v56, %v5419_v56 }
0x111d   :  { %v10757_v12 = vpop.permute.xlu1 %2135 }
0x111e   :  { %v2138_v59 = vmul.f32 %v10757_v12, %v2025_v3  ;;  %v91_v3 = vld [vmem:[%s12897_s5 + $0x8] sm:$0xff]  ;;  %v5446_v0 = vrot.slane %v5429_v51, %v9895_v4  ;;  %v90_v51 = vld [vmem:[%s12897_s5] sm:$0xff] }
0x118c   :  { %v2126_v25 = vpop.permute.xlu1 %2125 }
0x118d   :  { %v2128_v15 = vmul.f32 %v9399_v50, %v2126_v25  ;;  %v5438_v50 = vrot.slane %v5419_v56, %v9895_v4  ;;  %v93_v25 = vld [vmem:[%s12897_s5 + $0x18] sm:$0xff] }
0x118f   :  { %v10771_v40 = vmul.f32 %v10767_v21, %v2128_v15  ;;  %v10785_v20 = vmul.f32 %v5438_v50, %v91_v3  ;;  %v10791_v15 = vmul.f32 %v5446_v0, %v93_v25  ;;  %v118_v0 = vld [vmem:[%s12895_s16 + $0x10] sm:$0xff] }
0x1190   :  { %v10810_v23 = vpack.c.bf16 %v119_v44, %v118_v0  ;;  %v92_v44 = vld [vmem:[%s12897_s5 + $0x10] sm:$0xff]  ;;  %v13032_v0 = vmov 0.0|0.0  }
0x1191   :  { %v10776_v1 = vadd.f32 %v2138_v59, %v10771_v40  ;;  %13029 = vst [vmem:[#allocation22_spill] sm:$0xff] %v10785_v20  ;;  %13030 = vst [vmem:[#allocation23_spill] sm:$0xff] %v10791_v15  ;;  %v2407_v59 = vld [vmem:[%s12896_s1] sm:$0xff] }
0x1192   :  { %v2416_v55 = vrot.slane %v2407_v59, %v10760_v16  ;;  %v2409_v45 = vcombine.high %v2407_v59, %v2407_v59  ;;  %13031 = vst [vmem:[#allocation24_spill] sm:$0xff] %v10810_v23 }
0x1193   :  { %2144 = vrot.lane.b32.xlu0 %v10776_v1, %s13012_s4 }
0x1194   :  { %v2432_v56 = vrot.slane %v2416_v55, %v10760_v16  ;;  %v2424_v36 = vcombine.high %v2416_v55, %v2416_v55  ;;  %v2423_v10 = vrot.slane %v2409_v45, %v10760_v16 }
0x1196   :  { %v2461_v50 = vrot.slane %v2432_v56, %v9895_v4  ;;  %v2446_v43 = vrot.slane %v2424_v36, %v10760_v16  ;;  %v2454_v59 = vcombine.high %v2432_v56, %v2432_v56  ;;  %v2425_v11 = vcombine.high %v2423_v10, %v2423_v10 }
0x1197   :  { %v2439_v36 = vrot.slane %v2423_v10, %v10760_v16  ;;  %v94_v10 = vld [vmem:[%s12897_s5 + $0x20] sm:$0xff] }
0x1198   :  { %v2498_v55 = vmul.f32 %v2461_v50, %v90_v51  ;;  %v2465_v15 = vrot.slane %v2446_v43, %v9895_v4  ;;  %v2456_v29 = vcombine.high %v2446_v43, %v2446_v43  ;;  %v2469_v30 = vrot.slane %v2454_v59, %v9895_v4  ;;  %v96_v59 = vld [vmem:[%s12897_s5 + $0x30] sm:$0xff] }
0x1199   :  { %v2453_v43 = vrot.slane %v2425_v11, %v10760_v16  ;;  %v2477_v50 = vrot.slane %v2439_v36, %v9895_v4  ;;  %v2455_v51 = vcombine.high %v2439_v36, %v2439_v36 }
0x119a   :  { %v2499_v45 = vmul.f32 %v2465_v15, %v91_v3  ;;  %v2500_v56 = vmul.f32 %v2469_v30, %v92_v44  ;;  %v95_v30 = vld [vmem:[%s12897_s5 + $0x28] sm:$0xff] }
0x119b   :  { %v2481_v3 = vrot.slane %v2453_v43, %v9895_v4  ;;  %v2502_v11 = vmul.f32 %v2477_v50, %v94_v10  ;;  %v2485_v15 = vrot.slane %v2455_v51, %v9895_v4 }
0x119d   :  { %v2504_v44 = vmul.f32 %v2485_v15, %v96_v59 }
0x1205   :  { %v2145_v20 = vpop.permute.xlu0 %2144 }
0x1206   :  { %8744 = vmatmul.mubr.msk.f32.vlgmr.msra.gmra.mrb[20].mxu0 %vm1493_vm10, %v2145_v20  ;;  %v2473_v20 = vrot.slane %v2456_v29, %v9895_v4  ;;  %v2457_v29 = vcombine.high %v2453_v43, %v2453_v43  ;;  %v13033_v43 = vmov 0.0  }
0x1207   :  { %9098 = vmatpush3.bf16.msra.mxu0 %v10753_v2  ;;  %8771 = vmatprep.mubr.msk.f32.mxu0 %vm1493_vm10, %v2498_v55 }
0x1208   :  { %9100 = vmatprep.subr.bf16.mxu0 %v10810_v23  ;;  %v2501_v55 = vmul.f32 %v2473_v20, %v93_v25  ;;  %v2503_v25 = vmul.f32 %v2481_v3, %v95_v30  ;;  %v2489_v36 = vrot.slane %v2457_v29, %v9895_v4 }
0x120b   :  { %9102 = vmatpush3.bf16.msra.mxu0 %v10810_v23 }
0x120c   :  { %9111 = vmatprep.subr.bf16.mxu0 %v13032_v0 }
0x120e   :  { %8772 = vmatmul.mubr.msk.f32.vlgmr.msra.gmra.mrb[22].mxu0 %vm1493_vm10, %v2499_v45  ;;  %v97_v45 = vld [vmem:[%s12897_s5 + $0x38] sm:$0xff] }
0x120f   :  { %8774 = vmatprep.mubr.msk.f32.mxu0 %vm1493_vm10, %v2500_v56  ;;  %9113 = vmatpush3.bf16.msra.mxu0 %v10445_v58  ;;  %v2505_v20 = vmul.f32 %v2489_v36, %v97_v45  ;;  %v12939_v56 = vmov 5  }
0x1210   :  { %9114 = vmatprep.subr.bf16.mxu0 %v13032_v0  ;;  %9260 = vset.pattern.permute.xlu1 %v12939_v56 }
0x1212   :  { %8775 = vmatmul.mubr.msk.f32.gmra.mrb[24].mxu0 %vm1493_vm10, %v2501_v55 }
0x1213   :  { %8777 = vmatprep.mubr.msk.f32.mxu0 %vm1493_vm10, %v2502_v11  ;;  %9116 = vmatpush3.bf16.msra.mxu0 %v10457_v62 }
0x1214   :  { %9117 = vmatprep.subr.bf16.mxu0 %v13032_v0 }
0x1216   :  { %8778 = vmatmul.mubr.msk.f32.gmra.mrb[26].mxu0 %vm1493_vm10, %v2503_v25 }
0x1217   :  { %8780 = vmatprep.mubr.msk.f32.mxu0 %vm1493_vm10, %v2504_v44 }
0x121a   :  { %8781 = vmatmul.mubr.msk.f32.gmra.mrb[28].mxu0 %vm1493_vm10, %v2505_v20 }
0x121b   :  { %8816 = vmatprep.mubr.msk.f32.mxu0 %vm9741_vm9, %v13033_v43 }
0x12d9   :  { %v2214_v50 = vpop.f32.mrb[20].mxu0 }
0x12da   :  { %v2218_v51 = vadd.f32 %v2214_v50, %v10567_v47  ;;  %v8745_v10 = vpop.f32.mrb[21].mxu0 }
0x12dc   :  { %9402 = vtanh.f32 %v2218_v51  ;;  %v8341_v36 = vmul.f32 -1.442695, %v2218_v51 }
0x12de   :  { %9404 = vpow2.f32 %v8341_v36  ;;  %v2140_v36 = vmul.f32 %v10767_v21, %v10744_v9 }
0x12e1   :  { %v10857_v55 = vpop.f32.mrb[22].mxu0 }
0x12e2   :  { %v10859_v3 = vpop.f32.mrb[23].mxu0 }
0x12e5   :  { %v10861_v29 = vpop.f32.mrb[24].mxu0 }
0x12e6   :  { %v9403_v11 = vpop.eup %9402  ;;  %v10863_v30 = vpop.f32.mrb[25].mxu0 }
0x12e7   :  { %2228 = vrot.lane.b32.xlu1 %v9403_v11, %s9744_s8  ;;  %v2141_v11 = vmul.f32 %v10757_v12, %v10741_v49  ;;  %v114_v49 = vld [vmem:[%s12898_s14 + $0x18] sm:$0xff] }
0x12e8   :  { %v9405_v44 = vpop.eup %9404 }
0x12e9   :  { %v10866_v15 = vpop.f32.mrb[26].mxu0  ;;  %v2222_v45 = vadd.f32 1.0, %v9405_v44  ;;  %v10900_v44 = vadd.f32 %v2141_v11, %v2140_v36  ;;  %v121_v36 = vld [vmem:[%s12899_s18] sm:$0xff] }
0x12ea   :  { %v10868_v59 = vpop.f32.mrb[27].mxu0 }
0x12eb   :  { %2244 = vperm.xlu1 %9260, %v10579_v42   ;;  %9406 = vrcp.f32 %v2222_v45 }
0x12ed   :  { %v10871_v47 = vpop.f32.mrb[28].mxu0 }
0x12ee   :  { %v10873_v25 = vpop.f32.mrb[29].mxu0 }
0x12ef   :  { %2269 = vrot.lane.b32.xlu1 %v10588_v61, %s13012_s4  ;;  %v111_v61 = vld [vmem:[%s12898_s14] sm:$0xff] }
0x12f0   :  { %9262 = vset.pattern.permute.xlu1 %v13025_v33 }
0x12f3   :  { %2273 = vrot.lane.b32.xlu1 %v10684_v39, %s13012_s4  ;;  %v112_v39 = vld [vmem:[%s12898_s14 + $0x8] sm:$0xff] }
0x12f4   :  { %v10889_v10 = vpack.c.bf16 %v112_v39, %v111_v61  ;;  %v113_v61 = vld [vmem:[%s12898_s14 + $0x10] sm:$0xff] }
0x12f5   :  { %v9407_v42 = vpop.eup %9406  ;;  %v10912_v12 = vpack.c.bf16 %v114_v49, %v113_v61  ;;  %v8342_v61 = vld [vmem:[%s12901_s15] ss:$0 sm:$0xff] }
0x12f6   :  { %13034 = vst [vmem:[#allocation25_spill] sm:$0xff] %v10889_v10  ;;  %9088 = vmatprep.subr.bf16.mxu1 %v10889_v10  ;;  %v2226_v45 = vmul.f32 %v9407_v42, %v10900_v44 }
0x12f7   :  { %2277 = vrot.lane.b32.xlu1 %v10771_v40, %s13012_s4  ;;  %9090 = vmatpush3.bf16.msra.mxu1 %v10889_v10  ;;  %13035 = vst [vmem:[#allocation26_spill] sm:$0xff] %v10912_v12 }
0x12f8   :  { %9092 = vmatprep.subr.bf16.mxu1 %v10912_v12 }
0x12fb   :  { %9094 = vmatpush3.bf16.msra.mxu1 %v10912_v12 }
0x12fc   :  { %8783 = vmatprep.subr.mxu1 %v13033_v43 }
0x1359   :  { %v2229_v20 = vpop.permute.xlu1 %2228 }
0x135a   :  { %v2231_v50 = vmul.f32 %v9407_v42, %v2229_v20 }
0x135c   :  { %2233 = vrot.lane.b32.xlu0 %v2231_v50, %s13012_s4 }
0x136a   :  { %v10893_v40 = vpop.permute.xlu1 %2244 }
0x136e   :  { %v2270_v51 = vpop.permute.xlu1 %2269 }
0x136f   :  { %8754 = vmatprep.mubr.msk.f32.mxu1 %vm1493_vm10, %v2270_v51 }
0x1372   :  { %v2274_v51 = vpop.permute.xlu1 %2273 }
0x13ce   :  { %v2234_v20 = vpop.permute.xlu0 %2233 }
0x13cf   :  { %v10903_v50 = vadd.f32 %v2234_v20, %v2226_v45  ;;  %v2641_v20 = vld [vmem:[%s12900_s2] sm:$0xff] }
0x13d1   :  { %9408 = vtanh.f32 %v10903_v50 }
0x13db   :  { %v9409_v9 = vpop.eup %9408 }
0x13dc   :  { %2239 = vrot.lane.b32.xlu0 %v9409_v9, %s9744_s8 }
0x13e0   :  { %2271 = vrot.lane.b32.xlu0 %v10606_v60, %s13012_s4 }
0x13e4   :  { %2275 = vrot.lane.b32.xlu0 %v10728_v35, %s13012_s4  ;;  %v2278_v35 = vpop.permute.xlu1 %2277 }
0x144e   :  { %v2240_v21 = vpop.permute.xlu0 %2239 }
0x144f   :  { %v2242_v39 = vmul.f32 %v9407_v42, %v2240_v21 }
0x1451   :  { %v10923_v11 = vmul.f32 %v10893_v40, %v2242_v39 }
0x1452   :  { %v2272_v45 = vpop.permute.xlu0 %2271 }
0x1453   :  { %2279 = vrot.lane.b32.xlu0 %v10923_v11, %s13012_s4  ;;  %8755 = vmatmul.mubr.msk.f32.vlgmr.msra.gmra.mrb[10].mxu1 %vm1493_vm10, %v2272_v45  ;;  %v125_v45 = vld [vmem:[%s12903_s20 + $0x10] sm:$0xff] }
0x1454   :  { %8757 = vmatprep.mubr.msk.f32.mxu1 %vm1493_vm10, %v2274_v51  ;;  %8784 = vmatpush3.msra.mxu1 %v121_v36  ;;  %v123_v51 = vld [vmem:[%s12903_s20] sm:$0xff]  ;;  %v124_v36 = vld [vmem:[%s12903_s20 + $0x8] sm:$0xff] }
0x1456   :  { %v2276_v60 = vpop.permute.xlu0 %2275 }
0x1457   :  { %8758 = vmatmul.mubr.msk.f32.gmra.mrb[12].mxu1 %vm1493_vm10, %v2276_v60 }
0x1458   :  { %8760 = vmatprep.mubr.msk.f32.mxu1 %vm1493_vm10, %v2278_v35  ;;  %v10959_v35 = vpack.c.bf16 %v124_v36, %v123_v51 }
0x145a   :  { %13036 = vst [vmem:[#allocation27_spill] sm:$0xff] %v10959_v35  ;;  %9104 = vmatprep.subr.bf16.mxu1 %v10959_v35 }
0x14c5   :  { %v2280_v42 = vpop.permute.xlu0 %2279 }
0x14c6   :  { %8761 = vmatmul.mubr.msk.f32.gmra.mrb[14].mxu1 %vm1493_vm10, %v2280_v42  ;;  %v126_v42 = vld [vmem:[%s12903_s20 + $0x18] sm:$0xff] }
0x14c7   :  { %8785 = vmatprep.mubr.msk.f32.mxu1 %vm9741_vm9, %v13033_v43 }
0x14ca   :  { %8786 = vmatmul.mubr.msk.f32.vlgmr.msra.gmra.mrb[16].mxu1 %vm643_vm8, %v2641_v20 }
0x14cb   :  { %9106 = vmatpush3.bf16.msra.mxu1 %v10959_v35 }
0x1526   :  { %v8756_v49 = vpop.f32.mrb[10].mxu1 }
0x1527   :  { %v2365_v9 = vadd.f32 %v8756_v49, %v8342_v61  ;;  %v2359_v21 = vpop.f32.mrb[11].mxu1 }
0x1528   :  { %v2360_v39 = vadd.f32 %v8342_v61, %v2359_v21 }
0x1529   :  { %2389 = vst [vmem:[%s12902_s24 + $0x8] sm:$0xff] %v2365_v9  ;;  %v10964_v9 = vpack.c.bf16 %v126_v42, %v125_v45  ;;  %v8349_v45 = vld [vmem:[%s12904_s17] ss:$0 sm:$0xff] }
0x152a   :  { %2388 = vst [vmem:[%s12902_s24] sm:$0xff] %v2360_v39  ;;  %v8759_v60 = vpop.f32.mrb[12].mxu1  ;;  %v8358_v42 = vld [vmem:[%s12905_s19] ss:$0 sm:$0xff]  ;;  %v2603_v56 = vadd.f32 %v8349_v45, %v10859_v3 }
0x152b   :  { %v2375_v20 = vadd.f32 %v8759_v60, %v8342_v61  ;;  %v2369_v49 = vpop.f32.mrb[13].mxu1  ;;  %13037 = vst [vmem:[#allocation28_spill] sm:$0xff] %v10964_v9  ;;  %9108 = vmatprep.subr.bf16.mxu1 %v10964_v9 }
0x152c   :  { %v2370_v21 = vadd.f32 %v8342_v61, %v2369_v49  ;;  %9110 = vmatpush3.bf16.msra.mxu1 %v10964_v9  ;;  %v2608_v49 = vadd.f32 %v10857_v55, %v8349_v45 }
0x152d   :  { %2391 = vst [vmem:[%s12902_s24 + $0x18] sm:$0xff] %v2375_v20  ;;  %9123 = vmatprep.subr.bf16.mxu1 %v13032_v0 }
0x152e   :  { %2390 = vst [vmem:[%s12902_s24 + $0x10] sm:$0xff] %v2370_v21  ;;  %v2722_v62 = vmul.f32 %v2608_v49, %v9978_v38 }
0x1599   :  { %v8762_v39 = vpop.f32.mrb[14].mxu1 }
0x159a   :  { %v2385_v51 = vadd.f32 %v8762_v39, %v8342_v61  ;;  %v2379_v36 = vpop.f32.mrb[15].mxu1 }
0x159b   :  { %v2380_v60 = vadd.f32 %v8342_v61, %v2379_v36  ;;  %v2618_v61 = vadd.f32 %v10861_v29, %v8349_v45  ;;  %v2613_v36 = vadd.f32 %v8349_v45, %v10863_v30  ;;  %v2623_v30 = vadd.f32 %v8349_v45, %v10868_v59 }
0x159c   :  { %2393 = vst [vmem:[%s12902_s24 + $0x28] sm:$0xff] %v2385_v51  ;;  %v2628_v51 = vadd.f32 %v10866_v15, %v8349_v45 }
0x159d   :  { %2392 = vst [vmem:[%s12902_s24 + $0x20] sm:$0xff] %v2380_v60  ;;  %v2717_v20 = vpop.f32.mrb[16].mxu1  ;;  %v2724_v3 = vmul.f32 %v2618_v61, %v9976_v37  ;;  %v2723_v29 = vmul.f32 %v2613_v36, %v9943_v26  ;;  %v2725_v49 = vmul.f32 %v2623_v30, %v10002_v48 }
0x159e   :  { %v2718_v21 = vadd.f32 %v8358_v42, %v2717_v20  ;;  %v8787_v39 = vpop.f32.mrb[17].mxu1  ;;  %v2721_v42 = vmul.f32 %v2603_v56, %v9945_v27  ;;  %v2726_v38 = vmul.f32 %v2628_v51, %v10008_v53 }
0x15a0   :  { %v2730_v9 = vcombine.high %v2718_v21, %v2718_v21  ;;  %v2737_v35 = vrot.slane %v2718_v21, %v10760_v16 }
0x15a2   :  { %v2744_v60 = vrot.slane %v2730_v9, %v10760_v16  ;;  %v2745_v58 = vcombine.high %v2737_v35, %v2737_v35  ;;  %v2753_v55 = vrot.slane %v2737_v35, %v10760_v16  ;;  %v2638_v9 = vadd.f32 %v10871_v47, %v8349_v45 }
0x15a3   :  { %v2633_v35 = vadd.f32 %v8349_v45, %v10873_v25 }
0x15a4   :  { %v2746_v20 = vcombine.high %v2744_v60, %v2744_v60  ;;  %v2760_v21 = vrot.slane %v2744_v60, %v10760_v16  ;;  %v2767_v15 = vrot.slane %v2745_v58, %v10760_v16  ;;  %v2775_v39 = vcombine.high %v2753_v55, %v2753_v55 }
0x15a5   :  { %v2782_v27 = vrot.slane %v2753_v55, %v9895_v4  ;;  %v2727_v45 = vmul.f32 %v2633_v35, %v10037_v19  ;;  %v2728_v48 = vmul.f32 %v2638_v9, %v10042_v24  ;;  %v32_v24 = vstv %s12906_s23  ;;  %s13050_s23 = smov 16  }
0x15a6   :  { %v2774_v37 = vrot.slane %v2746_v20, %v10760_v16  ;;  %v2776_v56 = vcombine.high %v2760_v21, %v2760_v21  ;;  %v2777_v26 = vcombine.high %v2767_v15, %v2767_v15  ;;  %v2786_v59 = vrot.slane %v2767_v15, %v9895_v4  ;;  %33 = vst [vmem:[#allocation2] sm:$0x1] %v32_v24 }
0x15a7   :  { %v2790_v61 = vrot.slane %v2775_v39, %v9895_v4  ;;  %v2798_v58 = vrot.slane %v2760_v21, %v9895_v4  ;;  %v2819_v36 = vadd.f32 %v2782_v27, %v2721_v42 }
0x15a8   :  { %v2778_v53 = vcombine.high %v2774_v37, %v2774_v37  ;;  %v2820_v51 = vadd.f32 %v2786_v59, %v2722_v62  ;;  %v2794_v47 = vrot.slane %v2777_v26, %v9895_v4  ;;  %v2802_v25 = vrot.slane %v2774_v37, %v9895_v4 }
0x15a9   :  { %8796 = vmatprep.mubr.msk.f32.mxu1 %vm1493_vm10, %v2819_v36  ;;  %v2821_v60 = vadd.f32 %v2790_v61, %v2723_v29  ;;  %v2823_v55 = vadd.f32 %v2798_v58, %v2725_v49  ;;  %v2806_v20 = vrot.slane %v2776_v56, %v9895_v4 }
0x15aa   :  { %8797 = vmatmul.mubr.msk.f32.vlgmr.msra.gmra.mrb[18].mxu1 %vm1493_vm10, %v2820_v51  ;;  %v2822_v30 = vadd.f32 %v2794_v47, %v2724_v3  ;;  %v2824_v42 = vadd.f32 %v2802_v25, %v2726_v38  ;;  %v2810_v62 = vrot.slane %v2778_v53, %v9895_v4  ;;  %v8360_v3 = vld [vmem:[%s12907_s21] ss:$0 sm:$0xff] }
0x15ab   :  { %8799 = vmatprep.mubr.msk.f32.mxu1 %vm1493_vm10, %v2821_v60  ;;  %v2825_v21 = vadd.f32 %v2806_v20, %v2727_v45  ;;  %9125 = vmatpush3.bf16.msra.mxu1 %v10506_v34  ;;  %v8369_v38 = vld [vmem:[%s12908_s22] ss:$0 sm:$0xff] }
0x15ac   :  { %v2826_v19 = vadd.f32 %v2810_v62, %v2728_v48  ;;  %9126 = vmatprep.subr.bf16.mxu1 %v13032_v0 }
0x15ae   :  { %8800 = vmatmul.mubr.msk.f32.gmra.mrb[20].mxu1 %vm1493_vm10, %v2822_v30 }
0x15af   :  { %8802 = vmatprep.mubr.msk.f32.mxu1 %vm1493_vm10, %v2823_v55  ;;  %9128 = vmatpush3.bf16.msra.mxu1 %v10518_v63 }
0x15b0   :  { %9135 = vmatprep.subr.bf16.mxu1 %v13032_v0 }
0x15b2   :  { %8803 = vmatmul.mubr.msk.f32.gmra.mrb[22].mxu1 %vm1493_vm10, %v2824_v42 }
0x15b3   :  { %8805 = vmatprep.mubr.msk.f32.mxu1 %vm1493_vm10, %v2825_v21 }
0x15b6   :  { %8806 = vmatmul.mubr.msk.f32.gmra.mrb[24].mxu1 %vm1493_vm10, %v2826_v19 }
0x15b7   :  { %8838 = vmatprep.mubr.msk.f32.mxu1 %vm9741_vm9, %v13033_v43 }
0x167d   :  { %v8798_v29 = vpop.f32.mrb[18].mxu1 }
0x167e   :  { %v2929_v15 = vadd.f32 %v8798_v29, %v8360_v3  ;;  %v2923_v39 = vpop.f32.mrb[19].mxu1 }
0x167f   :  { %v2924_v9 = vadd.f32 %v8360_v3, %v2923_v39 }
0x1680   :  { %v2963_v35 = vmax.f32 %v2929_v15, 0.0 }
0x1681   :  { %v2962_v27 = vmax.f32 %v2924_v9, 0.0  ;;  %v8801_v37 = vpop.f32.mrb[20].mxu1 }
0x1682   :  { %v2977_v56 = vmul.f32 %v8369_v38, %v2963_v35  ;;  %v2939_v26 = vadd.f32 %v8801_v37, %v8360_v3  ;;  %v2933_v59 = vpop.f32.mrb[21].mxu1 }
0x1683   :  { %v2976_v49 = vmul.f32 %v8369_v38, %v2962_v27  ;;  %v2934_v61 = vadd.f32 %v8360_v3, %v2933_v59 }
0x1684   :  { %v2965_v58 = vmax.f32 %v2939_v26, 0.0  ;;  %v2987_v36 = vsel %vm150_vm0, %v2977_v56, 0.0 }
0x1685   :  { %v2964_v53 = vmax.f32 %v2934_v61, 0.0  ;;  %2988 = vadd.xlane.f32.xlu0 %v2987_v36  ;;  %v8804_v51 = vpop.f32.mrb[22].mxu1  ;;  %v2984_v47 = vsel %vm150_vm0, %v2976_v49, 0.0  ;;  %v8370_v61 = vld [vmem:[#allocation2] ss:$0 sm:$0xff] }
0x1686   :  { %v2979_v25 = vmul.f32 %v8369_v38, %v2965_v58  ;;  %v2949_v45 = vadd.f32 %v8804_v51, %v8360_v3  ;;  %v2943_v60 = vpop.f32.mrb[23].mxu1  ;;  %2985 = vadd.xlane.f32.xlu1 %v2984_v47 }
0x1687   :  { %v2978_v55 = vmul.f32 %v8369_v38, %v2964_v53  ;;  %v2944_v20 = vadd.f32 %v8360_v3, %v2943_v60 }
0x1688   :  { %v2967_v48 = vmax.f32 %v2949_v45, 0.0  ;;  %v2993_v30 = vsel %vm150_vm0, %v2979_v25, 0.0 }
0x1689   :  { %v2966_v42 = vmax.f32 %v2944_v20, 0.0  ;;  %v8807_v62 = vpop.f32.mrb[24].mxu1  ;;  %v2990_v21 = vsel %vm150_vm0, %v2978_v55, 0.0 }
0x168a   :  { %v2981_v19 = vmul.f32 %v8369_v38, %v2967_v48  ;;  %v2959_v24 = vadd.f32 %v8807_v62, %v8360_v3  ;;  %v2953_v29 = vpop.f32.mrb[25].mxu1  ;;  %2991 = vadd.xlane.f32.xlu0 %v2990_v21  ;;  %2994 = vadd.xlane.f32.xlu1 %v2993_v30 }
0x168b   :  { %v2980_v15 = vmul.f32 %v8369_v38, %v2966_v42  ;;  %v2954_v39 = vadd.f32 %v8360_v3, %v2953_v29 }
0x168c   :  { %v2969_v9 = vmax.f32 %v2959_v24, 0.0  ;;  %v2999_v35 = vsel %vm150_vm0, %v2981_v19, 0.0 }
0x168d   :  { %v2968_v27 = vmax.f32 %v2954_v39, 0.0  ;;  %v2996_v37 = vsel %vm150_vm0, %v2980_v15, 0.0 }
0x168e   :  { %v2983_v56 = vmul.f32 %v8369_v38, %v2969_v9  ;;  %2997 = vadd.xlane.f32.xlu0 %v2996_v37  ;;  %3000 = vadd.xlane.f32.xlu1 %v2999_v35 }
0x168f   :  { %v2982_v26 = vmul.f32 %v8369_v38, %v2968_v27 }
0x1690   :  { %v3005_v59 = vsel %vm150_vm0, %v2983_v56, 0.0 }
0x1691   :  { %v3002_v49 = vsel %vm150_vm0, %v2982_v26, 0.0 }
0x1692   :  { %3003 = vadd.xlane.f32.xlu0 %v3002_v49  ;;  %3006 = vadd.xlane.f32.xlu1 %v3005_v59 }
0x16a8   :  { %3014 = vperm.xlu0 %9261, %v8370_v61  }
0x1712   :  { %v2989_v58 = vpop.xlane.xlu0 %2988 }
0x1713   :  { %v2986_v36 = vpop.xlane.xlu1 %2985 }
0x1717   :  { %v2992_v3 = vpop.xlane.xlu0 %2991  ;;  %v2995_v51 = vpop.xlane.xlu1 %2994 }
0x171b   :  { %v2998_v53 = vpop.xlane.xlu0 %2997  ;;  %v3001_v25 = vpop.xlane.xlu1 %3000 }
0x171f   :  { %v3004_v47 = vpop.xlane.xlu0 %3003  ;;  %v3007_v19 = vpop.xlane.xlu1 %3006 }
0x1727   :  { %v11050_v45 = vpop.permute.xlu0 %3014 }
0x1728   :  { %13038 = vst [vmem:[#allocation29_spill] sm:$0xff] %v11050_v45  ;;  %v3017_v60 = vadd.f32 %v11050_v45, %v2986_v36  ;;  %v3018_v38 = vadd.f32 %v11050_v45, %v2989_v58  ;;  %v3019_v55 = vadd.f32 %v11050_v45, %v2992_v3  ;;  %v3020_v20 = vadd.f32 %v11050_v45, %v2995_v51 }
0x1729   :  { %v3021_v48 = vadd.f32 %v11050_v45, %v2998_v53  ;;  %v3022_v30 = vadd.f32 %v11050_v45, %v3001_v25  ;;  %v3023_v24 = vadd.f32 %v11050_v45, %v3004_v47  ;;  %v3024_v29 = vadd.f32 %v11050_v45, %v3007_v19 }
0x172a   :  { %v3036_v42 = vrot.slane %v3017_v60, %v9901_v6  ;;  %v3040_v62 = vrot.slane %v3018_v38, %v9901_v6  ;;  %v3044_v21 = vrot.slane %v3019_v55, %v9901_v6  ;;  %v3048_v15 = vrot.slane %v3020_v20, %v9901_v6 }
0x172b   :  { %v3052_v9 = vrot.slane %v3021_v48, %v9901_v6  ;;  %v3056_v27 = vrot.slane %v3022_v30, %v9901_v6  ;;  %v3060_v56 = vrot.slane %v3023_v24, %v9901_v6  ;;  %v3064_v59 = vrot.slane %v3024_v29, %v9901_v6 }
0x172c   :  { %v3065_v39 = vsel %vm628_vm1, %v3040_v62, %v3036_v42 }
0x172d   :  { %v3066_v35 = vsel %vm630_vm2, %v3044_v21, %v3065_v39 }
0x172e   :  { %v3067_v37 = vsel %vm632_vm3, %v3048_v15, %v3066_v35 }
0x172f   :  { %v3068_v26 = vsel %vm634_vm4, %v3052_v9, %v3067_v37 }
0x1730   :  { %v3069_v49 = vsel %vm636_vm5, %v3056_v27, %v3068_v26 }
0x1731   :  { %v3070_v61 = vsel %vm638_vm6, %v3060_v56, %v3069_v49 }
0x1732   :  { %v11075_v58 = vsel %vm640_vm7, %v3064_v59, %v3070_v61 }
0x1733   :  { %13039 = vst [vmem:[#allocation30_spill] sm:$0xff] %v11075_v58  ;;  %v3073_v3 = vsel %vm643_vm8, %v11075_v58, -inf }
0x1734   :  { %3074 = vmax.xlane.f32.xlu1 %v3073_v3 }
0x17c1   :  { %v3075_v36 = vpop.xlane.xlu1 %3074 }
0x17c2   :  { %v3080_v53 = vrot.slane %v3075_v36, %v9895_v4  ;;  %v3084_v51 = vrot.slane %v3075_v36, %v9907_v8  ;;  %v3104_v47 = vrot.slane %v3075_v36, %v9922_v17  ;;  %v3088_v25 = vrot.slane %v3075_v36, %v9898_v5 }
0x17c3   :  { %v3092_v15 = vrot.slane %v3075_v36, %v9904_v7  ;;  %v3096_v27 = vrot.slane %v3075_v36, %v9917_v14  ;;  %v3100_v26 = vrot.slane %v3075_v36, %v9914_v13 }
0x17c4   :  { %v3117_v42 = vsub.f32 %v3017_v60, %v3080_v53  ;;  %v3118_v62 = vsub.f32 %v3018_v38, %v3084_v51  ;;  %v3123_v21 = vsub.f32 %v3023_v24, %v3104_v47  ;;  %v3119_v39 = vsub.f32 %v3019_v55, %v3088_v25 }
0x17c5   :  { %v3120_v37 = vsub.f32 %v3020_v20, %v3092_v15  ;;  %v3121_v59 = vsub.f32 %v3021_v48, %v3096_v27  ;;  %v3108_v55 = vrot.slane %v3075_v36, %v9925_v18  ;;  %v3122_v24 = vsub.f32 %v3022_v30, %v3100_v26 }
0x17c6   :  { %v3125_v19 = vmul.f32 1.442695, %v3117_v42  ;;  %v3127_v9 = vmul.f32 1.442695, %v3118_v62  ;;  %v3137_v35 = vmul.f32 1.442695, %v3123_v21 }
0x17c7   :  { %v3129_v56 = vmul.f32 1.442695, %v3119_v39  ;;  %v3131_v60 = vmul.f32 1.442695, %v3120_v37  ;;  %v3133_v49 = vmul.f32 1.442695, %v3121_v59  ;;  %v3124_v3 = vsub.f32 %v3024_v29, %v3108_v55 }
0x17c8   :  { %9410 = vpow2.f32 %v3125_v19  ;;  %v3135_v53 = vmul.f32 1.442695, %v3122_v24 }
0x17c9   :  { %9412 = vpow2.f32 %v3127_v9  ;;  %v3139_v51 = vmul.f32 1.442695, %v3124_v3 }
0x17ca   :  { %9414 = vpow2.f32 %v3137_v35 }
0x17cb   :  { %9416 = vpow2.f32 %v3129_v56 }
0x17cc   :  { %9418 = vpow2.f32 %v3131_v60 }
0x17cd   :  { %9420 = vpow2.f32 %v3133_v49 }
0x17ce   :  { %9422 = vpow2.f32 %v3135_v53 }
0x17cf   :  { %9424 = vpow2.f32 %v3139_v51 }
0x17d2   :  { %v11086_v38 = vpop.eup %9410 }
0x17d3   :  { %3150 = vperm.xlu1 %9262, %v11086_v38   ;;  %v9413_v61 = vpop.eup %9412 }
0x17d4   :  { %v11090_v20 = vpop.eup %9414 }
0x17d5   :  { %3168 = vperm.xlu0 %9261, %v11090_v20   ;;  %v9417_v48 = vpop.eup %9416 }
0x17d6   :  { %v9419_v47 = vpop.eup %9418 }
0x17d7   :  { %3153 = vperm.xlu1 %9262, %v9413_v61   ;;  %v11093_v36 = vpop.eup %9420 }
0x17d8   :  { %v11096_v30 = vpop.eup %9422 }
0x17d9   :  { %v11099_v29 = vpop.eup %9424 }
0x17db   :  { %3156 = vperm.xlu1 %9262, %v9417_v48  }
0x17df   :  { %3159 = vperm.xlu1 %9262, %v9419_v47  }
0x17e3   :  { %3162 = vperm.xlu1 %9262, %v11093_v36  }
0x17e7   :  { %3165 = vperm.xlu1 %9262, %v11096_v30  }
0x17eb   :  { %3171 = vperm.xlu1 %9262, %v11099_v29  }
0x1852   :  { %v3151_v25 = vpop.permute.xlu1 %3150 }
0x1853   :  { %v3176_v9 = vrot.slane %v3151_v25, %v9901_v6 }
0x1854   :  { %v3169_v59 = vpop.permute.xlu0 %3168 }
0x1855   :  { %v3200_v3 = vrot.slane %v3169_v59, %v9901_v6 }
0x1856   :  { %v3154_v42 = vpop.permute.xlu1 %3153 }
0x1857   :  { %v3180_v19 = vrot.slane %v3154_v42, %v9901_v6 }
0x1859   :  { %v3205_v37 = vsel %vm628_vm1, %v3180_v19, %v3176_v9 }
0x185a   :  { %v3157_v62 = vpop.permute.xlu1 %3156 }
0x185b   :  { %v3184_v15 = vrot.slane %v3157_v62, %v9901_v6 }
0x185d   :  { %v3206_v56 = vsel %vm630_vm2, %v3184_v15, %v3205_v37 }
0x185e   :  { %v3160_v21 = vpop.permute.xlu1 %3159 }
0x185f   :  { %v3188_v35 = vrot.slane %v3160_v21, %v9901_v6 }
0x1861   :  { %v3207_v60 = vsel %vm632_vm3, %v3188_v35, %v3206_v56 }
0x1862   :  { %v3163_v39 = vpop.permute.xlu1 %3162 }
0x1863   :  { %v3192_v27 = vrot.slane %v3163_v39, %v9901_v6 }
0x1865   :  { %v3208_v24 = vsel %vm634_vm4, %v3192_v27, %v3207_v60 }
0x1866   :  { %v3166_v26 = vpop.permute.xlu1 %3165 }
0x1867   :  { %v3196_v55 = vrot.slane %v3166_v26, %v9901_v6 }
0x1869   :  { %v3209_v49 = vsel %vm636_vm5, %v3196_v55, %v3208_v24 }
0x186a   :  { %v3172_v53 = vpop.permute.xlu1 %3171  ;;  %v3210_v25 = vsel %vm638_vm6, %v3200_v3, %v3209_v49 }
0x186b   :  { %v3204_v51 = vrot.slane %v3172_v53, %v9901_v6 }
0x186d   :  { %v3211_v42 = vsel %vm640_vm7, %v3204_v51, %v3210_v25 }
0x186e   :  { %v3213_v62 = vsel %vm643_vm8, %v3211_v42, 0.0 }
0x186f   :  { %3214 = vadd.xlane.f32.xlu0 %v3213_v62 }
0x18fc   :  { %v3215_v21 = vpop.xlane.xlu0 %3214 }
0x18fd   :  { %v3220_v19 = vrot.slane %v3215_v21, %v9895_v4  ;;  %v3224_v15 = vrot.slane %v3215_v21, %v9907_v8  ;;  %v3228_v39 = vrot.slane %v3215_v21, %v9898_v5  ;;  %v3232_v9 = vrot.slane %v3215_v21, %v9904_v7 }
0x18fe   :  { %v3236_v35 = vrot.slane %v3215_v21, %v9917_v14  ;;  %v3240_v26 = vrot.slane %v3215_v21, %v9914_v13  ;;  %v3244_v24 = vrot.slane %v3215_v21, %v9922_v17  ;;  %v3248_v51 = vrot.slane %v3215_v21, %v9925_v18 }
0x18ff   :  { %9426 = vrcp.f32 %v3220_v19 }
0x1900   :  { %9428 = vrcp.f32 %v3224_v15 }
0x1901   :  { %9430 = vrcp.f32 %v3228_v39 }
0x1902   :  { %9432 = vrcp.f32 %v3232_v9 }
0x1903   :  { %9434 = vrcp.f32 %v3236_v35 }
0x1904   :  { %9436 = vrcp.f32 %v3240_v26 }
0x1905   :  { %9438 = vrcp.f32 %v3244_v24 }
0x1906   :  { %9440 = vrcp.f32 %v3248_v51 }
0x1909   :  { %v9427_v27 = vpop.eup %9426 }
0x190a   :  { %v9429_v37 = vpop.eup %9428  ;;  %v3258_v56 = vmul.f32 %v9427_v27, %v11086_v38 }
0x190b   :  { %v3260_v60 = vmul.f32 %v9429_v37, %v9413_v61  ;;  %v9431_v55 = vpop.eup %9430 }
0x190c   :  { %v3274_v59 = vmul.f32 0.5, %v3258_v56  ;;  %v3262_v3 = vmul.f32 %v9431_v55, %v9417_v48  ;;  %v9433_v53 = vpop.eup %9432 }
0x190d   :  { %v3275_v49 = vmul.f32 0.5, %v3260_v60  ;;  %v3264_v42 = vmul.f32 %v9433_v53, %v9419_v47  ;;  %v9435_v38 = vpop.eup %9434 }
0x190e   :  { %3291 = vperm.xlu1 %9262, %v3274_v59   ;;  %v3276_v25 = vmul.f32 0.5, %v3262_v3  ;;  %v3266_v61 = vmul.f32 %v9435_v38, %v11093_v36  ;;  %v9437_v19 = vpop.eup %9436 }
0x190f   :  { %v3277_v62 = vmul.f32 0.5, %v3264_v42  ;;  %v3268_v39 = vmul.f32 %v9437_v19, %v11096_v30  ;;  %v9439_v9 = vpop.eup %9438 }
0x1910   :  { %v3278_v15 = vmul.f32 0.5, %v3266_v61  ;;  %v3270_v35 = vmul.f32 %v9439_v9, %v11090_v20  ;;  %v9441_v27 = vpop.eup %9440  ;;  %v9698_v61 = vld [vmem:[%s12997_s11] sm:$0xff] }
0x1911   :  { %v3279_v48 = vmul.f32 0.5, %v3268_v39  ;;  %v3272_v47 = vmul.f32 %v9441_v27, %v11099_v29  ;;  %v3273_v19 = vmul.f32 0.5, %v9698_v61 }
0x1912   :  { %3294 = vperm.xlu1 %9262, %v3275_v49   ;;  %v3280_v21 = vmul.f32 0.5, %v3270_v35 }
0x1913   :  { %v3281_v37 = vmul.f32 0.5, %v3272_v47 }
0x1916   :  { %3297 = vperm.xlu1 %9262, %v3276_v25  }
0x191a   :  { %3300 = vperm.xlu1 %9262, %v3277_v62  }
0x191e   :  { %3303 = vperm.xlu1 %9262, %v3278_v15  }
0x1922   :  { %3306 = vperm.xlu1 %9262, %v3279_v48  }
0x1926   :  { %3309 = vperm.xlu1 %9262, %v3280_v21  }
0x192a   :  { %3312 = vperm.xlu1 %9262, %v3281_v37  }
0x198d   :  { %v3292_v56 = vpop.permute.xlu1 %3291 }
0x198e   :  { %v3317_v20 = vrot.slane %v3292_v56, %v9901_v6 }
0x1991   :  { %v3295_v36 = vpop.permute.xlu1 %3294 }
0x1992   :  { %v3321_v30 = vrot.slane %v3295_v36, %v9901_v6 }
0x1994   :  { %v3346_v53 = vsel %vm628_vm1, %v3321_v30, %v3317_v20 }
0x1995   :  { %v3298_v26 = vpop.permute.xlu1 %3297 }
0x1996   :  { %v3325_v24 = vrot.slane %v3298_v26, %v9901_v6 }
0x1998   :  { %v3347_v25 = vsel %vm630_vm2, %v3325_v24, %v3346_v53  ;;  %v9699_v24 = vld [vmem:[%s12999_s12 + $0x8] sm:$0xff] }
0x1999   :  { %v3301_v59 = vpop.permute.xlu1 %3300 }
0x199a   :  { %v3329_v49 = vrot.slane %v3301_v59, %v9901_v6 }
0x199c   :  { %v3348_v38 = vsel %vm632_vm3, %v3329_v49, %v3347_v25  ;;  %v9700_v49 = vld [vmem:[%s12999_s12] sm:$0xff] }
0x199d   :  { %v3304_v60 = vpop.permute.xlu1 %3303 }
0x199e   :  { %v3333_v3 = vrot.slane %v3304_v60, %v9901_v6 }
0x19a0   :  { %v3349_v62 = vsel %vm634_vm4, %v3333_v3, %v3348_v38 }
0x19a1   :  { %v3307_v55 = vpop.permute.xlu1 %3306 }
0x19a2   :  { %v3337_v51 = vrot.slane %v3307_v55, %v9901_v6 }
0x19a4   :  { %v3350_v39 = vsel %vm636_vm5, %v3337_v51, %v3349_v62  ;;  %v11199_v51 = vld [vmem:[%s13001_s9 + $0x8] sm:$0xff]  ;;  %v9702_v62 = vld [vmem:[%s12999_s12 + $0x10] sm:$0xff] }
0x19a5   :  { %v3310_v29 = vpop.permute.xlu1 %3309 }
0x19a6   :  { %v3341_v42 = vrot.slane %v3310_v29, %v9901_v6 }
0x19a8   :  { %v3351_v48 = vsel %vm638_vm6, %v3341_v42, %v3350_v39 }
0x19a9   :  { %v3313_v15 = vpop.permute.xlu1 %3312 }
0x19aa   :  { %v3345_v9 = vrot.slane %v3313_v15, %v9901_v6 }
0x19ac   :  { %v3352_v35 = vsel %vm640_vm7, %v3345_v9, %v3351_v48 }
0x19ad   :  { %v11149_v27 = vadd.f32 %v3352_v35, %v3273_v19 }
0x19af   :  { %13040 = vst [vmem:[#allocation31_spill] sm:$0xff] %v11149_v27  ;;  %v3379_v21 = vrot.slane %v11149_v27, %v9907_v8  ;;  %v3372_v47 = vrot.slane %v11149_v27, %v9895_v4  ;;  %3366 = vst.msk [vmem:[%s12909_s25] sm:$0xff] %vm643_vm8, %v11149_v27  ;;  %v3386_v37 = vrot.slane %v11149_v27, %v9898_v5 }
0x19b0   :  { %v3421_v56 = vrot.slane %v11149_v27, %v9925_v18  ;;  %v3393_v36 = vrot.slane %v11149_v27, %v9904_v7  ;;  %v3400_v26 = vrot.slane %v11149_v27, %v9917_v14  ;;  %v3407_v59 = vrot.slane %v11149_v27, %v9914_v13 }
0x19b1   :  { %3381 = vbcast.lane.b32.xlu1 %v3379_v21, 256  ;;  %3374 = vbcast.lane.b32.xlu0 %v3372_v47, 256  ;;  %v3414_v60 = vrot.slane %v11149_v27, %v9922_v17 }
0x19b5   :  { %3388 = vbcast.lane.b32.xlu1 %v3386_v37, 256  ;;  %3423 = vbcast.lane.b32.xlu0 %v3421_v56, 256 }
0x19b9   :  { %3395 = vbcast.lane.b32.xlu1 %v3393_v36, 256 }
0x19bd   :  { %3402 = vbcast.lane.b32.xlu1 %v3400_v26, 256 }
0x19c1   :  { %3409 = vbcast.lane.b32.xlu1 %v3407_v59, 256  ;;  %v9703_v59 = vld [vmem:[%s12999_s12 + $0x18] sm:$0xff] }
0x19c5   :  { %3416 = vbcast.lane.b32.xlu1 %v3414_v60, 256 }
0x1a23   :  { %v11172_v55 = vpop.permute.xlu1 %3381  ;;  %v11174_v30 = vpop.permute.xlu0 %3374 }
0x1a24   :  { %13041 = vst [vmem:[#allocation32_spill] sm:$0xff] %v11172_v55  ;;  %13042 = vst [vmem:[#allocation33_spill] sm:$0xff] %v11174_v30  ;;  %v11180_v20 = vmul.f32 %v9699_v24, %v11172_v55  ;;  %v11186_v3 = vmul.f32 %v9700_v49, %v11174_v30 }
0x1a26   :  { %v11190_v29 = vmul.f32 %v11180_v20, %v11180_v20  ;;  %v11194_v53 = vmul.f32 %v11186_v3, %v11186_v3  ;;  %v3937_v25 = vmul.f32 %v11199_v51, %v11186_v3  ;;  %v3938_v42 = vmul.f32 %v11199_v51, %v11180_v20 }
0x1a27   :  { %v11205_v38 = vpop.permute.xlu1 %3388  ;;  %v11229_v26 = vpop.permute.xlu0 %3423 }
0x1a28   :  { %13043 = vst [vmem:[#allocation34_spill] sm:$0xff] %v11205_v38  ;;  %v11211_v61 = vmul.f32 %v9702_v62, %v11205_v38  ;;  %v4002_v19 = vmul.f32 %v11190_v29, %v9960_v31  ;;  %v4001_v15 = vmul.f32 %v11194_v53, %v9960_v31  ;;  %v3945_v39 = vsel %vm150_vm0, %v3937_v25, 0.0  ;;  %13045 = vst [vmem:[#allocation36_spill] sm:$0xff] %v11229_v26 }
0x1a29   :  { %v3952_v9 = vsel %vm150_vm0, %v3938_v42, 0.0  ;;  %v3946_v47 = vrot.slane %v3945_v39, 4 }
0x1a2a   :  { %v4012_v48 = vsel %vm150_vm0, %v4002_v19, 0.0  ;;  %v4009_v35 = vsel %vm150_vm0, %v4001_v15, 0.0  ;;  %v11223_v21 = vmul.f32 %v11211_v61, %v11211_v61  ;;  %v3953_v56 = vrot.slane %v3952_v9, 4 }
0x1a2b   :  { %v11225_v37 = vpop.permute.xlu1 %3395  ;;  %4013 = vadd.xlane.f32.xlu0 %v4012_v48  ;;  %4010 = vadd.xlane.f32.xlu1 %v4009_v35  ;;  %v3939_v36 = vmul.f32 %v11199_v51, %v11211_v61  ;;  %v3947_v49 = vadd.f32 %v3946_v47, %v3945_v39  ;;  %v9704_v35 = vld [vmem:[%s12999_s12 + $0x38] sm:$0xff]  ;;  %v9705_v47 = vld [vmem:[%s12999_s12 + $0x20] sm:$0xff] }
0x1a2c   :  { %13044 = vst [vmem:[#allocation35_spill] sm:$0xff] %v11225_v37  ;;  %v11235_v60 = vmul.f32 %v9703_v59, %v11225_v37  ;;  %v4003_v24 = vmul.f32 %v11223_v21, %v9960_v31  ;;  %v3954_v25 = vadd.f32 %v3953_v56, %v3952_v9  ;;  %v11249_v59 = vmul.f32 %v9704_v35, %v11229_v26 }
0x1a2d   :  { %v3959_v42 = vsel %vm150_vm0, %v3939_v36, 0.0  ;;  %v3948_v15 = vrot.slane %v3947_v49, 2 }
0x1a2e   :  { %v4015_v62 = vsel %vm150_vm0, %v4003_v24, 0.0  ;;  %v11243_v19 = vmul.f32 %v11235_v60, %v11235_v60  ;;  %v3960_v48 = vrot.slane %v3959_v42, 4  ;;  %v3955_v39 = vrot.slane %v3954_v25, 2 }
0x1a2f   :  { %v11251_v58 = vpop.permute.xlu1 %3402  ;;  %4016 = vadd.xlane.f32.xlu1 %v4015_v62  ;;  %v3940_v9 = vmul.f32 %v11199_v51, %v11235_v60  ;;  %v3949_v24 = vadd.f32 %v3948_v15, %v3947_v49  ;;  %v11267_v62 = vld [vmem:[%s13001_s9] sm:$0xff]  ;;  %v3944_v12 = vmul.f32 %v11199_v51, %v11249_v59 }
0x1a30   :  { %13046 = vst [vmem:[#allocation37_spill] sm:$0xff] %v11251_v58  ;;  %v11259_v56 = vmul.f32 %v9705_v47, %v11251_v58  ;;  %v4004_v36 = vmul.f32 %v11243_v19, %v9960_v31  ;;  %v3961_v35 = vadd.f32 %v3960_v48, %v3959_v42  ;;  %v3956_v27 = vadd.f32 %v3955_v39, %v3954_v25 }
0x1a31   :  { %v3966_v45 = vsel %vm150_vm0, %v3940_v9, 0.0  ;;  %v11271_v26 = vmul.f32 %v11267_v62, %v11186_v3  ;;  %v3950_v49 = vrot.slane %v3949_v24, 1  ;;  %v11282_v48 = vmul.f32 %v11249_v59, %v11249_v59 }
0x1a32   :  { %v4018_v47 = vsel %vm150_vm0, %v4004_v36, 0.0  ;;  %v11276_v58 = vmul.f32 %v11259_v56, %v11259_v56  ;;  %v3962_v42 = vrot.slane %v3961_v35, 2  ;;  %v3957_v15 = vrot.slane %v3956_v27, 1  ;;  %v9707_v36 = vld [vmem:[%s12999_s12 + $0x28] sm:$0xff] }
0x1a33   :  { %v11278_v25 = vpop.permute.xlu1 %3409  ;;  %4019 = vadd.xlane.f32.xlu1 %v4018_v47  ;;  %v3967_v39 = vrot.slane %v3966_v45, 4  ;;  %v3941_v9 = vmul.f32 %v11199_v51, %v11259_v56  ;;  %v3951_v47 = vadd.f32 %v3950_v49, %v3949_v24 }
0x1a34   :  { %13047 = vst [vmem:[#allocation38_spill] sm:$0xff] %v11278_v25  ;;  %v11290_v30 = vmul.f32 %v9707_v36, %v11278_v25  ;;  %v4005_v55 = vmul.f32 %v11276_v58, %v9960_v31  ;;  %v3963_v38 = vadd.f32 %v3962_v42, %v3961_v35  ;;  %v3958_v37 = vadd.f32 %v3957_v15, %v3956_v27 }
0x1a35   :  { %v3968_v23 = vadd.f32 %v3967_v39, %v3966_v45  ;;  %v3973_v16 = vsel %vm150_vm0, %v3941_v9, 0.0  ;;  %v4033_v10 = vmul.f32 %v3951_v47, %v11186_v3  ;;  %v3994_v47 = vsel %vm150_vm0, %v3944_v12, 0.0 }
0x1a36   :  { %v4021_v2 = vsel %vm150_vm0, %v4005_v55, 0.0  ;;  %v11301_v36 = vmul.f32 %v11290_v30, %v11290_v30  ;;  %v3964_v25 = vrot.slane %v3963_v38, 1  ;;  %v4034_v27 = vmul.f32 %v3958_v37, %v11180_v20  ;;  %v9708_v55 = vld [vmem:[%s12999_s12 + $0x30] sm:$0xff] }
0x1a37   :  { %v11303_v32 = vpop.permute.xlu1 %3416  ;;  %4022 = vadd.xlane.f32.xlu1 %v4021_v2  ;;  %v3969_v45 = vrot.slane %v3968_v23, 2  ;;  %v3974_v24 = vrot.slane %v3973_v16, 4  ;;  %v3942_v35 = vmul.f32 %v11199_v51, %v11290_v30  ;;  %v4041_v42 = vsel %vm150_vm0, %v4033_v10, 0.0 }
0x1a38   :  { %13048 = vst [vmem:[#allocation39_spill] sm:$0xff] %v11303_v32  ;;  %v11312_v49 = vmul.f32 %v9708_v55, %v11303_v32  ;;  %v4006_v15 = vmul.f32 %v11301_v36, %v9960_v31  ;;  %v3965_v2 = vadd.f32 %v3964_v25, %v3963_v38  ;;  %4042 = vadd.xlane.f32.xlu0 %v4041_v42  ;;  %v4044_v12 = vsel %vm150_vm0, %v4034_v27, 0.0 }
0x1a39   :  { %v3970_v37 = vadd.f32 %v3969_v45, %v3968_v23  ;;  %v3975_v39 = vadd.f32 %v3974_v24, %v3973_v16  ;;  %v3980_v9 = vsel %vm150_vm0, %v3942_v35, 0.0  ;;  %v3442_v10 = vmul.f32 %v11267_v62, %v11180_v20 }
0x1a3a   :  { %v4024_v22 = vsel %vm150_vm0, %v4006_v15, 0.0  ;;  %v11322_v28 = vmul.f32 %v11312_v49, %v11312_v49  ;;  %v3981_v55 = vrot.slane %v3980_v9, 4  ;;  %v4035_v38 = vmul.f32 %v3965_v2, %v11211_v61 }
0x1a3b   :  { %4025 = vadd.xlane.f32.xlu1 %v4024_v22  ;;  %v3971_v25 = vrot.slane %v3970_v37, 1  ;;  %v3976_v23 = vrot.slane %v3975_v39, 2  ;;  %v3943_v16 = vmul.f32 %v11199_v51, %v11312_v49  ;;  %v3995_v35 = vrot.slane %v3994_v47, 4 }
0x1a3c   :  { %v4007_v45 = vmul.f32 %v11322_v28, %v9960_v31  ;;  %v3982_v24 = vadd.f32 %v3981_v55, %v3980_v9  ;;  %4045 = vadd.xlane.f32.xlu0 %v4044_v12  ;;  %v4008_v42 = vmul.f32 %v11282_v48, %v9960_v31  ;;  %v4047_v27 = vsel %vm150_vm0, %v4035_v38, 0.0 }
0x1a3d   :  { %v3972_v15 = vadd.f32 %v3971_v25, %v3970_v37  ;;  %v3977_v22 = vadd.f32 %v3976_v23, %v3975_v39  ;;  %v3987_v2 = vsel %vm150_vm0, %v3943_v16, 0.0  ;;  %v3996_v51 = vadd.f32 %v3995_v35, %v3994_v47 }
0x1a3e   :  { %v4027_v32 = vsel %vm150_vm0, %v4007_v45, 0.0  ;;  %v3983_v54 = vrot.slane %v3982_v24, 2  ;;  %v3988_v63 = vrot.slane %v3987_v2, 4  ;;  %v3449_v37 = vsel %vm150_vm0, %v11271_v26, 0.0 }
0x1a3f   :  { %4028 = vadd.xlane.f32.xlu1 %v4027_v32  ;;  %v4036_v0 = vmul.f32 %v3972_v15, %v11235_v60  ;;  %v3978_v9 = vrot.slane %v3977_v22, 1  ;;  %v3997_v43 = vrot.slane %v3996_v51, 2  ;;  %v3505_v39 = vmul.f32 %v11194_v53, %v10110_v41 }
0x1a40   :  { %v3984_v55 = vadd.f32 %v3983_v54, %v3982_v24  ;;  %v3989_v12 = vadd.f32 %v3988_v63, %v3987_v2  ;;  %4048 = vadd.xlane.f32.xlu0 %v4047_v27  ;;  %v3450_v23 = vrot.slane %v3449_v37, 4  ;;  %v3456_v47 = vsel %vm150_vm0, %v3442_v10, 0.0 }
0x1a41   :  { %v3979_v25 = vadd.f32 %v3978_v9, %v3977_v22  ;;  %v4030_v32 = vsel %vm150_vm0, %v4008_v42, 0.0  ;;  %v3457_v45 = vrot.slane %v3456_v47, 4  ;;  %v4050_v63 = vsel %vm150_vm0, %v4036_v0, 0.0 }
0x1a42   :  { %v3985_v38 = vrot.slane %v3984_v55, 1  ;;  %v3990_v16 = vrot.slane %v3989_v12, 2  ;;  %v3998_v54 = vadd.f32 %v3997_v43, %v3996_v51  ;;  %v3451_v24 = vadd.f32 %v3450_v23, %v3449_v37 }
0x1a43   :  { %4031 = vadd.xlane.f32.xlu1 %v4030_v32  ;;  %v3443_v26 = vmul.f32 %v11267_v62, %v11211_v61  ;;  %v4037_v35 = vmul.f32 %v3979_v25, %v11259_v56  ;;  %v3458_v22 = vadd.f32 %v3457_v45, %v3456_v47  ;;  %v3513_v42 = vsel %vm150_vm0, %v3505_v39, 0.0 }
0x1a44   :  { %v3986_v53 = vadd.f32 %v3985_v38, %v3984_v55  ;;  %v3991_v15 = vadd.f32 %v3990_v16, %v3989_v12  ;;  %4051 = vadd.xlane.f32.xlu0 %v4050_v63  ;;  %v3507_v2 = vmul.f32 %v11223_v21, %v10110_v41  ;;  %v3452_v0 = vrot.slane %v3451_v24, 2 }
0x1a45   :  { %v3463_v10 = vsel %vm150_vm0, %v3443_v26, 0.0  ;;  %v3459_v43 = vrot.slane %v3458_v22, 2  ;;  %v3444_v9 = vmul.f32 %v11267_v62, %v11235_v60  ;;  %v4053_v55 = vsel %vm150_vm0, %v4037_v35, 0.0 }
0x1a46   :  { %v3992_v27 = vrot.slane %v3991_v15, 1  ;;  %v3464_v51 = vrot.slane %v3463_v10, 4  ;;  %v4038_v12 = vmul.f32 %v3986_v53, %v11290_v30  ;;  %v3999_v25 = vrot.slane %v3998_v54, 1 }
0x1a47   :  { %3514 = vadd.xlane.f32.xlu1 %v3513_v42  ;;  %v3470_v39 = vsel %vm150_vm0, %v3444_v9, 0.0  ;;  %v3519_v21 = vsel %vm150_vm0, %v3507_v2, 0.0  ;;  %v3508_v47 = vmul.f32 %v11243_v19, %v10110_v41  ;;  %v3453_v32 = vadd.f32 %v3452_v0, %v3451_v24 }
0x1a48   :  { %v3993_v37 = vadd.f32 %v3992_v27, %v3991_v15  ;;  %4054 = vadd.xlane.f32.xlu0 %v4053_v55  ;;  %v3465_v23 = vadd.f32 %v3464_v51, %v3463_v10  ;;  %v3471_v38 = vrot.slane %v3470_v39, 4  ;;  %v3460_v16 = vadd.f32 %v3459_v43, %v3458_v22 }
0x1a49   :  { %v3445_v63 = vmul.f32 %v11267_v62, %v11259_v56  ;;  %v3446_v26 = vmul.f32 %v11267_v62, %v11290_v30  ;;  %v4056_v35 = vsel %vm150_vm0, %v4038_v12, 0.0  ;;  %v4000_v15 = vadd.f32 %v3999_v25, %v3998_v54 }
0x1a4a   :  { %v3466_v45 = vrot.slane %v3465_v23, 2  ;;  %v4039_v53 = vmul.f32 %v3993_v37, %v11312_v49  ;;  %v3472_v10 = vadd.f32 %v3471_v38, %v3470_v39  ;;  %v3447_v22 = vmul.f32 %v11267_v62, %v11312_v49 }
0x1a4b   :  { %3520 = vadd.xlane.f32.xlu1 %v3519_v21  ;;  %v3477_v19 = vsel %vm150_vm0, %v3445_v63, 0.0  ;;  %v3484_v24 = vsel %vm150_vm0, %v3446_v26, 0.0  ;;  %v3522_v42 = vsel %vm150_vm0, %v3508_v47, 0.0  ;;  %v3509_v2 = vmul.f32 %v11276_v58, %v10110_v41 }
0x1a4c   :  { %4057 = vadd.xlane.f32.xlu0 %v4056_v35  ;;  %v3454_v27 = vrot.slane %v3453_v32, 1  ;;  %v3478_v0 = vrot.slane %v3477_v19, 4  ;;  %v3461_v43 = vrot.slane %v3460_v16, 1  ;;  %v3467_v51 = vadd.f32 %v3466_v45, %v3465_v23 }
0x1a4d   :  { %v3473_v54 = vrot.slane %v3472_v10, 2  ;;  %v4059_v9 = vsel %vm150_vm0, %v4039_v53, 0.0  ;;  %v4040_v55 = vmul.f32 %v4000_v15, %v11249_v59  ;;  %v3485_v37 = vrot.slane %v3484_v24, 4 }
0x1a4e   :  { %v3479_v12 = vadd.f32 %v3478_v0, %v3477_v19  ;;  %v3491_v25 = vsel %vm150_vm0, %v3447_v22, 0.0  ;;  %v3448_v39 = vmul.f32 %v11267_v62, %v11249_v59  ;;  %v3525_v58 = vsel %vm150_vm0, %v3509_v2, 0.0 }
0x1a4f   :  { %3523 = vadd.xlane.f32.xlu1 %v3522_v42  ;;  %v3510_v21 = vmul.f32 %v11301_v36, %v10110_v41  ;;  %v3455_v47 = vadd.f32 %v3454_v27, %v3453_v32  ;;  %v3506_v23 = vmul.f32 %v11190_v29, %v10110_v41  ;;  %v3462_v38 = vadd.f32 %v3461_v43, %v3460_v16 }
0x1a50   :  { %4060 = vadd.xlane.f32.xlu0 %v4059_v9  ;;  %v3468_v45 = vrot.slane %v3467_v51, 1  ;;  %v3474_v63 = vadd.f32 %v3473_v54, %v3472_v10  ;;  %v4062_v26 = vsel %vm150_vm0, %v4040_v55, 0.0  ;;  %v3480_v35 = vrot.slane %v3479_v12, 2 }
0x1a51   :  { %v3486_v53 = vadd.f32 %v3485_v37, %v3484_v24  ;;  %v3492_v15 = vrot.slane %v3491_v25, 4  ;;  %v3498_v62 = vsel %vm150_vm0, %v3448_v39, 0.0  ;;  %v3528_v19 = vsel %vm150_vm0, %v3510_v21, 0.0 }
0x1a52   :  { %v3537_v36 = vmul.f32 %v3455_v47, %v11186_v3  ;;  %v3516_v32 = vsel %vm150_vm0, %v3506_v23, 0.0  ;;  %v3538_v29 = vmul.f32 %v3462_v38, %v11180_v20  ;;  %v3469_v16 = vadd.f32 %v3468_v45, %v3467_v51 }
0x1a53   :  { %3526 = vadd.xlane.f32.xlu1 %v3525_v58  ;;  %v3475_v22 = vrot.slane %v3474_v63, 1  ;;  %v3481_v10 = vadd.f32 %v3480_v35, %v3479_v12  ;;  %v3487_v42 = vrot.slane %v3486_v53, 2  ;;  %v3493_v2 = vadd.f32 %v3492_v15, %v3491_v25 }
0x1a54   :  { %4063 = vadd.xlane.f32.xlu0 %v4062_v26  ;;  %v3499_v27 = vrot.slane %v3498_v62, 4  ;;  %v3545_v24 = vsel %vm150_vm0, %v3537_v36, 0.0  ;;  %v3511_v0 = vmul.f32 %v11322_v28, %v10110_v41  ;;  %v3548_v43 = vsel %vm150_vm0, %v3538_v29, 0.0 }
0x1a55   :  { %v3539_v54 = vmul.f32 %v3469_v16, %v11211_v61  ;;  %v3476_v9 = vadd.f32 %v3475_v22, %v3474_v63  ;;  %v3482_v55 = vrot.slane %v3481_v10, 1  ;;  %v3488_v37 = vadd.f32 %v3487_v42, %v3486_v53 }
0x1a56   :  { %v3494_v51 = vrot.slane %v3493_v2, 2  ;;  %v3500_v39 = vadd.f32 %v3499_v27, %v3498_v62  ;;  %v3531_v12 = vsel %vm150_vm0, %v3511_v0, 0.0  ;;  %v3512_v25 = vmul.f32 %v11282_v48, %v10110_v41 }
0x1a57   :  { %3529 = vadd.xlane.f32.xlu1 %v3528_v19  ;;  %v3551_v58 = vsel %vm150_vm0, %v3539_v54, 0.0  ;;  %v3540_v28 = vmul.f32 %v3476_v9, %v11235_v60  ;;  %v3483_v21 = vadd.f32 %v3482_v55, %v3481_v10  ;;  %v3489_v47 = vrot.slane %v3488_v37, 1 }
0x1a58   :  { %3517 = vadd.xlane.f32.xlu0 %v3516_v32  ;;  %v3495_v23 = vadd.f32 %v3494_v51, %v3493_v2  ;;  %v3501_v38 = vrot.slane %v3500_v39, 2  ;;  %v3534_v45 = vsel %vm150_vm0, %v3512_v25, 0.0 }
0x1a59   :  { %v3554_v63 = vsel %vm150_vm0, %v3540_v28, 0.0  ;;  %v3541_v26 = vmul.f32 %v3483_v21, %v11259_v56  ;;  %v3490_v35 = vadd.f32 %v3489_v47, %v3488_v37 }
0x1a5a   :  { %v3496_v53 = vrot.slane %v3495_v23, 1  ;;  %v3502_v48 = vadd.f32 %v3501_v38, %v3500_v39 }
0x1a5b   :  { %3546 = vadd.xlane.f32.xlu1 %v3545_v24  ;;  %v3557_v15 = vsel %vm150_vm0, %v3541_v26, 0.0  ;;  %v3542_v62 = vmul.f32 %v3490_v35, %v11290_v30 }
0x1a5c   :  { %3549 = vadd.xlane.f32.xlu0 %v3548_v43  ;;  %v3497_v19 = vadd.f32 %v3496_v53, %v3495_v23  ;;  %v3503_v36 = vrot.slane %v3502_v48, 1 }
0x1a5d   :  { %v3560_v32 = vsel %vm150_vm0, %v3542_v62, 0.0 }
0x1a5e   :  { %v3543_v29 = vmul.f32 %v3497_v19, %v11312_v49  ;;  %v3504_v16 = vadd.f32 %v3503_v36, %v3502_v48 }
0x1a5f   :  { %3532 = vadd.xlane.f32.xlu1 %v3531_v12 }
0x1a60   :  { %3552 = vadd.xlane.f32.xlu0 %v3551_v58  ;;  %v3563_v22 = vsel %vm150_vm0, %v3543_v29, 0.0  ;;  %v3544_v10 = vmul.f32 %v3504_v16, %v11249_v59 }
0x1a62   :  { %v3566_v42 = vsel %vm150_vm0, %v3544_v10, 0.0 }
0x1a63   :  { %3535 = vadd.xlane.f32.xlu1 %v3534_v45 }
0x1a64   :  { %3555 = vadd.xlane.f32.xlu0 %v3554_v63 }
0x1a68   :  { %3558 = vadd.xlane.f32.xlu0 %v3557_v15 }
0x1a6c   :  { %3561 = vadd.xlane.f32.xlu0 %v3560_v32 }
0x1a70   :  { %3564 = vadd.xlane.f32.xlu0 %v3563_v22 }
0x1a74   :  { %3567 = vadd.xlane.f32.xlu0 %v3566_v42 }
0x1ab8   :  { %v4011_v2 = vpop.xlane.xlu1 %4010  ;;  %v4014_v0 = vpop.xlane.xlu0 %4013 }
0x1abc   :  { %v4017_v27 = vpop.xlane.xlu1 %4016 }
0x1ac0   :  { %v4020_v24 = vpop.xlane.xlu1 %4019 }
0x1ac4   :  { %v4023_v43 = vpop.xlane.xlu1 %4022 }
0x1ac5   :  { %v4043_v54 = vpop.xlane.xlu0 %4042 }
0x1ac6   :  { %v4065_v47 = vsub.f32 %v4011_v2, %v4043_v54 }
0x1ac8   :  { %v4026_v9 = vpop.xlane.xlu1 %4025  ;;  %v11416_v48 = vadd.f32 %v4065_v47, %v10181_v46 }
0x1ac9   :  { %v4046_v55 = vpop.xlane.xlu0 %4045 }
0x1aca   :  { %v4066_v28 = vsub.f32 %v4014_v0, %v4046_v55  ;;  %v4092_v22 = vrot.slane %v11416_v48, %v9901_v6 }
0x1acc   :  { %v4029_v37 = vpop.xlane.xlu1 %4028  ;;  %v11410_v63 = vadd.f32 %v4066_v28, %v10181_v46 }
0x1acd   :  { %v4049_v51 = vpop.xlane.xlu0 %4048 }
0x1ace   :  { %v4067_v21 = vsub.f32 %v4017_v27, %v4049_v51  ;;  %v4096_v36 = vrot.slane %v11410_v63, %v9901_v6 }
0x1ad0   :  { %v4032_v39 = vpop.xlane.xlu1 %4031  ;;  %v11413_v35 = vadd.f32 %v4067_v21, %v10181_v46  ;;  %v4121_v0 = vsel %vm628_vm1, %v4096_v36, %v4092_v22 }
0x1ad1   :  { %v4052_v12 = vpop.xlane.xlu0 %4051 }
0x1ad2   :  { %v4068_v23 = vsub.f32 %v4020_v24, %v4052_v12  ;;  %v4100_v16 = vrot.slane %v11413_v35, %v9901_v6 }
0x1ad4   :  { %v3515_v25 = vpop.xlane.xlu1 %3514  ;;  %v11419_v15 = vadd.f32 %v4068_v23, %v10181_v46 }
0x1ad5   :  { %v4055_v58 = vpop.xlane.xlu0 %4054 }
0x1ad6   :  { %v4069_v38 = vsub.f32 %v4023_v43, %v4055_v58  ;;  %v4104_v10 = vrot.slane %v11419_v15, %v9901_v6 }
0x1ad8   :  { %v3521_v53 = vpop.xlane.xlu1 %3520  ;;  %v11422_v62 = vadd.f32 %v4069_v38, %v10181_v46 }
0x1ad9   :  { %v4058_v45 = vpop.xlane.xlu0 %4057 }
0x1ada   :  { %v4070_v26 = vsub.f32 %v4026_v9, %v4058_v45  ;;  %v4108_v2 = vrot.slane %v11422_v62, %v9901_v6  ;;  %v4122_v9 = vsel %vm630_vm2, %v4100_v16, %v4121_v0 }
0x1adc   :  { %v11427_v32 = vadd.f32 %v4070_v26, %v10181_v46  ;;  %v3524_v27 = vpop.xlane.xlu1 %3523 }
0x1add   :  { %v4061_v19 = vpop.xlane.xlu0 %4060 }
0x1ade   :  { %v4071_v29 = vsub.f32 %v4029_v37, %v4061_v19  ;;  %v4112_v43 = vrot.slane %v11427_v32, %v9901_v6  ;;  %v4123_v37 = vsel %vm632_vm3, %v4104_v10, %v4122_v9 }
0x1adf   :  { %v4124_v58 = vsel %vm634_vm4, %v4108_v2, %v4123_v37 }
0x1ae0   :  { %v11436_v42 = vadd.f32 %v4071_v29, %v10181_v46  ;;  %v4125_v21 = vsel %vm636_vm5, %v4112_v43, %v4124_v58  ;;  %v3527_v47 = vpop.xlane.xlu1 %3526 }
0x1ae1   :  { %v4064_v24 = vpop.xlane.xlu0 %4063 }
0x1ae2   :  { %v4072_v54 = vsub.f32 %v4032_v39, %v4064_v24  ;;  %v4116_v55 = vrot.slane %v11436_v42, %v9901_v6 }
0x1ae4   :  { %v11448_v51 = vadd.f32 %v4072_v54, %v10181_v46  ;;  %v4126_v39 = vsel %vm638_vm6, %v4116_v55, %v4125_v21  ;;  %v3530_v26 = vpop.xlane.xlu1 %3529 }
0x1ae5   :  { %v3518_v12 = vpop.xlane.xlu0 %3517 }
0x1ae6   :  { %v4120_v28 = vrot.slane %v11448_v51, %v9901_v6 }
0x1ae8   :  { %v4127_v23 = vsel %vm640_vm7, %v4120_v28, %v4126_v39  ;;  %v3547_v29 = vpop.xlane.xlu1 %3546 }
0x1ae9   :  { %v3550_v38 = vpop.xlane.xlu0 %3549  ;;  %v4129_v45 = vsel %vm643_vm8, %v4127_v23, -inf  ;;  %v3569_v22 = vsub.f32 %v3515_v25, %v3547_v29 }
0x1aea   :  { %4130 = vmax.xlane.f32.xlu1 %v4129_v45  ;;  %v3570_v10 = vsub.f32 %v3518_v12, %v3550_v38 }
0x1aeb   :  { %v11458_v54 = vadd.f32 %v3569_v22, %v10232_v57 }
0x1aec   :  { %v11461_v9 = vadd.f32 %v3570_v10, %v10232_v57  ;;  %v3533_v37 = vpop.xlane.xlu1 %3532 }
0x1aed   :  { %v3553_v19 = vpop.xlane.xlu0 %3552 }
0x1aee   :  { %v3571_v2 = vsub.f32 %v3521_v53, %v3553_v19  ;;  %v3600_v12 = vrot.slane %v11461_v9, %v9901_v6 }
0x1af0   :  { %v11464_v58 = vadd.f32 %v3571_v2, %v10232_v57  ;;  %v3536_v45 = vpop.xlane.xlu1 %3535 }
0x1af1   :  { %v3556_v36 = vpop.xlane.xlu0 %3555 }
0x1af2   :  { %v3572_v24 = vsub.f32 %v3524_v27, %v3556_v36  ;;  %v3596_v27 = vrot.slane %v11458_v54, %v9901_v6  ;;  %v3604_v39 = vrot.slane %v11464_v58, %v9901_v6 }
0x1af4   :  { %v11467_v28 = vadd.f32 %v3572_v24, %v10232_v57  ;;  %v3625_v36 = vsel %vm628_vm1, %v3600_v12, %v3596_v27 }
0x1af5   :  { %v3559_v16 = vpop.xlane.xlu0 %3558  ;;  %v3626_v22 = vsel %vm630_vm2, %v3604_v39, %v3625_v36 }
0x1af6   :  { %v3573_v0 = vsub.f32 %v3527_v47, %v3559_v16  ;;  %v3608_v23 = vrot.slane %v11467_v28, %v9901_v6 }
0x1af8   :  { %v11470_v25 = vadd.f32 %v3573_v0, %v10232_v57  ;;  %v3627_v2 = vsel %vm632_vm3, %v3608_v23, %v3626_v22 }
0x1af9   :  { %v3562_v43 = vpop.xlane.xlu0 %3561 }
0x1afa   :  { %v3574_v55 = vsub.f32 %v3530_v26, %v3562_v43  ;;  %v3612_v26 = vrot.slane %v11470_v25, %v9901_v6 }
0x1afc   :  { %v11477_v21 = vadd.f32 %v3574_v55, %v10232_v57  ;;  %v3628_v0 = vsel %vm634_vm4, %v3612_v26, %v3627_v2 }
0x1afd   :  { %v3565_v53 = vpop.xlane.xlu0 %3564 }
0x1afe   :  { %v3575_v47 = vsub.f32 %v3533_v37, %v3565_v53  ;;  %v3616_v29 = vrot.slane %v11477_v21, %v9901_v6 }
0x1b00   :  { %v11484_v38 = vadd.f32 %v3575_v47, %v10232_v57  ;;  %v3629_v55 = vsel %vm636_vm5, %v3616_v29, %v3628_v0 }
0x1b01   :  { %v3568_v19 = vpop.xlane.xlu0 %3567 }
0x1b02   :  { %v3576_v16 = vsub.f32 %v3536_v45, %v3568_v19  ;;  %v3620_v10 = vrot.slane %v11484_v38, %v9901_v6 }
0x1b04   :  { %v11496_v24 = vadd.f32 %v3576_v16, %v10232_v57  ;;  %v3630_v37 = vsel %vm638_vm6, %v3620_v10, %v3629_v55 }
0x1b06   :  { %v3624_v43 = vrot.slane %v11496_v24, %v9901_v6 }
0x1b08   :  { %v3631_v53 = vsel %vm640_vm7, %v3624_v43, %v3630_v37 }
0x1b09   :  { %v3633_v27 = vsel %vm643_vm8, %v3631_v53, -inf }
0x1b0a   :  { %3634 = vmax.xlane.f32.xlu0 %v3633_v27 }
0x1b77   :  { %v4131_v12 = vpop.xlane.xlu1 %4130 }
0x1b78   :  { %v4136_v47 = vrot.slane %v4131_v12, %v9895_v4  ;;  %v4140_v39 = vrot.slane %v4131_v12, %v9907_v8  ;;  %v4144_v23 = vrot.slane %v4131_v12, %v9898_v5  ;;  %v4156_v45 = vrot.slane %v4131_v12, %v9914_v13 }
0x1b79   :  { %v4148_v26 = vrot.slane %v4131_v12, %v9904_v7  ;;  %v4164_v16 = vrot.slane %v4131_v12, %v9925_v18  ;;  %v4152_v0 = vrot.slane %v4131_v12, %v9917_v14 }
0x1b7a   :  { %v4173_v19 = vsub.f32 %v11416_v48, %v4136_v47  ;;  %v4174_v36 = vsub.f32 %v11410_v63, %v4140_v39  ;;  %v4175_v29 = vsub.f32 %v11413_v35, %v4144_v23  ;;  %v4178_v22 = vsub.f32 %v11427_v32, %v4156_v45 }
0x1b7b   :  { %v4176_v43 = vsub.f32 %v11419_v15, %v4148_v26  ;;  %v4180_v37 = vsub.f32 %v11448_v51, %v4164_v16  ;;  %v4160_v63 = vrot.slane %v4131_v12, %v9922_v17  ;;  %v4177_v35 = vsub.f32 %v11422_v62, %v4152_v0 }
0x1b7c   :  { %v4181_v10 = vmul.f32 1.442695, %v4173_v19  ;;  %v4183_v2 = vmul.f32 1.442695, %v4174_v36  ;;  %v4185_v55 = vmul.f32 1.442695, %v4175_v29 }
0x1b7d   :  { %v4191_v48 = vmul.f32 1.442695, %v4178_v22  ;;  %v4187_v53 = vmul.f32 1.442695, %v4176_v43  ;;  %v4195_v32 = vmul.f32 1.442695, %v4180_v37  ;;  %v4179_v27 = vsub.f32 %v11436_v42, %v4160_v63 }
0x1b7e   :  { %9442 = vpow2.f32 %v4181_v10  ;;  %v4189_v47 = vmul.f32 1.442695, %v4177_v35 }
0x1b7f   :  { %9444 = vpow2.f32 %v4183_v2  ;;  %v4193_v51 = vmul.f32 1.442695, %v4179_v27 }
0x1b80   :  { %9446 = vpow2.f32 %v4185_v55 }
0x1b81   :  { %9448 = vpow2.f32 %v4191_v48 }
0x1b82   :  { %9450 = vpow2.f32 %v4187_v53 }
0x1b83   :  { %9452 = vpow2.f32 %v4195_v32 }
0x1b84   :  { %9454 = vpow2.f32 %v4189_v47 }
0x1b85   :  { %9456 = vpow2.f32 %v4193_v51 }
0x1b88   :  { %v11521_v15 = vpop.eup %9442 }
0x1b89   :  { %v11523_v39 = vpop.eup %9444  ;;  %4206 = vperm.xlu1 %9262, %v11521_v15  }
0x1b8a   :  { %4209 = vperm.xlu0 %9261, %v11523_v39   ;;  %v11527_v62 = vpop.eup %9446 }
0x1b8b   :  { %v11529_v12 = vpop.eup %9448 }
0x1b8c   :  { %v11533_v42 = vpop.eup %9450 }
0x1b8d   :  { %4212 = vperm.xlu1 %9262, %v11527_v62   ;;  %v11535_v23 = vpop.eup %9452 }
0x1b8e   :  { %4221 = vperm.xlu0 %9261, %v11529_v12   ;;  %v11539_v45 = vpop.eup %9454 }
0x1b8f   :  { %v11542_v19 = vpop.eup %9456 }
0x1b91   :  { %4215 = vperm.xlu1 %9262, %v11533_v42  }
0x1b92   :  { %4227 = vperm.xlu0 %9261, %v11535_v23  }
0x1b95   :  { %4218 = vperm.xlu1 %9262, %v11539_v45  }
0x1b97   :  { %v3635_v26 = vpop.xlane.xlu0 %3634 }
0x1b98   :  { %v3640_v36 = vrot.slane %v3635_v26, %v9895_v4  ;;  %v3644_v29 = vrot.slane %v3635_v26, %v9907_v8  ;;  %v3648_v16 = vrot.slane %v3635_v26, %v9898_v5  ;;  %v3652_v22 = vrot.slane %v3635_v26, %v9904_v7 }
0x1b99   :  { %4224 = vperm.xlu1 %9262, %v11542_v19   ;;  %v3656_v10 = vrot.slane %v3635_v26, %v9917_v14  ;;  %v3660_v55 = vrot.slane %v3635_v26, %v9914_v13  ;;  %v3664_v35 = vrot.slane %v3635_v26, %v9922_v17  ;;  %v3668_v27 = vrot.slane %v3635_v26, %v9925_v18 }
0x1b9a   :  { %v3677_v2 = vsub.f32 %v11458_v54, %v3640_v36  ;;  %v3678_v0 = vsub.f32 %v11461_v9, %v3644_v29  ;;  %v3679_v43 = vsub.f32 %v11464_v58, %v3648_v16  ;;  %v3680_v37 = vsub.f32 %v11467_v28, %v3652_v22 }
0x1b9b   :  { %v3681_v53 = vsub.f32 %v11470_v25, %v3656_v10  ;;  %v3682_v54 = vsub.f32 %v11477_v21, %v3660_v55  ;;  %v3683_v58 = vsub.f32 %v11484_v38, %v3664_v35  ;;  %v3684_v28 = vsub.f32 %v11496_v24, %v3668_v27 }
0x1b9c   :  { %v3685_v48 = vmul.f32 1.442695, %v3677_v2  ;;  %v3687_v63 = vmul.f32 1.442695, %v3678_v0  ;;  %v3689_v32 = vmul.f32 1.442695, %v3679_v43 }
0x1b9d   :  { %v3691_v9 = vmul.f32 1.442695, %v3680_v37  ;;  %v3693_v47 = vmul.f32 1.442695, %v3681_v53  ;;  %v3695_v51 = vmul.f32 1.442695, %v3682_v54 }
0x1b9e   :  { %9458 = vpow2.f32 %v3685_v48  ;;  %v3697_v36 = vmul.f32 1.442695, %v3683_v58  ;;  %v3699_v25 = vmul.f32 1.442695, %v3684_v28 }
0x1b9f   :  { %9460 = vpow2.f32 %v3687_v63 }
0x1ba0   :  { %9462 = vpow2.f32 %v3689_v32 }
0x1ba1   :  { %9464 = vpow2.f32 %v3691_v9 }
0x1ba2   :  { %9466 = vpow2.f32 %v3693_v47 }
0x1ba3   :  { %9468 = vpow2.f32 %v3695_v51 }
0x1ba4   :  { %9470 = vpow2.f32 %v3697_v36 }
0x1ba5   :  { %9472 = vpow2.f32 %v3699_v25 }
0x1ba8   :  { %v11561_v29 = vpop.eup %9458 }
0x1ba9   :  { %v11563_v16 = vpop.eup %9460  ;;  %3710 = vperm.xlu1 %9262, %v11561_v29  }
0x1baa   :  { %3713 = vperm.xlu0 %9261, %v11563_v16   ;;  %v11567_v21 = vpop.eup %9462 }
0x1bab   :  { %v11569_v38 = vpop.eup %9464 }
0x1bac   :  { %v11573_v24 = vpop.eup %9466 }
0x1bad   :  { %3716 = vperm.xlu1 %9262, %v11567_v21   ;;  %v11575_v26 = vpop.eup %9468 }
0x1bae   :  { %3719 = vperm.xlu0 %9261, %v11569_v38   ;;  %v11579_v22 = vpop.eup %9470 }
0x1baf   :  { %v11581_v10 = vpop.eup %9472 }
0x1bb1   :  { %3722 = vperm.xlu1 %9262, %v11573_v24  }
0x1bb2   :  { %3725 = vperm.xlu0 %9261, %v11575_v26  }
0x1bb5   :  { %3728 = vperm.xlu1 %9262, %v11579_v22  }
0x1bb6   :  { %3731 = vperm.xlu0 %9261, %v11581_v10  }
0x1c08   :  { %v4207_v2 = vpop.permute.xlu1 %4206 }
0x1c09   :  { %v4210_v0 = vpop.permute.xlu0 %4209  ;;  %v4232_v55 = vrot.slane %v4207_v2, %v9901_v6 }
0x1c0a   :  { %v4236_v37 = vrot.slane %v4210_v0, %v9901_v6 }
0x1c0c   :  { %v4213_v43 = vpop.permute.xlu1 %4212  ;;  %v4261_v32 = vsel %vm628_vm1, %v4236_v37, %v4232_v55 }
0x1c0d   :  { %v4240_v63 = vrot.slane %v4213_v43, %v9901_v6  ;;  %v4222_v35 = vpop.permute.xlu0 %4221 }
0x1c0e   :  { %v4252_v51 = vrot.slane %v4222_v35, %v9901_v6 }
0x1c0f   :  { %v4262_v54 = vsel %vm630_vm2, %v4240_v63, %v4261_v32 }
0x1c10   :  { %v4216_v48 = vpop.permute.xlu1 %4215 }
0x1c11   :  { %v4244_v53 = vrot.slane %v4216_v48, %v9901_v6  ;;  %v4228_v47 = vpop.permute.xlu0 %4227 }
0x1c12   :  { %v4260_v2 = vrot.slane %v4228_v47, %v9901_v6 }
0x1c13   :  { %v4263_v58 = vsel %vm632_vm3, %v4244_v53, %v4262_v54 }
0x1c14   :  { %v4219_v27 = vpop.permute.xlu1 %4218 }
0x1c15   :  { %v4248_v9 = vrot.slane %v4219_v27, %v9901_v6 }
0x1c17   :  { %v4264_v28 = vsel %vm634_vm4, %v4248_v9, %v4263_v58 }
0x1c18   :  { %v4225_v36 = vpop.permute.xlu1 %4224  ;;  %v4265_v0 = vsel %vm636_vm5, %v4252_v51, %v4264_v28 }
0x1c19   :  { %v4256_v25 = vrot.slane %v4225_v36, %v9901_v6 }
0x1c1b   :  { %v4266_v43 = vsel %vm638_vm6, %v4256_v25, %v4265_v0 }
0x1c1c   :  { %v4267_v55 = vsel %vm640_vm7, %v4260_v2, %v4266_v43 }
0x1c1d   :  { %v4269_v37 = vsel %vm643_vm8, %v4267_v55, 0.0 }
0x1c1e   :  { %4270 = vadd.xlane.f32.xlu1 %v4269_v37 }
0x1c28   :  { %v3711_v48 = vpop.permute.xlu1 %3710 }
0x1c29   :  { %v3714_v63 = vpop.permute.xlu0 %3713  ;;  %v3736_v53 = vrot.slane %v3711_v48, %v9901_v6 }
0x1c2a   :  { %v3740_v35 = vrot.slane %v3714_v63, %v9901_v6 }
0x1c2c   :  { %v3717_v32 = vpop.permute.xlu1 %3716  ;;  %v3765_v9 = vsel %vm628_vm1, %v3740_v35, %v3736_v53 }
0x1c2d   :  { %v3744_v27 = vrot.slane %v3717_v32, %v9901_v6  ;;  %v3720_v54 = vpop.permute.xlu0 %3719 }
0x1c2e   :  { %v3748_v58 = vrot.slane %v3720_v54, %v9901_v6 }
0x1c2f   :  { %v3766_v47 = vsel %vm630_vm2, %v3744_v27, %v3765_v9 }
0x1c30   :  { %v3723_v28 = vpop.permute.xlu1 %3722  ;;  %v3767_v25 = vsel %vm632_vm3, %v3748_v58, %v3766_v47 }
0x1c31   :  { %v3752_v51 = vrot.slane %v3723_v28, %v9901_v6  ;;  %v3726_v36 = vpop.permute.xlu0 %3725 }
0x1c32   :  { %v3756_v2 = vrot.slane %v3726_v36, %v9901_v6 }
0x1c33   :  { %v3768_v0 = vsel %vm634_vm4, %v3752_v51, %v3767_v25 }
0x1c34   :  { %v3729_v43 = vpop.permute.xlu1 %3728  ;;  %v3769_v48 = vsel %vm636_vm5, %v3756_v2, %v3768_v0 }
0x1c35   :  { %v3760_v55 = vrot.slane %v3729_v43, %v9901_v6  ;;  %v3732_v37 = vpop.permute.xlu0 %3731 }
0x1c36   :  { %v3764_v63 = vrot.slane %v3732_v37, %v9901_v6 }
0x1c37   :  { %v3770_v53 = vsel %vm638_vm6, %v3760_v55, %v3769_v48 }
0x1c38   :  { %v3771_v35 = vsel %vm640_vm7, %v3764_v63, %v3770_v53 }
0x1c39   :  { %v3773_v32 = vsel %vm643_vm8, %v3771_v35, 0.0 }
0x1c3a   :  { %3774 = vadd.xlane.f32.xlu0 %v3773_v32 }
0x1cab   :  { %v4271_v27 = vpop.xlane.xlu1 %4270 }
0x1cac   :  { %v4280_v54 = vrot.slane %v4271_v27, %v9907_v8  ;;  %v4276_v9 = vrot.slane %v4271_v27, %v9895_v4  ;;  %v4284_v58 = vrot.slane %v4271_v27, %v9898_v5  ;;  %v4288_v47 = vrot.slane %v4271_v27, %v9904_v7 }
0x1cad   :  { %v4292_v28 = vrot.slane %v4271_v27, %v9917_v14  ;;  %v4296_v51 = vrot.slane %v4271_v27, %v9914_v13  ;;  %v4300_v36 = vrot.slane %v4271_v27, %v9922_v17  ;;  %v4304_v25 = vrot.slane %v4271_v27, %v9925_v18 }
0x1cae   :  { %9474 = vrcp.f32 %v4280_v54 }
0x1caf   :  { %9476 = vrcp.f32 %v4276_v9 }
0x1cb0   :  { %9478 = vrcp.f32 %v4284_v58 }
0x1cb1   :  { %9480 = vrcp.f32 %v4288_v47 }
0x1cb2   :  { %9482 = vrcp.f32 %v4292_v28 }
0x1cb3   :  { %9484 = vrcp.f32 %v4296_v51  ;;  %v9709_v51 = vld [vmem:[%s13010_s7] sm:$0xff] }
0x1cb4   :  { %9486 = vrcp.f32 %v4300_v36 }
0x1cb5   :  { %9488 = vrcp.f32 %v4304_v25 }
0x1cb8   :  { %v9475_v2 = vpop.eup %9474 }
0x1cb9   :  { %v9477_v0 = vpop.eup %9476  ;;  %v4316_v43 = vmul.f32 %v9475_v2, %v11523_v39 }
0x1cba   :  { %v9479_v55 = vpop.eup %9478  ;;  %v4314_v37 = vmul.f32 %v9477_v0, %v11521_v15 }
0x1cbb   :  { %v9481_v48 = vpop.eup %9480  ;;  %4336 = vperm.xlu1 %9262, %v4316_v43   ;;  %v4318_v63 = vmul.f32 %v9479_v55, %v11527_v62 }
0x1cbc   :  { %4331 = vperm.xlu0 %9261, %v4314_v37   ;;  %v9483_v53 = vpop.eup %9482  ;;  %v4320_v35 = vmul.f32 %v9481_v48, %v11533_v42 }
0x1cbd   :  { %v9485_v32 = vpop.eup %9484  ;;  %v4322_v27 = vmul.f32 %v9483_v53, %v11539_v45 }
0x1cbe   :  { %v9487_v54 = vpop.eup %9486  ;;  %v4324_v39 = vmul.f32 %v9485_v32, %v11529_v12  ;;  %v13049_v12 = vmov 5  }
0x1cbf   :  { %4341 = vperm.xlu1 %9262, %v4318_v63   ;;  %v9489_v9 = vpop.eup %9488  ;;  %v4326_v15 = vmul.f32 %v9487_v54, %v11542_v19  ;;  %v12973_v19 = vmov 6  }
0x1cc0   :  { %4346 = vperm.xlu0 %9261, %v4320_v35   ;;  %v4328_v58 = vmul.f32 %v9489_v9, %v11535_v23 }
0x1cc3   :  { %4351 = vperm.xlu1 %9262, %v4322_v27  }
0x1cc4   :  { %4356 = vperm.xlu0 %9261, %v4324_v39  }
0x1cc7   :  { %4361 = vperm.xlu1 %9262, %v4326_v15   ;;  %v3775_v62 = vpop.xlane.xlu0 %3774 }
0x1cc8   :  { %4366 = vperm.xlu0 %9261, %v4328_v58   ;;  %v3784_v42 = vrot.slane %v3775_v62, %v9907_v8  ;;  %v3780_v47 = vrot.slane %v3775_v62, %v9895_v4  ;;  %v3796_v28 = vrot.slane %v3775_v62, %v9917_v14  ;;  %v3788_v45 = vrot.slane %v3775_v62, %v9898_v5 }
0x1cc9   :  { %v3804_v23 = vrot.slane %v3775_v62, %v9922_v17  ;;  %v3792_v36 = vrot.slane %v3775_v62, %v9904_v7  ;;  %v3800_v25 = vrot.slane %v3775_v62, %v9914_v13  ;;  %v3808_v55 = vrot.slane %v3775_v62, %v9925_v18 }
0x1cca   :  { %9490 = vrcp.f32 %v3784_v42 }
0x1ccb   :  { %9263 = vset.pattern.permute.xlu1 %v13049_v12  ;;  %9492 = vrcp.f32 %v3780_v47 }
0x1ccc   :  { %2249 = vperm.xlu1 %9263, %v10584_v52   ;;  %9264 = vset.pattern.permute.xlu0 %v12973_v19  ;;  %9494 = vrcp.f32 %v3796_v28 }
0x1ccd   :  { %2395 = vperm.xlu0 %9264, %v9709_v51   ;;  %9496 = vrcp.f32 %v3788_v45 }
0x1cce   :  { %9498 = vrcp.f32 %v3804_v23 }
0x1ccf   :  { %9500 = vrcp.f32 %v3792_v36 }
0x1cd0   :  { %9265 = vset.pattern.permute.xlu1 %v12973_v19  ;;  %9502 = vrcp.f32 %v3800_v25 }
0x1cd1   :  { %2400 = vperm.xlu1 %9265, %v10584_v52   ;;  %9267 = vset.pattern.permute.xlu0 %v13025_v33  ;;  %9504 = vrcp.f32 %v3808_v55 }
0x1cd4   :  { %v9491_v2 = vpop.eup %9490 }
0x1cd5   :  { %v9493_v0 = vpop.eup %9492  ;;  %9266 = vset.pattern.permute.xlu1 %v13025_v33  ;;  %v3820_v43 = vmul.f32 %v9491_v2, %v11563_v16 }
0x1cd6   :  { %v9495_v37 = vpop.eup %9494  ;;  %v3818_v48 = vmul.f32 %v9493_v0, %v11561_v29 }
0x1cd7   :  { %v9497_v63 = vpop.eup %9496  ;;  %3840 = vperm.xlu0 %9267, %v3820_v43   ;;  %v3826_v53 = vmul.f32 %v9495_v37, %v11573_v24 }
0x1cd8   :  { %3835 = vperm.xlu1 %9266, %v3818_v48   ;;  %v9499_v35 = vpop.eup %9498  ;;  %v3822_v32 = vmul.f32 %v9497_v63, %v11567_v21 }
0x1cd9   :  { %v9501_v27 = vpop.eup %9500  ;;  %v3830_v16 = vmul.f32 %v9499_v35, %v11579_v22 }
0x1cda   :  { %v3824_v54 = vmul.f32 %v9501_v27, %v11569_v38  ;;  %v9503_v39 = vpop.eup %9502  ;;  %v2254_v27 = vmul.f32 %v10893_v40, %v10903_v50 }
0x1cdb   :  { %3855 = vperm.xlu0 %9267, %v3826_v53   ;;  %v3828_v29 = vmul.f32 %v9503_v39, %v11575_v26  ;;  %v9505_v9 = vpop.eup %9504 }
0x1cdc   :  { %3845 = vperm.xlu1 %9266, %v3822_v32   ;;  %v3832_v24 = vmul.f32 %v9505_v9, %v11581_v10 }
0x1cdf   :  { %3865 = vperm.xlu0 %9267, %v3830_v16  }
0x1ce0   :  { %3850 = vperm.xlu1 %9266, %v3824_v54  }
0x1ce4   :  { %3860 = vperm.xlu1 %9266, %v3828_v29  }
0x1ce8   :  { %3870 = vperm.xlu1 %9266, %v3832_v24  }
0x1d3a   :  { %v4337_v15 = vpop.permute.xlu1 %4336 }
0x1d3b   :  { %v4370_v21 = vmul.f32 %v4337_v15, %v11180_v20  ;;  %v4332_v58 = vpop.permute.xlu0 %4331 }
0x1d3c   :  { %v4369_v62 = vmul.f32 %v4332_v58, %v11186_v3 }
0x1d3d   :  { %v4384_v22 = vsel %vm150_vm0, %v4370_v21, 0.0 }
0x1d3e   :  { %v4385_v42 = vrot.slane %v4384_v22, 4  ;;  %v4377_v38 = vsel %vm150_vm0, %v4369_v62, 0.0  ;;  %v4342_v47 = vpop.permute.xlu1 %4341 }
0x1d3f   :  { %v4378_v28 = vrot.slane %v4377_v38, 4  ;;  %v4371_v26 = vmul.f32 %v4342_v47, %v11211_v61  ;;  %v4347_v45 = vpop.permute.xlu0 %4346 }
0x1d40   :  { %v4386_v23 = vadd.f32 %v4385_v42, %v4384_v22  ;;  %v4372_v10 = vmul.f32 %v4347_v45, %v11235_v60 }
0x1d41   :  { %v4379_v51 = vadd.f32 %v4378_v28, %v4377_v38  ;;  %v4391_v36 = vsel %vm150_vm0, %v4371_v26, 0.0 }
0x1d42   :  { %v4387_v25 = vrot.slane %v4386_v23, 2  ;;  %v4392_v2 = vrot.slane %v4391_v36, 4  ;;  %v4398_v0 = vsel %vm150_vm0, %v4372_v10, 0.0  ;;  %v4352_v43 = vpop.permute.xlu1 %4351 }
0x1d43   :  { %v4380_v55 = vrot.slane %v4379_v51, 2  ;;  %v4399_v37 = vrot.slane %v4398_v0, 4  ;;  %v4373_v48 = vmul.f32 %v4352_v43, %v11259_v56  ;;  %v4357_v63 = vpop.permute.xlu0 %4356 }
0x1d44   :  { %v4388_v53 = vadd.f32 %v4387_v25, %v4386_v23  ;;  %v4393_v35 = vadd.f32 %v4392_v2, %v4391_v36  ;;  %v4374_v32 = vmul.f32 %v4357_v63, %v11290_v30 }
0x1d45   :  { %v4381_v16 = vadd.f32 %v4380_v55, %v4379_v51  ;;  %v4400_v54 = vadd.f32 %v4399_v37, %v4398_v0  ;;  %v4405_v39 = vsel %vm150_vm0, %v4373_v48, 0.0 }
0x1d46   :  { %v4389_v29 = vrot.slane %v4388_v53, 1  ;;  %v4394_v9 = vrot.slane %v4393_v35, 2  ;;  %v4406_v24 = vrot.slane %v4405_v39, 4  ;;  %v4412_v15 = vsel %vm150_vm0, %v4374_v32, 0.0  ;;  %v4362_v21 = vpop.permute.xlu1 %4361 }
0x1d47   :  { %v4382_v58 = vrot.slane %v4381_v16, 1  ;;  %v4401_v62 = vrot.slane %v4400_v54, 2  ;;  %v4413_v22 = vrot.slane %v4412_v15, 4  ;;  %v4375_v42 = vmul.f32 %v4362_v21, %v11312_v49  ;;  %v4367_v38 = vpop.permute.xlu0 %4366 }
0x1d48   :  { %v4390_v47 = vadd.f32 %v4389_v29, %v4388_v53  ;;  %v4395_v28 = vadd.f32 %v4394_v9, %v4393_v35  ;;  %v4407_v26 = vadd.f32 %v4406_v24, %v4405_v39  ;;  %v4376_v40 = vmul.f32 %v4367_v38, %v11249_v59 }
0x1d49   :  { %v4383_v50 = vadd.f32 %v4382_v58, %v4381_v16  ;;  %v4402_v45 = vadd.f32 %v4401_v62, %v4400_v54  ;;  %v4414_v23 = vadd.f32 %v4413_v22, %v4412_v15  ;;  %v4419_v10 = vsel %vm150_vm0, %v4375_v42, 0.0 }
0x1d4a   :  { %v4396_v51 = vrot.slane %v4395_v28, 1  ;;  %v4408_v36 = vrot.slane %v4407_v26, 2  ;;  %v4420_v25 = vrot.slane %v4419_v10, 4  ;;  %v4426_v2 = vsel %vm150_vm0, %v4376_v40, 0.0 }
0x1d4b   :  { %v4457_v0 = vsel %vm628_vm1, %v4390_v47, %v4383_v50  ;;  %v4403_v43 = vrot.slane %v4402_v45, 1  ;;  %v4415_v55 = vrot.slane %v4414_v23, 2  ;;  %v4427_v37 = vrot.slane %v4426_v2, 4  ;;  %v2250_v48 = vpop.permute.xlu1 %2249 }
0x1d4c   :  { %v4397_v63 = vadd.f32 %v4396_v51, %v4395_v28  ;;  %v4409_v53 = vadd.f32 %v4408_v36, %v4407_v26  ;;  %v4421_v35 = vadd.f32 %v4420_v25, %v4419_v10  ;;  %v2252_v32 = vmul.f32 %v2250_v48, %v10776_v1  ;;  %v2396_v9 = vpop.permute.xlu0 %2395 }
0x1d4d   :  { %v4404_v16 = vadd.f32 %v4403_v43, %v4402_v45  ;;  %v4416_v54 = vadd.f32 %v4415_v55, %v4414_v23  ;;  %v4428_v39 = vadd.f32 %v4427_v37, %v4426_v2  ;;  %v2255_v29 = vmul.f32 %v2250_v48, %v10900_v44 }
0x1d4e   :  { %v4458_v24 = vsel %vm630_vm2, %v4397_v63, %v4457_v0  ;;  %v4410_v15 = vrot.slane %v4409_v53, 1  ;;  %v4422_v21 = vrot.slane %v4421_v35, 2  ;;  %v2253_v58 = vadd.f32 %v2252_v32, %v10923_v11 }
0x1d4f   :  { %v4417_v62 = vrot.slane %v4416_v54, 1  ;;  %v4429_v22 = vrot.slane %v4428_v39, 2  ;;  %v2256_v42 = vadd.f32 %v2255_v29, %v2254_v27  ;;  %v4459_v1 = vsel %vm632_vm3, %v4404_v16, %v4458_v24 }
0x1d50   :  { %v4411_v38 = vadd.f32 %v4410_v15, %v4409_v53  ;;  %v4423_v47 = vadd.f32 %v4422_v21, %v4421_v35  ;;  %v2398_v28 = vmul.f32 %v2396_v9, %v2253_v58  ;;  %v2401_v26 = vpop.permute.xlu1 %2400 }
0x1d51   :  { %v4418_v40 = vadd.f32 %v4417_v62, %v4416_v54  ;;  %v4430_v50 = vadd.f32 %v4429_v22, %v4428_v39  ;;  %v2405_v45 = vmul.f32 %v2396_v9, %v2256_v42  ;;  %v2403_v44 = vmul.f32 0.0, %v2401_v26 }
0x1d52   :  { %v4424_v23 = vrot.slane %v4423_v47, 1  ;;  %v4460_v10 = vsel %vm634_vm4, %v4411_v38, %v4459_v1 }
0x1d53   :  { %v4431_v51 = vrot.slane %v4430_v50, 1  ;;  %v11684_v36 = vadd.f32 %v2403_v44, %v2398_v28  ;;  %v11686_v11 = vadd.f32 %v2405_v45, %v2403_v44  ;;  %v4461_v2 = vsel %vm636_vm5, %v4418_v40, %v4460_v10 }
0x1d54   :  { %v4425_v25 = vadd.f32 %v4424_v23, %v4423_v47 }
0x1d55   :  { %4548 = vrot.lane.b32.xlu1 %v11684_v36, %s13012_s4  ;;  %v4432_v27 = vadd.f32 %v4431_v51, %v4430_v50 }
0x1d56   :  { %v4462_v0 = vsel %vm638_vm6, %v4425_v25, %v4461_v2  ;;  %v3841_v63 = vpop.permute.xlu0 %3840 }
0x1d57   :  { %v4463_v43 = vsel %vm640_vm7, %v4432_v27, %v4462_v0  ;;  %v3836_v55 = vpop.permute.xlu1 %3835  ;;  %v3874_v35 = vmul.f32 %v3841_v63, %v11180_v20 }
0x1d58   :  { %4464 = vrot.lane.b32.xlu0 %v4463_v43, %s13050_s23  ;;  %v3873_v53 = vmul.f32 %v3836_v55, %v11186_v3 }
0x1d59   :  { %v3888_v9 = vsel %vm150_vm0, %v3874_v35, 0.0 }
0x1d5a   :  { %v3856_v54 = vpop.permute.xlu0 %3855  ;;  %v3881_v29 = vsel %vm150_vm0, %v3873_v53, 0.0  ;;  %v3889_v3 = vrot.slane %v3888_v9, 4 }
0x1d5b   :  { %v3846_v37 = vpop.permute.xlu1 %3845  ;;  %v3882_v58 = vrot.slane %v3881_v29, 4  ;;  %v3877_v20 = vmul.f32 %v3856_v54, %v11259_v56 }
0x1d5c   :  { %v3875_v32 = vmul.f32 %v3846_v37, %v11211_v61  ;;  %v3890_v28 = vadd.f32 %v3889_v3, %v3888_v9 }
0x1d5d   :  { %v3883_v47 = vadd.f32 %v3882_v58, %v3881_v29  ;;  %v3909_v26 = vsel %vm150_vm0, %v3877_v20, 0.0 }
0x1d5e   :  { %v3895_v24 = vsel %vm150_vm0, %v3875_v32, 0.0  ;;  %v3866_v22 = vpop.permute.xlu0 %3865  ;;  %v3910_v45 = vrot.slane %v3909_v26, 4  ;;  %v3891_v23 = vrot.slane %v3890_v28, 2 }
0x1d5f   :  { %v3851_v48 = vpop.permute.xlu1 %3850  ;;  %v3896_v61 = vrot.slane %v3895_v24, 4  ;;  %v3879_v1 = vmul.f32 %v3866_v22, %v11312_v49  ;;  %v3884_v44 = vrot.slane %v3883_v47, 2 }
0x1d60   :  { %v3876_v39 = vmul.f32 %v3851_v48, %v11235_v60  ;;  %v3911_v2 = vadd.f32 %v3910_v45, %v3909_v26  ;;  %v3892_v55 = vadd.f32 %v3891_v23, %v3890_v28 }
0x1d61   :  { %v3897_v40 = vadd.f32 %v3896_v61, %v3895_v24  ;;  %v3923_v10 = vsel %vm150_vm0, %v3879_v1, 0.0  ;;  %v3885_v43 = vadd.f32 %v3884_v44, %v3883_v47 }
0x1d62   :  { %v3902_v15 = vsel %vm150_vm0, %v3876_v39, 0.0  ;;  %v3924_v0 = vrot.slane %v3923_v10, 4  ;;  %v3912_v53 = vrot.slane %v3911_v2, 2 }
0x1d63   :  { %v3861_v16 = vpop.permute.xlu1 %3860  ;;  %v3903_v42 = vrot.slane %v3902_v15, 4  ;;  %v3898_v51 = vrot.slane %v3897_v40, 2  ;;  %v3886_v32 = vrot.slane %v3885_v43, 1 }
0x1d64   :  { %v3878_v21 = vmul.f32 %v3861_v16, %v11290_v30  ;;  %v3925_v35 = vadd.f32 %v3924_v0, %v3923_v10  ;;  %v3893_v16 = vrot.slane %v3892_v55, 1  ;;  %v3913_v24 = vadd.f32 %v3912_v53, %v3911_v2 }
0x1d65   :  { %v3904_v30 = vadd.f32 %v3903_v42, %v3902_v15  ;;  %v3899_v37 = vadd.f32 %v3898_v51, %v3897_v40 }
0x1d66   :  { %v3916_v60 = vsel %vm150_vm0, %v3878_v21, 0.0  ;;  %v3926_v15 = vrot.slane %v3925_v35, 2  ;;  %v3887_v21 = vadd.f32 %v3886_v32, %v3885_v43  ;;  %v3894_v58 = vadd.f32 %v3893_v16, %v3892_v55  ;;  %v9710_v43 = vld [vmem:[%s13009_s0] ss:$0 sm:$0xff]  ;;  %v13057_v16 = vld [vmem:[#allocation9_spill] sm:$0xff] }
0x1d67   :  { %v3871_v62 = vpop.permute.xlu1 %3870  ;;  %v3917_v50 = vrot.slane %v3916_v60, 4  ;;  %v3905_v25 = vrot.slane %v3904_v30, 2  ;;  %v3900_v54 = vrot.slane %v3899_v37, 1  ;;  %v3914_v22 = vrot.slane %v3913_v24, 1 }
0x1d68   :  { %v3880_v38 = vmul.f32 %v3871_v62, %v11249_v59  ;;  %v3927_v42 = vadd.f32 %v3926_v15, %v3925_v35  ;;  %v13056_v35 = vld [vmem:[#allocation10_spill] sm:$0xff] }
0x1d69   :  { %v3918_v27 = vadd.f32 %v3917_v50, %v3916_v60  ;;  %v3906_v49 = vadd.f32 %v3905_v25, %v3904_v30  ;;  %v3901_v3 = vadd.f32 %v3900_v54, %v3899_v37  ;;  %v4441_v60 = vsel %vm628_vm1, %v3894_v58, %v3887_v21 }
0x1d6a   :  { %v3930_v56 = vsel %vm150_vm0, %v3880_v38, 0.0  ;;  %v3915_v1 = vadd.f32 %v3914_v22, %v3913_v24  ;;  %v3928_v40 = vrot.slane %v3927_v42, 1  ;;  %v13051_v25 = vmov 0.0  }
0x1d6b   :  { %v3931_v59 = vrot.slane %v3930_v56, 4  ;;  %v3919_v48 = vrot.slane %v3918_v27, 2  ;;  %v3907_v39 = vrot.slane %v3906_v49, 1  ;;  %v4442_v38 = vsel %vm630_vm2, %v3901_v3, %v4441_v60 }
0x1d6d   :  { %v3932_v63 = vadd.f32 %v3931_v59, %v3930_v56  ;;  %v3920_v29 = vadd.f32 %v3919_v48, %v3918_v27  ;;  %v3908_v20 = vadd.f32 %v3907_v39, %v3906_v49  ;;  %v3929_v56 = vadd.f32 %v3928_v40, %v3927_v42  ;;  %v13053_v59 = vld [vmem:[#allocation5_spill] sm:$0xff]  ;;  %v13054_v49 = vld [vmem:[#allocation8_spill] sm:$0xff] }
0x1d6e   :  { %v13052_v27 = vmov 0.0|0.0   ;;  %v13058_v39 = vld [vmem:[#allocation12_spill] sm:$0xff] }
0x1d6f   :  { %v3933_v9 = vrot.slane %v3932_v63, 2  ;;  %v3921_v62 = vrot.slane %v3920_v29, 1  ;;  %v4443_v26 = vsel %vm632_vm3, %v3908_v20, %v4442_v38  ;;  %v11753_v20 = vld [vmem:[%s13010_s7 + $0x8] sm:$0xff] }
0x1d70   :  { %v4444_v30 = vsel %vm634_vm4, %v3915_v1, %v4443_v26 }
0x1d71   :  { %v3934_v61 = vadd.f32 %v3933_v9, %v3932_v63  ;;  %v3922_v47 = vadd.f32 %v3921_v62, %v3920_v29  ;;  %v13055_v63 = vld [vmem:[#allocation7_spill] sm:$0xff]  ;;  %v13060_v62 = vmov 1  }
0x1d72   :  { %v13059_v9 = vld [vmem:[#allocation11_spill] sm:$0xff] }
0x1d73   :  { %v3935_v28 = vrot.slane %v3934_v61, 1  ;;  %v4445_v45 = vsel %vm636_vm5, %v3922_v47, %v4444_v30 }
0x1d74   :  { %v4446_v44 = vsel %vm638_vm6, %v3929_v56, %v4445_v45 }
0x1d75   :  { %v3936_v50 = vadd.f32 %v3935_v28, %v3934_v61  ;;  %v11759_v28 = vsub.f32 1.0, %v11753_v20 }
0x1d77   :  { %v4447_v23 = vsel %vm640_vm7, %v3936_v50, %v4446_v44 }
0x1dc7   :  { %v4549_v2 = vpop.permute.xlu1 %4548 }
0x1dca   :  { %v4465_v10 = vpop.permute.xlu0 %4464 }
0x1dcb   :  { %v4467_v51 = vsel %vm150_vm0, %v4447_v23, %v4465_v10 }
0x1dcc   :  { %8817 = vmatmul.mubr.msk.f32.vlgmr.msra.gmra.mrb[30].mxu0 %vm1493_vm10, %v4467_v51 }
0x1dcd   :  { %9119 = vmatpush3.bf16.msra.mxu0 %v10506_v34  ;;  %8827 = vmatprep.mubr.msk.f32.mxu0 %vm9741_vm9, %v13051_v25 }
0x1dce   :  { %9120 = vmatprep.subr.bf16.mxu0 %v13052_v27 }
0x1dd1   :  { %9122 = vmatpush3.bf16.msra.mxu0 %v13053_v59 }
0x1dd2   :  { %9129 = vmatprep.subr.bf16.mxu0 %v13052_v27 }
0x1dd4   :  { %8828 = vmatmul.mubr.msk.f32.vlgmr.msra.gmra.mrb[32].mxu0 %vm1493_vm10, %v4549_v2 }
0x1dd5   :  { %9131 = vmatpush3.bf16.msra.mxu0 %v10506_v34  ;;  %8849 = vmatprep.mubr.msk.f32.mxu0 %vm9741_vm9, %v13051_v25 }
0x1dd6   :  { %9132 = vmatprep.subr.bf16.mxu0 %v13052_v27 }
0x1dd9   :  { %9134 = vmatpush3.bf16.msra.mxu0 %v13053_v59 }
0x1dda   :  { %9141 = vmatprep.subr.bf16.mxu0 %v13052_v27 }
0x1e9f   :  { %v4537_v0 = vpop.f32.mrb[30].mxu0 }
0x1ea0   :  { %v4538_v55 = vadd.f32 %v9710_v43, %v4537_v0  ;;  %v8818_v37 = vpop.f32.mrb[31].mxu0 }
0x1ea2   :  { %v4541_v48 = vadd.f32 %v4538_v55, %v13054_v49  ;;  %v4542_v53 = vadd.f32 %v13055_v63, %v4538_v55  ;;  %v11738_v32 = vadd.f32 %v4538_v55, %v13056_v35  ;;  %v11741_v54 = vadd.f32 %v13057_v16, %v4538_v55 }
0x1ea3   :  { %v11744_v29 = vadd.f32 %v4538_v55, %v13058_v39  ;;  %v11747_v24 = vadd.f32 %v13059_v9, %v4538_v55  ;;  %v13061_v49 = vmov 2  }
0x1ea7   :  { %v4618_v15 = vpop.f32.mrb[32].mxu0 }
0x1ea8   :  { %v4622_v21 = vadd.f32 %v4618_v15, %v4541_v48  ;;  %v8829_v58 = vpop.f32.mrb[33].mxu0 }
0x1eaa   :  { %9506 = vtanh.f32 %v4622_v21  ;;  %v8374_v61 = vmul.f32 -1.442695, %v4622_v21 }
0x1eac   :  { %9508 = vpow2.f32 %v8374_v61 }
0x1eb4   :  { %v9507_v3 = vpop.eup %9506 }
0x1eb5   :  { %4632 = vrot.lane.b32.xlu0 %v9507_v3, %s9744_s8 }
0x1eb6   :  { %v9509_v22 = vpop.eup %9508 }
0x1eb7   :  { %v4626_v42 = vadd.f32 1.0, %v9509_v22 }
0x1eb9   :  { %4650 = vperm.xlu0 %9267, %v11753_v20   ;;  %9510 = vrcp.f32 %v4626_v42 }
0x1ebd   :  { %9268 = vset.pattern.permute.xlu0 %v13060_v62 }
0x1ec3   :  { %v9511_v60 = vpop.eup %9510 }
0x1ec4   :  { %v4630_v26 = vmul.f32 %v9511_v60, %v11686_v11 }
0x1f27   :  { %v4633_v38 = vpop.permute.xlu0 %4632 }
0x1f28   :  { %v4635_v47 = vmul.f32 %v9511_v60, %v4633_v38 }
0x1f2a   :  { %4637 = vrot.lane.b32.xlu1 %v4635_v47, %s13012_s4 }
0x1f2e   :  { %4656 = vperm.xlu1 %9266, %v11759_v28  }
0x1f32   :  { %9269 = vset.pattern.permute.xlu1 %v13060_v62 }
0x1f38   :  { %v4651_v50 = vpop.permute.xlu0 %4650 }
0x1f9c   :  { %v4638_v1 = vpop.permute.xlu1 %4637 }
0x1f9d   :  { %v4640_v40 = vadd.f32 %v4638_v1, %v4630_v26 }
0x1f9f   :  { %9512 = vtanh.f32 %v4640_v40  ;;  %v4661_v15 = vmul.f32 %v4651_v50, %v4640_v40 }
0x1fa9   :  { %v9513_v30 = vpop.eup %9512 }
0x1faa   :  { %4643 = vrot.lane.b32.xlu0 %v9513_v30, %s9744_s8 }
0x1fad   :  { %v4657_v45 = vpop.permute.xlu1 %4656 }
0x1fae   :  { %v4659_v23 = vmul.f32 %v4657_v45, %v11684_v36 }
0x201c   :  { %v4644_v56 = vpop.permute.xlu0 %4643 }
0x201d   :  { %v4646_v44 = vmul.f32 %v9511_v60, %v4644_v56 }
0x201f   :  { %v11766_v10 = vmul.f32 %v4651_v50, %v4646_v44  ;;  %v13062_v50 = vld [vmem:[#allocation25_spill] sm:$0xff] }
0x2021   :  { %v4660_v51 = vadd.f32 %v4659_v23, %v11766_v10 }
0x2023   :  { %4665 = vrot.lane.b32.xlu1 %v4660_v51, %s13012_s4 }
0x2095   :  { %v4666_v2 = vpop.permute.xlu1 %4665 }
0x2096   :  { %8839 = vmatmul.mubr.msk.f32.vlgmr.msra.gmra.mrb[26].mxu1 %vm1493_vm10, %v4666_v2 }
0x2097   :  { %9137 = vmatpush3.bf16.msra.mxu1 %v10506_v34  ;;  %8860 = vmatprep.mubr.msk.f32.mxu1 %vm9741_vm9, %v13051_v25 }
0x2098   :  { %9138 = vmatprep.subr.bf16.mxu1 %v13052_v27 }
0x209b   :  { %9140 = vmatpush3.bf16.msra.mxu1 %v13053_v59 }
0x209c   :  { %9147 = vmatprep.subr.bf16.mxu1 %v13052_v27 }
0x2169   :  { %v4735_v0 = vpop.f32.mrb[26].mxu1 }
0x216a   :  { %v4739_v43 = vadd.f32 %v4735_v0, %v4542_v53  ;;  %v8840_v55 = vpop.f32.mrb[27].mxu1  ;;  %v4662_v53 = vmul.f32 %v4657_v45, %v11686_v11 }
0x216c   :  { %9514 = vtanh.f32 %v4739_v43  ;;  %v8376_v48 = vmul.f32 -1.442695, %v4739_v43  ;;  %v4663_v21 = vadd.f32 %v4662_v53, %v4661_v15 }
0x216e   :  { %9516 = vpow2.f32 %v8376_v48 }
0x2176   :  { %v9515_v37 = vpop.eup %9514 }
0x2177   :  { %4749 = vrot.lane.b32.xlu0 %v9515_v37, %s9744_s8 }
0x2178   :  { %v9517_v63 = vpop.eup %9516 }
0x2179   :  { %v4743_v35 = vadd.f32 1.0, %v9517_v63 }
0x217b   :  { %4765 = vperm.xlu0 %9268, %v11753_v20   ;;  %9518 = vrcp.f32 %v4743_v35 }
0x217f   :  { %9271 = vset.pattern.permute.xlu0 %v13061_v49 }
0x2185   :  { %v9519_v16 = vpop.eup %9518 }
0x2186   :  { %v4747_v58 = vmul.f32 %v9519_v16, %v4663_v21 }
0x21e9   :  { %v4750_v39 = vpop.permute.xlu0 %4749 }
0x21ea   :  { %v4752_v9 = vmul.f32 %v9519_v16, %v4750_v39 }
0x21ec   :  { %4754 = vrot.lane.b32.xlu1 %v4752_v9, %s13012_s4 }
0x21f0   :  { %4770 = vperm.xlu1 %9269, %v11759_v28  }
0x21f4   :  { %9270 = vset.pattern.permute.xlu1 %v13061_v49 }
0x21fa   :  { %v4766_v47 = vpop.permute.xlu0 %4765 }
0x225e   :  { %v4755_v3 = vpop.permute.xlu1 %4754 }
0x225f   :  { %v4757_v61 = vadd.f32 %v4755_v3, %v4747_v58 }
0x2261   :  { %9520 = vtanh.f32 %v4757_v61  ;;  %v4775_v63 = vmul.f32 %v4766_v47, %v4757_v61  ;;  %v13064_v61 = vld [vmem:[#allocation19_spill] sm:$0xff] }
0x226b   :  { %v9521_v22 = vpop.eup %9520 }
0x226c   :  { %4760 = vrot.lane.b32.xlu1 %v9521_v22, %s9744_s8 }
0x226f   :  { %v4771_v42 = vpop.permute.xlu1 %4770 }
0x2270   :  { %v4773_v26 = vmul.f32 %v4771_v42, %v4660_v51  ;;  %v13063_v51 = vmov 3  }
0x22de   :  { %v4761_v60 = vpop.permute.xlu1 %4760 }
0x22df   :  { %v4763_v38 = vmul.f32 %v9519_v16, %v4761_v60 }
0x22e1   :  { %v11785_v1 = vmul.f32 %v4766_v47, %v4763_v38 }
0x22e3   :  { %v4774_v30 = vadd.f32 %v4773_v26, %v11785_v1 }
0x22e5   :  { %4779 = vrot.lane.b32.xlu0 %v4774_v30, %s13012_s4 }
0x2357   :  { %v4780_v40 = vpop.permute.xlu0 %4779 }
0x2358   :  { %8850 = vmatmul.mubr.msk.f32.vlgmr.msra.gmra.mrb[34].mxu0 %vm1493_vm10, %v4780_v40 }
0x2359   :  { %9143 = vmatpush3.bf16.msra.mxu0 %v10506_v34  ;;  %8871 = vmatprep.mubr.msk.f32.mxu0 %vm9741_vm9, %v13051_v25 }
0x235a   :  { %9144 = vmatprep.subr.bf16.mxu0 %v13052_v27 }
0x235d   :  { %9146 = vmatpush3.bf16.msra.mxu0 %v13053_v59 }
0x235e   :  { %9154 = vmatprep.subr.bf16.mxu0 %v13062_v50 }
0x242b   :  { %v4849_v45 = vpop.f32.mrb[34].mxu0 }
0x242c   :  { %v4853_v56 = vadd.f32 %v4849_v45, %v11738_v32  ;;  %v8851_v44 = vpop.f32.mrb[35].mxu0  ;;  %v4776_v32 = vmul.f32 %v4771_v42, %v4663_v21  ;;  %v13065_v45 = vmov 4  }
0x242e   :  { %9522 = vtanh.f32 %v4853_v56  ;;  %v8378_v2 = vmul.f32 -1.442695, %v4853_v56  ;;  %v4777_v35 = vadd.f32 %v4776_v32, %v4775_v63 }
0x2430   :  { %9524 = vpow2.f32 %v8378_v2 }
0x2438   :  { %v9523_v23 = vpop.eup %9522 }
0x2439   :  { %4863 = vrot.lane.b32.xlu1 %v9523_v23, %s9744_s8 }
0x243a   :  { %v9525_v0 = vpop.eup %9524 }
0x243b   :  { %v4857_v43 = vadd.f32 1.0, %v9525_v0 }
0x243d   :  { %4879 = vperm.xlu1 %9270, %v11753_v20   ;;  %9526 = vrcp.f32 %v4857_v43 }
0x2441   :  { %9273 = vset.pattern.permute.xlu1 %v13063_v51 }
0x2447   :  { %v9527_v55 = vpop.eup %9526 }
0x2448   :  { %v4861_v16 = vmul.f32 %v9527_v55, %v4777_v35 }
0x24ab   :  { %v4864_v37 = vpop.permute.xlu1 %4863 }
0x24ac   :  { %v4866_v48 = vmul.f32 %v9527_v55, %v4864_v37 }
0x24ae   :  { %4868 = vrot.lane.b32.xlu0 %v4866_v48, %s13012_s4 }
0x24b2   :  { %4884 = vperm.xlu0 %9271, %v11759_v28  }
0x24b6   :  { %9272 = vset.pattern.permute.xlu0 %v13063_v51 }
0x24bc   :  { %v4880_v15 = vpop.permute.xlu1 %4879 }
0x2520   :  { %v4869_v39 = vpop.permute.xlu0 %4868 }
0x2521   :  { %v4871_v9 = vadd.f32 %v4869_v39, %v4861_v16 }
0x2523   :  { %9528 = vtanh.f32 %v4871_v9 }
0x252d   :  { %v9529_v53 = vpop.eup %9528 }
0x252e   :  { %4874 = vrot.lane.b32.xlu1 %v9529_v53, %s9744_s8 }
0x2531   :  { %v4885_v58 = vpop.permute.xlu0 %4884 }
0x2532   :  { %v4887_v60 = vmul.f32 %v4885_v58, %v4774_v30 }
0x25a0   :  { %v4875_v3 = vpop.permute.xlu1 %4874 }
0x25a1   :  { %v4877_v22 = vmul.f32 %v9527_v55, %v4875_v3  ;;  %v4889_v55 = vmul.f32 %v4880_v15, %v4871_v9  ;;  %v13066_v9 = vld [vmem:[#allocation26_spill] sm:$0xff] }
0x25a3   :  { %v11804_v38 = vmul.f32 %v4880_v15, %v4877_v22 }
0x25a5   :  { %v4888_v26 = vadd.f32 %v4887_v60, %v11804_v38 }
0x25a7   :  { %4893 = vrot.lane.b32.xlu1 %v4888_v26, %s13012_s4 }
0x2619   :  { %v4894_v21 = vpop.permute.xlu1 %4893 }
0x261a   :  { %8861 = vmatmul.mubr.msk.f32.vlgmr.msra.gmra.mrb[28].mxu1 %vm1493_vm10, %v4894_v21 }
0x261b   :  { %9149 = vmatpush3.bf16.msra.mxu1 %v10506_v34  ;;  %8882 = vmatprep.mubr.msk.f32.mxu1 %vm9741_vm9, %v13051_v25 }
0x261c   :  { %9150 = vmatprep.subr.bf16.mxu1 %v13052_v27 }
0x261f   :  { %9152 = vmatpush3.bf16.msra.mxu1 %v13053_v59 }
0x2620   :  { %9227 = vmatprep.subr.bf16.mxu1 %v13064_v61 }
0x26ed   :  { %v4963_v42 = vpop.f32.mrb[28].mxu1 }
0x26ee   :  { %v4967_v47 = vadd.f32 %v4963_v42, %v11741_v54  ;;  %v8862_v30 = vpop.f32.mrb[29].mxu1  ;;  %v4890_v54 = vmul.f32 %v4885_v58, %v4777_v35 }
0x26f0   :  { %9530 = vtanh.f32 %v4967_v47  ;;  %v8380_v56 = vmul.f32 -1.442695, %v4967_v47  ;;  %v4891_v37 = vadd.f32 %v4890_v54, %v4889_v55 }
0x26f2   :  { %9532 = vpow2.f32 %v8380_v56 }
0x26fa   :  { %v9531_v40 = vpop.eup %9530 }
0x26fb   :  { %4977 = vrot.lane.b32.xlu0 %v9531_v40, %s9744_s8 }
0x26fc   :  { %v9533_v44 = vpop.eup %9532 }
0x26fd   :  { %v4971_v23 = vadd.f32 1.0, %v9533_v44 }
0x26ff   :  { %4993 = vperm.xlu0 %9272, %v11753_v20   ;;  %9534 = vrcp.f32 %v4971_v23 }
0x2703   :  { %9275 = vset.pattern.permute.xlu0 %v13065_v45 }
0x2709   :  { %v9535_v2 = vpop.eup %9534 }
0x270a   :  { %v4975_v48 = vmul.f32 %v9535_v2, %v4891_v37 }
0x276d   :  { %v4978_v0 = vpop.permute.xlu0 %4977 }
0x276e   :  { %v4980_v43 = vmul.f32 %v9535_v2, %v4978_v0 }
0x2770   :  { %4982 = vrot.lane.b32.xlu1 %v4980_v43, %s13012_s4 }
0x2774   :  { %4998 = vperm.xlu1 %9273, %v11759_v28  }
0x2778   :  { %9274 = vset.pattern.permute.xlu1 %v13065_v45 }
0x277e   :  { %v4994_v22 = vpop.permute.xlu0 %4993 }
0x27e2   :  { %v4983_v32 = vpop.permute.xlu1 %4982 }
0x27e3   :  { %v4985_v63 = vadd.f32 %v4983_v32, %v4975_v48 }
0x27e5   :  { %9536 = vtanh.f32 %v4985_v63  ;;  %v5003_v0 = vmul.f32 %v4994_v22, %v4985_v63 }
0x27ef   :  { %v9537_v16 = vpop.eup %9536 }
0x27f0   :  { %4988 = vrot.lane.b32.xlu1 %v9537_v16, %s9744_s8 }
0x27f3   :  { %v4999_v39 = vpop.permute.xlu1 %4998 }
0x27f4   :  { %v5001_v60 = vmul.f32 %v4999_v39, %v4888_v26 }
0x2862   :  { %v4989_v53 = vpop.permute.xlu1 %4988 }
0x2863   :  { %v4991_v3 = vmul.f32 %v9535_v2, %v4989_v53 }
0x2865   :  { %v11823_v21 = vmul.f32 %v4994_v22, %v4991_v3  ;;  %v13067_v22 = vld [vmem:[#allocation20_spill] sm:$0xff] }
0x2867   :  { %v5002_v42 = vadd.f32 %v5001_v60, %v11823_v21 }
0x2869   :  { %5007 = vrot.lane.b32.xlu0 %v5002_v42, %s13012_s4 }
0x28db   :  { %v5008_v35 = vpop.permute.xlu0 %5007 }
0x28dc   :  { %8872 = vmatmul.mubr.msk.f32.vlgmr.msra.gmra.mrb[36].mxu0 %vm1493_vm10, %v5008_v35  ;;  %v13068_v35 = vld [vmem:[#allocation21_spill] sm:$0xff] }
0x28dd   :  { %9156 = vmatpush3.bf16.msra.mxu0 %v13062_v50 }
0x28de   :  { %9158 = vmatprep.subr.bf16.mxu0 %v13066_v9 }
0x28e1   :  { %9160 = vmatpush3.bf16.msra.mxu0 %v13066_v9 }
0x28e2   :  { %9162 = vmatprep.subr.bf16.mxu0 %v13064_v61 }
0x29af   :  { %v5077_v15 = vpop.f32.mrb[36].mxu0 }
0x29b0   :  { %v5081_v58 = vadd.f32 %v5077_v15, %v11744_v29  ;;  %v8873_v26 = vpop.f32.mrb[37].mxu0  ;;  %v5004_v29 = vmul.f32 %v4999_v39, %v4891_v37  ;;  %v11861_v15 = vrot.slane %v13068_v35, %v13067_v22 }
0x29b2   :  { %9538 = vtanh.f32 %v5081_v58  ;;  %v8382_v30 = vmul.f32 -1.442695, %v5081_v58  ;;  %v11839_v43 = vadd.f32 %v5004_v29, %v5003_v0  ;;  %v9711_v58 = vld [vmem:[%s12896_s1 + $0x8] sm:$0xff] }
0x29b3   :  { %v5382_v26 = vcombine.high %v9711_v58, %v9711_v58  ;;  %v13070_v58 = vld [vmem:[#allocation23_spill] sm:$0xff] }
0x29b4   :  { %9540 = vpow2.f32 %v8382_v30 }
0x29bc   :  { %v9539_v47 = vpop.eup %9538 }
0x29bd   :  { %5091 = vrot.lane.b32.xlu1 %v9539_v47, %s9744_s8  ;;  %v5396_v47 = vrot.slane %v5382_v26, %v13067_v22  ;;  %v9714_v26 = vld [vmem:[%s12897_s5 + $0x28] sm:$0xff] }
0x29be   :  { %v9541_v40 = vpop.eup %9540 }
0x29bf   :  { %v5085_v56 = vadd.f32 1.0, %v9541_v40  ;;  %v5398_v40 = vcombine.high %v5396_v47, %v5396_v47 }
0x29c1   :  { %5107 = vperm.xlu1 %9274, %v11753_v20   ;;  %9542 = vrcp.f32 %v5085_v56  ;;  %v9712_v56 = vld [vmem:[%s12897_s5 + $0x10] sm:$0xff]  ;;  %v5426_v29 = vrot.slane %v5398_v40, %v13067_v22 }
0x29c5   :  { %9278 = vset.pattern.permute.xlu1 %v13025_v33 }
0x29cb   :  { %v9543_v44 = vpop.eup %9542 }
0x29cc   :  { %v5089_v54 = vmul.f32 %v9543_v44, %v11839_v43 }
0x2a2f   :  { %v5092_v23 = vpop.permute.xlu1 %5091 }
0x2a30   :  { %v5094_v2 = vmul.f32 %v9543_v44, %v5092_v23  ;;  %v5412_v23 = vrot.slane %v5396_v47, %v13067_v22 }
0x2a32   :  { %5096 = vrot.lane.b32.xlu0 %v5094_v2, %s13012_s4  ;;  %v5450_v0 = vrot.slane %v5412_v23, %v9895_v4 }
0x2a36   :  { %5112 = vperm.xlu0 %9275, %v11759_v28  }
0x2a3a   :  { %9276 = vset.pattern.permute.xlu0 %v13049_v12 }
0x2a40   :  { %v11846_v16 = vpop.permute.xlu1 %5107 }
0x2aa4   :  { %v5097_v55 = vpop.permute.xlu0 %5096 }
0x2aa5   :  { %v11842_v48 = vadd.f32 %v5097_v55, %v5089_v54  ;;  %v5428_v54 = vcombine.high %v5412_v23, %v5412_v23  ;;  %v13069_v55 = vld [vmem:[#allocation24_spill] sm:$0xff] }
0x2aa7   :  { %9544 = vtanh.f32 %v11842_v48  ;;  %v5458_v35 = vrot.slane %v5428_v54, %v9895_v4 }
0x2ab1   :  { %v9545_v32 = vpop.eup %9544 }
0x2ab2   :  { %5102 = vrot.lane.b32.xlu1 %v9545_v32, %s9744_s8  ;;  %v5454_v32 = vrot.slane %v5426_v29, %v9895_v4 }
0x2ab5   :  { %v11848_v53 = vpop.permute.xlu0 %5112 }
0x2ab6   :  { %v5115_v37 = vmul.f32 %v11848_v53, %v5002_v42  ;;  %v5427_v42 = vcombine.high %v11861_v15, %v11861_v15 }
0x2ab8   :  { %v5442_v30 = vrot.slane %v5427_v42, %v9895_v4  ;;  %v5476_v42 = vmul.f32 %v9714_v26, %v5454_v32 }
0x2b24   :  { %v5103_v3 = vpop.permute.xlu1 %5102 }
0x2b25   :  { %v5105_v60 = vmul.f32 %v9543_v44, %v5103_v3  ;;  %v5473_v44 = vmul.f32 %v9712_v56, %v5442_v30  ;;  %v5430_v3 = vcombine.high %v5426_v29, %v5426_v29  ;;  %v9715_v30 = vld [vmem:[%s12897_s5 + $0x30] sm:$0xff]  ;;  %v13071_v56 = vld [vmem:[#allocation3_spill] sm:$0xff] }
0x2b26   :  { %v5477_v40 = vmul.f32 %v9715_v30, %v5458_v35 }
0x2b27   :  { %v11852_v63 = vmul.f32 %v11846_v16, %v5105_v60  ;;  %v9713_v60 = vld [vmem:[%s12897_s5 + $0x20] sm:$0xff]  ;;  %v5462_v47 = vrot.slane %v5430_v3, %v9895_v4 }
0x2b29   :  { %v11855_v39 = vadd.f32 %v5115_v37, %v11852_v63  ;;  %v5475_v37 = vmul.f32 %v9713_v60, %v5450_v0 }
0x2b2b   :  { %5121 = vrot.lane.b32.xlu1 %v11855_v39, %s13012_s4 }
0x2b9d   :  { %v5122_v2 = vpop.permute.xlu1 %5121 }
0x2b9e   :  { %8883 = vmatmul.mubr.msk.f32.vlgmr.msra.gmra.mrb[30].mxu1 %vm1493_vm10, %v5122_v2  ;;  %v13072_v2 = vld [vmem:[#allocation4_spill] sm:$0xff] }
0x2b9f   :  { %9229 = vmatpush3.bf16.msra.mxu1 %v13064_v61  ;;  %8913 = vmatprep.mubr.msk.f32.mxu1 %vm1493_vm10, %v5473_v44  ;;  %v9716_v44 = vld [vmem:[%s12897_s5 + $0x38] sm:$0xff] }
0x2ba0   :  { %9228 = vmatprep.subr.bf16.mxu1 %v13069_v55  ;;  %v5478_v23 = vmul.f32 %v9716_v44, %v5462_v47 }
0x2ba3   :  { %9230 = vmatpush3.bf16.msra.mxu1 %v13069_v55 }
0x2ba4   :  { %9177 = vmatprep.subr.bf16.mxu1 %v13052_v27 }
0x2ba6   :  { %8914 = vmatmul.mubr.msk.f32.vlgmr.msra.gmra.mrb[32].mxu1 %vm1493_vm10, %v13070_v58 }
0x2ba7   :  { %8916 = vmatprep.mubr.msk.f32.mxu1 %vm1493_vm10, %v5475_v37  ;;  %9179 = vmatpush3.bf16.msra.mxu1 %v13071_v56 }
0x2ba8   :  { %9180 = vmatprep.subr.bf16.mxu1 %v13052_v27 }
0x2baa   :  { %8917 = vmatmul.mubr.msk.f32.gmra.mrb[34].mxu1 %vm1493_vm10, %v5476_v42 }
0x2bab   :  { %8919 = vmatprep.mubr.msk.f32.mxu1 %vm1493_vm10, %v5477_v40  ;;  %9182 = vmatpush3.bf16.msra.mxu1 %v13072_v2 }
0x2bac   :  { %9183 = vmatprep.subr.bf16.mxu1 %v13052_v27 }
0x2bae   :  { %8920 = vmatmul.mubr.msk.f32.gmra.mrb[36].mxu1 %vm1493_vm10, %v5478_v23 }
0x2baf   :  { %8955 = vmatprep.mubr.msk.f32.mxu1 %vm9741_vm9, %v13051_v25 }
0x2c71   :  { %v5191_v29 = vpop.f32.mrb[30].mxu1 }
0x2c72   :  { %v5195_v0 = vadd.f32 %v5191_v29, %v11747_v24  ;;  %v8884_v54 = vpop.f32.mrb[31].mxu1 }
0x2c74   :  { %9546 = vtanh.f32 %v5195_v0  ;;  %v8384_v24 = vmul.f32 -1.442695, %v5195_v0 }
0x2c76   :  { %9548 = vpow2.f32 %v8384_v24 }
0x2c79   :  { %v11910_v32 = vpop.f32.mrb[32].mxu1 }
0x2c7a   :  { %v11912_v3 = vpop.f32.mrb[33].mxu1 }
0x2c7d   :  { %v11914_v60 = vpop.f32.mrb[34].mxu1 }
0x2c7e   :  { %v9547_v37 = vpop.eup %9546  ;;  %v11916_v35 = vpop.f32.mrb[35].mxu1 }
0x2c7f   :  { %5205 = vrot.lane.b32.xlu0 %v9547_v37, %s9744_s8  ;;  %v5434_v37 = vrot.slane %v11861_v15, %v9895_v4  ;;  %v8400_v15 = vld [vmem:[%s12900_s2 + $0x8] sm:$0xff] }
0x2c80   :  { %v9549_v42 = vpop.eup %9548 }
0x2c81   :  { %v11919_v58 = vpop.f32.mrb[36].mxu1  ;;  %v5199_v47 = vadd.f32 1.0, %v9549_v42 }
0x2c82   :  { %v11921_v26 = vpop.f32.mrb[37].mxu1 }
0x2c83   :  { %5221 = vperm.xlu0 %9276, %v11753_v20   ;;  %9550 = vrcp.f32 %v5199_v47  ;;  %v5118_v20 = vmul.f32 %v11848_v53, %v11839_v43  ;;  %v13073_v47 = vld [vmem:[#allocation22_spill] sm:$0xff] }
0x2c87   :  { %5242 = vrot.lane.b32.xlu0 %v11785_v1, %s13012_s4  ;;  %v5117_v1 = vmul.f32 %v11846_v16, %v11842_v48 }
0x2c88   :  { %9277 = vset.pattern.permute.xlu0 %v13025_v33 }
0x2c89   :  { %v11934_v44 = vadd.f32 %v5118_v20, %v5117_v1  ;;  %v9719_v20 = vld [vmem:[%s12901_s15] ss:$0 sm:$0xff] }
0x2c8b   :  { %5246 = vrot.lane.b32.xlu0 %v11823_v21, %s13012_s4 }
0x2c8d   :  { %v9551_v30 = vpop.eup %9550 }
0x2c8e   :  { %v5203_v21 = vmul.f32 %v9551_v30, %v11934_v44 }
0x2cf1   :  { %v5206_v40 = vpop.permute.xlu0 %5205 }
0x2cf2   :  { %v5208_v56 = vmul.f32 %v9551_v30, %v5206_v40  ;;  %v13075_v40 = vld [vmem:[#allocation28_spill] sm:$0xff] }
0x2cf4   :  { %5210 = vrot.lane.b32.xlu1 %v5208_v56, %s13012_s4 }
0x2d02   :  { %v11947_v43 = vpop.permute.xlu0 %5221 }
0x2d06   :  { %v5243_v53 = vpop.permute.xlu0 %5242 }
0x2d66   :  { %v5211_v23 = vpop.permute.xlu1 %5210 }
0x2d67   :  { %v11937_v2 = vadd.f32 %v5211_v23, %v5203_v21 }
0x2d69   :  { %9552 = vtanh.f32 %v11937_v2 }
0x2d73   :  { %v9553_v29 = vpop.eup %9552 }
0x2d74   :  { %5216 = vrot.lane.b32.xlu1 %v9553_v29, %s9744_s8 }
0x2d78   :  { %5240 = vrot.lane.b32.xlu1 %v11766_v10, %s13012_s4 }
0x2d7c   :  { %5244 = vrot.lane.b32.xlu1 %v11804_v38, %s13012_s4  ;;  %v5247_v38 = vpop.permute.xlu0 %5246 }
0x2d80   :  { %5248 = vrot.lane.b32.xlu1 %v11852_v63, %s13012_s4 }
0x2de6   :  { %v5217_v48 = vpop.permute.xlu1 %5216 }
0x2de7   :  { %v5219_v16 = vmul.f32 %v9551_v30, %v5217_v48  ;;  %v13074_v30 = vld [vmem:[#allocation27_spill] sm:$0xff] }
0x2de9   :  { %v11950_v0 = vmul.f32 %v11947_v43, %v5219_v16 }
0x2dea   :  { %v5241_v54 = vpop.permute.xlu1 %5240 }
0x2deb   :  { %5250 = vrot.lane.b32.xlu0 %v11950_v0, %s13012_s4  ;;  %8893 = vmatprep.mubr.msk.f32.mxu0 %vm1493_vm10, %v5241_v54 }
0x2dec   :  { %8894 = vmatmul.mubr.msk.f32.vlgmr.msra.gmra.mrb[38].mxu0 %vm1493_vm10, %v5243_v53 }
0x2ded   :  { %9164 = vmatpush3.bf16.msra.mxu0 %v13064_v61  ;;  %v9717_v61 = vld [vmem:[%s12897_s5] sm:$0xff] }
0x2dee   :  { %v5245_v10 = vpop.permute.xlu1 %5244  ;;  %9166 = vmatprep.subr.bf16.mxu0 %v13069_v55  ;;  %v5471_v24 = vmul.f32 %v9717_v61, %v5434_v37 }
0x2def   :  { %8896 = vmatprep.mubr.msk.f32.mxu0 %vm1493_vm10, %v5245_v10 }
0x2df0   :  { %8897 = vmatmul.mubr.msk.f32.gmra.mrb[40].mxu0 %vm1493_vm10, %v5247_v38 }
0x2df1   :  { %9168 = vmatpush3.bf16.msra.mxu0 %v13069_v55  ;;  %v9718_v55 = vld [vmem:[%s12899_s18] sm:$0xff] }
0x2df2   :  { %v5249_v63 = vpop.permute.xlu1 %5248  ;;  %8922 = vmatprep.subr.mxu0 %v13051_v25 }
0x2df3   :  { %8899 = vmatprep.mubr.msk.f32.mxu0 %vm1493_vm10, %v5249_v63 }
0x2e5d   :  { %v5251_v42 = vpop.permute.xlu0 %5250 }
0x2e5e   :  { %8900 = vmatmul.mubr.msk.f32.gmra.mrb[42].mxu0 %vm1493_vm10, %v5251_v42  ;;  %v9720_v42 = vld [vmem:[%s12904_s17] ss:$0 sm:$0xff] }
0x2e5f   :  { %8910 = vmatprep.mubr.msk.f32.mxu0 %vm1493_vm10, %v5471_v24 }
0x2e62   :  { %8911 = vmatmul.mubr.msk.f32.vlgmr.msra.gmra.mrb[44].mxu0 %vm1493_vm10, %v13073_v47  ;;  %v5585_v47 = vadd.f32 %v9720_v42, %v11910_v32 }
0x2e63   :  { %8923 = vmatpush3.msra.mxu0 %v9718_v55  ;;  %8924 = vmatprep.mubr.msk.f32.mxu0 %vm9741_vm9, %v13051_v25  ;;  %v9721_v55 = vld [vmem:[%s12905_s19] ss:$0 sm:$0xff] }
0x2e64   :  { %9170 = vmatprep.subr.bf16.mxu0 %v13074_v30 }
0x2e66   :  { %8925 = vmatmul.mubr.msk.f32.vlgmr.msra.gmra.mrb[46].mxu0 %vm643_vm8, %v8400_v15 }
0x2e67   :  { %9172 = vmatpush3.bf16.msra.mxu0 %v13074_v30 }
0x2e68   :  { %9174 = vmatprep.subr.bf16.mxu0 %v13075_v40 }
0x2e6b   :  { %9176 = vmatpush3.bf16.msra.mxu0 %v13075_v40  ;;  %v5580_v40 = vadd.f32 %v9720_v42, %v11912_v3  ;;  %v5590_v3 = vadd.f32 %v9720_v42, %v11916_v35 }
0x2e6c   :  { %9189 = vmatprep.subr.bf16.mxu0 %v13052_v27 }
0x2ebf   :  { %v8895_v56 = vpop.f32.mrb[38].mxu0 }
0x2ec0   :  { %v5336_v1 = vadd.f32 %v9719_v20, %v8895_v56  ;;  %v5330_v21 = vpop.f32.mrb[39].mxu0  ;;  %v5595_v56 = vadd.f32 %v9720_v42, %v11914_v60  ;;  %v5605_v60 = vadd.f32 %v9720_v42, %v11919_v58 }
0x2ec1   :  { %v5331_v23 = vadd.f32 %v9719_v20, %v5330_v21 }
0x2ec2   :  { %5360 = vst [vmem:[%s12902_s24 + $0x38] sm:$0xff] %v5336_v1 }
0x2ec3   :  { %5359 = vst [vmem:[%s12902_s24 + $0x30] sm:$0xff] %v5331_v23  ;;  %v8898_v29 = vpop.f32.mrb[40].mxu0 }
0x2ec4   :  { %v5346_v48 = vadd.f32 %v9719_v20, %v8898_v29  ;;  %v5340_v16 = vpop.f32.mrb[41].mxu0  ;;  %v13076_v29 = vld [vmem:[#allocation35_spill] sm:$0xff] }
0x2ec5   :  { %v5341_v53 = vadd.f32 %v9719_v20, %v5340_v16 }
0x2ec6   :  { %5362 = vst [vmem:[%s12902_s24 + $0x48] sm:$0xff] %v5346_v48  ;;  %v5686_v48 = vmul.f32 %v5585_v47, %v13076_v29  ;;  %v5600_v47 = vadd.f32 %v9720_v42, %v11921_v26 }
0x2ec7   :  { %5361 = vst [vmem:[%s12902_s24 + $0x40] sm:$0xff] %v5341_v53 }
0x2f31   :  { %v8901_v54 = vpop.f32.mrb[42].mxu0 }
0x2f32   :  { %v5356_v10 = vadd.f32 %v9719_v20, %v8901_v54  ;;  %v5350_v38 = vpop.f32.mrb[43].mxu0  ;;  %v13077_v54 = vld [vmem:[#allocation34_spill] sm:$0xff] }
0x2f33   :  { %v5351_v63 = vadd.f32 %v9719_v20, %v5350_v38  ;;  %v13078_v38 = vld [vmem:[#allocation38_spill] sm:$0xff] }
0x2f34   :  { %5364 = vst [vmem:[%s12902_s24 + $0x58] sm:$0xff] %v5356_v10  ;;  %v5685_v10 = vmul.f32 %v5580_v40, %v13077_v54  ;;  %v13081_v54 = vld [vmem:[#allocation37_spill] sm:$0xff] }
0x2f35   :  { %5363 = vst [vmem:[%s12902_s24 + $0x50] sm:$0xff] %v5351_v63  ;;  %v8912_v37 = vpop.f32.mrb[44].mxu0  ;;  %v5688_v63 = vmul.f32 %v5595_v56, %v13078_v38  ;;  %v5687_v38 = vmul.f32 %v5590_v3, %v13081_v54  ;;  %v13083_v3 = vld [vmem:[#allocation36_spill] sm:$0xff] }
0x2f36   :  { %v5569_v61 = vpop.f32.mrb[45].mxu0  ;;  %v5575_v21 = vadd.f32 %v9720_v42, %v8912_v37 }
0x2f37   :  { %v5570_v23 = vadd.f32 %v9720_v42, %v5569_v61 }
0x2f39   :  { %v5679_v24 = vpop.f32.mrb[46].mxu0 }
0x2f3a   :  { %v5680_v15 = vadd.f32 %v9721_v55, %v5679_v24  ;;  %v8926_v30 = vpop.f32.mrb[47].mxu0 }
0x2f3c   :  { %v5692_v20 = vcombine.high %v5680_v15, %v5680_v15  ;;  %v5699_v1 = vrot.slane %v5680_v15, %v13067_v22  ;;  %v13079_v15 = vld [vmem:[#allocation32_spill] sm:$0xff] }
0x2f3d   :  { %v5684_v30 = vmul.f32 %v5575_v21, %v13079_v15 }
0x2f3e   :  { %v5706_v16 = vrot.slane %v5692_v20, %v13067_v22  ;;  %v5707_v32 = vcombine.high %v5699_v1, %v5699_v1  ;;  %v5715_v53 = vrot.slane %v5699_v1, %v13067_v22  ;;  %v13080_v20 = vld [vmem:[#allocation33_spill] sm:$0xff] }
0x2f3f   :  { %v5683_v1 = vmul.f32 %v5570_v23, %v13080_v20  ;;  %v5690_v20 = vmul.f32 %v5605_v60, %v13083_v3 }
0x2f40   :  { %v5708_v24 = vcombine.high %v5706_v16, %v5706_v16  ;;  %v5722_v55 = vrot.slane %v5706_v16, %v13067_v22  ;;  %v5729_v37 = vrot.slane %v5707_v32, %v13067_v22  ;;  %v5737_v61 = vcombine.high %v5715_v53, %v5715_v53 }
0x2f41   :  { %v5744_v40 = vrot.slane %v5715_v53, %v9895_v4  ;;  %v13082_v53 = vld [vmem:[#allocation39_spill] sm:$0xff] }
0x2f42   :  { %v5736_v56 = vrot.slane %v5708_v24, %v13067_v22  ;;  %v5738_v29 = vcombine.high %v5722_v55, %v5722_v55  ;;  %v5739_v35 = vcombine.high %v5729_v37, %v5729_v37  ;;  %v5748_v58 = vrot.slane %v5729_v37, %v9895_v4 }
0x2f43   :  { %v5752_v16 = vrot.slane %v5737_v61, %v9895_v4  ;;  %v5760_v32 = vrot.slane %v5722_v55, %v9895_v4  ;;  %v5781_v19 = vadd.f32 %v5744_v40, %v5683_v1  ;;  %v5689_v15 = vmul.f32 %v5600_v47, %v13082_v53 }
0x2f44   :  { %v5740_v26 = vcombine.high %v5736_v56, %v5736_v56  ;;  %v5782_v42 = vadd.f32 %v5748_v58, %v5684_v30  ;;  %v5756_v21 = vrot.slane %v5739_v35, %v9895_v4  ;;  %v5764_v23 = vrot.slane %v5736_v56, %v9895_v4  ;;  %v9723_v35 = vld [vmem:[%s12908_s22] ss:$0 sm:$0xff] }
0x2f45   :  { %8935 = vmatprep.mubr.msk.f32.mxu0 %vm1493_vm10, %v5781_v19  ;;  %v5783_v22 = vadd.f32 %v5752_v16, %v5685_v10  ;;  %v5785_v24 = vadd.f32 %v5760_v32, %v5687_v38  ;;  %v5768_v37 = vrot.slane %v5738_v29, %v9895_v4 }
0x2f46   :  { %8936 = vmatmul.mubr.msk.f32.vlgmr.msra.gmra.mrb[48].mxu0 %vm1493_vm10, %v5782_v42  ;;  %v5784_v55 = vadd.f32 %v5756_v21, %v5686_v48  ;;  %v5786_v61 = vadd.f32 %v5764_v23, %v5688_v63  ;;  %v5772_v30 = vrot.slane %v5740_v26, %v9895_v4  ;;  %v9722_v48 = vld [vmem:[%s12907_s21] ss:$0 sm:$0xff] }
0x2f47   :  { %8938 = vmatprep.mubr.msk.f32.mxu0 %vm1493_vm10, %v5783_v22  ;;  %v5787_v1 = vadd.f32 %v5768_v37, %v5689_v15  ;;  %9191 = vmatpush3.bf16.msra.mxu0 %v10506_v34 }
0x2f48   :  { %v5788_v47 = vadd.f32 %v5772_v30, %v5690_v20  ;;  %9192 = vmatprep.subr.bf16.mxu0 %v13052_v27 }
0x2f4a   :  { %8939 = vmatmul.mubr.msk.f32.gmra.mrb[50].mxu0 %vm1493_vm10, %v5784_v55 }
0x2f4b   :  { %8941 = vmatprep.mubr.msk.f32.mxu0 %vm1493_vm10, %v5785_v24  ;;  %9194 = vmatpush3.bf16.msra.mxu0 %v13053_v59 }
0x2f4c   :  { %9201 = vmatprep.subr.bf16.mxu0 %v13052_v27 }
0x2f4e   :  { %8942 = vmatmul.mubr.msk.f32.gmra.mrb[52].mxu0 %vm1493_vm10, %v5786_v61 }
0x2f4f   :  { %8944 = vmatprep.mubr.msk.f32.mxu0 %vm1493_vm10, %v5787_v1 }
0x2f52   :  { %8945 = vmatmul.mubr.msk.f32.gmra.mrb[54].mxu0 %vm1493_vm10, %v5788_v47 }
0x2f53   :  { %8977 = vmatprep.mubr.msk.f32.mxu0 %vm9741_vm9, %v13051_v25 }
0x3019   :  { %v8937_v19 = vpop.f32.mrb[48].mxu0 }
0x301a   :  { %v5885_v10 = vadd.f32 %v9722_v48, %v8937_v19  ;;  %v5879_v63 = vpop.f32.mrb[49].mxu0 }
0x301b   :  { %v5880_v60 = vadd.f32 %v9722_v48, %v5879_v63 }
0x301c   :  { %v5919_v40 = vmax.f32 %v5885_v10, 0.0 }
0x301d   :  { %v5918_v56 = vmax.f32 %v5880_v60, 0.0  ;;  %v8940_v29 = vpop.f32.mrb[50].mxu0 }
0x301e   :  { %v5927_v58 = vmul.f32 %v9723_v35, %v5919_v40  ;;  %v5895_v54 = vadd.f32 %v9722_v48, %v8940_v29  ;;  %v5889_v38 = vpop.f32.mrb[51].mxu0 }
0x301f   :  { %v5926_v16 = vmul.f32 %v9723_v35, %v5918_v56  ;;  %v5890_v32 = vadd.f32 %v9722_v48, %v5889_v38 }
0x3020   :  { %v5921_v26 = vmax.f32 %v5895_v54, 0.0  ;;  %v5937_v42 = vsel %vm150_vm0, %v5927_v58, 0.0 }
0x3021   :  { %v5920_v21 = vmax.f32 %v5890_v32, 0.0  ;;  %5938 = vadd.xlane.f32.xlu0 %v5937_v42  ;;  %v8943_v23 = vpop.f32.mrb[52].mxu0  ;;  %v5934_v53 = vsel %vm150_vm0, %v5926_v16, 0.0  ;;  %v13084_v42 = vld [vmem:[#allocation29_spill] sm:$0xff] }
0x3022   :  { %v5929_v15 = vmul.f32 %v9723_v35, %v5921_v26  ;;  %v5905_v22 = vadd.f32 %v9722_v48, %v8943_v23  ;;  %v5899_v24 = vpop.f32.mrb[53].mxu0  ;;  %5935 = vadd.xlane.f32.xlu1 %v5934_v53 }
0x3023   :  { %v5900_v37 = vadd.f32 %v9722_v48, %v5899_v24  ;;  %v5928_v3 = vmul.f32 %v9723_v35, %v5920_v21 }
0x3024   :  { %v5923_v20 = vmax.f32 %v5905_v22, 0.0  ;;  %v5943_v55 = vsel %vm150_vm0, %v5929_v15, 0.0 }
0x3025   :  { %v5922_v61 = vmax.f32 %v5900_v37, 0.0  ;;  %5944 = vadd.xlane.f32.xlu0 %v5943_v55  ;;  %v8946_v30 = vpop.f32.mrb[54].mxu0  ;;  %v5940_v40 = vsel %vm150_vm0, %v5928_v3, 0.0 }
0x3026   :  { %v5915_v1 = vadd.f32 %v9722_v48, %v8946_v30  ;;  %v5909_v47 = vpop.f32.mrb[55].mxu0  ;;  %v5931_v63 = vmul.f32 %v9723_v35, %v5923_v20 }
0x3027   :  { %v5930_v19 = vmul.f32 %v9723_v35, %v5922_v61  ;;  %v5910_v10 = vadd.f32 %v9722_v48, %v5909_v47 }
0x3028   :  { %v5925_v60 = vmax.f32 %v5915_v1, 0.0  ;;  %v5949_v38 = vsel %vm150_vm0, %v5931_v63, 0.0 }
0x3029   :  { %v5924_v56 = vmax.f32 %v5910_v10, 0.0  ;;  %5941 = vadd.xlane.f32.xlu0 %v5940_v40  ;;  %v5946_v29 = vsel %vm150_vm0, %v5930_v19, 0.0 }
0x302a   :  { %5947 = vadd.xlane.f32.xlu1 %v5946_v29  ;;  %v5933_v54 = vmul.f32 %v9723_v35, %v5925_v60 }
0x302b   :  { %v5932_v58 = vmul.f32 %v9723_v35, %v5924_v56 }
0x302c   :  { %v5955_v32 = vsel %vm150_vm0, %v5933_v54, 0.0 }
0x302d   :  { %5950 = vadd.xlane.f32.xlu0 %v5949_v38  ;;  %v5952_v16 = vsel %vm150_vm0, %v5932_v58, 0.0 }
0x302e   :  { %5953 = vadd.xlane.f32.xlu1 %v5952_v16 }
0x3031   :  { %5956 = vadd.xlane.f32.xlu0 %v5955_v32 }
0x30ae   :  { %v5939_v48 = vpop.xlane.xlu0 %5938 }
0x30af   :  { %v5936_v26 = vpop.xlane.xlu1 %5935  ;;  %v5959_v21 = vadd.f32 %v5939_v48, %v13084_v42 }
0x30b0   :  { %v5958_v23 = vadd.f32 %v5936_v26, %v13084_v42 }
0x30b1   :  { %v5981_v15 = vrot.slane %v5959_v21, %v9901_v6 }
0x30b2   :  { %v5945_v53 = vpop.xlane.xlu0 %5944  ;;  %v5977_v35 = vrot.slane %v5958_v23, %v9901_v6 }
0x30b3   :  { %v5961_v22 = vadd.f32 %v5945_v53, %v13084_v42 }
0x30b4   :  { %v6006_v61 = vsel %vm628_vm1, %v5981_v15, %v5977_v35 }
0x30b5   :  { %v5989_v30 = vrot.slane %v5961_v22, %v9901_v6 }
0x30b6   :  { %v5942_v24 = vpop.xlane.xlu0 %5941 }
0x30b7   :  { %v5960_v37 = vadd.f32 %v5942_v24, %v13084_v42  ;;  %v5948_v3 = vpop.xlane.xlu1 %5947 }
0x30b8   :  { %v5962_v20 = vadd.f32 %v5948_v3, %v13084_v42 }
0x30b9   :  { %v5985_v55 = vrot.slane %v5960_v37, %v9901_v6 }
0x30ba   :  { %v5993_v1 = vrot.slane %v5962_v20, %v9901_v6  ;;  %v5951_v47 = vpop.xlane.xlu0 %5950 }
0x30bb   :  { %v6007_v19 = vsel %vm630_vm2, %v5985_v55, %v6006_v61  ;;  %v5963_v10 = vadd.f32 %v5951_v47, %v13084_v42  ;;  %v5954_v63 = vpop.xlane.xlu1 %5953 }
0x30bc   :  { %v6008_v60 = vsel %vm632_vm3, %v5989_v30, %v6007_v19  ;;  %v5964_v40 = vadd.f32 %v5954_v63, %v13084_v42 }
0x30bd   :  { %v6009_v56 = vsel %vm634_vm4, %v5993_v1, %v6008_v60  ;;  %v5997_v29 = vrot.slane %v5963_v10, %v9901_v6 }
0x30be   :  { %v6001_v58 = vrot.slane %v5964_v40, %v9901_v6  ;;  %v5957_v54 = vpop.xlane.xlu0 %5956 }
0x30bf   :  { %v5965_v38 = vadd.f32 %v5957_v54, %v13084_v42  ;;  %v6010_v16 = vsel %vm636_vm5, %v5997_v29, %v6009_v56 }
0x30c0   :  { %v6011_v48 = vsel %vm638_vm6, %v6001_v58, %v6010_v16 }
0x30c1   :  { %v6005_v32 = vrot.slane %v5965_v38, %v9901_v6 }
0x30c3   :  { %v12092_v26 = vsel %vm640_vm7, %v6005_v32, %v6011_v48 }
0x30c4   :  { %13085 = vst [vmem:[#allocation8_spill] sm:$0xff] %v12092_v26  ;;  %v6014_v53 = vsel %vm643_vm8, %v12092_v26, -inf }
0x30c5   :  { %6015 = vmax.xlane.f32.xlu1 %v6014_v53 }
0x3152   :  { %v6016_v15 = vpop.xlane.xlu1 %6015 }
0x3153   :  { %v6021_v35 = vrot.slane %v6016_v15, %v9895_v4  ;;  %v6025_v24 = vrot.slane %v6016_v15, %v9907_v8  ;;  %v6029_v42 = vrot.slane %v6016_v15, %v9898_v5  ;;  %v6033_v61 = vrot.slane %v6016_v15, %v9904_v7 }
0x3154   :  { %v6037_v19 = vrot.slane %v6016_v15, %v9917_v14  ;;  %v6041_v56 = vrot.slane %v6016_v15, %v9914_v13  ;;  %v6045_v54 = vrot.slane %v6016_v15, %v9922_v17 }
0x3155   :  { %v6058_v3 = vsub.f32 %v5958_v23, %v6021_v35  ;;  %v6059_v55 = vsub.f32 %v5959_v21, %v6025_v24  ;;  %v6060_v30 = vsub.f32 %v5960_v37, %v6029_v42  ;;  %v6061_v63 = vsub.f32 %v5961_v22, %v6033_v61 }
0x3156   :  { %v6062_v29 = vsub.f32 %v5962_v20, %v6037_v19  ;;  %v6063_v23 = vsub.f32 %v5963_v10, %v6041_v56  ;;  %v6049_v22 = vrot.slane %v6016_v15, %v9925_v18  ;;  %v6064_v32 = vsub.f32 %v5964_v40, %v6045_v54 }
0x3157   :  { %v6066_v1 = vmul.f32 1.442695, %v6058_v3  ;;  %v6068_v47 = vmul.f32 1.442695, %v6059_v55  ;;  %v6070_v60 = vmul.f32 1.442695, %v6060_v30 }
0x3158   :  { %v6072_v58 = vmul.f32 1.442695, %v6061_v63  ;;  %v6074_v21 = vmul.f32 1.442695, %v6062_v29  ;;  %v6076_v20 = vmul.f32 1.442695, %v6063_v23  ;;  %v6065_v10 = vsub.f32 %v5965_v38, %v6049_v22 }
0x3159   :  { %9554 = vpow2.f32 %v6066_v1  ;;  %v6078_v53 = vmul.f32 1.442695, %v6064_v32 }
0x315a   :  { %9556 = vpow2.f32 %v6068_v47  ;;  %v6080_v24 = vmul.f32 1.442695, %v6065_v10 }
0x315b   :  { %9558 = vpow2.f32 %v6070_v60 }
0x315c   :  { %9560 = vpow2.f32 %v6072_v58 }
0x315d   :  { %9562 = vpow2.f32 %v6074_v21 }
0x315e   :  { %9564 = vpow2.f32 %v6076_v20 }
0x315f   :  { %9566 = vpow2.f32 %v6078_v53 }
0x3160   :  { %9568 = vpow2.f32 %v6080_v24 }
0x3163   :  { %v12103_v16 = vpop.eup %9554 }
0x3164   :  { %v12105_v37 = vpop.eup %9556  ;;  %6091 = vperm.xlu0 %9277, %v12103_v16  }
0x3165   :  { %6094 = vperm.xlu1 %9278, %v12105_v37   ;;  %v12110_v48 = vpop.eup %9558 }
0x3166   :  { %v12113_v35 = vpop.eup %9560 }
0x3167   :  { %v12116_v42 = vpop.eup %9562 }
0x3168   :  { %v12119_v40 = vpop.eup %9564 }
0x3169   :  { %6097 = vperm.xlu1 %9278, %v12110_v48   ;;  %v12122_v15 = vpop.eup %9566 }
0x316a   :  { %v12125_v38 = vpop.eup %9568 }
0x316d   :  { %6100 = vperm.xlu1 %9278, %v12113_v35  }
0x3171   :  { %6103 = vperm.xlu1 %9278, %v12116_v42  }
0x3175   :  { %6106 = vperm.xlu1 %9278, %v12119_v40  }
0x3179   :  { %6109 = vperm.xlu1 %9278, %v12122_v15  }
0x317d   :  { %6112 = vperm.xlu1 %9278, %v12125_v38  }
0x31e3   :  { %v6092_v1 = vpop.permute.xlu0 %6091 }
0x31e4   :  { %v6095_v3 = vpop.permute.xlu1 %6094  ;;  %v6117_v63 = vrot.slane %v6092_v1, %v9901_v6 }
0x31e5   :  { %v6121_v19 = vrot.slane %v6095_v3, %v9901_v6 }
0x31e7   :  { %v6146_v54 = vsel %vm628_vm1, %v6121_v19, %v6117_v63 }
0x31e8   :  { %v6098_v55 = vpop.permute.xlu1 %6097 }
0x31e9   :  { %v6125_v60 = vrot.slane %v6098_v55, %v9901_v6 }
0x31eb   :  { %v6147_v21 = vsel %vm630_vm2, %v6125_v60, %v6146_v54 }
0x31ec   :  { %v6101_v61 = vpop.permute.xlu1 %6100 }
0x31ed   :  { %v6129_v56 = vrot.slane %v6101_v61, %v9901_v6 }
0x31ef   :  { %v6148_v32 = vsel %vm632_vm3, %v6129_v56, %v6147_v21 }
0x31f0   :  { %v6104_v30 = vpop.permute.xlu1 %6103 }
0x31f1   :  { %v6133_v29 = vrot.slane %v6104_v30, %v9901_v6 }
0x31f3   :  { %v6149_v20 = vsel %vm634_vm4, %v6133_v29, %v6148_v32 }
0x31f4   :  { %v6107_v47 = vpop.permute.xlu1 %6106 }
0x31f5   :  { %v6137_v23 = vrot.slane %v6107_v47, %v9901_v6 }
0x31f7   :  { %v6150_v53 = vsel %vm636_vm5, %v6137_v23, %v6149_v20 }
0x31f8   :  { %v6110_v58 = vpop.permute.xlu1 %6109 }
0x31f9   :  { %v6141_v22 = vrot.slane %v6110_v58, %v9901_v6 }
0x31fb   :  { %v6151_v3 = vsel %vm638_vm6, %v6141_v22, %v6150_v53 }
0x31fc   :  { %v6113_v10 = vpop.permute.xlu1 %6112 }
0x31fd   :  { %v6145_v24 = vrot.slane %v6113_v10, %v9901_v6 }
0x31ff   :  { %v6152_v55 = vsel %vm640_vm7, %v6145_v24, %v6151_v3 }
0x3200   :  { %v6154_v61 = vsel %vm643_vm8, %v6152_v55, 0.0 }
0x3201   :  { %6155 = vadd.xlane.f32.xlu1 %v6154_v61 }
0x328e   :  { %v6156_v30 = vpop.xlane.xlu1 %6155 }
0x328f   :  { %v6161_v1 = vrot.slane %v6156_v30, %v9895_v4  ;;  %v6165_v47 = vrot.slane %v6156_v30, %v9907_v8  ;;  %v6169_v19 = vrot.slane %v6156_v30, %v9898_v5  ;;  %v6173_v63 = vrot.slane %v6156_v30, %v9904_v7 }
0x3290   :  { %v6177_v60 = vrot.slane %v6156_v30, %v9917_v14  ;;  %v6181_v54 = vrot.slane %v6156_v30, %v9914_v13  ;;  %v6185_v32 = vrot.slane %v6156_v30, %v9922_v17  ;;  %v6189_v24 = vrot.slane %v6156_v30, %v9925_v18 }
0x3291   :  { %9570 = vrcp.f32 %v6161_v1 }
0x3292   :  { %9572 = vrcp.f32 %v6165_v47 }
0x3293   :  { %9574 = vrcp.f32 %v6169_v19 }
0x3294   :  { %9576 = vrcp.f32 %v6173_v63 }
0x3295   :  { %9578 = vrcp.f32 %v6177_v60 }
0x3296   :  { %9580 = vrcp.f32 %v6181_v54 }
0x3297   :  { %9582 = vrcp.f32 %v6185_v32 }
0x3298   :  { %9584 = vrcp.f32 %v6189_v24 }
0x329b   :  { %v9571_v56 = vpop.eup %9570 }
0x329c   :  { %v9573_v29 = vpop.eup %9572  ;;  %v6199_v58 = vmul.f32 %v9571_v56, %v12103_v16 }
0x329d   :  { %v6201_v21 = vmul.f32 %v9573_v29, %v12105_v37  ;;  %v9575_v22 = vpop.eup %9574 }
0x329e   :  { %v6215_v23 = vmul.f32 0.5, %v6199_v58  ;;  %v6203_v10 = vmul.f32 %v9575_v22, %v12110_v48  ;;  %v9577_v53 = vpop.eup %9576 }
0x329f   :  { %v6216_v20 = vmul.f32 0.5, %v6201_v21  ;;  %v6205_v3 = vmul.f32 %v9577_v53, %v12113_v35  ;;  %v9579_v55 = vpop.eup %9578 }
0x32a0   :  { %6232 = vperm.xlu0 %9277, %v6215_v23   ;;  %v6217_v16 = vmul.f32 0.5, %v6203_v10  ;;  %v6207_v61 = vmul.f32 %v9579_v55, %v12116_v42  ;;  %v9581_v1 = vpop.eup %9580 }
0x32a1   :  { %v6218_v37 = vmul.f32 0.5, %v6205_v3  ;;  %v6209_v19 = vmul.f32 %v9581_v1, %v12119_v40  ;;  %v9583_v48 = vpop.eup %9582 }
0x32a2   :  { %v6219_v47 = vmul.f32 0.5, %v6207_v61  ;;  %v6211_v60 = vmul.f32 %v9583_v48, %v12122_v15  ;;  %v9585_v30 = vpop.eup %9584  ;;  %v13086_v48 = vld [vmem:[#allocation31_spill] sm:$0xff] }
0x32a3   :  { %v6220_v63 = vmul.f32 0.5, %v6209_v19  ;;  %v6213_v35 = vmul.f32 %v9585_v30, %v12125_v38 }
0x32a4   :  { %6235 = vperm.xlu0 %9277, %v6216_v20   ;;  %v6221_v56 = vmul.f32 0.5, %v6211_v60 }
0x32a5   :  { %v6222_v29 = vmul.f32 0.5, %v6213_v35 }
0x32a8   :  { %6238 = vperm.xlu0 %9277, %v6217_v16  }
0x32ac   :  { %6241 = vperm.xlu0 %9277, %v6218_v37  }
0x32b0   :  { %6244 = vperm.xlu0 %9277, %v6219_v47  }
0x32b4   :  { %6247 = vperm.xlu0 %9277, %v6220_v63   ;;  %v6214_v63 = vmul.f32 0.5, %v13086_v48 }
0x32b8   :  { %6250 = vperm.xlu0 %9277, %v6221_v56  }
0x32bc   :  { %6253 = vperm.xlu0 %9277, %v6222_v29  }
0x331f   :  { %v6233_v58 = vpop.permute.xlu0 %6232 }
0x3320   :  { %v6258_v15 = vrot.slane %v6233_v58, %v9901_v6 }
0x3323   :  { %v6236_v42 = vpop.permute.xlu0 %6235 }
0x3324   :  { %v6262_v40 = vrot.slane %v6236_v42, %v9901_v6 }
0x3326   :  { %v6287_v53 = vsel %vm628_vm1, %v6262_v40, %v6258_v15 }
0x3327   :  { %v6239_v54 = vpop.permute.xlu0 %6238 }
0x3328   :  { %v6266_v32 = vrot.slane %v6239_v54, %v9901_v6 }
0x332a   :  { %v6288_v16 = vsel %vm630_vm2, %v6266_v32, %v6287_v53  ;;  %v9724_v32 = vld [vmem:[%s12999_s12 + $0x8] sm:$0xff] }
0x332b   :  { %v6242_v23 = vpop.permute.xlu0 %6241 }
0x332c   :  { %v6270_v20 = vrot.slane %v6242_v23, %v9901_v6 }
0x332e   :  { %v6289_v55 = vsel %vm632_vm3, %v6270_v20, %v6288_v16  ;;  %v9725_v20 = vld [vmem:[%s12999_s12] sm:$0xff] }
0x332f   :  { %v6245_v21 = vpop.permute.xlu0 %6244 }
0x3330   :  { %v6274_v10 = vrot.slane %v6245_v21, %v9901_v6 }
0x3332   :  { %v6290_v37 = vsel %vm634_vm4, %v6274_v10, %v6289_v55 }
0x3333   :  { %v6248_v22 = vpop.permute.xlu0 %6247 }
0x3334   :  { %v6278_v24 = vrot.slane %v6248_v22, %v9901_v6 }
0x3336   :  { %v6291_v1 = vsel %vm636_vm5, %v6278_v24, %v6290_v37  ;;  %v12209_v24 = vld [vmem:[%s13001_s9 + $0x8] sm:$0xff] }
0x3337   :  { %v6251_v38 = vpop.permute.xlu0 %6250 }
0x3338   :  { %v6282_v3 = vrot.slane %v6251_v38, %v9901_v6 }
0x333a   :  { %v6292_v19 = vsel %vm638_vm6, %v6282_v3, %v6291_v1 }
0x333b   :  { %v6254_v61 = vpop.permute.xlu0 %6253 }
0x333c   :  { %v6286_v47 = vrot.slane %v6254_v61, %v9901_v6  ;;  %v9727_v61 = vld [vmem:[%s12999_s12 + $0x30] sm:$0xff] }
0x333e   :  { %v6293_v60 = vsel %vm640_vm7, %v6286_v47, %v6292_v19  ;;  %v9728_v47 = vld [vmem:[%s12999_s12 + $0x10] sm:$0xff] }
0x333f   :  { %v6295_v30 = vadd.f32 %v6293_v60, %v6214_v63 }
0x3341   :  { %8410 = vst.msk [vmem:[%s12909_s25 + $0x8] sm:$0xff] %vm643_vm8, %v6295_v30  ;;  %v6321_v56 = vrot.slane %v6295_v30, %v9907_v8  ;;  %v6314_v35 = vrot.slane %v6295_v30, %v9895_v4  ;;  %v6356_v29 = vrot.slane %v6295_v30, %v9922_v17  ;;  %v6328_v58 = vrot.slane %v6295_v30, %v9898_v5 }
0x3342   :  { %v6335_v42 = vrot.slane %v6295_v30, %v9904_v7  ;;  %v6342_v54 = vrot.slane %v6295_v30, %v9917_v14  ;;  %v6349_v23 = vrot.slane %v6295_v30, %v9914_v13  ;;  %v6363_v21 = vrot.slane %v6295_v30, %v9925_v18 }
0x3343   :  { %6323 = vbcast.lane.b32.xlu1 %v6321_v56, 256  ;;  %6316 = vbcast.lane.b32.xlu0 %v6314_v35, 256 }
0x3347   :  { %6358 = vbcast.lane.b32.xlu1 %v6356_v29, 256  ;;  %6330 = vbcast.lane.b32.xlu0 %v6328_v58, 256 }
0x334b   :  { %6337 = vbcast.lane.b32.xlu0 %v6335_v42, 256 }
0x334f   :  { %6344 = vbcast.lane.b32.xlu0 %v6342_v54, 256 }
0x3353   :  { %6351 = vbcast.lane.b32.xlu0 %v6349_v23, 256 }
0x3357   :  { %6365 = vbcast.lane.b32.xlu0 %v6363_v21, 256  ;;  %v9729_v21 = vld [vmem:[%s12999_s12 + $0x18] sm:$0xff] }
0x33b5   :  { %v6324_v22 = vpop.permute.xlu1 %6323  ;;  %v6317_v40 = vpop.permute.xlu0 %6316 }
0x33b6   :  { %v12191_v15 = vmul.f32 %v9724_v32, %v6324_v22  ;;  %v12196_v10 = vmul.f32 %v9725_v20, %v6317_v40 }
0x33b8   :  { %v12200_v38 = vmul.f32 %v12191_v15, %v12191_v15  ;;  %v12204_v53 = vmul.f32 %v12196_v10, %v12196_v10  ;;  %v6880_v16 = vmul.f32 %v12209_v24, %v12191_v15  ;;  %v6879_v3 = vmul.f32 %v12209_v24, %v12196_v10 }
0x33b9   :  { %v6359_v55 = vpop.permute.xlu1 %6358  ;;  %v6331_v37 = vpop.permute.xlu0 %6330 }
0x33ba   :  { %v12218_v1 = vmul.f32 %v9727_v61, %v6359_v55  ;;  %v12223_v19 = vmul.f32 %v9728_v47, %v6331_v37  ;;  %v6944_v48 = vmul.f32 %v12200_v38, %v9960_v31  ;;  %v6943_v63 = vmul.f32 %v12204_v53, %v9960_v31 }
0x33bb   :  { %v6894_v60 = vsel %vm150_vm0, %v6880_v16, 0.0  ;;  %v6887_v30 = vsel %vm150_vm0, %v6879_v3, 0.0  ;;  %v6447_v27 = vmul.f32 %v12204_v53, %v10110_v41 }
0x33bc   :  { %v6954_v56 = vsel %vm150_vm0, %v6944_v48, 0.0  ;;  %v6951_v35 = vsel %vm150_vm0, %v6943_v63, 0.0  ;;  %v12235_v29 = vmul.f32 %v12223_v19, %v12223_v19  ;;  %v6895_v58 = vrot.slane %v6894_v60, 4 }
0x33bd   :  { %6955 = vadd.xlane.f32.xlu0 %v6954_v56  ;;  %6952 = vadd.xlane.f32.xlu1 %v6951_v35  ;;  %v6338_v42 = vpop.permute.xlu0 %6337  ;;  %v6881_v54 = vmul.f32 %v12209_v24, %v12223_v19  ;;  %v6888_v23 = vrot.slane %v6887_v30, 4  ;;  %v6885_v20 = vmul.f32 %v12209_v24, %v12218_v1 }
0x33be   :  { %v12242_v22 = vmul.f32 %v9729_v21, %v6338_v42  ;;  %v6945_v40 = vmul.f32 %v12235_v29, %v9960_v31  ;;  %v6896_v32 = vadd.f32 %v6895_v58, %v6894_v60 }
0x33bf   :  { %v6901_v16 = vsel %vm150_vm0, %v6881_v54, 0.0  ;;  %v6889_v3 = vadd.f32 %v6888_v23, %v6887_v30  ;;  %v6929_v56 = vsel %vm150_vm0, %v6885_v20, 0.0  ;;  %v9730_v30 = vld [vmem:[%s12999_s12 + $0x20] sm:$0xff] }
0x33c0   :  { %v6957_v55 = vsel %vm150_vm0, %v6945_v40, 0.0  ;;  %v12252_v37 = vmul.f32 %v12242_v22, %v12242_v22  ;;  %v6897_v61 = vrot.slane %v6896_v32, 2  ;;  %v6902_v47 = vrot.slane %v6901_v16, 4 }
0x33c1   :  { %6958 = vadd.xlane.f32.xlu0 %v6957_v55  ;;  %v6345_v48 = vpop.permute.xlu0 %6344  ;;  %v6890_v63 = vrot.slane %v6889_v3, 2  ;;  %v6882_v60 = vmul.f32 %v12209_v24, %v12242_v22  ;;  %v6930_v40 = vrot.slane %v6929_v56, 4 }
0x33c2   :  { %v12260_v35 = vmul.f32 %v9730_v30, %v6345_v48  ;;  %v6946_v58 = vmul.f32 %v12252_v37, %v9960_v31  ;;  %v6898_v42 = vadd.f32 %v6897_v61, %v6896_v32  ;;  %v6903_v54 = vadd.f32 %v6902_v47, %v6901_v16 }
0x33c3   :  { %v6891_v23 = vadd.f32 %v6890_v63, %v6889_v3  ;;  %v6908_v21 = vsel %vm150_vm0, %v6882_v60, 0.0  ;;  %v6931_v16 = vadd.f32 %v6930_v40, %v6929_v56  ;;  %v9731_v3 = vld [vmem:[%s12999_s12 + $0x28] sm:$0xff] }
0x33c4   :  { %v6960_v55 = vsel %vm150_vm0, %v6946_v58, 0.0  ;;  %v12268_v20 = vmul.f32 %v12260_v35, %v12260_v35  ;;  %v6899_v26 = vrot.slane %v6898_v42, 1  ;;  %v6904_v52 = vrot.slane %v6903_v54, 2 }
0x33c5   :  { %6961 = vadd.xlane.f32.xlu0 %v6960_v55  ;;  %v6352_v48 = vpop.permute.xlu0 %6351  ;;  %v6892_v30 = vrot.slane %v6891_v23, 1  ;;  %v6909_v9 = vrot.slane %v6908_v21, 4  ;;  %v6883_v32 = vmul.f32 %v12209_v24, %v12260_v35 }
0x33c6   :  { %v12275_v61 = vmul.f32 %v9731_v3, %v6352_v48  ;;  %v6947_v47 = vmul.f32 %v12268_v20, %v9960_v31  ;;  %v6900_v63 = vadd.f32 %v6899_v26, %v6898_v42  ;;  %v6905_v60 = vadd.f32 %v6904_v52, %v6903_v54 }
0x33c7   :  { %v6893_v58 = vadd.f32 %v6892_v30, %v6891_v23  ;;  %v6910_v55 = vadd.f32 %v6909_v9, %v6908_v21  ;;  %v6915_v45 = vsel %vm150_vm0, %v6883_v32, 0.0  ;;  %v6932_v26 = vrot.slane %v6931_v16, 2  ;;  %v9732_v9 = vld [vmem:[%s12999_s12 + $0x38] sm:$0xff] }
0x33c8   :  { %v6963_v51 = vsel %vm150_vm0, %v6947_v47, 0.0  ;;  %v6976_v50 = vmul.f32 %v6900_v63, %v12191_v15  ;;  %v12284_v56 = vmul.f32 %v12275_v61, %v12275_v61  ;;  %v6906_v40 = vrot.slane %v6905_v60, 1 }
0x33c9   :  { %6964 = vadd.xlane.f32.xlu0 %v6963_v51  ;;  %v6366_v48 = vpop.permute.xlu0 %6365  ;;  %v6911_v3 = vrot.slane %v6910_v55, 2  ;;  %v6916_v49 = vrot.slane %v6915_v45, 4  ;;  %v6884_v52 = vmul.f32 %v12209_v24, %v12275_v61  ;;  %v12298_v30 = vmul.f32 %v12218_v1, %v12218_v1 }
0x33ca   :  { %v12291_v42 = vmul.f32 %v9732_v9, %v6366_v48  ;;  %v6986_v54 = vsel %vm150_vm0, %v6976_v50, 0.0  ;;  %v6948_v23 = vmul.f32 %v12284_v56, %v9960_v31  ;;  %v6907_v21 = vadd.f32 %v6906_v40, %v6905_v60 }
0x33cb   :  { %6987 = vadd.xlane.f32.xlu1 %v6986_v54  ;;  %v6912_v51 = vadd.f32 %v6911_v3, %v6910_v55  ;;  %v6917_v32 = vadd.f32 %v6916_v49, %v6915_v45  ;;  %v6922_v47 = vsel %vm150_vm0, %v6884_v52, 0.0  ;;  %v6975_v9 = vmul.f32 %v6893_v58, %v12196_v10  ;;  %v12314_v3 = vld [vmem:[%s13001_s9] sm:$0xff] }
0x33cc   :  { %v6966_v63 = vsel %vm150_vm0, %v6948_v23, 0.0  ;;  %v6977_v48 = vmul.f32 %v6907_v21, %v12223_v19  ;;  %v6923_v50 = vrot.slane %v6922_v47, 4  ;;  %v12306_v60 = vmul.f32 %v12291_v42, %v12291_v42 }
0x33cd   :  { %6967 = vadd.xlane.f32.xlu0 %v6966_v63  ;;  %v6913_v62 = vrot.slane %v6912_v51, 1  ;;  %v6918_v59 = vrot.slane %v6917_v32, 2  ;;  %v6886_v55 = vmul.f32 %v12209_v24, %v12291_v42  ;;  %v6933_v40 = vadd.f32 %v6932_v26, %v6931_v16 }
0x33ce   :  { %v6989_v49 = vsel %vm150_vm0, %v6977_v48, 0.0  ;;  %v6924_v45 = vadd.f32 %v6923_v50, %v6922_v47  ;;  %v6384_v58 = vmul.f32 %v12314_v3, %v12191_v15  ;;  %v6983_v21 = vsel %vm150_vm0, %v6975_v9, 0.0 }
0x33cf   :  { %6990 = vadd.xlane.f32.xlu1 %v6989_v49  ;;  %v6914_v52 = vadd.f32 %v6913_v62, %v6912_v51  ;;  %v6919_v54 = vadd.f32 %v6918_v59, %v6917_v32  ;;  %v6936_v23 = vsel %vm150_vm0, %v6886_v55, 0.0  ;;  %v6949_v24 = vmul.f32 %v12298_v30, %v9960_v31 }
0x33d0   :  { %v6925_v47 = vrot.slane %v6924_v45, 2  ;;  %v6937_v16 = vrot.slane %v6936_v23, 4  ;;  %v6950_v48 = vmul.f32 %v12306_v60, %v9960_v31  ;;  %v6383_v62 = vmul.f32 %v12314_v3, %v12196_v10 }
0x33d1   :  { %6984 = vadd.xlane.f32.xlu0 %v6983_v21  ;;  %v6978_v26 = vmul.f32 %v6914_v52, %v12242_v22  ;;  %v6920_v63 = vrot.slane %v6919_v54, 1  ;;  %v6934_v51 = vrot.slane %v6933_v40, 1  ;;  %v6398_v9 = vsel %vm150_vm0, %v6384_v58, 0.0 }
0x33d2   :  { %v6926_v59 = vadd.f32 %v6925_v47, %v6924_v45  ;;  %v6938_v32 = vadd.f32 %v6937_v16, %v6936_v23  ;;  %v6399_v49 = vrot.slane %v6398_v9, 4  ;;  %v6969_v21 = vsel %vm150_vm0, %v6949_v24, 0.0 }
0x33d3   :  { %v6992_v50 = vsel %vm150_vm0, %v6978_v26, 0.0  ;;  %v6921_v55 = vadd.f32 %v6920_v63, %v6919_v54  ;;  %v6972_v45 = vsel %vm150_vm0, %v6950_v48, 0.0  ;;  %v6385_v58 = vmul.f32 %v12314_v3, %v12223_v19 }
0x33d4   :  { %6993 = vadd.xlane.f32.xlu1 %v6992_v50  ;;  %v6927_v52 = vrot.slane %v6926_v59, 1  ;;  %v6939_v31 = vrot.slane %v6938_v32, 2  ;;  %v6400_v23 = vadd.f32 %v6399_v49, %v6398_v9  ;;  %v6935_v54 = vadd.f32 %v6934_v51, %v6933_v40 }
0x33d5   :  { %6970 = vadd.xlane.f32.xlu0 %v6969_v21  ;;  %v6979_v25 = vmul.f32 %v6921_v55, %v12260_v35  ;;  %v6391_v26 = vsel %vm150_vm0, %v6383_v62, 0.0  ;;  %v6405_v53 = vsel %vm150_vm0, %v6385_v58, 0.0  ;;  %v6386_v9 = vmul.f32 %v12314_v3, %v12242_v22 }
0x33d6   :  { %v6928_v47 = vadd.f32 %v6927_v52, %v6926_v59  ;;  %v6940_v16 = vadd.f32 %v6939_v31, %v6938_v32  ;;  %v6401_v63 = vrot.slane %v6400_v23, 2  ;;  %v6392_v50 = vrot.slane %v6391_v26, 4 }
0x33d7   :  { %v6995_v24 = vsel %vm150_vm0, %v6979_v25, 0.0  ;;  %v6406_v48 = vrot.slane %v6405_v53, 4  ;;  %v6387_v62 = vmul.f32 %v12314_v3, %v12260_v35  ;;  %v6449_v51 = vmul.f32 %v12235_v29, %v10110_v41 }
0x33d8   :  { %6996 = vadd.xlane.f32.xlu1 %v6995_v24  ;;  %v6980_v55 = vmul.f32 %v6928_v47, %v12275_v61  ;;  %v6941_v21 = vrot.slane %v6940_v16, 1  ;;  %v6402_v59 = vadd.f32 %v6401_v63, %v6400_v23  ;;  %v6393_v40 = vadd.f32 %v6392_v50, %v6391_v26 }
0x33d9   :  { %6973 = vadd.xlane.f32.xlu0 %v6972_v45  ;;  %v6407_v32 = vadd.f32 %v6406_v48, %v6405_v53  ;;  %v6412_v49 = vsel %vm150_vm0, %v6386_v9, 0.0  ;;  %v6981_v52 = vmul.f32 %v6935_v54, %v12218_v1  ;;  %v6455_v45 = vsel %vm150_vm0, %v6447_v27, 0.0 }
0x33da   :  { %v6998_v25 = vsel %vm150_vm0, %v6980_v55, 0.0  ;;  %v6942_v31 = vadd.f32 %v6941_v21, %v6940_v16  ;;  %v6413_v58 = vrot.slane %v6412_v49, 4  ;;  %v6394_v47 = vrot.slane %v6393_v40, 2 }
0x33db   :  { %v6408_v23 = vrot.slane %v6407_v32, 2  ;;  %v6419_v26 = vsel %vm150_vm0, %v6387_v62, 0.0  ;;  %v6403_v24 = vrot.slane %v6402_v59, 1  ;;  %v6461_v29 = vsel %vm150_vm0, %v6449_v51, 0.0 }
0x33dc   :  { %6999 = vadd.xlane.f32.xlu1 %v6998_v25  ;;  %v6414_v63 = vadd.f32 %v6413_v58, %v6412_v49  ;;  %v6420_v50 = vrot.slane %v6419_v26, 4  ;;  %v6450_v53 = vmul.f32 %v12252_v37, %v10110_v41  ;;  %v6388_v54 = vmul.f32 %v12314_v3, %v12275_v61 }
0x33dd   :  { %6456 = vadd.xlane.f32.xlu0 %v6455_v45  ;;  %v6409_v55 = vadd.f32 %v6408_v23, %v6407_v32  ;;  %v7001_v16 = vsel %vm150_vm0, %v6981_v52, 0.0  ;;  %v6982_v27 = vmul.f32 %v6942_v31, %v12291_v42  ;;  %v6395_v9 = vadd.f32 %v6394_v47, %v6393_v40 }
0x33de   :  { %v6415_v21 = vrot.slane %v6414_v63, 2  ;;  %v6421_v48 = vadd.f32 %v6420_v50, %v6419_v26  ;;  %v6426_v62 = vsel %vm150_vm0, %v6388_v54, 0.0  ;;  %v6389_v25 = vmul.f32 %v12314_v3, %v12218_v1 }
0x33df   :  { %v6390_v37 = vmul.f32 %v12314_v3, %v12291_v42  ;;  %v6448_v51 = vmul.f32 %v12200_v38, %v10110_v41  ;;  %v6404_v32 = vadd.f32 %v6403_v24, %v6402_v59  ;;  %v6410_v49 = vrot.slane %v6409_v55, 1 }
0x33e0   :  { %7002 = vadd.xlane.f32.xlu1 %v7001_v16  ;;  %v6416_v52 = vadd.f32 %v6415_v21, %v6414_v63  ;;  %v6427_v31 = vrot.slane %v6426_v62, 4  ;;  %v6433_v58 = vsel %vm150_vm0, %v6389_v25, 0.0  ;;  %v7004_v40 = vsel %vm150_vm0, %v6982_v27, 0.0 }
0x33e1   :  { %6462 = vadd.xlane.f32.xlu0 %v6461_v29  ;;  %v6464_v45 = vsel %vm150_vm0, %v6450_v53, 0.0  ;;  %v6422_v23 = vrot.slane %v6421_v48, 2  ;;  %v6434_v47 = vrot.slane %v6433_v58, 4  ;;  %v6451_v3 = vmul.f32 %v12268_v20, %v10110_v41 }
0x33e2   :  { %v6396_v26 = vrot.slane %v6395_v9, 1  ;;  %v6428_v50 = vadd.f32 %v6427_v31, %v6426_v62  ;;  %v6440_v38 = vsel %vm150_vm0, %v6390_v37, 0.0  ;;  %v6458_v59 = vsel %vm150_vm0, %v6448_v51, 0.0 }
0x33e3   :  { %v6480_v24 = vmul.f32 %v6404_v32, %v12191_v15  ;;  %v6411_v63 = vadd.f32 %v6410_v49, %v6409_v55  ;;  %v6417_v29 = vrot.slane %v6416_v52, 1  ;;  %v6423_v54 = vadd.f32 %v6422_v23, %v6421_v48 }
0x33e4   :  { %7005 = vadd.xlane.f32.xlu1 %v7004_v40  ;;  %v6429_v16 = vrot.slane %v6428_v50, 2  ;;  %v6435_v53 = vadd.f32 %v6434_v47, %v6433_v58  ;;  %v6441_v27 = vrot.slane %v6440_v38, 4  ;;  %v6467_v21 = vsel %vm150_vm0, %v6451_v3, 0.0 }
0x33e5   :  { %6465 = vadd.xlane.f32.xlu0 %v6464_v45  ;;  %v6452_v20 = vmul.f32 %v12284_v56, %v10110_v41  ;;  %v6397_v62 = vadd.f32 %v6396_v26, %v6395_v9  ;;  %v6490_v25 = vsel %vm150_vm0, %v6480_v24, 0.0  ;;  %v6481_v37 = vmul.f32 %v6411_v63, %v12223_v19 }
0x33e6   :  { %v6418_v51 = vadd.f32 %v6417_v29, %v6416_v52  ;;  %v6424_v32 = vrot.slane %v6423_v54, 1  ;;  %v6430_v55 = vadd.f32 %v6429_v16, %v6428_v50  ;;  %v6436_v49 = vrot.slane %v6435_v53, 2 }
0x33e7   :  { %v6442_v48 = vadd.f32 %v6441_v27, %v6440_v38  ;;  %v6470_v31 = vsel %vm150_vm0, %v6452_v20, 0.0  ;;  %v6479_v58 = vmul.f32 %v6397_v62, %v12196_v10  ;;  %v6493_v40 = vsel %vm150_vm0, %v6481_v37, 0.0 }
0x33e8   :  { %6459 = vadd.xlane.f32.xlu1 %v6458_v59  ;;  %v6482_v56 = vmul.f32 %v6418_v51, %v12242_v22  ;;  %v6425_v9 = vadd.f32 %v6424_v32, %v6423_v54  ;;  %v6431_v45 = vrot.slane %v6430_v55, 1  ;;  %v6437_v23 = vadd.f32 %v6436_v49, %v6435_v53 }
0x33e9   :  { %6468 = vadd.xlane.f32.xlu0 %v6467_v21  ;;  %v6443_v47 = vrot.slane %v6442_v48, 2  ;;  %v6487_v52 = vsel %vm150_vm0, %v6479_v58, 0.0  ;;  %v6453_v3 = vmul.f32 %v12298_v30, %v10110_v41  ;;  %v6454_v29 = vmul.f32 %v12306_v60, %v10110_v41 }
0x33ea   :  { %v6496_v26 = vsel %vm150_vm0, %v6482_v56, 0.0  ;;  %v6483_v50 = vmul.f32 %v6425_v9, %v12260_v35  ;;  %v6432_v38 = vadd.f32 %v6431_v45, %v6430_v55  ;;  %v6438_v59 = vrot.slane %v6437_v23, 1 }
0x33eb   :  { %v6444_v24 = vadd.f32 %v6443_v47, %v6442_v48  ;;  %v6473_v63 = vsel %vm150_vm0, %v6453_v3, 0.0  ;;  %v6476_v27 = vsel %vm150_vm0, %v6454_v29, 0.0 }
0x33ec   :  { %6491 = vadd.xlane.f32.xlu1 %v6490_v25  ;;  %v6499_v54 = vsel %vm150_vm0, %v6483_v50, 0.0  ;;  %v6484_v16 = vmul.f32 %v6432_v38, %v12275_v61  ;;  %v6439_v30 = vadd.f32 %v6438_v59, %v6437_v23 }
0x33ed   :  { %6471 = vadd.xlane.f32.xlu0 %v6470_v31  ;;  %v6445_v53 = vrot.slane %v6444_v24, 1 }
0x33ee   :  { %v6502_v21 = vsel %vm150_vm0, %v6484_v16, 0.0  ;;  %v6485_v20 = vmul.f32 %v6439_v30, %v12218_v1 }
0x33ef   :  { %v6446_v62 = vadd.f32 %v6445_v53, %v6444_v24 }
0x33f0   :  { %6494 = vadd.xlane.f32.xlu1 %v6493_v40  ;;  %v6505_v25 = vsel %vm150_vm0, %v6485_v20, 0.0 }
0x33f1   :  { %6488 = vadd.xlane.f32.xlu0 %v6487_v52  ;;  %v6486_v41 = vmul.f32 %v6446_v62, %v12291_v42 }
0x33f3   :  { %v6508_v60 = vsel %vm150_vm0, %v6486_v41, 0.0 }
0x33f4   :  { %6497 = vadd.xlane.f32.xlu1 %v6496_v26 }
0x33f5   :  { %6474 = vadd.xlane.f32.xlu0 %v6473_v63 }
0x33f8   :  { %6500 = vadd.xlane.f32.xlu1 %v6499_v54 }
0x33f9   :  { %6477 = vadd.xlane.f32.xlu0 %v6476_v27 }
0x33fc   :  { %6503 = vadd.xlane.f32.xlu1 %v6502_v21 }
0x3400   :  { %6506 = vadd.xlane.f32.xlu1 %v6505_v25 }
0x3404   :  { %6509 = vadd.xlane.f32.xlu1 %v6508_v60 }
0x344a   :  { %v6956_v37 = vpop.xlane.xlu0 %6955  ;;  %v6953_v55 = vpop.xlane.xlu1 %6952 }
0x344e   :  { %v6959_v51 = vpop.xlane.xlu0 %6958 }
0x3452   :  { %v6962_v32 = vpop.xlane.xlu0 %6961 }
0x3456   :  { %v6965_v49 = vpop.xlane.xlu0 %6964 }
0x3458   :  { %v6988_v48 = vpop.xlane.xlu1 %6987 }
0x3459   :  { %v7008_v23 = vsub.f32 %v6956_v37, %v6988_v48 }
0x345a   :  { %v6968_v31 = vpop.xlane.xlu0 %6967 }
0x345b   :  { %v12402_v50 = vadd.f32 %v7008_v23, %v10181_v46 }
0x345c   :  { %v6991_v58 = vpop.xlane.xlu1 %6990 }
0x345d   :  { %v7009_v26 = vsub.f32 %v6959_v51, %v6991_v58  ;;  %v7038_v30 = vrot.slane %v12402_v50, %v9901_v6 }
0x345e   :  { %v6985_v40 = vpop.xlane.xlu0 %6984 }
0x345f   :  { %v7007_v9 = vsub.f32 %v6953_v55, %v6985_v40  ;;  %v12407_v16 = vadd.f32 %v7009_v26, %v10181_v46 }
0x3461   :  { %v6994_v56 = vpop.xlane.xlu1 %6993  ;;  %v12399_v52 = vadd.f32 %v7007_v9, %v10181_v46  ;;  %v7042_v60 = vrot.slane %v12407_v16, %v9901_v6 }
0x3462   :  { %v6971_v45 = vpop.xlane.xlu0 %6970  ;;  %v7010_v38 = vsub.f32 %v6962_v32, %v6994_v56 }
0x3463   :  { %v7034_v63 = vrot.slane %v12399_v52, %v9901_v6 }
0x3464   :  { %v12412_v53 = vadd.f32 %v7010_v38, %v10181_v46 }
0x3465   :  { %v6997_v47 = vpop.xlane.xlu1 %6996  ;;  %v7063_v20 = vsel %vm628_vm1, %v7038_v30, %v7034_v63 }
0x3466   :  { %v6974_v3 = vpop.xlane.xlu0 %6973  ;;  %v7011_v59 = vsub.f32 %v6965_v49, %v6997_v47  ;;  %v7046_v37 = vrot.slane %v12412_v53, %v9901_v6  ;;  %v7064_v32 = vsel %vm630_vm2, %v7042_v60, %v7063_v20 }
0x3468   :  { %v12415_v27 = vadd.f32 %v7011_v59, %v10181_v46  ;;  %v7065_v56 = vsel %vm632_vm3, %v7046_v37, %v7064_v32 }
0x3469   :  { %v7000_v24 = vpop.xlane.xlu1 %6999 }
0x346a   :  { %v7012_v29 = vsub.f32 %v6968_v31, %v7000_v24  ;;  %v6457_v54 = vpop.xlane.xlu0 %6456  ;;  %v7050_v55 = vrot.slane %v12415_v27, %v9901_v6 }
0x346c   :  { %v12419_v62 = vadd.f32 %v7012_v29, %v10181_v46  ;;  %v7066_v23 = vsel %vm634_vm4, %v7050_v55, %v7065_v56 }
0x346d   :  { %v7003_v21 = vpop.xlane.xlu1 %7002 }
0x346e   :  { %v7013_v25 = vsub.f32 %v6971_v45, %v7003_v21  ;;  %v6463_v41 = vpop.xlane.xlu0 %6462  ;;  %v7054_v48 = vrot.slane %v12419_v62, %v9901_v6 }
0x3470   :  { %v12426_v51 = vadd.f32 %v7013_v25, %v10181_v46  ;;  %v7067_v38 = vsel %vm636_vm5, %v7054_v48, %v7066_v23 }
0x3471   :  { %v7006_v49 = vpop.xlane.xlu1 %7005 }
0x3472   :  { %v7014_v31 = vsub.f32 %v6974_v3, %v7006_v49  ;;  %v6466_v58 = vpop.xlane.xlu0 %6465  ;;  %v7058_v40 = vrot.slane %v12426_v51, %v9901_v6 }
0x3474   :  { %v12437_v9 = vadd.f32 %v7014_v31, %v10181_v46  ;;  %v7068_v3 = vsel %vm638_vm6, %v7058_v40, %v7067_v38 }
0x3475   :  { %v6460_v45 = vpop.xlane.xlu1 %6459 }
0x3476   :  { %v7062_v47 = vrot.slane %v12437_v9, %v9901_v6  ;;  %v6469_v26 = vpop.xlane.xlu0 %6468 }
0x3478   :  { %v7069_v59 = vsel %vm640_vm7, %v7062_v47, %v7068_v3 }
0x3479   :  { %v6492_v24 = vpop.xlane.xlu1 %6491  ;;  %v7071_v63 = vsel %vm643_vm8, %v7069_v59, -inf }
0x347a   :  { %7072 = vmax.xlane.f32.xlu0 %v7071_v63  ;;  %v6472_v29 = vpop.xlane.xlu0 %6471  ;;  %v6512_v25 = vsub.f32 %v6460_v45, %v6492_v24 }
0x347c   :  { %v12450_v55 = vadd.f32 %v6512_v25, %v10232_v57 }
0x347d   :  { %v6495_v46 = vpop.xlane.xlu1 %6494 }
0x347e   :  { %v6489_v30 = vpop.xlane.xlu0 %6488  ;;  %v6513_v32 = vsub.f32 %v6463_v41, %v6495_v46  ;;  %v6542_v45 = vrot.slane %v12450_v55, %v9901_v6 }
0x347f   :  { %v6511_v20 = vsub.f32 %v6457_v54, %v6489_v30 }
0x3480   :  { %v12455_v23 = vadd.f32 %v6513_v32, %v10232_v57 }
0x3481   :  { %v6498_v21 = vpop.xlane.xlu1 %6497  ;;  %v12447_v37 = vadd.f32 %v6511_v20, %v10232_v57 }
0x3482   :  { %v6514_v49 = vsub.f32 %v6466_v58, %v6498_v21  ;;  %v6475_v54 = vpop.xlane.xlu0 %6474  ;;  %v6546_v59 = vrot.slane %v12455_v23, %v9901_v6 }
0x3483   :  { %v6538_v40 = vrot.slane %v12447_v37, %v9901_v6 }
0x3484   :  { %v12460_v47 = vadd.f32 %v6514_v49, %v10232_v57 }
0x3485   :  { %v6501_v60 = vpop.xlane.xlu1 %6500 }
0x3486   :  { %v6515_v48 = vsub.f32 %v6469_v26, %v6501_v60  ;;  %v6567_v26 = vsel %vm628_vm1, %v6542_v45, %v6538_v40  ;;  %v6550_v24 = vrot.slane %v12460_v47, %v9901_v6  ;;  %v6478_v30 = vpop.xlane.xlu0 %6477 }
0x3488   :  { %v12463_v41 = vadd.f32 %v6515_v48, %v10232_v57 }
0x3489   :  { %v6504_v31 = vpop.xlane.xlu1 %6503 }
0x348a   :  { %v6516_v56 = vsub.f32 %v6472_v29, %v6504_v31  ;;  %v6568_v29 = vsel %vm630_vm2, %v6546_v59, %v6567_v26  ;;  %v6554_v46 = vrot.slane %v12463_v41, %v9901_v6 }
0x348b   :  { %v6569_v32 = vsel %vm632_vm3, %v6550_v24, %v6568_v29 }
0x348c   :  { %v12467_v38 = vadd.f32 %v6516_v56, %v10232_v57  ;;  %v6570_v48 = vsel %vm634_vm4, %v6554_v46, %v6569_v32 }
0x348d   :  { %v6507_v58 = vpop.xlane.xlu1 %6506 }
0x348e   :  { %v6517_v3 = vsub.f32 %v6475_v54, %v6507_v58  ;;  %v6558_v20 = vrot.slane %v12467_v38, %v9901_v6 }
0x3490   :  { %v12474_v63 = vadd.f32 %v6517_v3, %v10232_v57  ;;  %v6571_v40 = vsel %vm636_vm5, %v6558_v20, %v6570_v48 }
0x3491   :  { %v6510_v21 = vpop.xlane.xlu1 %6509 }
0x3492   :  { %v6518_v25 = vsub.f32 %v6478_v30, %v6510_v21  ;;  %v6562_v60 = vrot.slane %v12474_v63, %v9901_v6 }
0x3494   :  { %v12485_v49 = vadd.f32 %v6518_v25, %v10232_v57  ;;  %v6572_v56 = vsel %vm638_vm6, %v6562_v60, %v6571_v40 }
0x3496   :  { %v6566_v31 = vrot.slane %v12485_v49, %v9901_v6 }
0x3498   :  { %v6573_v54 = vsel %vm640_vm7, %v6566_v31, %v6572_v56 }
0x3499   :  { %v6575_v45 = vsel %vm643_vm8, %v6573_v54, -inf }
0x349a   :  { %6576 = vmax.xlane.f32.xlu1 %v6575_v45 }
0x3507   :  { %v7073_v58 = vpop.xlane.xlu0 %7072 }
0x3508   :  { %v7078_v26 = vrot.slane %v7073_v58, %v9895_v4  ;;  %v7082_v57 = vrot.slane %v7073_v58, %v9907_v8  ;;  %v7086_v3 = vrot.slane %v7073_v58, %v9898_v5  ;;  %v7090_v59 = vrot.slane %v7073_v58, %v9904_v7 }
0x3509   :  { %v7098_v24 = vrot.slane %v7073_v58, %v9914_v13  ;;  %v7094_v21 = vrot.slane %v7073_v58, %v9917_v14  ;;  %v7106_v32 = vrot.slane %v7073_v58, %v9925_v18  ;;  %v7102_v40 = vrot.slane %v7073_v58, %v9922_v17 }
0x350a   :  { %v7115_v29 = vsub.f32 %v12399_v52, %v7078_v26  ;;  %v7116_v46 = vsub.f32 %v12402_v50, %v7082_v57  ;;  %v7118_v30 = vsub.f32 %v12412_v53, %v7090_v59  ;;  %v7117_v20 = vsub.f32 %v12407_v16, %v7086_v3 }
0x350b   :  { %v7120_v48 = vsub.f32 %v12419_v62, %v7098_v24  ;;  %v7119_v52 = vsub.f32 %v12415_v27, %v7094_v21  ;;  %v7122_v53 = vsub.f32 %v12437_v9, %v7106_v32  ;;  %v7121_v16 = vsub.f32 %v12426_v51, %v7102_v40 }
0x350c   :  { %v7123_v25 = vmul.f32 1.442695, %v7115_v29  ;;  %v7125_v60 = vmul.f32 1.442695, %v7116_v46  ;;  %v7129_v31 = vmul.f32 1.442695, %v7118_v30 }
0x350d   :  { %v7127_v50 = vmul.f32 1.442695, %v7117_v20  ;;  %v7133_v56 = vmul.f32 1.442695, %v7120_v48  ;;  %v7131_v54 = vmul.f32 1.442695, %v7119_v52 }
0x350e   :  { %9586 = vpow2.f32 %v7123_v25  ;;  %v7137_v45 = vmul.f32 1.442695, %v7122_v53  ;;  %v7135_v62 = vmul.f32 1.442695, %v7121_v16 }
0x350f   :  { %9588 = vpow2.f32 %v7125_v60 }
0x3510   :  { %9590 = vpow2.f32 %v7129_v31 }
0x3511   :  { %9592 = vpow2.f32 %v7127_v50 }
0x3512   :  { %9594 = vpow2.f32 %v7133_v56 }
0x3513   :  { %9596 = vpow2.f32 %v7131_v54 }
0x3514   :  { %9598 = vpow2.f32 %v7137_v45 }
0x3515   :  { %9600 = vpow2.f32 %v7135_v62 }
0x3518   :  { %v12510_v26 = vpop.eup %9586 }
0x3519   :  { %v12512_v57 = vpop.eup %9588  ;;  %7148 = vperm.xlu0 %9277, %v12510_v26  }
0x351a   :  { %7151 = vperm.xlu1 %9278, %v12512_v57   ;;  %v12516_v27 = vpop.eup %9590 }
0x351b   :  { %v12518_v9 = vpop.eup %9592 }
0x351c   :  { %v12522_v51 = vpop.eup %9594 }
0x351d   :  { %7157 = vperm.xlu0 %9277, %v12516_v27   ;;  %v12524_v58 = vpop.eup %9596 }
0x351e   :  { %7154 = vperm.xlu1 %9278, %v12518_v9   ;;  %v12528_v3 = vpop.eup %9598 }
0x351f   :  { %v12530_v59 = vpop.eup %9600 }
0x3521   :  { %7163 = vperm.xlu0 %9277, %v12522_v51  }
0x3522   :  { %7160 = vperm.xlu1 %9278, %v12524_v58  }
0x3525   :  { %7169 = vperm.xlu0 %9277, %v12528_v3  }
0x3526   :  { %7166 = vperm.xlu1 %9278, %v12530_v59  }
0x3527   :  { %v6577_v24 = vpop.xlane.xlu1 %6576 }
0x3528   :  { %v6582_v29 = vrot.slane %v6577_v24, %v9895_v4  ;;  %v6586_v46 = vrot.slane %v6577_v24, %v9907_v8  ;;  %v6590_v30 = vrot.slane %v6577_v24, %v9898_v5  ;;  %v6594_v21 = vrot.slane %v6577_v24, %v9904_v7 }
0x3529   :  { %v6598_v20 = vrot.slane %v6577_v24, %v9917_v14  ;;  %v6602_v48 = vrot.slane %v6577_v24, %v9914_v13  ;;  %v6606_v50 = vrot.slane %v6577_v24, %v9922_v17  ;;  %v6610_v16 = vrot.slane %v6577_v24, %v9925_v18 }
0x352a   :  { %v6619_v25 = vsub.f32 %v12447_v37, %v6582_v29  ;;  %v6620_v60 = vsub.f32 %v12450_v55, %v6586_v46  ;;  %v6621_v32 = vsub.f32 %v12455_v23, %v6590_v30  ;;  %v6622_v31 = vsub.f32 %v12460_v47, %v6594_v21 }
0x352b   :  { %v6623_v53 = vsub.f32 %v12463_v41, %v6598_v20  ;;  %v6624_v37 = vsub.f32 %v12467_v38, %v6602_v48  ;;  %v6625_v23 = vsub.f32 %v12474_v63, %v6606_v50  ;;  %v6626_v47 = vsub.f32 %v12485_v49, %v6610_v16 }
0x352c   :  { %v6627_v40 = vmul.f32 1.442695, %v6619_v25  ;;  %v6629_v52 = vmul.f32 1.442695, %v6620_v60  ;;  %v6631_v56 = vmul.f32 1.442695, %v6621_v32 }
0x352d   :  { %v6633_v55 = vmul.f32 1.442695, %v6622_v31  ;;  %v6635_v54 = vmul.f32 1.442695, %v6623_v53  ;;  %v6637_v45 = vmul.f32 1.442695, %v6624_v37 }
0x352e   :  { %9602 = vpow2.f32 %v6627_v40  ;;  %v6639_v62 = vmul.f32 1.442695, %v6625_v23  ;;  %v6641_v41 = vmul.f32 1.442695, %v6626_v47 }
0x352f   :  { %9604 = vpow2.f32 %v6629_v52 }
0x3530   :  { %9606 = vpow2.f32 %v6631_v56 }
0x3531   :  { %9608 = vpow2.f32 %v6633_v55 }
0x3532   :  { %9610 = vpow2.f32 %v6635_v54 }
0x3533   :  { %9612 = vpow2.f32 %v6637_v45 }
0x3534   :  { %9614 = vpow2.f32 %v6639_v62 }
0x3535   :  { %9616 = vpow2.f32 %v6641_v41 }
0x3538   :  { %v12550_v29 = vpop.eup %9602 }
0x3539   :  { %v12552_v46 = vpop.eup %9604  ;;  %6652 = vperm.xlu1 %9278, %v12550_v29  }
0x353a   :  { %6655 = vperm.xlu0 %9277, %v12552_v46   ;;  %v12556_v38 = vpop.eup %9606 }
0x353b   :  { %v12558_v63 = vpop.eup %9608 }
0x353c   :  { %v12562_v49 = vpop.eup %9610 }
0x353d   :  { %6658 = vperm.xlu1 %9278, %v12556_v38   ;;  %v12564_v24 = vpop.eup %9612 }
0x353e   :  { %6661 = vperm.xlu0 %9277, %v12558_v63   ;;  %v12568_v30 = vpop.eup %9614 }
0x353f   :  { %v12570_v21 = vpop.eup %9616 }
0x3541   :  { %6664 = vperm.xlu1 %9278, %v12562_v49  }
0x3542   :  { %6667 = vperm.xlu0 %9277, %v12564_v24  }
0x3545   :  { %6670 = vperm.xlu1 %9278, %v12568_v30  }
0x3546   :  { %6673 = vperm.xlu0 %9277, %v12570_v21  }
0x3598   :  { %v7149_v20 = vpop.permute.xlu0 %7148 }
0x3599   :  { %v7152_v25 = vpop.permute.xlu1 %7151  ;;  %v7174_v32 = vrot.slane %v7149_v20, %v9901_v6 }
0x359a   :  { %v7178_v60 = vrot.slane %v7152_v25, %v9901_v6 }
0x359c   :  { %v7158_v48 = vpop.permute.xlu0 %7157  ;;  %v7203_v52 = vsel %vm628_vm1, %v7178_v60, %v7174_v32 }
0x359d   :  { %v7155_v31 = vpop.permute.xlu1 %7154  ;;  %v7186_v50 = vrot.slane %v7158_v48, %v9901_v6 }
0x359e   :  { %v7182_v40 = vrot.slane %v7155_v31, %v9901_v6 }
0x35a0   :  { %v7204_v53 = vsel %vm630_vm2, %v7182_v40, %v7203_v52  ;;  %v7164_v56 = vpop.permute.xlu0 %7163 }
0x35a1   :  { %v7161_v16 = vpop.permute.xlu1 %7160  ;;  %v7205_v55 = vsel %vm632_vm3, %v7186_v50, %v7204_v53  ;;  %v7194_v23 = vrot.slane %v7164_v56, %v9901_v6 }
0x35a2   :  { %v7190_v37 = vrot.slane %v7161_v16, %v9901_v6 }
0x35a4   :  { %v7206_v54 = vsel %vm634_vm4, %v7190_v37, %v7205_v55  ;;  %v7170_v47 = vpop.permute.xlu0 %7169 }
0x35a5   :  { %v7167_v45 = vpop.permute.xlu1 %7166  ;;  %v7202_v62 = vrot.slane %v7170_v47, %v9901_v6  ;;  %v7207_v20 = vsel %vm636_vm5, %v7194_v23, %v7206_v54 }
0x35a6   :  { %v7198_v41 = vrot.slane %v7167_v45, %v9901_v6 }
0x35a8   :  { %v7208_v25 = vsel %vm638_vm6, %v7198_v41, %v7207_v20 }
0x35a9   :  { %v7209_v60 = vsel %vm640_vm7, %v7202_v62, %v7208_v25 }
0x35aa   :  { %v7211_v32 = vsel %vm643_vm8, %v7209_v60, 0.0 }
0x35ab   :  { %7212 = vadd.xlane.f32.xlu1 %v7211_v32 }
0x35b8   :  { %v6653_v48 = vpop.permute.xlu1 %6652 }
0x35b9   :  { %v6656_v31 = vpop.permute.xlu0 %6655  ;;  %v6678_v40 = vrot.slane %v6653_v48, %v9901_v6 }
0x35ba   :  { %v6682_v52 = vrot.slane %v6656_v31, %v9901_v6 }
0x35bc   :  { %v6659_v50 = vpop.permute.xlu1 %6658  ;;  %v6707_v16 = vsel %vm628_vm1, %v6682_v52, %v6678_v40 }
0x35bd   :  { %v6686_v53 = vrot.slane %v6659_v50, %v9901_v6  ;;  %v6662_v56 = vpop.permute.xlu0 %6661 }
0x35be   :  { %v6690_v37 = vrot.slane %v6662_v56, %v9901_v6 }
0x35bf   :  { %v6708_v55 = vsel %vm630_vm2, %v6686_v53, %v6707_v16 }
0x35c0   :  { %v6665_v23 = vpop.permute.xlu1 %6664  ;;  %v6709_v45 = vsel %vm632_vm3, %v6690_v37, %v6708_v55 }
0x35c1   :  { %v6694_v54 = vrot.slane %v6665_v23, %v9901_v6  ;;  %v6668_v47 = vpop.permute.xlu0 %6667 }
0x35c2   :  { %v6698_v62 = vrot.slane %v6668_v47, %v9901_v6 }
0x35c3   :  { %v6710_v41 = vsel %vm634_vm4, %v6694_v54, %v6709_v45 }
0x35c4   :  { %v6671_v20 = vpop.permute.xlu1 %6670  ;;  %v6711_v32 = vsel %vm636_vm5, %v6698_v62, %v6710_v41 }
0x35c5   :  { %v6702_v25 = vrot.slane %v6671_v20, %v9901_v6  ;;  %v6674_v60 = vpop.permute.xlu0 %6673 }
0x35c6   :  { %v6706_v48 = vrot.slane %v6674_v60, %v9901_v6 }
0x35c7   :  { %v6712_v31 = vsel %vm638_vm6, %v6702_v25, %v6711_v32 }
0x35c8   :  { %v6713_v40 = vsel %vm640_vm7, %v6706_v48, %v6712_v31 }
0x35c9   :  { %v6715_v52 = vsel %vm643_vm8, %v6713_v40, 0.0 }
0x35ca   :  { %6716 = vadd.xlane.f32.xlu0 %v6715_v52 }
0x3638   :  { %v7213_v50 = vpop.xlane.xlu1 %7212 }
0x3639   :  { %v7222_v53 = vrot.slane %v7213_v50, %v9907_v8  ;;  %v7218_v56 = vrot.slane %v7213_v50, %v9895_v4  ;;  %v7226_v16 = vrot.slane %v7213_v50, %v9898_v5  ;;  %v7230_v37 = vrot.slane %v7213_v50, %v9904_v7 }
0x363a   :  { %v7234_v6 = vrot.slane %v7213_v50, %v9917_v14  ;;  %v7238_v55 = vrot.slane %v7213_v50, %v9914_v13  ;;  %v7242_v23 = vrot.slane %v7213_v50, %v9922_v17  ;;  %v7246_v54 = vrot.slane %v7213_v50, %v9925_v18 }
0x363b   :  { %9618 = vrcp.f32 %v7222_v53 }
0x363c   :  { %9620 = vrcp.f32 %v7218_v56 }
0x363d   :  { %9622 = vrcp.f32 %v7226_v16 }
0x363e   :  { %9624 = vrcp.f32 %v7230_v37 }
0x363f   :  { %9626 = vrcp.f32 %v7234_v6 }
0x3640   :  { %9628 = vrcp.f32 %v7238_v55 }
0x3641   :  { %9630 = vrcp.f32 %v7242_v23 }
0x3642   :  { %9632 = vrcp.f32 %v7246_v54 }
0x3645   :  { %v9619_v47 = vpop.eup %9618 }
0x3646   :  { %v9621_v45 = vpop.eup %9620  ;;  %v7258_v62 = vmul.f32 %v9619_v47, %v12512_v57 }
0x3647   :  { %v9623_v41 = vpop.eup %9622  ;;  %v7256_v20 = vmul.f32 %v9621_v45, %v12510_v26 }
0x3648   :  { %v9625_v25 = vpop.eup %9624  ;;  %7278 = vperm.xlu1 %9278, %v7258_v62   ;;  %v7260_v60 = vmul.f32 %v9623_v41, %v12518_v9 }
0x3649   :  { %7273 = vperm.xlu0 %9277, %v7256_v20   ;;  %v9627_v32 = vpop.eup %9626  ;;  %v7262_v48 = vmul.f32 %v9625_v25, %v12516_v27 }
0x364a   :  { %v9629_v31 = vpop.eup %9628  ;;  %v7264_v40 = vmul.f32 %v9627_v32, %v12524_v58 }
0x364b   :  { %v9631_v52 = vpop.eup %9630  ;;  %v7266_v57 = vmul.f32 %v9629_v31, %v12522_v51  ;;  %v13087_v51 = vmov 6  }
0x364c   :  { %7283 = vperm.xlu1 %9278, %v7260_v60   ;;  %v9633_v50 = vpop.eup %9632  ;;  %v7268_v26 = vmul.f32 %v9631_v52, %v12530_v59 }
0x364d   :  { %7288 = vperm.xlu0 %9277, %v7262_v48   ;;  %v7270_v53 = vmul.f32 %v9633_v50, %v12528_v3  ;;  %v12632_v3 = vld [vmem:[%s13010_s7 + $0x8] sm:$0xff] }
0x3650   :  { %7293 = vperm.xlu1 %9278, %v7264_v40  }
0x3651   :  { %7298 = vperm.xlu0 %9277, %v7266_v57  }
0x3654   :  { %7303 = vperm.xlu1 %9278, %v7268_v26  }
0x3655   :  { %7308 = vperm.xlu0 %9277, %v7270_v53  }
0x3657   :  { %v6717_v9 = vpop.xlane.xlu0 %6716 }
0x3658   :  { %9279 = vset.pattern.permute.xlu1 %v13049_v12  ;;  %v6726_v27 = vrot.slane %v6717_v9, %v9907_v8  ;;  %v6722_v56 = vrot.slane %v6717_v9, %v9895_v4  ;;  %v6738_v58 = vrot.slane %v6717_v9, %v9917_v14  ;;  %v6730_v16 = vrot.slane %v6717_v9, %v9898_v5 }
0x3659   :  { %5226 = vperm.xlu1 %9279, %v11759_v28   ;;  %9280 = vset.pattern.permute.xlu0 %v13087_v51  ;;  %v6746_v4 = vrot.slane %v6717_v9, %v9922_v17  ;;  %v6734_v8 = vrot.slane %v6717_v9, %v9904_v7  ;;  %v6742_v5 = vrot.slane %v6717_v9, %v9914_v13 }
0x365a   :  { %5366 = vperm.xlu0 %9280, %v12632_v3   ;;  %9634 = vrcp.f32 %v6726_v27  ;;  %v6750_v17 = vrot.slane %v6717_v9, %v9925_v18 }
0x365b   :  { %9636 = vrcp.f32 %v6722_v56 }
0x365c   :  { %9638 = vrcp.f32 %v6738_v58 }
0x365d   :  { %9281 = vset.pattern.permute.xlu1 %v13087_v51  ;;  %9640 = vrcp.f32 %v6730_v16 }
0x365e   :  { %5371 = vperm.xlu1 %9281, %v11759_v28   ;;  %9283 = vset.pattern.permute.xlu0 %v13025_v33  ;;  %9642 = vrcp.f32 %v6746_v4 }
0x365f   :  { %9644 = vrcp.f32 %v6734_v8  ;;  %v5231_v8 = vmul.f32 %v11947_v43, %v11937_v2 }
0x3660   :  { %9646 = vrcp.f32 %v6742_v5 }
0x3661   :  { %9648 = vrcp.f32 %v6750_v17 }
0x3662   :  { %9282 = vset.pattern.permute.xlu1 %v13025_v33 }
0x3664   :  { %v9635_v14 = vpop.eup %9634 }
0x3665   :  { %v9637_v59 = vpop.eup %9636  ;;  %v6762_v37 = vmul.f32 %v9635_v14, %v12552_v46 }
0x3666   :  { %v9639_v6 = vpop.eup %9638  ;;  %v6760_v7 = vmul.f32 %v9637_v59, %v12550_v29 }
0x3667   :  { %v9641_v55 = vpop.eup %9640  ;;  %6782 = vperm.xlu0 %9283, %v6762_v37   ;;  %v6768_v23 = vmul.f32 %v9639_v6, %v12562_v49 }
0x3668   :  { %6777 = vperm.xlu1 %9282, %v6760_v7   ;;  %v9643_v54 = vpop.eup %9642  ;;  %v6764_v13 = vmul.f32 %v9641_v55, %v12556_v38 }
0x3669   :  { %v9645_v33 = vpop.eup %9644  ;;  %v6772_v46 = vmul.f32 %v9643_v54, %v12568_v30 }
0x366a   :  { %v6766_v47 = vmul.f32 %v9645_v33, %v12558_v63  ;;  %v9647_v18 = vpop.eup %9646 }
0x366b   :  { %6797 = vperm.xlu0 %9283, %v6768_v23   ;;  %v6770_v29 = vmul.f32 %v9647_v18, %v12564_v24  ;;  %v9649_v45 = vpop.eup %9648 }
0x366c   :  { %6787 = vperm.xlu1 %9282, %v6764_v13   ;;  %v6774_v49 = vmul.f32 %v9649_v45, %v12570_v21 }
0x366f   :  { %6807 = vperm.xlu0 %9283, %v6772_v46  }
0x3670   :  { %6792 = vperm.xlu1 %9282, %v6766_v47  }
0x3674   :  { %6802 = vperm.xlu1 %9282, %v6770_v29  }
0x3678   :  { %6812 = vperm.xlu1 %9282, %v6774_v49  }
0x36c7   :  { %v7279_v62 = vpop.permute.xlu1 %7278 }
0x36c8   :  { %v7312_v38 = vmul.f32 %v7279_v62, %v12191_v15  ;;  %v7274_v41 = vpop.permute.xlu0 %7273 }
0x36c9   :  { %v7311_v20 = vmul.f32 %v7274_v41, %v12196_v10 }
0x36ca   :  { %v7326_v30 = vsel %vm150_vm0, %v7312_v38, 0.0 }
0x36cb   :  { %v7327_v25 = vrot.slane %v7326_v30, 4  ;;  %v7319_v63 = vsel %vm150_vm0, %v7311_v20, 0.0  ;;  %v7284_v60 = vpop.permute.xlu1 %7283 }
0x36cc   :  { %v7320_v32 = vrot.slane %v7319_v63, 4  ;;  %v7313_v24 = vmul.f32 %v7284_v60, %v12223_v19  ;;  %v7289_v48 = vpop.permute.xlu0 %7288 }
0x36cd   :  { %v7328_v31 = vadd.f32 %v7327_v25, %v7326_v30  ;;  %v7314_v21 = vmul.f32 %v7289_v48, %v12242_v22 }
0x36ce   :  { %v7321_v40 = vadd.f32 %v7320_v32, %v7319_v63  ;;  %v7333_v52 = vsel %vm150_vm0, %v7313_v24, 0.0 }
0x36cf   :  { %v7329_v57 = vrot.slane %v7328_v31, 2  ;;  %v7334_v50 = vrot.slane %v7333_v52, 4  ;;  %v7340_v26 = vsel %vm150_vm0, %v7314_v21, 0.0  ;;  %v7294_v53 = vpop.permute.xlu1 %7293 }
0x36d0   :  { %v7322_v9 = vrot.slane %v7321_v40, 2  ;;  %v7341_v27 = vrot.slane %v7340_v26, 4  ;;  %v7315_v56 = vmul.f32 %v7294_v53, %v12260_v35  ;;  %v7299_v58 = vpop.permute.xlu0 %7298 }
0x36d1   :  { %v7330_v51 = vadd.f32 %v7329_v57, %v7328_v31  ;;  %v7335_v16 = vadd.f32 %v7334_v50, %v7333_v52  ;;  %v7316_v4 = vmul.f32 %v7299_v58, %v12275_v61 }
0x36d2   :  { %v7323_v5 = vadd.f32 %v7322_v9, %v7321_v40  ;;  %v7342_v14 = vadd.f32 %v7341_v27, %v7340_v26  ;;  %v7347_v59 = vsel %vm150_vm0, %v7315_v56, 0.0 }
0x36d3   :  { %v7331_v37 = vrot.slane %v7330_v51, 1  ;;  %v7336_v17 = vrot.slane %v7335_v16, 2  ;;  %v7348_v6 = vrot.slane %v7347_v59, 4  ;;  %v7354_v7 = vsel %vm150_vm0, %v7316_v4, 0.0  ;;  %v7304_v55 = vpop.permute.xlu1 %7303 }
0x36d4   :  { %v7324_v23 = vrot.slane %v7323_v5, 1  ;;  %v7343_v54 = vrot.slane %v7342_v14, 2  ;;  %v7355_v13 = vrot.slane %v7354_v7, 4  ;;  %v7317_v33 = vmul.f32 %v7304_v55, %v12218_v1  ;;  %v7309_v46 = vpop.permute.xlu0 %7308 }
0x36d5   :  { %v7332_v47 = vadd.f32 %v7331_v37, %v7330_v51  ;;  %v7337_v18 = vadd.f32 %v7336_v17, %v7335_v16  ;;  %v7349_v29 = vadd.f32 %v7348_v6, %v7347_v59  ;;  %v7318_v2 = vmul.f32 %v7309_v46, %v12291_v42 }
0x36d6   :  { %v7325_v43 = vadd.f32 %v7324_v23, %v7323_v5  ;;  %v7344_v45 = vadd.f32 %v7343_v54, %v7342_v14  ;;  %v7356_v49 = vadd.f32 %v7355_v13, %v7354_v7  ;;  %v7361_v62 = vsel %vm150_vm0, %v7317_v33, 0.0 }
0x36d7   :  { %v7338_v38 = vrot.slane %v7337_v18, 1  ;;  %v7350_v41 = vrot.slane %v7349_v29, 2  ;;  %v7362_v20 = vrot.slane %v7361_v62, 4  ;;  %v7368_v30 = vsel %vm150_vm0, %v7318_v2, 0.0 }
0x36d8   :  { %v7399_v25 = vsel %vm628_vm1, %v7332_v47, %v7325_v43  ;;  %v7345_v63 = vrot.slane %v7344_v45, 1  ;;  %v7357_v60 = vrot.slane %v7356_v49, 2  ;;  %v7369_v32 = vrot.slane %v7368_v30, 4  ;;  %v5227_v24 = vpop.permute.xlu1 %5226 }
0x36d9   :  { %v7339_v48 = vadd.f32 %v7338_v38, %v7337_v18  ;;  %v7351_v31 = vadd.f32 %v7350_v41, %v7349_v29  ;;  %v7363_v21 = vadd.f32 %v7362_v20, %v7361_v62  ;;  %v5229_v40 = vmul.f32 %v5227_v24, %v11855_v39  ;;  %v5367_v53 = vpop.permute.xlu0 %5366 }
0x36da   :  { %v7346_v52 = vadd.f32 %v7345_v63, %v7344_v45  ;;  %v7358_v57 = vadd.f32 %v7357_v60, %v7356_v49  ;;  %v7370_v50 = vadd.f32 %v7369_v32, %v7368_v30  ;;  %v5232_v26 = vmul.f32 %v5227_v24, %v11934_v44 }
0x36db   :  { %v7400_v9 = vsel %vm630_vm2, %v7339_v48, %v7399_v25  ;;  %v7352_v27 = vrot.slane %v7351_v31, 1  ;;  %v7364_v56 = vrot.slane %v7363_v21, 2  ;;  %v5230_v58 = vadd.f32 %v5229_v40, %v11950_v0 }
0x36dc   :  { %v7359_v51 = vrot.slane %v7358_v57, 1  ;;  %v7371_v16 = vrot.slane %v7370_v50, 2  ;;  %v5233_v4 = vadd.f32 %v5232_v26, %v5231_v8  ;;  %v7401_v5 = vsel %vm632_vm3, %v7346_v52, %v7400_v9 }
0x36dd   :  { %v7353_v14 = vadd.f32 %v7352_v27, %v7351_v31  ;;  %v7365_v59 = vadd.f32 %v7364_v56, %v7363_v21  ;;  %v5369_v39 = vmul.f32 %v5367_v53, %v5230_v58  ;;  %v5372_v37 = vpop.permute.xlu1 %5371 }
0x36de   :  { %v7360_v17 = vadd.f32 %v7359_v51, %v7358_v57  ;;  %v7372_v6 = vadd.f32 %v7371_v16, %v7370_v50  ;;  %v5376_v7 = vmul.f32 %v5367_v53, %v5233_v4  ;;  %v5374_v44 = vmul.f32 %v5372_v37, %v11684_v36 }
0x36df   :  { %v7366_v55 = vrot.slane %v7365_v59, 1  ;;  %v5377_v23 = vmul.f32 %v5372_v37, %v11686_v11  ;;  %v7402_v54 = vsel %vm634_vm4, %v7353_v14, %v7401_v5 }
0x36e0   :  { %v7373_v0 = vrot.slane %v7372_v6, 1  ;;  %v12678_v13 = vadd.f32 %v5374_v44, %v5369_v39  ;;  %v7403_v47 = vsel %vm636_vm5, %v7360_v17, %v7402_v54 }
0x36e1   :  { %v7367_v8 = vadd.f32 %v7366_v55, %v7365_v59  ;;  %v12680_v33 = vadd.f32 %v5377_v23, %v5376_v7 }
0x36e2   :  { %v7374_v46 = vadd.f32 %v7373_v0, %v7372_v6  ;;  %7490 = vrot.lane.b32.xlu1 %v12678_v13, %s13012_s4 }
0x36e3   :  { %v7404_v18 = vsel %vm638_vm6, %v7367_v8, %v7403_v47 }
0x36e4   :  { %v7405_v36 = vsel %vm640_vm7, %v7374_v46, %v7404_v18 }
0x36e5   :  { %7406 = vrot.lane.b32.xlu0 %v7405_v36, %s13050_s23 }
0x36e6   :  { %v6783_v43 = vpop.permute.xlu0 %6782 }
0x36e7   :  { %v6778_v11 = vpop.permute.xlu1 %6777  ;;  %v6816_v49 = vmul.f32 %v6783_v43, %v12191_v15 }
0x36e8   :  { %v6815_v45 = vmul.f32 %v6778_v11, %v12196_v10 }
0x36e9   :  { %v6830_v25 = vsel %vm150_vm0, %v6816_v49, 0.0 }
0x36ea   :  { %v6798_v41 = vpop.permute.xlu0 %6797  ;;  %v6823_v30 = vsel %vm150_vm0, %v6815_v45, 0.0  ;;  %v6831_v10 = vrot.slane %v6830_v25, 4 }
0x36eb   :  { %v6788_v29 = vpop.permute.xlu1 %6787  ;;  %v6824_v24 = vrot.slane %v6823_v30, 4  ;;  %v6819_v15 = vmul.f32 %v6798_v41, %v12260_v35 }
0x36ec   :  { %v6817_v62 = vmul.f32 %v6788_v29, %v12223_v19  ;;  %v6832_v57 = vadd.f32 %v6831_v10, %v6830_v25 }
0x36ed   :  { %v6825_v52 = vadd.f32 %v6824_v24, %v6823_v30  ;;  %v6851_v50 = vsel %vm150_vm0, %v6819_v15, 0.0 }
0x36ee   :  { %v6837_v63 = vsel %vm150_vm0, %v6817_v62, 0.0  ;;  %v6808_v31 = vpop.permute.xlu0 %6807  ;;  %v6852_v27 = vrot.slane %v6851_v50, 4  ;;  %v6833_v58 = vrot.slane %v6832_v57, 2 }
0x36ef   :  { %v6793_v2 = vpop.permute.xlu1 %6792  ;;  %v6838_v19 = vrot.slane %v6837_v63, 4  ;;  %v6821_v26 = vmul.f32 %v6808_v31, %v12218_v1  ;;  %v6826_v56 = vrot.slane %v6825_v52, 2 }
0x36f0   :  { %v6818_v20 = vmul.f32 %v6793_v2, %v12242_v22  ;;  %v6853_v14 = vadd.f32 %v6852_v27, %v6851_v50  ;;  %v6834_v37 = vadd.f32 %v6833_v58, %v6832_v57  ;;  %v13090_v57 = vld [vmem:[#allocation5_spill] sm:$0xff]  ;;  %v13091_v27 = vld [vmem:[#allocation14_spill] sm:$0xff] }
0x36f1   :  { %v6839_v53 = vadd.f32 %v6838_v19, %v6837_v63  ;;  %v6865_v51 = vsel %vm150_vm0, %v6821_v26, 0.0  ;;  %v6827_v39 = vadd.f32 %v6826_v56, %v6825_v52  ;;  %v13089_v52 = vmov 0.0|0.0   ;;  %v13092_v56 = vld [vmem:[#allocation13_spill] sm:$0xff] }
0x36f2   :  { %v6844_v60 = vsel %vm150_vm0, %v6818_v20, 0.0  ;;  %v6866_v59 = vrot.slane %v6865_v51, 4  ;;  %v6854_v44 = vrot.slane %v6853_v14, 2  ;;  %v6835_v54 = vrot.slane %v6834_v37, 1 }
0x36f3   :  { %v6803_v38 = vpop.permute.xlu1 %6802  ;;  %v6845_v21 = vrot.slane %v6844_v60, 4  ;;  %v6840_v16 = vrot.slane %v6839_v53, 2  ;;  %v6828_v23 = vrot.slane %v6827_v39, 1 }
0x36f4   :  { %v6820_v32 = vmul.f32 %v6803_v38, %v12275_v61  ;;  %v6867_v55 = vadd.f32 %v6866_v59, %v6865_v51  ;;  %v6855_v18 = vadd.f32 %v6854_v44, %v6853_v14  ;;  %v6836_v29 = vadd.f32 %v6835_v54, %v6834_v37  ;;  %v13093_v51 = vld [vmem:[#allocation16_spill] sm:$0xff]  ;;  %v13096_v59 = vld [vmem:[#allocation17_spill] sm:$0xff] }
0x36f5   :  { %v6846_v61 = vadd.f32 %v6845_v21, %v6844_v60  ;;  %v6841_v17 = vadd.f32 %v6840_v16, %v6839_v53  ;;  %v6829_v11 = vadd.f32 %v6828_v23, %v6827_v39  ;;  %v9735_v53 = vld [vmem:[%s13009_s0] ss:$0 sm:$0xff]  ;;  %v13097_v44 = vmov 1  }
0x36f6   :  { %v6858_v22 = vsel %vm150_vm0, %v6820_v32, 0.0  ;;  %v6868_v36 = vrot.slane %v6867_v55, 2  ;;  %v6856_v62 = vrot.slane %v6855_v18, 1 }
0x36f7   :  { %v6813_v48 = vpop.permute.xlu1 %6812  ;;  %v6859_v9 = vrot.slane %v6858_v22, 4  ;;  %v6847_v4 = vrot.slane %v6846_v61, 2  ;;  %v6842_v0 = vrot.slane %v6841_v17, 1  ;;  %v7383_v41 = vsel %vm628_vm1, %v6836_v29, %v6829_v11 }
0x36f8   :  { %v6822_v40 = vmul.f32 %v6813_v48, %v12291_v42  ;;  %v6869_v38 = vadd.f32 %v6868_v36, %v6867_v55  ;;  %v6857_v60 = vadd.f32 %v6856_v62, %v6855_v18 }
0x36f9   :  { %v6860_v5 = vadd.f32 %v6859_v9, %v6858_v22  ;;  %v6848_v1 = vadd.f32 %v6847_v4, %v6846_v61  ;;  %v6843_v2 = vadd.f32 %v6842_v0, %v6841_v17  ;;  %v13094_v4 = vld [vmem:[#allocation15_spill] sm:$0xff] }
0x36fa   :  { %v6872_v35 = vsel %vm150_vm0, %v6822_v40, 0.0  ;;  %v6870_v32 = vrot.slane %v6869_v38, 1  ;;  %v13088_v40 = vmov 0.0  }
0x36fb   :  { %v6873_v42 = vrot.slane %v6872_v35, 4  ;;  %v6861_v6 = vrot.slane %v6860_v5, 2  ;;  %v6849_v8 = vrot.slane %v6848_v1, 1  ;;  %v7384_v20 = vsel %vm630_vm2, %v6843_v2, %v7383_v41 }
0x36fc   :  { %v6871_v48 = vadd.f32 %v6870_v32, %v6869_v38 }
0x36fd   :  { %v6874_v7 = vadd.f32 %v6873_v42, %v6872_v35  ;;  %v6862_v46 = vadd.f32 %v6861_v6, %v6860_v5  ;;  %v6850_v43 = vadd.f32 %v6849_v8, %v6848_v1  ;;  %v13095_v42 = vld [vmem:[#allocation18_spill] sm:$0xff] }
0x36ff   :  { %v6875_v47 = vrot.slane %v6874_v7, 2  ;;  %v6863_v45 = vrot.slane %v6862_v46, 1  ;;  %v7385_v30 = vsel %vm632_vm3, %v6850_v43, %v7384_v20 }
0x3700   :  { %v7386_v24 = vsel %vm634_vm4, %v6857_v60, %v7385_v30  ;;  %v13098_v60 = vmov 2  }
0x3701   :  { %v6876_v49 = vadd.f32 %v6875_v47, %v6874_v7  ;;  %v6864_v25 = vadd.f32 %v6863_v45, %v6862_v46  ;;  %v12747_v7 = vld [vmem:[%s13010_s7 + $0x10] sm:$0xff] }
0x3702   :  { %v12753_v47 = vsub.f32 1.0, %v12747_v7 }
0x3703   :  { %v6877_v63 = vrot.slane %v6876_v49, 1  ;;  %v7387_v15 = vsel %vm636_vm5, %v6864_v25, %v7386_v24 }
0x3704   :  { %v7388_v19 = vsel %vm638_vm6, %v6871_v48, %v7387_v15 }
0x3705   :  { %v6878_v10 = vadd.f32 %v6877_v63, %v6876_v49 }
0x3707   :  { %v7389_v31 = vsel %vm640_vm7, %v6878_v10, %v7388_v19 }
0x3754   :  { %v7491_v50 = vpop.permute.xlu1 %7490 }
0x3757   :  { %v7407_v21 = vpop.permute.xlu0 %7406 }
0x3758   :  { %v7409_v22 = vsel %vm150_vm0, %v7389_v31, %v7407_v21 }
0x3759   :  { %8956 = vmatmul.mubr.msk.f32.vlgmr.msra.gmra.mrb[38].mxu1 %vm1493_vm10, %v7409_v22 }
0x375a   :  { %9185 = vmatpush3.bf16.msra.mxu1 %v10506_v34  ;;  %8966 = vmatprep.mubr.msk.f32.mxu1 %vm9741_vm9, %v13088_v40 }
0x375b   :  { %9186 = vmatprep.subr.bf16.mxu1 %v13089_v52 }
0x375e   :  { %9188 = vmatpush3.bf16.msra.mxu1 %v13090_v57 }
0x375f   :  { %9195 = vmatprep.subr.bf16.mxu1 %v13089_v52 }
0x3761   :  { %8967 = vmatmul.mubr.msk.f32.vlgmr.msra.gmra.mrb[40].mxu1 %vm1493_vm10, %v7491_v50 }
0x3762   :  { %9197 = vmatpush3.bf16.msra.mxu1 %v10506_v34  ;;  %8988 = vmatprep.mubr.msk.f32.mxu1 %vm9741_vm9, %v13088_v40 }
0x3763   :  { %9198 = vmatprep.subr.bf16.mxu1 %v13089_v52 }
0x3766   :  { %9200 = vmatpush3.bf16.msra.mxu1 %v13090_v57 }
0x3767   :  { %9207 = vmatprep.subr.bf16.mxu1 %v13089_v52 }
0x382c   :  { %v7479_v26 = vpop.f32.mrb[38].mxu1 }
0x382d   :  { %v7480_v61 = vadd.f32 %v9735_v53, %v7479_v26  ;;  %v8957_v9 = vpop.f32.mrb[39].mxu1 }
0x382f   :  { %v7483_v35 = vadd.f32 %v7480_v61, %v13091_v27  ;;  %v7484_v58 = vadd.f32 %v13092_v56, %v7480_v61  ;;  %v12732_v16 = vadd.f32 %v7480_v61, %v13093_v51  ;;  %v12735_v5 = vadd.f32 %v13094_v4, %v7480_v61 }
0x3830   :  { %v12738_v14 = vadd.f32 %v7480_v61, %v13095_v42  ;;  %v12741_v39 = vadd.f32 %v13096_v59, %v7480_v61  ;;  %v13099_v42 = vld [vmem:[#allocation25_spill] sm:$0xff] }
0x3834   :  { %v7560_v37 = vpop.f32.mrb[40].mxu1 }
0x3835   :  { %v7564_v17 = vadd.f32 %v7560_v37, %v7483_v35  ;;  %v8968_v1 = vpop.f32.mrb[41].mxu1 }
0x3837   :  { %9650 = vtanh.f32 %v7564_v17  ;;  %v8414_v55 = vmul.f32 -1.442695, %v7564_v17 }
0x3839   :  { %9652 = vpow2.f32 %v8414_v55 }
0x3841   :  { %v9651_v6 = vpop.eup %9650 }
0x3842   :  { %7574 = vrot.lane.b32.xlu0 %v9651_v6, %s9744_s8  ;;  %v13100_v6 = vmov 3  }
0x3843   :  { %v9653_v23 = vpop.eup %9652 }
0x3844   :  { %v7568_v54 = vadd.f32 1.0, %v9653_v23 }
0x3846   :  { %7592 = vperm.xlu0 %9283, %v12747_v7   ;;  %9654 = vrcp.f32 %v7568_v54 }
0x384a   :  { %9284 = vset.pattern.permute.xlu0 %v13097_v44 }
0x3850   :  { %v9655_v0 = vpop.eup %9654 }
0x3851   :  { %v7572_v18 = vmul.f32 %v9655_v0, %v12680_v33 }
0x38b4   :  { %v7575_v8 = vpop.permute.xlu0 %7574 }
0x38b5   :  { %v7577_v46 = vmul.f32 %v9655_v0, %v7575_v8 }
0x38b7   :  { %7579 = vrot.lane.b32.xlu1 %v7577_v46, %s13012_s4 }
0x38bb   :  { %7598 = vperm.xlu1 %9282, %v12753_v47  }
0x38bf   :  { %9285 = vset.pattern.permute.xlu1 %v13097_v44 }
0x38c5   :  { %v7593_v2 = vpop.permute.xlu0 %7592 }
0x3929   :  { %v7580_v36 = vpop.permute.xlu1 %7579 }
0x392a   :  { %v7582_v11 = vadd.f32 %v7580_v36, %v7572_v18 }
0x392c   :  { %9656 = vtanh.f32 %v7582_v11  ;;  %v7603_v21 = vmul.f32 %v7593_v2, %v7582_v11 }
0x3936   :  { %v9657_v29 = vpop.eup %9656 }
0x3937   :  { %7585 = vrot.lane.b32.xlu0 %v9657_v29, %s9744_s8 }
0x393a   :  { %v7599_v43 = vpop.permute.xlu1 %7598 }
0x393b   :  { %v7601_v62 = vmul.f32 %v7599_v43, %v12678_v13  ;;  %v7604_v31 = vmul.f32 %v7599_v43, %v12680_v33 }
0x393d   :  { %v7605_v22 = vadd.f32 %v7604_v31, %v7603_v21 }
0x39a9   :  { %v7586_v45 = vpop.permute.xlu0 %7585 }
0x39aa   :  { %v7588_v49 = vmul.f32 %v9655_v0, %v7586_v45 }
0x39ac   :  { %v12760_v38 = vmul.f32 %v7593_v2, %v7588_v49 }
0x39ae   :  { %v7602_v41 = vadd.f32 %v7601_v62, %v12760_v38 }
0x39b0   :  { %7607 = vrot.lane.b32.xlu1 %v7602_v41, %s13012_s4 }
0x3a22   :  { %v7608_v20 = vpop.permute.xlu1 %7607 }
0x3a23   :  { %8978 = vmatmul.mubr.msk.f32.vlgmr.msra.gmra.mrb[56].mxu0 %vm1493_vm10, %v7608_v20 }
0x3a24   :  { %9203 = vmatpush3.bf16.msra.mxu0 %v10506_v34  ;;  %8999 = vmatprep.mubr.msk.f32.mxu0 %vm9741_vm9, %v13088_v40 }
0x3a25   :  { %9204 = vmatprep.subr.bf16.mxu0 %v13089_v52 }
0x3a28   :  { %9206 = vmatpush3.bf16.msra.mxu0 %v13090_v57 }
0x3a29   :  { %9213 = vmatprep.subr.bf16.mxu0 %v13089_v52 }
0x3af6   :  { %v7677_v13 = vpop.f32.mrb[56].mxu0 }
0x3af7   :  { %v7681_v30 = vadd.f32 %v7677_v13, %v7484_v58  ;;  %v8979_v25 = vpop.f32.mrb[57].mxu0 }
0x3af9   :  { %9658 = vtanh.f32 %v7681_v30  ;;  %v8416_v32 = vmul.f32 -1.442695, %v7681_v30 }
0x3afb   :  { %9660 = vpow2.f32 %v8416_v32 }
0x3b03   :  { %v9659_v63 = vpop.eup %9658 }
0x3b04   :  { %7691 = vrot.lane.b32.xlu0 %v9659_v63, %s9744_s8 }
0x3b05   :  { %v9661_v24 = vpop.eup %9660 }
0x3b06   :  { %v7685_v10 = vadd.f32 1.0, %v9661_v24  ;;  %v13101_v24 = vmov 4  }
0x3b08   :  { %7707 = vperm.xlu0 %9284, %v12747_v7   ;;  %9662 = vrcp.f32 %v7685_v10 }
0x3b0c   :  { %9287 = vset.pattern.permute.xlu0 %v13098_v60 }
0x3b12   :  { %v9663_v15 = vpop.eup %9662 }
0x3b13   :  { %v7689_v50 = vmul.f32 %v9663_v15, %v7605_v22 }
0x3b76   :  { %v7692_v48 = vpop.permute.xlu0 %7691 }
0x3b77   :  { %v7694_v19 = vmul.f32 %v9663_v15, %v7692_v48 }
0x3b79   :  { %7696 = vrot.lane.b32.xlu1 %v7694_v19, %s13012_s4 }
0x3b7d   :  { %7712 = vperm.xlu1 %9285, %v12753_v47  }
0x3b81   :  { %9286 = vset.pattern.permute.xlu1 %v13098_v60 }
0x3b87   :  { %v7708_v56 = vpop.permute.xlu0 %7707 }
0x3beb   :  { %v7697_v26 = vpop.permute.xlu1 %7696 }
0x3bec   :  { %v7699_v53 = vadd.f32 %v7697_v26, %v7689_v50 }
0x3bee   :  { %9664 = vtanh.f32 %v7699_v53  ;;  %v7717_v46 = vmul.f32 %v7708_v56, %v7699_v53 }
0x3bf8   :  { %v9665_v61 = vpop.eup %9664 }
0x3bf9   :  { %7702 = vrot.lane.b32.xlu1 %v9665_v61, %s9744_s8 }
0x3bfc   :  { %v7713_v9 = vpop.permute.xlu1 %7712 }
0x3bfd   :  { %v7715_v58 = vmul.f32 %v7713_v9, %v7602_v41 }
0x3c6b   :  { %v7703_v27 = vpop.permute.xlu1 %7702 }
0x3c6c   :  { %v7705_v35 = vmul.f32 %v9663_v15, %v7703_v27 }
0x3c6e   :  { %v12779_v51 = vmul.f32 %v7708_v56, %v7705_v35 }
0x3c70   :  { %v7716_v4 = vadd.f32 %v7715_v58, %v12779_v51 }
0x3c72   :  { %7721 = vrot.lane.b32.xlu0 %v7716_v4, %s13012_s4 }
0x3ce4   :  { %v7722_v33 = vpop.permute.xlu0 %7721 }
0x3ce5   :  { %8989 = vmatmul.mubr.msk.f32.vlgmr.msra.gmra.mrb[42].mxu1 %vm1493_vm10, %v7722_v33 }
0x3ce6   :  { %9209 = vmatpush3.bf16.msra.mxu1 %v10506_v34  ;;  %9010 = vmatprep.mubr.msk.f32.mxu1 %vm9741_vm9, %v13088_v40 }
0x3ce7   :  { %9210 = vmatprep.subr.bf16.mxu1 %v13089_v52 }
0x3cea   :  { %9212 = vmatpush3.bf16.msra.mxu1 %v13090_v57 }
0x3ceb   :  { %9220 = vmatprep.subr.bf16.mxu1 %v13099_v42 }
0x3db8   :  { %v7791_v59 = vpop.f32.mrb[42].mxu1 }
0x3db9   :  { %v7795_v37 = vadd.f32 %v7791_v59, %v12732_v16  ;;  %v8990_v17 = vpop.f32.mrb[43].mxu1  ;;  %v7718_v16 = vmul.f32 %v7713_v9, %v7605_v22 }
0x3dbb   :  { %9666 = vtanh.f32 %v7795_v37  ;;  %v8418_v44 = vmul.f32 -1.442695, %v7795_v37  ;;  %v7719_v18 = vadd.f32 %v7718_v16, %v7717_v46 }
0x3dbd   :  { %9668 = vpow2.f32 %v8418_v44 }
0x3dc5   :  { %v9667_v1 = vpop.eup %9666 }
0x3dc6   :  { %7805 = vrot.lane.b32.xlu1 %v9667_v1, %s9744_s8 }
0x3dc7   :  { %v9669_v55 = vpop.eup %9668 }
0x3dc8   :  { %v7799_v23 = vadd.f32 1.0, %v9669_v55 }
0x3dca   :  { %7821 = vperm.xlu1 %9286, %v12747_v7   ;;  %9670 = vrcp.f32 %v7799_v23 }
0x3dce   :  { %9289 = vset.pattern.permute.xlu1 %v13100_v6 }
0x3dd4   :  { %v9671_v54 = vpop.eup %9670 }
0x3dd5   :  { %v7803_v36 = vmul.f32 %v9671_v54, %v7719_v18 }
0x3e38   :  { %v7806_v0 = vpop.permute.xlu1 %7805 }
0x3e39   :  { %v7808_v8 = vmul.f32 %v9671_v54, %v7806_v0 }
0x3e3b   :  { %7810 = vrot.lane.b32.xlu0 %v7808_v8, %s13012_s4 }
0x3e3f   :  { %7826 = vperm.xlu0 %9287, %v12753_v47  }
0x3e43   :  { %9288 = vset.pattern.permute.xlu0 %v13100_v6 }
0x3e49   :  { %v7822_v43 = vpop.permute.xlu1 %7821 }
0x3ead   :  { %v7811_v11 = vpop.permute.xlu0 %7810 }
0x3eae   :  { %v7813_v29 = vadd.f32 %v7811_v11, %v7803_v36 }
0x3eb0   :  { %9672 = vtanh.f32 %v7813_v29  ;;  %v7831_v48 = vmul.f32 %v7822_v43, %v7813_v29 }
0x3eba   :  { %v9673_v2 = vpop.eup %9672 }
0x3ebb   :  { %7816 = vrot.lane.b32.xlu1 %v9673_v2, %s9744_s8 }
0x3ebe   :  { %v7827_v45 = vpop.permute.xlu0 %7826 }
0x3ebf   :  { %v7829_v41 = vmul.f32 %v7827_v45, %v7716_v4  ;;  %v13102_v4 = vld [vmem:[#allocation26_spill] sm:$0xff] }
0x3f2d   :  { %v7817_v49 = vpop.permute.xlu1 %7816 }
0x3f2e   :  { %v7819_v62 = vmul.f32 %v9671_v54, %v7817_v49 }
0x3f30   :  { %v12798_v20 = vmul.f32 %v7822_v43, %v7819_v62 }
0x3f32   :  { %v7830_v13 = vadd.f32 %v7829_v41, %v12798_v20 }
0x3f34   :  { %7835 = vrot.lane.b32.xlu1 %v7830_v13, %s13012_s4 }
0x3fa6   :  { %v7836_v30 = vpop.permute.xlu1 %7835 }
0x3fa7   :  { %9000 = vmatmul.mubr.msk.f32.vlgmr.msra.gmra.mrb[58].mxu0 %vm1493_vm10, %v7836_v30 }
0x3fa8   :  { %9215 = vmatpush3.bf16.msra.mxu0 %v10506_v34  ;;  %9021 = vmatprep.mubr.msk.f32.mxu0 %vm9741_vm9, %v13088_v40 }
0x3fa9   :  { %9216 = vmatprep.subr.bf16.mxu0 %v13089_v52 }
0x3fac   :  { %9218 = vmatpush3.bf16.msra.mxu0 %v13090_v57 }
0x407a   :  { %v7905_v25 = vpop.f32.mrb[58].mxu0 }
0x407b   :  { %v7909_v63 = vadd.f32 %v7905_v25, %v12735_v5  ;;  %v9001_v60 = vpop.f32.mrb[59].mxu0  ;;  %v7832_v5 = vmul.f32 %v7827_v45, %v7719_v18 }
0x407d   :  { %9674 = vtanh.f32 %v7909_v63  ;;  %v8420_v34 = vmul.f32 -1.442695, %v7909_v63  ;;  %v7833_v19 = vadd.f32 %v7832_v5, %v7831_v48  ;;  %v9736_v5 = vld [vmem:[%s13010_s7] sm:$0xff] }
0x407f   :  { %9676 = vpow2.f32 %v8420_v34  ;;  %v9753_v34 = vmov 7  }
0x4087   :  { %v9675_v32 = vpop.eup %9674 }
0x4088   :  { %7919 = vrot.lane.b32.xlu0 %v9675_v32, %s9744_s8 }
0x4089   :  { %v9677_v10 = vpop.eup %9676 }
0x408a   :  { %v7913_v40 = vadd.f32 1.0, %v9677_v10 }
0x408c   :  { %7935 = vperm.xlu0 %9288, %v12747_v7   ;;  %9678 = vrcp.f32 %v7913_v40 }
0x4090   :  { %9291 = vset.pattern.permute.xlu0 %v13101_v24 }
0x4096   :  { %v9679_v52 = vpop.eup %9678 }
0x4097   :  { %v7917_v31 = vmul.f32 %v9679_v52, %v7833_v19 }
0x40fa   :  { %v7920_v15 = vpop.permute.xlu0 %7919 }
0x40fb   :  { %v7922_v57 = vmul.f32 %v9679_v52, %v7920_v15 }
0x40fd   :  { %7924 = vrot.lane.b32.xlu1 %v7922_v57, %s13012_s4 }
0x4101   :  { %7940 = vperm.xlu1 %9289, %v12753_v47  }
0x4105   :  { %9290 = vset.pattern.permute.xlu1 %v13101_v24 }
0x410b   :  { %v7936_v9 = vpop.permute.xlu0 %7935 }
0x416f   :  { %v7925_v21 = vpop.permute.xlu1 %7924 }
0x4170   :  { %v7927_v22 = vadd.f32 %v7925_v21, %v7917_v31 }
0x4172   :  { %9680 = vtanh.f32 %v7927_v22  ;;  %v7945_v54 = vmul.f32 %v7936_v9, %v7927_v22 }
0x417c   :  { %v9681_v50 = vpop.eup %9680 }
0x417d   :  { %7930 = vrot.lane.b32.xlu1 %v9681_v50, %s9744_s8 }
0x4180   :  { %v7941_v26 = vpop.permute.xlu1 %7940 }
0x4181   :  { %v7943_v27 = vmul.f32 %v7941_v26, %v7830_v13 }
0x41ef   :  { %v7931_v53 = vpop.permute.xlu1 %7930 }
0x41f0   :  { %v7933_v61 = vmul.f32 %v9679_v52, %v7931_v53 }
0x41f2   :  { %v7938_v35 = vmul.f32 %v7936_v9, %v7933_v61 }
0x41f4   :  { %v7944_v56 = vadd.f32 %v7943_v27, %v7938_v35  ;;  %v13104_v27 = vld [vmem:[#allocation30_spill] sm:$0xff] }
0x41f6   :  { %7949 = vrot.lane.b32.xlu0 %v7944_v56, %s13012_s4 }
0x4268   :  { %v7950_v58 = vpop.permute.xlu0 %7949 }
0x4269   :  { %9011 = vmatmul.mubr.msk.f32.vlgmr.msra.gmra.mrb[44].mxu1 %vm1493_vm10, %v7950_v58 }
0x426a   :  { %9222 = vmatpush3.bf16.msra.mxu1 %v13099_v42 }
0x426b   :  { %9224 = vmatprep.subr.bf16.mxu1 %v13102_v4 }
0x426e   :  { %9226 = vmatpush3.bf16.msra.mxu1 %v13102_v4 }
0x433c   :  { %v8019_v33 = vpop.f32.mrb[44].mxu1 }
0x433d   :  { %v8023_v59 = vadd.f32 %v8019_v33, %v12738_v14  ;;  %v9012_v37 = vpop.f32.mrb[45].mxu1  ;;  %v7946_v14 = vmul.f32 %v7941_v26, %v7833_v19  ;;  %v13103_v26 = vld [vmem:[#allocation6_spill] sm:$0xff]  ;;  %v13105_v33 = vld [vmem:[#allocation8_spill] sm:$0xff] }
0x433f   :  { %9682 = vtanh.f32 %v8023_v59  ;;  %v8422_v1 = vmul.f32 -1.442695, %v8023_v59  ;;  %v7947_v0 = vadd.f32 %v7946_v14, %v7945_v54 }
0x4341   :  { %9684 = vpow2.f32 %v8422_v1  ;;  %v9737_v1 = vld [vmem:[%s12901_s15] ss:$0 sm:$0xff] }
0x4349   :  { %v9683_v17 = vpop.eup %9682 }
0x434a   :  { %8033 = vrot.lane.b32.xlu1 %v9683_v17, %s9744_s8 }
0x434b   :  { %v9685_v6 = vpop.eup %9684 }
0x434c   :  { %v8027_v44 = vadd.f32 1.0, %v9685_v6 }
0x434e   :  { %8049 = vperm.xlu1 %9290, %v12747_v7   ;;  %9686 = vrcp.f32 %v8027_v44 }
0x4352   :  { %9293 = vset.pattern.permute.xlu1 %v9753_v34 }
0x4358   :  { %v9687_v42 = vpop.eup %9686 }
0x4359   :  { %v8031_v8 = vmul.f32 %v9687_v42, %v7947_v0 }
0x43bc   :  { %v8034_v55 = vpop.permute.xlu1 %8033 }
0x43bd   :  { %v8036_v23 = vmul.f32 %v9687_v42, %v8034_v55 }
0x43bf   :  { %8038 = vrot.lane.b32.xlu0 %v8036_v23, %s13012_s4 }
0x43c3   :  { %8054 = vperm.xlu0 %9291, %v12753_v47  }
0x43c7   :  { %9292 = vset.pattern.permute.xlu0 %v13049_v12 }
0x43cd   :  { %v8050_v36 = vpop.permute.xlu1 %8049 }
0x4431   :  { %v8039_v16 = vpop.permute.xlu0 %8038 }
0x4432   :  { %v8041_v46 = vadd.f32 %v8039_v16, %v8031_v8 }
0x4434   :  { %9688 = vtanh.f32 %v8041_v46 }
0x443e   :  { %v9689_v18 = vpop.eup %9688 }
0x443f   :  { %8044 = vrot.lane.b32.xlu1 %v9689_v18, %s9744_s8 }
0x4442   :  { %v8055_v11 = vpop.permute.xlu0 %8054 }
0x4443   :  { %v8057_v43 = vmul.f32 %v8055_v11, %v7944_v56  ;;  %v8060_v10 = vmul.f32 %v8055_v11, %v7947_v0 }
0x44b1   :  { %v8045_v29 = vpop.permute.xlu1 %8044 }
0x44b2   :  { %v8047_v2 = vmul.f32 %v9687_v42, %v8045_v29 }
0x44b4   :  { %v8052_v45 = vmul.f32 %v8050_v36, %v8047_v2 }
0x44b6   :  { %v8058_v49 = vadd.f32 %v8057_v43, %v8052_v45 }
0x44b8   :  { %8063 = vrot.lane.b32.xlu1 %v8058_v49, %s13012_s4 }
0x452a   :  { %v8064_v47 = vpop.permute.xlu1 %8063 }
0x452b   :  { %9022 = vmatmul.mubr.msk.f32.vlgmr.msra.gmra.mrb[60].mxu0 %vm1493_vm10, %v8064_v47 }
0x45fe   :  { %v8133_v62 = vpop.f32.mrb[60].mxu0 }
0x45ff   :  { %v8137_v41 = vadd.f32 %v8133_v62, %v12741_v39  ;;  %v9023_v13 = vpop.f32.mrb[61].mxu0 }
0x4601   :  { %9690 = vtanh.f32 %v8137_v41  ;;  %v8424_v25 = vmul.f32 -1.442695, %v8137_v41 }
0x4603   :  { %9692 = vpow2.f32 %v8424_v25 }
0x460b   :  { %v9691_v30 = vpop.eup %9690 }
0x460c   :  { %8147 = vrot.lane.b32.xlu0 %v9691_v30, %s9744_s8 }
0x460d   :  { %v9693_v63 = vpop.eup %9692 }
0x460e   :  { %v8141_v60 = vadd.f32 1.0, %v9693_v63 }
0x4610   :  { %8163 = vperm.xlu0 %9292, %v12747_v7   ;;  %9694 = vrcp.f32 %v8141_v60  ;;  %v8059_v7 = vmul.f32 %v8050_v36, %v8041_v46 }
0x4612   :  { %v8061_v40 = vadd.f32 %v8060_v10, %v8059_v7 }
0x4614   :  { %8175 = vrot.lane.b32.xlu0 %v12779_v51, %s13012_s4 }
0x4615   :  { %9294 = vset.pattern.permute.xlu0 %v9753_v34 }
0x4618   :  { %8179 = vrot.lane.b32.xlu0 %v7938_v35, %s13012_s4 }
0x461a   :  { %v9695_v32 = vpop.eup %9694 }
0x461b   :  { %v8145_v52 = vmul.f32 %v9695_v32, %v8061_v40 }
0x467e   :  { %v8148_v24 = vpop.permute.xlu0 %8147 }
0x467f   :  { %v8150_v39 = vmul.f32 %v9695_v32, %v8148_v24 }
0x4681   :  { %8152 = vrot.lane.b32.xlu1 %v8150_v39, %s13012_s4 }
0x468f   :  { %v8164_v48 = vpop.permute.xlu0 %8163 }
0x4693   :  { %v8176_v21 = vpop.permute.xlu0 %8175 }
0x4697   :  { %v8180_v50 = vpop.permute.xlu0 %8179 }
0x46f3   :  { %v8153_v51 = vpop.permute.xlu1 %8152 }
0x46f4   :  { %v8155_v15 = vadd.f32 %v8153_v51, %v8145_v52 }
0x46f6   :  { %9696 = vtanh.f32 %v8155_v15 }
0x4700   :  { %v9697_v57 = vpop.eup %9696 }
0x4701   :  { %8158 = vrot.lane.b32.xlu1 %v9697_v57, %s9744_s8 }
0x4705   :  { %8173 = vrot.lane.b32.xlu1 %v12760_v38, %s13012_s4 }
0x4709   :  { %8177 = vrot.lane.b32.xlu1 %v12798_v20, %s13012_s4 }
0x470d   :  { %8181 = vrot.lane.b32.xlu1 %v8052_v45, %s13012_s4 }
0x4711   :  { %3356 = vperm.xlu1 %9293, %v9736_v5  }
0x4715   :  { %6297 = vperm.xlu1 %9293, %v12632_v3  }
0x4719   :  { %6302 = vperm.xlu1 %9293, %v11759_v28  }
0x4773   :  { %v8159_v19 = vpop.permute.xlu1 %8158 }
0x4774   :  { %v8161_v31 = vmul.f32 %v9695_v32, %v8159_v19 }
0x4776   :  { %v8166_v22 = vmul.f32 %v8164_v48, %v8161_v31 }
0x4777   :  { %v8174_v38 = vpop.permute.xlu1 %8173 }
0x4778   :  { %8183 = vrot.lane.b32.xlu0 %v8166_v22, %s13012_s4  ;;  %9032 = vmatprep.mubr.msk.f32.mxu1 %vm1493_vm10, %v8174_v38 }
0x4779   :  { %9033 = vmatmul.mubr.msk.f32.vlgmr.msra.gmra.mrb[46].mxu1 %vm1493_vm10, %v8176_v21 }
0x477b   :  { %v8178_v20 = vpop.permute.xlu1 %8177 }
0x477c   :  { %3361 = vperm.xlu0 %9294, %v13103_v26   ;;  %9035 = vmatprep.mubr.msk.f32.mxu1 %vm1493_vm10, %v8178_v20 }
0x477d   :  { %9036 = vmatmul.mubr.msk.f32.gmra.mrb[48].mxu1 %vm1493_vm10, %v8180_v50 }
0x477f   :  { %v8182_v28 = vpop.permute.xlu1 %8181 }
0x4780   :  { %9038 = vmatprep.mubr.msk.f32.mxu1 %vm1493_vm10, %v8182_v28  ;;  %9295 = vset.pattern.permute.xlu0 %v13049_v12 }
0x4790   :  { %v3357_v53 = vpop.permute.xlu1 %3356 }
0x4791   :  { %v3359_v35 = vmul.f32 %v3357_v53, %v13104_v27 }
0x4794   :  { %v6298_v61 = vpop.permute.xlu1 %6297 }
0x4795   :  { %v6300_v59 = vmul.f32 %v6298_v61, %v13105_v33 }
0x4798   :  { %v6303_v58 = vpop.permute.xlu1 %6302 }
0x47ea   :  { %v8184_v3 = vpop.permute.xlu0 %8183 }
0x47eb   :  { %9039 = vmatmul.mubr.msk.f32.gmra.mrb[50].mxu1 %vm1493_vm10, %v8184_v3 }
0x47fb   :  { %v3362_v9 = vpop.permute.xlu0 %3361 }
0x47fc   :  { %v3364_v56 = vmul.f32 0.0, %v3362_v9 }
0x47fe   :  { %v3365_v4 = vadd.f32 %v3364_v56, %v3359_v35 }
0x4800   :  { %v6305_v37 = vmul.f32 %v6303_v58, %v3365_v4 }
0x4802   :  { %v6306_v17 = vadd.f32 %v6305_v37, %v6300_v59 }
0x4804   :  { %8298 = vst.msk [vmem:[%s12910_s26] sm:$0xff] %vm643_vm8, %v6306_v17 }
0x484c   :  { %v9034_v12 = vpop.f32.mrb[46].mxu1 }
0x484d   :  { %v8269_v6 = vadd.f32 %v9737_v1, %v9034_v12  ;;  %v8263_v44 = vpop.f32.mrb[47].mxu1 }
0x484e   :  { %v8264_v42 = vadd.f32 %v9737_v1, %v8263_v44 }
0x484f   :  { %8293 = vst [vmem:[%s12902_s24 + $0x68] sm:$0xff] %v8269_v6 }
0x4850   :  { %8292 = vst [vmem:[%s12902_s24 + $0x60] sm:$0xff] %v8264_v42  ;;  %v9037_v55 = vpop.f32.mrb[48].mxu1 }
0x4851   :  { %v8279_v23 = vadd.f32 %v9737_v1, %v9037_v55  ;;  %v8273_v14 = vpop.f32.mrb[49].mxu1 }
0x4852   :  { %v8274_v54 = vadd.f32 %v9737_v1, %v8273_v14 }
0x4853   :  { %8295 = vst [vmem:[%s12902_s24 + $0x78] sm:$0xff] %v8279_v23 }
0x4854   :  { %8294 = vst [vmem:[%s12902_s24 + $0x70] sm:$0xff] %v8274_v54 }
0x48be   :  { %v9040_v0 = vpop.f32.mrb[50].mxu1 }
0x48bf   :  { %v8289_v8 = vadd.f32 %v9737_v1, %v9040_v0  ;;  %v8283_v16 = vpop.f32.mrb[51].mxu1 }
0x48c0   :  { %v8284_v46 = vadd.f32 %v9737_v1, %v8283_v16 }
0x48c1   :  { %8297 = vst [vmem:[%s12902_s24 + $0x88] sm:$0xff] %v8289_v8 }
0x48c2   :  { %8296 = vst [vmem:[%s12902_s24 + $0x80] sm:$0xff] %v8284_v46 }

</bundles_post_ra>
